<compile_context>
chip_gen: v7x
topology: tpu7x:2x2x1
jax: 0.10.0
libtpu: 0.0.40
codegen_flags: <defaults>
</compile_context>

<pallas_src>
import math

import jax
import jax.numpy as jnp
import numpy as np
from jax.experimental import pallas as pl
from jax.experimental.pallas import tpu as pltpu


def _round_up(x, m):
    return ((x + m - 1) // m) * m


def _make_kernel(ts, tk, inv, resident):
    """ts: spatial tile, tk: c_sim panel, inv: 1/c_sim, resident: weights in VMEM."""

    def kernel(value_ref,
               wa_ref, ba_ref, wb_ref, bb_ref,
               wc_ref, bc_ref, wt_ref, bt_ref,
               wp1_ref, bp1_ref, wp2_ref, bp2_ref,
               ipost_ref, jpost_ref, sim_ref,
               t2_scr, inter_acc, ictx_acc):
        j = pl.program_id(1)          # spatial tile
        k = pl.program_id(2)          # c_sim panel (innermost, "arbitrary")
        nk = pl.num_programs(2)

        # ---- once per (batch, S-tile): branch up to t2, reset accumulators ----
        @pl.when(k == 0)
        def _init():
            row0 = pl.multiple_of(j * ts, ts)
            v_tile = value_ref[0, pl.ds(row0, ts), :]                     # (ts, c_inner) bf16
            t = jnp.dot(v_tile, wa_ref[...],
                        preferred_element_type=jnp.float32) + ba_ref[...]
            t = jnp.maximum(t, 0.0).astype(jnp.bfloat16)
            t2 = jnp.dot(t, wb_ref[...],
                         preferred_element_type=jnp.float32) + bb_ref[...]
            t2_scr[...] = jnp.maximum(t2, 0.0).astype(jnp.bfloat16)       # (ts, c_pad)
            inter_acc[...] = jnp.zeros_like(inter_acc)
            ictx_acc[...] = jnp.zeros_like(ictx_acc)

        # ---- per panel k: intra-similarity columns for this panel ----
        if resident:
            wc_panel = wc_ref[k]                                          # (c_pad, tk)
            wt_panel = wt_ref[pl.ds(pl.multiple_of(k * tk, tk), tk), :]   # (tk, c_pad)
        else:
            wc_panel = wc_ref[0]                                          # streamed panel
            wt_panel = wt_ref[...]

        intra_p = jnp.dot(t2_scr[...], wc_panel,
                          preferred_element_type=jnp.float32) + bc_ref[...]  # (ts, tk) f32
        sig_p = jax.nn.sigmoid(intra_p)
        # already (spatial, channel) == torch layout; bf16 output
        sim_ref[0] = sig_p.astype(sim_ref.dtype)

        # inter-similarity accumulation: inter += intra[:, panel] @ w_t^T[panel, :]
        inter_acc[...] += jnp.dot(intra_p.astype(jnp.bfloat16), wt_panel,
                                  preferred_element_type=jnp.float32)

        # intra-context accumulation: ctx += sigmoid(intra[:, panel]) @ value[panel, :]
        col0 = pl.multiple_of(k * tk, tk)
        v_k = value_ref[0, pl.ds(col0, tk), :]                            # (tk, c_inner) bf16
        ictx_acc[...] += jnp.dot(sig_p.astype(jnp.bfloat16), v_k,
                                 preferred_element_type=jnp.float32)

        # ---- finalize S-tile: inter context + the two post convs ----
        @pl.when(k == nk - 1)
        def _fin():
            # 1 - sigmoid(z) == sigmoid(-z)
            sig_inter = jax.nn.sigmoid(-(inter_acc[...] + bt_ref[...]))   # (ts, c_pad) f32
            jctx = jnp.dot(sig_inter.astype(jnp.bfloat16), value_ref[0],
                           preferred_element_type=jnp.float32) * inv      # (ts, c_inner)
            ictx = ictx_acc[...] * inv
            ip = jnp.dot(ictx.astype(jnp.bfloat16), wp1_ref[...],
                         preferred_element_type=jnp.float32) + bp1_ref[...]
            jp = jnp.dot(jctx.astype(jnp.bfloat16), wp2_ref[...],
                         preferred_element_type=jnp.float32) + bp2_ref[...]
            ipost_ref[0] = jnp.maximum(ip, 0.0).astype(ipost_ref.dtype)
            jpost_ref[0] = jnp.maximum(jp, 0.0).astype(jpost_ref.dtype)

    return kernel


def init_params(key, c_in, c_inner, c_sim, eps=1e-5):
    """Deterministic ConvBn (1x1, no conv bias) params, BN folded (eval mode), f32."""
    def conv_bn(k, c_out, c_in_):
        k1, k2, k3, k4, k5 = jax.random.split(k, 5)
        w = jax.random.normal(k1, (c_out, c_in_), jnp.float32) / jnp.sqrt(float(c_in_))
        gamma = 1.0 + 0.1 * jax.random.normal(k2, (c_out,), jnp.float32)
        beta = 0.1 * jax.random.normal(k3, (c_out,), jnp.float32)
        mean = 0.1 * jax.random.normal(k4, (c_out,), jnp.float32)
        var = 1.0 + 0.1 * jnp.abs(jax.random.normal(k5, (c_out,), jnp.float32))
        scale = gamma / jnp.sqrt(var + eps)
        return [w * scale[:, None], beta - mean * scale]

    keys = jax.random.split(key, 7)
    p = []
    p += conv_bn(keys[0], c_inner, c_in)     # reduce_conv
    p += conv_bn(keys[1], c_inner, c_inner)  # branch conv 1 (relu)
    p += conv_bn(keys[2], c_sim, c_inner)    # branch conv 2 (relu)
    p += conv_bn(keys[3], c_sim, c_sim)      # branch conv 3 (no relu)
    p += conv_bn(keys[4], c_sim, c_sim)      # transform_conv (no relu)
    p += conv_bn(keys[5], c_inner, c_inner)  # intra_post_conv
    p += conv_bn(keys[6], c_inner, c_inner)  # inter_post_conv
    return p


def object_context_forward(x, params, c_inner, c_sim, *,
                           ts=384, tk=256,
                           resident_weights=None,
                           single_buffer_constants=True):
    B, c_in, H, W = x.shape
    S = H * W
    assert S == c_sim, "module requires h*w == similarity-channel count (3600)"
    (w_red, b_red, w_a, b_a, w_b, b_b, w_c, b_c,
     w_t, b_t, w_p1, b_p1, w_p2, b_p2) = params

    # --- tiling: lane-aligned tiles, pad S (== c_sim) to a common multiple ---
    s128 = _round_up(S, 128)
    ts = min(_round_up(ts, 128), s128)
    tk = min(_round_up(tk, 128), s128)
    lcm = ts * tk // math.gcd(ts, tk)
    S_pad = _round_up(S, lcm)        # e.g. 3600 -> 3840 at ts=384, tk=256
    c_pad = S_pad                    # c_sim padded identically (c_sim == S)
    ns, nk = S_pad // ts, S_pad // tk
    pad_s, pad_c = S_pad - S, c_pad - c_sim
    inv = 1.0 / float(c_sim)         # torch divides by 3600 == c_sim

    # --- VMEM budget / weight-residency decision (v5e/v6e resident, v7x streamed) ---
    try:
        vmem_cap = int(pltpu.get_tpu_info().vmem_capacity_bytes)
    except Exception:
        vmem_cap = 64 * 1024 * 1024
    vmem_limit = min(100 * 1024 * 1024, int(0.75 * vmem_cap))
    if resident_weights is None:
        resident_weights = 2 * c_pad * c_pad * 2 <= int(0.45 * vmem_cap)

    # --- reduce_conv (folded 1x1 conv+BN+relu) in the wrapper, spatial-major,
    #     padded spatial rows are exact zeros so padded channels never contribute ---
    x2 = x.reshape(B, c_in, S)
    value = jnp.maximum(jnp.einsum('bcs,oc->bso', x2, w_red) + b_red[None, None, :], 0.0)
    value = jnp.pad(value, ((0, 0), (0, pad_s), (0, 0))).astype(jnp.bfloat16)

    # --- pad / transpose weights (wrapper-side layout plumbing, zero padding) ---
    bf16 = lambda a: a.astype(jnp.bfloat16)

    def row(b, n):   # (1, n) f32 bias row -> pads to (8, n) in VMEM, not (n, 128)
        return jnp.pad(b, (0, n - b.shape[0])).astype(jnp.float32).reshape(1, n)

    waT = bf16(w_a.T)
    ba = row(b_a, c_inner)
    wbT = bf16(jnp.pad(w_b, ((0, pad_c), (0, 0))).T)              # (c_inner, c_pad)
    bb = row(b_b, c_pad)
    wcT = jnp.pad(w_c, ((0, pad_c), (0, pad_c))).T                # (c_pad, c_pad)
    wcT_p = bf16(wcT.reshape(c_pad, nk, tk).transpose(1, 0, 2))   # (nk, c_pad, tk) contiguous panels
    bc = row(b_c, c_pad)
    wtT = bf16(jnp.pad(w_t, ((0, pad_c), (0, pad_c))).T)          # (c_pad, c_pad); row panels contiguous
    bt = row(b_t, c_pad)
    wp1T, bp1 = bf16(w_p1.T), row(b_p1, c_inner)
    wp2T, bp2 = bf16(w_p2.T), row(b_p2, c_inner)

    args = (value, waT, ba, wbT, bb, wcT_p, bc, wtT, bt, wp1T, bp1, wp2T, bp2)

    out_shapes = (
        jax.ShapeDtypeStruct((B, S_pad, c_inner), jnp.float32),   # intra_post (spatial-major)
        jax.ShapeDtypeStruct((B, S_pad, c_inner), jnp.float32),   # inter_post
        jax.ShapeDtypeStruct((B, S_pad, c_pad), jnp.bfloat16),    # sim map, torch layout, bf16
    )
    scratch_shapes = [
        pltpu.VMEM((ts, c_pad), jnp.bfloat16),   # t2 (per S-tile)
        pltpu.VMEM((ts, c_pad), jnp.float32),    # inter-similarity accumulator
        pltpu.VMEM((ts, c_inner), jnp.float32),  # intra-context accumulator
    ]
    kernel = _make_kernel(ts, tk, inv, resident_weights)

    def run(single_buf):
        def spec(shape, imap, constant=False):
            if single_buf and constant:
                return pl.BlockSpec(shape, imap, pipeline_mode=pl.Buffered(1))
            return pl.BlockSpec(shape, imap)

        if resident_weights:
            wc_spec = spec((nk, c_pad, tk), lambda b, j, k: (0, 0, 0), True)
            wt_spec = spec((c_pad, c_pad), lambda b, j, k: (0, 0), True)
        else:
            wc_spec = spec((1, c_pad, tk), lambda b, j, k: (k, 0, 0))     # streamed, contiguous
            wt_spec = spec((tk, c_pad), lambda b, j, k: (k, 0))           # streamed, contiguous

        in_specs = [
            spec((1, S_pad, c_inner), lambda b, j, k: (b, 0, 0), True),   # value
            spec((c_inner, c_inner), lambda b, j, k: (0, 0), True),       # w_a^T
            spec((1, c_inner), lambda b, j, k: (0, 0), True),             # b_a
            spec((c_inner, c_pad), lambda b, j, k: (0, 0), True),         # w_b^T
            spec((1, c_pad), lambda b, j, k: (0, 0), True),               # b_b
            wc_spec,                                                      # w_c^T panels
            spec((1, tk), lambda b, j, k: (0, k)),                        # b_c panel
            wt_spec,                                                      # w_t^T
            spec((1, c_pad), lambda b, j, k: (0, 0), True),               # b_t
            spec((c_inner, c_inner), lambda b, j, k: (0, 0), True),       # w_p1^T
            spec((1, c_inner), lambda b, j, k: (0, 0), True),             # b_p1
            spec((c_inner, c_inner), lambda b, j, k: (0, 0), True),       # w_p2^T
            spec((1, c_inner), lambda b, j, k: (0, 0), True),             # b_p2
        ]
        out_specs = [
            pl.BlockSpec((1, ts, c_inner), lambda b, j, k: (b, j, 0)),
            pl.BlockSpec((1, ts, c_inner), lambda b, j, k: (b, j, 0)),
            pl.BlockSpec((1, ts, tk), lambda b, j, k: (b, j, k)),
        ]
        return pl.pallas_call(
            kernel,
            out_shape=out_shapes,
            grid_spec=pltpu.PrefetchScalarGridSpec(
                num_scalar_prefetch=0,
                grid=(B, ns, nk),
                in_specs=in_specs,
                out_specs=out_specs,
                scratch_shapes=scratch_shapes,
            ),
            compiler_params=pltpu.CompilerParams(
                dimension_semantics=("parallel", "parallel", "arbitrary"),
                vmem_limit_bytes=vmem_limit,
            ),
        )(*args)

    if single_buffer_constants:
        try:
            ipost, jpost, sim = run(True)
        except Exception:   # pipeline_mode/Buffered(1) unsupported -> default buffering
            ipost, jpost, sim = run(False)
    else:
        ipost, jpost, sim = run(False)

    # layout-only wrapper work: strip padding, channel-major concat with x
    ipost = jnp.swapaxes(ipost[:, :S, :], 1, 2)
    jpost = jnp.swapaxes(jpost[:, :S, :], 1, 2)
    out = jnp.concatenate([x2, ipost, jpost], axis=1).reshape(B, c_in + 2 * c_inner, H, W)
    sim = sim[:, :S, :c_sim]   # bf16, already in torch (b, h*w, 3600) layout
    return out, sim


def reference(x, params, c_inner, c_sim):
    """Plain-JAX f32 re-implementation of the PyTorch forward (eval-mode BN folded)."""
    B, c_in, H, W = x.shape
    S = H * W
    xm = x.reshape(B, c_in, S)
    (w_red, b_red, w_a, b_a, w_b, b_b, w_c, b_c,
     w_t, b_t, w_p1, b_p1, w_p2, b_p2) = params

    def cbr(w, b, inp, relu=True):
        y = jnp.einsum('oc,bcs->bos', w, inp) + b[None, :, None]
        return jnp.maximum(y, 0.0) if relu else y

    value = cbr(w_red, b_red, xm)
    t = cbr(w_a, b_a, value)
    t = cbr(w_b, b_b, t)
    intra = cbr(w_c, b_c, t, relu=False)
    inter = cbr(w_t, b_t, intra, relu=False)
    sig_intra = jax.nn.sigmoid(intra)
    sig_inter = 1.0 - jax.nn.sigmoid(inter)
    intra_ctx = jnp.einsum('bkj,bji->bki', value, sig_intra) / c_sim
    inter_ctx = jnp.einsum('bkj,bji->bki', value, sig_inter) / c_sim
    ip = cbr(w_p1, b_p1, intra_ctx)
    jp = cbr(w_p2, b_p2, inter_ctx)
    out = jnp.concatenate([xm, ip, jp], axis=1).reshape(B, c_in + 2 * c_inner, H, W)
    sim_map = jnp.transpose(sig_intra, (0, 2, 1))
    return out, sim_map


if __name__ == "__main__":
    key = jax.random.PRNGKey(0)
    B, C_IN, C_INNER, H, W = 2, 16, 32, 14, 14
    C_SIM = H * W   # stands in for the hardcoded 3600 (== h*w) of the original module

    kx, kp = jax.random.split(key)
    x = jax.random.normal(kx, (B, C_IN, H, W), jnp.float32)
    params = init_params(kp, C_IN, C_INNER, C_SIM)

    ref_out, ref_sim = reference(x, params, C_INNER, C_SIM)

    # Small tiles so the test exercises the zero-padded (196 -> 256) grid with
    # multiple spatial tiles and multiple similarity panels, (B, ns, nk) = (2, 2, 2),
    # for both the streamed-weight (production v7x) and VMEM-resident (v5e/v6e) paths.
    for resident in (False, True):
        out, sim = object_context_forward(x, params, C_INNER, C_SIM,
                                          ts=128, tk=128, resident_weights=resident)
        jax.block_until_ready((out, sim))
        assert out.shape == (B, C_IN + 2 * C_INNER, H, W)
        assert sim.shape == (B, H * W, C_SIM)
        out_f = np.asarray(out, dtype=np.float32)
        sim_f = np.asarray(sim.astype(jnp.float32))
        # bf16 MXU inputs / f32 accumulation vs f32 reference
        assert np.allclose(out_f, np.asarray(ref_out), atol=3e-2, rtol=3e-2), resident
        assert np.allclose(sim_f, np.asarray(ref_sim), atol=3e-2, rtol=3e-2), resident

    print("KERNEL_OK")
</pallas_src>

<mosaic_0001>
module attributes {stable_mosaic.version = 11 : i64} {
  func.func @kernel(%arg0: i32, %arg1: i32, %arg2: i32, %arg3: memref<1x256x32xbf16, #tpu.memory_space<vmem>>, %arg4: memref<32x32xbf16, #tpu.memory_space<vmem>>, %arg5: memref<1x32xf32, #tpu.memory_space<vmem>>, %arg6: memref<32x256xbf16, #tpu.memory_space<vmem>>, %arg7: memref<1x256xf32, #tpu.memory_space<vmem>>, %arg8: memref<1x256x128xbf16, #tpu.memory_space<vmem>>, %arg9: memref<1x128xf32, #tpu.memory_space<vmem>>, %arg10: memref<128x256xbf16, #tpu.memory_space<vmem>>, %arg11: memref<1x256xf32, #tpu.memory_space<vmem>>, %arg12: memref<32x32xbf16, #tpu.memory_space<vmem>>, %arg13: memref<1x32xf32, #tpu.memory_space<vmem>>, %arg14: memref<32x32xbf16, #tpu.memory_space<vmem>>, %arg15: memref<1x32xf32, #tpu.memory_space<vmem>>, %arg16: memref<1x128x32xf32, #tpu.memory_space<vmem>>, %arg17: memref<1x128x32xf32, #tpu.memory_space<vmem>>, %arg18: memref<1x128x128xbf16, #tpu.memory_space<vmem>>, %arg19: memref<128x256xbf16, #tpu.memory_space<vmem>>, %arg20: memref<128x256xf32, #tpu.memory_space<vmem>>, %arg21: memref<128x32xf32, #tpu.memory_space<vmem>>) attributes {dimension_semantics = [#tpu.dimension_semantics<parallel>, #tpu.dimension_semantics<parallel>, #tpu.dimension_semantics<arbitrary>], iteration_bounds = array<i64: 2, 2, 2>, scalar_prefetch = 0 : i64, scratch_operands = 3 : i64, tpu.core_type = #tpu.core_type<tc>, window_params = [{pipeline_mode = #tpu.pipeline_mode<synchronous>, transform_indices = @transform_0, window_bounds = array<i64: 1, 256, 32>}, {pipeline_mode = #tpu.pipeline_mode<synchronous>, transform_indices = @transform_1, window_bounds = array<i64: 32, 32>}, {pipeline_mode = #tpu.pipeline_mode<synchronous>, transform_indices = @transform_2, window_bounds = array<i64: 1, 32>}, {pipeline_mode = #tpu.pipeline_mode<synchronous>, transform_indices = @transform_3, window_bounds = array<i64: 32, 256>}, {pipeline_mode = #tpu.pipeline_mode<synchronous>, transform_indices = @transform_4, window_bounds = array<i64: 1, 256>}, {transform_indices = @transform_5, window_bounds = array<i64: 1, 256, 128>}, {transform_indices = @transform_6, window_bounds = array<i64: 1, 128>}, {transform_indices = @transform_7, window_bounds = array<i64: 128, 256>}, {pipeline_mode = #tpu.pipeline_mode<synchronous>, transform_indices = @transform_8, window_bounds = array<i64: 1, 256>}, {pipeline_mode = #tpu.pipeline_mode<synchronous>, transform_indices = @transform_9, window_bounds = array<i64: 32, 32>}, {pipeline_mode = #tpu.pipeline_mode<synchronous>, transform_indices = @transform_10, window_bounds = array<i64: 1, 32>}, {pipeline_mode = #tpu.pipeline_mode<synchronous>, transform_indices = @transform_11, window_bounds = array<i64: 32, 32>}, {pipeline_mode = #tpu.pipeline_mode<synchronous>, transform_indices = @transform_12, window_bounds = array<i64: 1, 32>}, {transform_indices = @transform_13, window_bounds = array<i64: 1, 128, 32>}, {transform_indices = @transform_14, window_bounds = array<i64: 1, 128, 32>}, {transform_indices = @transform_15, window_bounds = array<i64: 1, 128, 128>}]} {
    %c0_i32 = arith.constant 0 : i32
    %0 = arith.cmpi eq, %arg2, %c0_i32 : i32
    %1 = arith.extui %0 : i1 to i32
    %c0_i32_0 = arith.constant 0 : i32
    %2 = arith.cmpi ne, %1, %c0_i32_0 : i32
    scf.if %2 {
      %c128_i32_26 = arith.constant 128 : i32
      %38 = arith.muli %arg1, %c128_i32_26 : i32
      %39 = tpu.assume_multiple %38, 128 : i32
      %c0_27 = arith.constant 0 : index
      %40 = arith.index_cast %39 : i32 to index
      %c0_28 = arith.constant 0 : index
      %41 = vector.load %arg3[%c0_27, %40, %c0_28] : memref<1x256x32xbf16, #tpu.memory_space<vmem>>, vector<1x128x32xbf16>
      %42 = vector.shape_cast %41 : vector<1x128x32xbf16> to vector<128x32xbf16>
      %c0_29 = arith.constant 0 : index
      %c0_30 = arith.constant 0 : index
      %43 = vector.load %arg4[%c0_29, %c0_30] : memref<32x32xbf16, #tpu.memory_space<vmem>>, vector<32x32xbf16>
      %cst_31 = arith.constant dense<0.000000e+00> : vector<128x32xf32>
      %44 = tpu.matmul %42, %43, %cst_31 {dimension_numbers = #tpu.dot_dimension_numbers<[1], [0], [0], [1], [0, 0, 1, 1], [], []>} : vector<128x32xbf16>, vector<32x32xbf16>, vector<128x32xf32> -> vector<128x32xf32>
      %c0_32 = arith.constant 0 : index
      %c0_33 = arith.constant 0 : index
      %45 = vector.load %arg5[%c0_32, %c0_33] : memref<1x32xf32, #tpu.memory_space<vmem>>, vector<1x32xf32>
      %46 = vector.broadcast %45 : vector<1x32xf32> to vector<128x32xf32>
      %47 = arith.addf %44, %46 : vector<128x32xf32>
      %cst_34 = arith.constant 0.000000e+00 : f32
      %48 = vector.broadcast %cst_34 : f32 to vector<128x32xf32>
      %49 = arith.maximumf %47, %48 : vector<128x32xf32>
      %50 = arith.truncf %49 : vector<128x32xf32> to vector<128x32xbf16>
      %c0_35 = arith.constant 0 : index
      %c0_36 = arith.constant 0 : index
      %51 = vector.load %arg6[%c0_35, %c0_36] : memref<32x256xbf16, #tpu.memory_space<vmem>>, vector<32x256xbf16>
      %cst_37 = arith.constant dense<0.000000e+00> : vector<128x256xf32>
      %52 = tpu.matmul %50, %51, %cst_37 {dimension_numbers = #tpu.dot_dimension_numbers<[1], [0], [0], [1], [0, 0, 1, 1], [], []>} : vector<128x32xbf16>, vector<32x256xbf16>, vector<128x256xf32> -> vector<128x256xf32>
      %c0_38 = arith.constant 0 : index
      %c0_39 = arith.constant 0 : index
      %53 = vector.load %arg7[%c0_38, %c0_39] : memref<1x256xf32, #tpu.memory_space<vmem>>, vector<1x256xf32>
      %54 = vector.broadcast %53 : vector<1x256xf32> to vector<128x256xf32>
      %55 = arith.addf %52, %54 : vector<128x256xf32>
      %cst_40 = arith.constant 0.000000e+00 : f32
      %56 = vector.broadcast %cst_40 : f32 to vector<128x256xf32>
      %57 = arith.maximumf %55, %56 : vector<128x256xf32>
      %58 = arith.truncf %57 : vector<128x256xf32> to vector<128x256xbf16>
      %c0_41 = arith.constant 0 : index
      %c0_42 = arith.constant 0 : index
      %59 = vector.load %arg19[%c0_41, %c0_42] : memref<128x256xbf16, #tpu.memory_space<vmem>>, vector<128x256xbf16>
      tpu.vector_store %arg19[%c0_41, %c0_42], %58 {strides = array<i32>} : memref<128x256xbf16, #tpu.memory_space<vmem>>, vector<128x256xbf16>,
      %cst_43 = arith.constant 0.000000e+00 : f32
      %60 = vector.broadcast %cst_43 : f32 to vector<128x256xf32>
      %c0_44 = arith.constant 0 : index
      %c0_45 = arith.constant 0 : index
      %61 = vector.load %arg20[%c0_44, %c0_45] : memref<128x256xf32, #tpu.memory_space<vmem>>, vector<128x256xf32>
      tpu.vector_store %arg20[%c0_44, %c0_45], %60 {strides = array<i32>} : memref<128x256xf32, #tpu.memory_space<vmem>>, vector<128x256xf32>,
      %cst_46 = arith.constant 0.000000e+00 : f32
      %62 = vector.broadcast %cst_46 : f32 to vector<128x32xf32>
      %c0_47 = arith.constant 0 : index
      %c0_48 = arith.constant 0 : index
      %63 = vector.load %arg21[%c0_47, %c0_48] : memref<128x32xf32, #tpu.memory_space<vmem>>, vector<128x32xf32>
      tpu.vector_store %arg21[%c0_47, %c0_48], %62 {strides = array<i32>} : memref<128x32xf32, #tpu.memory_space<vmem>>, vector<128x32xf32>,
    } else {
    }
    %c0 = arith.constant 0 : index
    %c0_1 = arith.constant 0 : index
    %c0_2 = arith.constant 0 : index
    %3 = vector.load %arg8[%c0, %c0_1, %c0_2] : memref<1x256x128xbf16, #tpu.memory_space<vmem>>, vector<1x256x128xbf16>
    %4 = vector.shape_cast %3 : vector<1x256x128xbf16> to vector<256x128xbf16>
    %c0_3 = arith.constant 0 : index
    %c0_4 = arith.constant 0 : index
    %5 = vector.load %arg10[%c0_3, %c0_4] : memref<128x256xbf16, #tpu.memory_space<vmem>>, vector<128x256xbf16>
    %c0_5 = arith.constant 0 : index
    %c0_6 = arith.constant 0 : index
    %6 = vector.load %arg19[%c0_5, %c0_6] : memref<128x256xbf16, #tpu.memory_space<vmem>>, vector<128x256xbf16>
    %cst = arith.constant dense<0.000000e+00> : vector<128x128xf32>
    %7 = tpu.matmul %6, %4, %cst {dimension_numbers = #tpu.dot_dimension_numbers<[1], [0], [0], [1], [0, 0, 1, 1], [], []>} : vector<128x256xbf16>, vector<256x128xbf16>, vector<128x128xf32> -> vector<128x128xf32>
    %c0_7 = arith.constant 0 : index
    %c0_8 = arith.constant 0 : index
    %8 = vector.load %arg9[%c0_7, %c0_8] : memref<1x128xf32, #tpu.memory_space<vmem>>, vector<1x128xf32>
    %9 = vector.broadcast %8 : vector<1x128xf32> to vector<128x128xf32>
    %10 = arith.addf %7, %9 : vector<128x128xf32>
    %11 = arith.negf %10 : vector<128x128xf32>
    %12 = math.exp %11 : vector<128x128xf32>
    %cst_9 = arith.constant 1.000000e+00 : f32
    %13 = vector.broadcast %cst_9 : f32 to vector<128x128xf32>
    %14 = arith.addf %13, %12 : vector<128x128xf32>
    %15 = arith.divf %13, %14 : vector<128x128xf32>
    %16 = arith.truncf %15 : vector<128x128xf32> to vector<128x128xbf16>
    %c0_10 = arith.constant 0 : index
    %c0_11 = arith.constant 0 : index
    %c0_12 = arith.constant 0 : index
    %17 = vector.load %arg18[%c0_10, %c0_11, %c0_12] : memref<1x128x128xbf16, #tpu.memory_space<vmem>>, vector<1x128x128xbf16>
    %18 = vector.shape_cast %17 : vector<1x128x128xbf16> to vector<128x128xbf16>
    %19 = vector.shape_cast %16 : vector<128x128xbf16> to vector<1x128x128xbf16>
    tpu.vector_store %arg18[%c0_10, %c0_11, %c0_12], %19 {strides = array<i32>} : memref<1x128x128xbf16, #tpu.memory_space<vmem>>, vector<1x128x128xbf16>,
    %c0_13 = arith.constant 0 : index
    %c0_14 = arith.constant 0 : index
    %20 = vector.load %arg20[%c0_13, %c0_14] : memref<128x256xf32, #tpu.memory_space<vmem>>, vector<128x256xf32>
    %21 = arith.truncf %10 : vector<128x128xf32> to vector<128x128xbf16>
    %cst_15 = arith.constant dense<0.000000e+00> : vector<128x256xf32>
    %22 = tpu.matmul %21, %5, %cst_15 {dimension_numbers = #tpu.dot_dimension_numbers<[1], [0], [0], [1], [0, 0, 1, 1], [], []>} : vector<128x128xbf16>, vector<128x256xbf16>, vector<128x256xf32> -> vector<128x256xf32>
    %23 = arith.addf %20, %22 : vector<128x256xf32>
    %c0_16 = arith.constant 0 : index
    %c0_17 = arith.constant 0 : index
    %24 = vector.load %arg20[%c0_16, %c0_17] : memref<128x256xf32, #tpu.memory_space<vmem>>, vector<128x256xf32>
    tpu.vector_store %arg20[%c0_16, %c0_17], %23 {strides = array<i32>} : memref<128x256xf32, #tpu.memory_space<vmem>>, vector<128x256xf32>,
    %c128_i32 = arith.constant 128 : i32
    %25 = arith.muli %arg2, %c128_i32 : i32
    %26 = tpu.assume_multiple %25, 128 : i32
    %c0_18 = arith.constant 0 : index
    %27 = arith.index_cast %26 : i32 to index
    %c0_19 = arith.constant 0 : index
    %28 = vector.load %arg3[%c0_18, %27, %c0_19] : memref<1x256x32xbf16, #tpu.memory_space<vmem>>, vector<1x128x32xbf16>
    %29 = vector.shape_cast %28 : vector<1x128x32xbf16> to vector<128x32xbf16>
    %c0_20 = arith.constant 0 : index
    %c0_21 = arith.constant 0 : index
    %30 = vector.load %arg21[%c0_20, %c0_21] : memref<128x32xf32, #tpu.memory_space<vmem>>, vector<128x32xf32>
    %31 = arith.truncf %15 : vector<128x128xf32> to vector<128x128xbf16>
    %cst_22 = arith.constant dense<0.000000e+00> : vector<128x32xf32>
    %32 = tpu.matmul %31, %29, %cst_22 {dimension_numbers = #tpu.dot_dimension_numbers<[1], [0], [0], [1], [0, 0, 1, 1], [], []>} : vector<128x128xbf16>, vector<128x32xbf16>, vector<128x32xf32> -> vector<128x32xf32>
    %33 = arith.addf %30, %32 : vector<128x32xf32>
    %c0_23 = arith.constant 0 : index
    %c0_24 = arith.constant 0 : index
    %34 = vector.load %arg21[%c0_23, %c0_24] : memref<128x32xf32, #tpu.memory_space<vmem>>, vector<128x32xf32>
    tpu.vector_store %arg21[%c0_23, %c0_24], %33 {strides = array<i32>} : memref<128x32xf32, #tpu.memory_space<vmem>>, vector<128x32xf32>,
    %c1_i32 = arith.constant 1 : i32
    %35 = arith.cmpi eq, %arg2, %c1_i32 : i32
    %36 = arith.extui %35 : i1 to i32
    %c0_i32_25 = arith.constant 0 : i32
    %37 = arith.cmpi ne, %36, %c0_i32_25 : i32
    scf.if %37 {
      %c0_26 = arith.constant 0 : index
      %c0_27 = arith.constant 0 : index
      %38 = vector.load %arg20[%c0_26, %c0_27] : memref<128x256xf32, #tpu.memory_space<vmem>>, vector<128x256xf32>
      %c0_28 = arith.constant 0 : index
      %c0_29 = arith.constant 0 : index
      %39 = vector.load %arg11[%c0_28, %c0_29] : memref<1x256xf32, #tpu.memory_space<vmem>>, vector<1x256xf32>
      %40 = vector.broadcast %39 : vector<1x256xf32> to vector<128x256xf32>
      %41 = arith.addf %38, %40 : vector<128x256xf32>
      %cst_30 = arith.constant 0.000000e+00 : f32
      %42 = vector.broadcast %cst_30 : f32 to vector<128x256xf32>
      %43 = arith.subf %42, %41 : vector<128x256xf32>
      %44 = arith.negf %43 : vector<128x256xf32>
      %45 = math.exp %44 : vector<128x256xf32>
      %cst_31 = arith.constant 1.000000e+00 : f32
      %46 = vector.broadcast %cst_31 : f32 to vector<128x256xf32>
      %47 = arith.addf %46, %45 : vector<128x256xf32>
      %48 = arith.divf %46, %47 : vector<128x256xf32>
      %49 = arith.truncf %48 : vector<128x256xf32> to vector<128x256xbf16>
      %c0_32 = arith.constant 0 : index
      %c0_33 = arith.constant 0 : index
      %c0_34 = arith.constant 0 : index
      %50 = vector.load %arg3[%c0_32, %c0_33, %c0_34] : memref<1x256x32xbf16, #tpu.memory_space<vmem>>, vector<1x256x32xbf16>
      %51 = vector.shape_cast %50 : vector<1x256x32xbf16> to vector<256x32xbf16>
      %cst_35 = arith.constant dense<0.000000e+00> : vector<128x32xf32>
      %52 = tpu.matmul %49, %51, %cst_35 {dimension_numbers = #tpu.dot_dimension_numbers<[1], [0], [0], [1], [0, 0, 1, 1], [], []>} : vector<128x256xbf16>, vector<256x32xbf16>, vector<128x32xf32> -> vector<128x32xf32>
      %cst_36 = arith.constant 0.00510204071 : f32
      %53 = vector.broadcast %cst_36 : f32 to vector<128x32xf32>
      %54 = arith.mulf %52, %53 : vector<128x32xf32>
      %c0_37 = arith.constant 0 : index
      %c0_38 = arith.constant 0 : index
      %55 = vector.load %arg21[%c0_37, %c0_38] : memref<128x32xf32, #tpu.memory_space<vmem>>, vector<128x32xf32>
      %cst_39 = arith.constant 0.00510204071 : f32
      %56 = vector.broadcast %cst_39 : f32 to vector<128x32xf32>
      %57 = arith.mulf %55, %56 : vector<128x32xf32>
      %58 = arith.truncf %57 : vector<128x32xf32> to vector<128x32xbf16>
      %c0_40 = arith.constant 0 : index
      %c0_41 = arith.constant 0 : index
      %59 = vector.load %arg12[%c0_40, %c0_41] : memref<32x32xbf16, #tpu.memory_space<vmem>>, vector<32x32xbf16>
      %cst_42 = arith.constant dense<0.000000e+00> : vector<128x32xf32>
      %60 = tpu.matmul %58, %59, %cst_42 {dimension_numbers = #tpu.dot_dimension_numbers<[1], [0], [0], [1], [0, 0, 1, 1], [], []>} : vector<128x32xbf16>, vector<32x32xbf16>, vector<128x32xf32> -> vector<128x32xf32>
      %c0_43 = arith.constant 0 : index
      %c0_44 = arith.constant 0 : index
      %61 = vector.load %arg13[%c0_43, %c0_44] : memref<1x32xf32, #tpu.memory_space<vmem>>, vector<1x32xf32>
      %62 = vector.broadcast %61 : vector<1x32xf32> to vector<128x32xf32>
      %63 = arith.addf %60, %62 : vector<128x32xf32>
      %64 = arith.truncf %54 : vector<128x32xf32> to vector<128x32xbf16>
      %c0_45 = arith.constant 0 : index
      %c0_46 = arith.constant 0 : index
      %65 = vector.load %arg14[%c0_45, %c0_46] : memref<32x32xbf16, #tpu.memory_space<vmem>>, vector<32x32xbf16>
      %cst_47 = arith.constant dense<0.000000e+00> : vector<128x32xf32>
      %66 = tpu.matmul %64, %65, %cst_47 {dimension_numbers = #tpu.dot_dimension_numbers<[1], [0], [0], [1], [0, 0, 1, 1], [], []>} : vector<128x32xbf16>, vector<32x32xbf16>, vector<128x32xf32> -> vector<128x32xf32>
      %c0_48 = arith.constant 0 : index
      %c0_49 = arith.constant 0 : index
      %67 = vector.load %arg15[%c0_48, %c0_49] : memref<1x32xf32, #tpu.memory_space<vmem>>, vector<1x32xf32>
      %68 = vector.broadcast %67 : vector<1x32xf32> to vector<128x32xf32>
      %69 = arith.addf %66, %68 : vector<128x32xf32>
      %cst_50 = arith.constant 0.000000e+00 : f32
      %70 = vector.broadcast %cst_50 : f32 to vector<128x32xf32>
      %71 = arith.maximumf %63, %70 : vector<128x32xf32>
      %c0_51 = arith.constant 0 : index
      %c0_52 = arith.constant 0 : index
      %c0_53 = arith.constant 0 : index
      %72 = vector.load %arg16[%c0_51, %c0_52, %c0_53] : memref<1x128x32xf32, #tpu.memory_space<vmem>>, vector<1x128x32xf32>
      %73 = vector.shape_cast %72 : vector<1x128x32xf32> to vector<128x32xf32>
      %74 = vector.shape_cast %71 : vector<128x32xf32> to vector<1x128x32xf32>
      tpu.vector_store %arg16[%c0_51, %c0_52, %c0_53], %74 {strides = array<i32>} : memref<1x128x32xf32, #tpu.memory_space<vmem>>, vector<1x128x32xf32>,
      %cst_54 = arith.constant 0.000000e+00 : f32
      %75 = vector.broadcast %cst_54 : f32 to vector<128x32xf32>
      %76 = arith.maximumf %69, %75 : vector<128x32xf32>
      %c0_55 = arith.constant 0 : index
      %c0_56 = arith.constant 0 : index
      %c0_57 = arith.constant 0 : index
      %77 = vector.load %arg17[%c0_55, %c0_56, %c0_57] : memref<1x128x32xf32, #tpu.memory_space<vmem>>, vector<1x128x32xf32>
      %78 = vector.shape_cast %77 : vector<1x128x32xf32> to vector<128x32xf32>
      %79 = vector.shape_cast %76 : vector<128x32xf32> to vector<1x128x32xf32>
      tpu.vector_store %arg17[%c0_55, %c0_56, %c0_57], %79 {strides = array<i32>} : memref<1x128x32xf32, #tpu.memory_space<vmem>>, vector<1x128x32xf32>,
    } else {
    }
    return
  }
  func.func @transform_0(%arg0: i32, %arg1: i32, %arg2: i32) -> (i32, i32, i32) {
    %c0_i32 = arith.constant 0 : i32
    %c0_i32_0 = arith.constant 0 : i32
    %c0_i32_1 = arith.constant 0 : i32
    return %arg0, %c0_i32, %c0_i32_0 : i32, i32, i32
  }
  func.func @transform_1(%arg0: i32, %arg1: i32, %arg2: i32) -> (i32, i32) {
    %c0_i32 = arith.constant 0 : i32
    %c0_i32_0 = arith.constant 0 : i32
    %c0_i32_1 = arith.constant 0 : i32
    return %c0_i32, %c0_i32_0 : i32, i32
  }
  func.func @transform_2(%arg0: i32, %arg1: i32, %arg2: i32) -> (i32, i32) {
    %c0_i32 = arith.constant 0 : i32
    %c0_i32_0 = arith.constant 0 : i32
    %c0_i32_1 = arith.constant 0 : i32
    return %c0_i32, %c0_i32_0 : i32, i32
  }
  func.func @transform_3(%arg0: i32, %arg1: i32, %arg2: i32) -> (i32, i32) {
    %c0_i32 = arith.constant 0 : i32
    %c0_i32_0 = arith.constant 0 : i32
    %c0_i32_1 = arith.constant 0 : i32
    return %c0_i32, %c0_i32_0 : i32, i32
  }
  func.func @transform_4(%arg0: i32, %arg1: i32, %arg2: i32) -> (i32, i32) {
    %c0_i32 = arith.constant 0 : i32
    %c0_i32_0 = arith.constant 0 : i32
    %c0_i32_1 = arith.constant 0 : i32
    return %c0_i32, %c0_i32_0 : i32, i32
  }
  func.func @transform_5(%arg0: i32, %arg1: i32, %arg2: i32) -> (i32, i32, i32) {
    %c0_i32 = arith.constant 0 : i32
    %c0_i32_0 = arith.constant 0 : i32
    %c0_i32_1 = arith.constant 0 : i32
    return %arg2, %c0_i32, %c0_i32_0 : i32, i32, i32
  }
  func.func @transform_6(%arg0: i32, %arg1: i32, %arg2: i32) -> (i32, i32) {
    %c0_i32 = arith.constant 0 : i32
    %c0_i32_0 = arith.constant 0 : i32
    return %c0_i32, %arg2 : i32, i32
  }
  func.func @transform_7(%arg0: i32, %arg1: i32, %arg2: i32) -> (i32, i32) {
    %c0_i32 = arith.constant 0 : i32
    %c0_i32_0 = arith.constant 0 : i32
    return %arg2, %c0_i32 : i32, i32
  }
  func.func @transform_8(%arg0: i32, %arg1: i32, %arg2: i32) -> (i32, i32) {
    %c0_i32 = arith.constant 0 : i32
    %c0_i32_0 = arith.constant 0 : i32
    %c0_i32_1 = arith.constant 0 : i32
    return %c0_i32, %c0_i32_0 : i32, i32
  }
  func.func @transform_9(%arg0: i32, %arg1: i32, %arg2: i32) -> (i32, i32) {
    %c0_i32 = arith.constant 0 : i32
    %c0_i32_0 = arith.constant 0 : i32
    %c0_i32_1 = arith.constant 0 : i32
    return %c0_i32, %c0_i32_0 : i32, i32
  }
  func.func @transform_10(%arg0: i32, %arg1: i32, %arg2: i32) -> (i32, i32) {
    %c0_i32 = arith.constant 0 : i32
    %c0_i32_0 = arith.constant 0 : i32
    %c0_i32_1 = arith.constant 0 : i32
    return %c0_i32, %c0_i32_0 : i32, i32
  }
  func.func @transform_11(%arg0: i32, %arg1: i32, %arg2: i32) -> (i32, i32) {
    %c0_i32 = arith.constant 0 : i32
    %c0_i32_0 = arith.constant 0 : i32
    %c0_i32_1 = arith.constant 0 : i32
    return %c0_i32, %c0_i32_0 : i32, i32
  }
  func.func @transform_12(%arg0: i32, %arg1: i32, %arg2: i32) -> (i32, i32) {
    %c0_i32 = arith.constant 0 : i32
    %c0_i32_0 = arith.constant 0 : i32
    %c0_i32_1 = arith.constant 0 : i32
    return %c0_i32, %c0_i32_0 : i32, i32
  }
  func.func @transform_13(%arg0: i32, %arg1: i32, %arg2: i32) -> (i32, i32, i32) {
    %c0_i32 = arith.constant 0 : i32
    %c0_i32_0 = arith.constant 0 : i32
    return %arg0, %arg1, %c0_i32 : i32, i32, i32
  }
  func.func @transform_14(%arg0: i32, %arg1: i32, %arg2: i32) -> (i32, i32, i32) {
    %c0_i32 = arith.constant 0 : i32
    %c0_i32_0 = arith.constant 0 : i32
    return %arg0, %arg1, %c0_i32 : i32, i32, i32
  }
  func.func @transform_15(%arg0: i32, %arg1: i32, %arg2: i32) -> (i32, i32, i32) {
    %c0_i32 = arith.constant 0 : i32
    return %arg0, %arg1, %arg2 : i32, i32, i32
  }
}

module attributes {stable_mosaic.version = 11 : i64} {
  func.func @kernel(%arg0: i32, %arg1: i32, %arg2: i32, %arg3: memref<1x256x32xbf16, #tpu.memory_space<vmem>>, %arg4: memref<32x32xbf16, #tpu.memory_space<vmem>>, %arg5: memref<1x32xf32, #tpu.memory_space<vmem>>, %arg6: memref<32x256xbf16, #tpu.memory_space<vmem>>, %arg7: memref<1x256xf32, #tpu.memory_space<vmem>>, %arg8: memref<1x256x128xbf16, #tpu.memory_space<vmem>>, %arg9: memref<1x128xf32, #tpu.memory_space<vmem>>, %arg10: memref<128x256xbf16, #tpu.memory_space<vmem>>, %arg11: memref<1x256xf32, #tpu.memory_space<vmem>>, %arg12: memref<32x32xbf16, #tpu.memory_space<vmem>>, %arg13: memref<1x32xf32, #tpu.memory_space<vmem>>, %arg14: memref<32x32xbf16, #tpu.memory_space<vmem>>, %arg15: memref<1x32xf32, #tpu.memory_space<vmem>>, %arg16: memref<1x128x32xf32, #tpu.memory_space<vmem>>, %arg17: memref<1x128x32xf32, #tpu.memory_space<vmem>>, %arg18: memref<1x128x128xbf16, #tpu.memory_space<vmem>>, %arg19: memref<128x256xbf16, #tpu.memory_space<vmem>>, %arg20: memref<128x256xf32, #tpu.memory_space<vmem>>, %arg21: memref<128x32xf32, #tpu.memory_space<vmem>>) attributes {dimension_semantics = [#tpu.dimension_semantics<parallel>, #tpu.dimension_semantics<parallel>, #tpu.dimension_semantics<arbitrary>], iteration_bounds = array<i64: 2, 2, 2>, scalar_prefetch = 0 : i64, scratch_operands = 3 : i64, tpu.core_type = #tpu.core_type<tc>, window_params = [{transform_indices = @transform_0, window_bounds = array<i64: 1, 256, 32>}, {pipeline_mode = #tpu.pipeline_mode<synchronous>, transform_indices = @transform_1, window_bounds = array<i64: 32, 32>}, {pipeline_mode = #tpu.pipeline_mode<synchronous>, transform_indices = @transform_2, window_bounds = array<i64: 1, 32>}, {pipeline_mode = #tpu.pipeline_mode<synchronous>, transform_indices = @transform_3, window_bounds = array<i64: 32, 256>}, {pipeline_mode = #tpu.pipeline_mode<synchronous>, transform_indices = @transform_4, window_bounds = array<i64: 1, 256>}, {transform_indices = @transform_5, window_bounds = array<i64: 1, 256, 128>}, {transform_indices = @transform_6, window_bounds = array<i64: 1, 128>}, {transform_indices = @transform_7, window_bounds = array<i64: 128, 256>}, {pipeline_mode = #tpu.pipeline_mode<synchronous>, transform_indices = @transform_8, window_bounds = array<i64: 1, 256>}, {pipeline_mode = #tpu.pipeline_mode<synchronous>, transform_indices = @transform_9, window_bounds = array<i64: 32, 32>}, {pipeline_mode = #tpu.pipeline_mode<synchronous>, transform_indices = @transform_10, window_bounds = array<i64: 1, 32>}, {pipeline_mode = #tpu.pipeline_mode<synchronous>, transform_indices = @transform_11, window_bounds = array<i64: 32, 32>}, {pipeline_mode = #tpu.pipeline_mode<synchronous>, transform_indices = @transform_12, window_bounds = array<i64: 1, 32>}, {transform_indices = @transform_13, window_bounds = array<i64: 1, 128, 32>}, {transform_indices = @transform_14, window_bounds = array<i64: 1, 128, 32>}, {transform_indices = @transform_15, window_bounds = array<i64: 1, 128, 128>}]} {
    %c0_i32 = arith.constant 0 : i32
    %0 = arith.cmpi eq, %arg2, %c0_i32 : i32
    %1 = arith.extui %0 : i1 to i32
    %c0_i32_0 = arith.constant 0 : i32
    %2 = arith.cmpi ne, %1, %c0_i32_0 : i32
    scf.if %2 {
      %c128_i32_26 = arith.constant 128 : i32
      %38 = arith.muli %arg1, %c128_i32_26 : i32
      %39 = tpu.assume_multiple %38, 128 : i32
      %c0_27 = arith.constant 0 : index
      %40 = arith.index_cast %39 : i32 to index
      %c0_28 = arith.constant 0 : index
      %41 = vector.load %arg3[%c0_27, %40, %c0_28] : memref<1x256x32xbf16, #tpu.memory_space<vmem>>, vector<1x128x32xbf16>
      %42 = vector.shape_cast %41 : vector<1x128x32xbf16> to vector<128x32xbf16>
      %c0_29 = arith.constant 0 : index
      %c0_30 = arith.constant 0 : index
      %43 = vector.load %arg4[%c0_29, %c0_30] : memref<32x32xbf16, #tpu.memory_space<vmem>>, vector<32x32xbf16>
      %cst_31 = arith.constant dense<0.000000e+00> : vector<128x32xf32>
      %44 = tpu.matmul %42, %43, %cst_31 {dimension_numbers = #tpu.dot_dimension_numbers<[1], [0], [0], [1], [0, 0, 1, 1], [], []>} : vector<128x32xbf16>, vector<32x32xbf16>, vector<128x32xf32> -> vector<128x32xf32>
      %c0_32 = arith.constant 0 : index
      %c0_33 = arith.constant 0 : index
      %45 = vector.load %arg5[%c0_32, %c0_33] : memref<1x32xf32, #tpu.memory_space<vmem>>, vector<1x32xf32>
      %46 = vector.broadcast %45 : vector<1x32xf32> to vector<128x32xf32>
      %47 = arith.addf %44, %46 : vector<128x32xf32>
      %cst_34 = arith.constant 0.000000e+00 : f32
      %48 = vector.broadcast %cst_34 : f32 to vector<128x32xf32>
      %49 = arith.maximumf %47, %48 : vector<128x32xf32>
      %50 = arith.truncf %49 : vector<128x32xf32> to vector<128x32xbf16>
      %c0_35 = arith.constant 0 : index
      %c0_36 = arith.constant 0 : index
      %51 = vector.load %arg6[%c0_35, %c0_36] : memref<32x256xbf16, #tpu.memory_space<vmem>>, vector<32x256xbf16>
      %cst_37 = arith.constant dense<0.000000e+00> : vector<128x256xf32>
      %52 = tpu.matmul %50, %51, %cst_37 {dimension_numbers = #tpu.dot_dimension_numbers<[1], [0], [0], [1], [0, 0, 1, 1], [], []>} : vector<128x32xbf16>, vector<32x256xbf16>, vector<128x256xf32> -> vector<128x256xf32>
      %c0_38 = arith.constant 0 : index
      %c0_39 = arith.constant 0 : index
      %53 = vector.load %arg7[%c0_38, %c0_39] : memref<1x256xf32, #tpu.memory_space<vmem>>, vector<1x256xf32>
      %54 = vector.broadcast %53 : vector<1x256xf32> to vector<128x256xf32>
      %55 = arith.addf %52, %54 : vector<128x256xf32>
      %cst_40 = arith.constant 0.000000e+00 : f32
      %56 = vector.broadcast %cst_40 : f32 to vector<128x256xf32>
      %57 = arith.maximumf %55, %56 : vector<128x256xf32>
      %58 = arith.truncf %57 : vector<128x256xf32> to vector<128x256xbf16>
      %c0_41 = arith.constant 0 : index
      %c0_42 = arith.constant 0 : index
      %59 = vector.load %arg19[%c0_41, %c0_42] : memref<128x256xbf16, #tpu.memory_space<vmem>>, vector<128x256xbf16>
      tpu.vector_store %arg19[%c0_41, %c0_42], %58 {strides = array<i32>} : memref<128x256xbf16, #tpu.memory_space<vmem>>, vector<128x256xbf16>,
      %cst_43 = arith.constant 0.000000e+00 : f32
      %60 = vector.broadcast %cst_43 : f32 to vector<128x256xf32>
      %c0_44 = arith.constant 0 : index
      %c0_45 = arith.constant 0 : index
      %61 = vector.load %arg20[%c0_44, %c0_45] : memref<128x256xf32, #tpu.memory_space<vmem>>, vector<128x256xf32>
      tpu.vector_store %arg20[%c0_44, %c0_45], %60 {strides = array<i32>} : memref<128x256xf32, #tpu.memory_space<vmem>>, vector<128x256xf32>,
      %cst_46 = arith.constant 0.000000e+00 : f32
      %62 = vector.broadcast %cst_46 : f32 to vector<128x32xf32>
      %c0_47 = arith.constant 0 : index
      %c0_48 = arith.constant 0 : index
      %63 = vector.load %arg21[%c0_47, %c0_48] : memref<128x32xf32, #tpu.memory_space<vmem>>, vector<128x32xf32>
      tpu.vector_store %arg21[%c0_47, %c0_48], %62 {strides = array<i32>} : memref<128x32xf32, #tpu.memory_space<vmem>>, vector<128x32xf32>,
    } else {
    }
    %c0 = arith.constant 0 : index
    %c0_1 = arith.constant 0 : index
    %c0_2 = arith.constant 0 : index
    %3 = vector.load %arg8[%c0, %c0_1, %c0_2] : memref<1x256x128xbf16, #tpu.memory_space<vmem>>, vector<1x256x128xbf16>
    %4 = vector.shape_cast %3 : vector<1x256x128xbf16> to vector<256x128xbf16>
    %c0_3 = arith.constant 0 : index
    %c0_4 = arith.constant 0 : index
    %5 = vector.load %arg10[%c0_3, %c0_4] : memref<128x256xbf16, #tpu.memory_space<vmem>>, vector<128x256xbf16>
    %c0_5 = arith.constant 0 : index
    %c0_6 = arith.constant 0 : index
    %6 = vector.load %arg19[%c0_5, %c0_6] : memref<128x256xbf16, #tpu.memory_space<vmem>>, vector<128x256xbf16>
    %cst = arith.constant dense<0.000000e+00> : vector<128x128xf32>
    %7 = tpu.matmul %6, %4, %cst {dimension_numbers = #tpu.dot_dimension_numbers<[1], [0], [0], [1], [0, 0, 1, 1], [], []>} : vector<128x256xbf16>, vector<256x128xbf16>, vector<128x128xf32> -> vector<128x128xf32>
    %c0_7 = arith.constant 0 : index
    %c0_8 = arith.constant 0 : index
    %8 = vector.load %arg9[%c0_7, %c0_8] : memref<1x128xf32, #tpu.memory_space<vmem>>, vector<1x128xf32>
    %9 = vector.broadcast %8 : vector<1x128xf32> to vector<128x128xf32>
    %10 = arith.addf %7, %9 : vector<128x128xf32>
    %11 = arith.negf %10 : vector<128x128xf32>
    %12 = math.exp %11 : vector<128x128xf32>
    %cst_9 = arith.constant 1.000000e+00 : f32
    %13 = vector.broadcast %cst_9 : f32 to vector<128x128xf32>
    %14 = arith.addf %13, %12 : vector<128x128xf32>
    %15 = arith.divf %13, %14 : vector<128x128xf32>
    %16 = arith.truncf %15 : vector<128x128xf32> to vector<128x128xbf16>
    %c0_10 = arith.constant 0 : index
    %c0_11 = arith.constant 0 : index
    %c0_12 = arith.constant 0 : index
    %17 = vector.load %arg18[%c0_10, %c0_11, %c0_12] : memref<1x128x128xbf16, #tpu.memory_space<vmem>>, vector<1x128x128xbf16>
    %18 = vector.shape_cast %17 : vector<1x128x128xbf16> to vector<128x128xbf16>
    %19 = vector.shape_cast %16 : vector<128x128xbf16> to vector<1x128x128xbf16>
    tpu.vector_store %arg18[%c0_10, %c0_11, %c0_12], %19 {strides = array<i32>} : memref<1x128x128xbf16, #tpu.memory_space<vmem>>, vector<1x128x128xbf16>,
    %c0_13 = arith.constant 0 : index
    %c0_14 = arith.constant 0 : index
    %20 = vector.load %arg20[%c0_13, %c0_14] : memref<128x256xf32, #tpu.memory_space<vmem>>, vector<128x256xf32>
    %21 = arith.truncf %10 : vector<128x128xf32> to vector<128x128xbf16>
    %cst_15 = arith.constant dense<0.000000e+00> : vector<128x256xf32>
    %22 = tpu.matmul %21, %5, %cst_15 {dimension_numbers = #tpu.dot_dimension_numbers<[1], [0], [0], [1], [0, 0, 1, 1], [], []>} : vector<128x128xbf16>, vector<128x256xbf16>, vector<128x256xf32> -> vector<128x256xf32>
    %23 = arith.addf %20, %22 : vector<128x256xf32>
    %c0_16 = arith.constant 0 : index
    %c0_17 = arith.constant 0 : index
    %24 = vector.load %arg20[%c0_16, %c0_17] : memref<128x256xf32, #tpu.memory_space<vmem>>, vector<128x256xf32>
    tpu.vector_store %arg20[%c0_16, %c0_17], %23 {strides = array<i32>} : memref<128x256xf32, #tpu.memory_space<vmem>>, vector<128x256xf32>,
    %c128_i32 = arith.constant 128 : i32
    %25 = arith.muli %arg2, %c128_i32 : i32
    %26 = tpu.assume_multiple %25, 128 : i32
    %c0_18 = arith.constant 0 : index
    %27 = arith.index_cast %26 : i32 to index
    %c0_19 = arith.constant 0 : index
    %28 = vector.load %arg3[%c0_18, %27, %c0_19] : memref<1x256x32xbf16, #tpu.memory_space<vmem>>, vector<1x128x32xbf16>
    %29 = vector.shape_cast %28 : vector<1x128x32xbf16> to vector<128x32xbf16>
    %c0_20 = arith.constant 0 : index
    %c0_21 = arith.constant 0 : index
    %30 = vector.load %arg21[%c0_20, %c0_21] : memref<128x32xf32, #tpu.memory_space<vmem>>, vector<128x32xf32>
    %31 = arith.truncf %15 : vector<128x128xf32> to vector<128x128xbf16>
    %cst_22 = arith.constant dense<0.000000e+00> : vector<128x32xf32>
    %32 = tpu.matmul %31, %29, %cst_22 {dimension_numbers = #tpu.dot_dimension_numbers<[1], [0], [0], [1], [0, 0, 1, 1], [], []>} : vector<128x128xbf16>, vector<128x32xbf16>, vector<128x32xf32> -> vector<128x32xf32>
    %33 = arith.addf %30, %32 : vector<128x32xf32>
    %c0_23 = arith.constant 0 : index
    %c0_24 = arith.constant 0 : index
    %34 = vector.load %arg21[%c0_23, %c0_24] : memref<128x32xf32, #tpu.memory_space<vmem>>, vector<128x32xf32>
    tpu.vector_store %arg21[%c0_23, %c0_24], %33 {strides = array<i32>} : memref<128x32xf32, #tpu.memory_space<vmem>>, vector<128x32xf32>,
    %c1_i32 = arith.constant 1 : i32
    %35 = arith.cmpi eq, %arg2, %c1_i32 : i32
    %36 = arith.extui %35 : i1 to i32
    %c0_i32_25 = arith.constant 0 : i32
    %37 = arith.cmpi ne, %36, %c0_i32_25 : i32
    scf.if %37 {
      %c0_26 = arith.constant 0 : index
      %c0_27 = arith.constant 0 : index
      %38 = vector.load %arg20[%c0_26, %c0_27] : memref<128x256xf32, #tpu.memory_space<vmem>>, vector<128x256xf32>
      %c0_28 = arith.constant 0 : index
      %c0_29 = arith.constant 0 : index
      %39 = vector.load %arg11[%c0_28, %c0_29] : memref<1x256xf32, #tpu.memory_space<vmem>>, vector<1x256xf32>
      %40 = vector.broadcast %39 : vector<1x256xf32> to vector<128x256xf32>
      %41 = arith.addf %38, %40 : vector<128x256xf32>
      %cst_30 = arith.constant 0.000000e+00 : f32
      %42 = vector.broadcast %cst_30 : f32 to vector<128x256xf32>
      %43 = arith.subf %42, %41 : vector<128x256xf32>
      %44 = arith.negf %43 : vector<128x256xf32>
      %45 = math.exp %44 : vector<128x256xf32>
      %cst_31 = arith.constant 1.000000e+00 : f32
      %46 = vector.broadcast %cst_31 : f32 to vector<128x256xf32>
      %47 = arith.addf %46, %45 : vector<128x256xf32>
      %48 = arith.divf %46, %47 : vector<128x256xf32>
      %49 = arith.truncf %48 : vector<128x256xf32> to vector<128x256xbf16>
      %c0_32 = arith.constant 0 : index
      %c0_33 = arith.constant 0 : index
      %c0_34 = arith.constant 0 : index
      %50 = vector.load %arg3[%c0_32, %c0_33, %c0_34] : memref<1x256x32xbf16, #tpu.memory_space<vmem>>, vector<1x256x32xbf16>
      %51 = vector.shape_cast %50 : vector<1x256x32xbf16> to vector<256x32xbf16>
      %cst_35 = arith.constant dense<0.000000e+00> : vector<128x32xf32>
      %52 = tpu.matmul %49, %51, %cst_35 {dimension_numbers = #tpu.dot_dimension_numbers<[1], [0], [0], [1], [0, 0, 1, 1], [], []>} : vector<128x256xbf16>, vector<256x32xbf16>, vector<128x32xf32> -> vector<128x32xf32>
      %cst_36 = arith.constant 0.00510204071 : f32
      %53 = vector.broadcast %cst_36 : f32 to vector<128x32xf32>
      %54 = arith.mulf %52, %53 : vector<128x32xf32>
      %c0_37 = arith.constant 0 : index
      %c0_38 = arith.constant 0 : index
      %55 = vector.load %arg21[%c0_37, %c0_38] : memref<128x32xf32, #tpu.memory_space<vmem>>, vector<128x32xf32>
      %cst_39 = arith.constant 0.00510204071 : f32
      %56 = vector.broadcast %cst_39 : f32 to vector<128x32xf32>
      %57 = arith.mulf %55, %56 : vector<128x32xf32>
      %58 = arith.truncf %57 : vector<128x32xf32> to vector<128x32xbf16>
      %c0_40 = arith.constant 0 : index
      %c0_41 = arith.constant 0 : index
      %59 = vector.load %arg12[%c0_40, %c0_41] : memref<32x32xbf16, #tpu.memory_space<vmem>>, vector<32x32xbf16>
      %cst_42 = arith.constant dense<0.000000e+00> : vector<128x32xf32>
      %60 = tpu.matmul %58, %59, %cst_42 {dimension_numbers = #tpu.dot_dimension_numbers<[1], [0], [0], [1], [0, 0, 1, 1], [], []>} : vector<128x32xbf16>, vector<32x32xbf16>, vector<128x32xf32> -> vector<128x32xf32>
      %c0_43 = arith.constant 0 : index
      %c0_44 = arith.constant 0 : index
      %61 = vector.load %arg13[%c0_43, %c0_44] : memref<1x32xf32, #tpu.memory_space<vmem>>, vector<1x32xf32>
      %62 = vector.broadcast %61 : vector<1x32xf32> to vector<128x32xf32>
      %63 = arith.addf %60, %62 : vector<128x32xf32>
      %64 = arith.truncf %54 : vector<128x32xf32> to vector<128x32xbf16>
      %c0_45 = arith.constant 0 : index
      %c0_46 = arith.constant 0 : index
      %65 = vector.load %arg14[%c0_45, %c0_46] : memref<32x32xbf16, #tpu.memory_space<vmem>>, vector<32x32xbf16>
      %cst_47 = arith.constant dense<0.000000e+00> : vector<128x32xf32>
      %66 = tpu.matmul %64, %65, %cst_47 {dimension_numbers = #tpu.dot_dimension_numbers<[1], [0], [0], [1], [0, 0, 1, 1], [], []>} : vector<128x32xbf16>, vector<32x32xbf16>, vector<128x32xf32> -> vector<128x32xf32>
      %c0_48 = arith.constant 0 : index
      %c0_49 = arith.constant 0 : index
      %67 = vector.load %arg15[%c0_48, %c0_49] : memref<1x32xf32, #tpu.memory_space<vmem>>, vector<1x32xf32>
      %68 = vector.broadcast %67 : vector<1x32xf32> to vector<128x32xf32>
      %69 = arith.addf %66, %68 : vector<128x32xf32>
      %cst_50 = arith.constant 0.000000e+00 : f32
      %70 = vector.broadcast %cst_50 : f32 to vector<128x32xf32>
      %71 = arith.maximumf %63, %70 : vector<128x32xf32>
      %c0_51 = arith.constant 0 : index
      %c0_52 = arith.constant 0 : index
      %c0_53 = arith.constant 0 : index
      %72 = vector.load %arg16[%c0_51, %c0_52, %c0_53] : memref<1x128x32xf32, #tpu.memory_space<vmem>>, vector<1x128x32xf32>
      %73 = vector.shape_cast %72 : vector<1x128x32xf32> to vector<128x32xf32>
      %74 = vector.shape_cast %71 : vector<128x32xf32> to vector<1x128x32xf32>
      tpu.vector_store %arg16[%c0_51, %c0_52, %c0_53], %74 {strides = array<i32>} : memref<1x128x32xf32, #tpu.memory_space<vmem>>, vector<1x128x32xf32>,
      %cst_54 = arith.constant 0.000000e+00 : f32
      %75 = vector.broadcast %cst_54 : f32 to vector<128x32xf32>
      %76 = arith.maximumf %69, %75 : vector<128x32xf32>
      %c0_55 = arith.constant 0 : index
      %c0_56 = arith.constant 0 : index
      %c0_57 = arith.constant 0 : index
      %77 = vector.load %arg17[%c0_55, %c0_56, %c0_57] : memref<1x128x32xf32, #tpu.memory_space<vmem>>, vector<1x128x32xf32>
      %78 = vector.shape_cast %77 : vector<1x128x32xf32> to vector<128x32xf32>
      %79 = vector.shape_cast %76 : vector<128x32xf32> to vector<1x128x32xf32>
      tpu.vector_store %arg17[%c0_55, %c0_56, %c0_57], %79 {strides = array<i32>} : memref<1x128x32xf32, #tpu.memory_space<vmem>>, vector<1x128x32xf32>,
    } else {
    }
    return
  }
  func.func @transform_0(%arg0: i32, %arg1: i32, %arg2: i32) -> (i32, i32, i32) {
    %c0_i32 = arith.constant 0 : i32
    %c0_i32_0 = arith.constant 0 : i32
    %c0_i32_1 = arith.constant 0 : i32
    return %arg0, %c0_i32, %c0_i32_0 : i32, i32, i32
  }
  func.func @transform_1(%arg0: i32, %arg1: i32, %arg2: i32) -> (i32, i32) {
    %c0_i32 = arith.constant 0 : i32
    %c0_i32_0 = arith.constant 0 : i32
    %c0_i32_1 = arith.constant 0 : i32
    return %c0_i32, %c0_i32_0 : i32, i32
  }
  func.func @transform_2(%arg0: i32, %arg1: i32, %arg2: i32) -> (i32, i32) {
    %c0_i32 = arith.constant 0 : i32
    %c0_i32_0 = arith.constant 0 : i32
    %c0_i32_1 = arith.constant 0 : i32
    return %c0_i32, %c0_i32_0 : i32, i32
  }
  func.func @transform_3(%arg0: i32, %arg1: i32, %arg2: i32) -> (i32, i32) {
    %c0_i32 = arith.constant 0 : i32
    %c0_i32_0 = arith.constant 0 : i32
    %c0_i32_1 = arith.constant 0 : i32
    return %c0_i32, %c0_i32_0 : i32, i32
  }
  func.func @transform_4(%arg0: i32, %arg1: i32, %arg2: i32) -> (i32, i32) {
    %c0_i32 = arith.constant 0 : i32
    %c0_i32_0 = arith.constant 0 : i32
    %c0_i32_1 = arith.constant 0 : i32
    return %c0_i32, %c0_i32_0 : i32, i32
  }
  func.func @transform_5(%arg0: i32, %arg1: i32, %arg2: i32) -> (i32, i32, i32) {
    %c0_i32 = arith.constant 0 : i32
    %c0_i32_0 = arith.constant 0 : i32
    %c0_i32_1 = arith.constant 0 : i32
    return %arg2, %c0_i32, %c0_i32_0 : i32, i32, i32
  }
  func.func @transform_6(%arg0: i32, %arg1: i32, %arg2: i32) -> (i32, i32) {
    %c0_i32 = arith.constant 0 : i32
    %c0_i32_0 = arith.constant 0 : i32
    return %c0_i32, %arg2 : i32, i32
  }
  func.func @transform_7(%arg0: i32, %arg1: i32, %arg2: i32) -> (i32, i32) {
    %c0_i32 = arith.constant 0 : i32
    %c0_i32_0 = arith.constant 0 : i32
    return %arg2, %c0_i32 : i32, i32
  }
  func.func @transform_8(%arg0: i32, %arg1: i32, %arg2: i32) -> (i32, i32) {
    %c0_i32 = arith.constant 0 : i32
    %c0_i32_0 = arith.constant 0 : i32
    %c0_i32_1 = arith.constant 0 : i32
    return %c0_i32, %c0_i32_0 : i32, i32
  }
  func.func @transform_9(%arg0: i32, %arg1: i32, %arg2: i32) -> (i32, i32) {
    %c0_i32 = arith.constant 0 : i32
    %c0_i32_0 = arith.constant 0 : i32
    %c0_i32_1 = arith.constant 0 : i32
    return %c0_i32, %c0_i32_0 : i32, i32
  }
  func.func @transform_10(%arg0: i32, %arg1: i32, %arg2: i32) -> (i32, i32) {
    %c0_i32 = arith.constant 0 : i32
    %c0_i32_0 = arith.constant 0 : i32
    %c0_i32_1 = arith.constant 0 : i32
    return %c0_i32, %c0_i32_0 : i32, i32
  }
  func.func @transform_11(%arg0: i32, %arg1: i32, %arg2: i32) -> (i32, i32) {
    %c0_i32 = arith.constant 0 : i32
    %c0_i32_0 = arith.constant 0 : i32
    %c0_i32_1 = arith.constant 0 : i32
    return %c0_i32, %c0_i32_0 : i32, i32
  }
  func.func @transform_12(%arg0: i32, %arg1: i32, %arg2: i32) -> (i32, i32) {
    %c0_i32 = arith.constant 0 : i32
    %c0_i32_0 = arith.constant 0 : i32
    %c0_i32_1 = arith.constant 0 : i32
    return %c0_i32, %c0_i32_0 : i32, i32
  }
  func.func @transform_13(%arg0: i32, %arg1: i32, %arg2: i32) -> (i32, i32, i32) {
    %c0_i32 = arith.constant 0 : i32
    %c0_i32_0 = arith.constant 0 : i32
    return %arg0, %arg1, %c0_i32 : i32, i32, i32
  }
  func.func @transform_14(%arg0: i32, %arg1: i32, %arg2: i32) -> (i32, i32, i32) {
    %c0_i32 = arith.constant 0 : i32
    %c0_i32_0 = arith.constant 0 : i32
    return %arg0, %arg1, %c0_i32 : i32, i32, i32
  }
  func.func @transform_15(%arg0: i32, %arg1: i32, %arg2: i32) -> (i32, i32, i32) {
    %c0_i32 = arith.constant 0 : i32
    return %arg0, %arg1, %arg2 : i32, i32, i32
  }
}

</mosaic_0001>

<bundles_post_ra>
// kernel: tpu_custom_call.1
= control target key start
LH: loop header
LB: loop body
LE: loop exit
PB: predicated region body
PF: predicated region fallthrough
CT: control target
= control target key end

     0   :  { %s5362_s0 = inlined_call_operand.vmem [shape: bf16[2,256,32], index: 0, kind: input, shape index: {}]   ;;  %s5363_s1 = inlined_call_operand.vmem [shape: bf16[32,32], index: 1, kind: input, shape index: {}]   ;;  %s5364_s2 = inlined_call_operand.hbm [shape: f32[1,32], index: 2, kind: input, shape index: {}]   ;;  %s5365_s3 = inlined_call_operand.vmem [shape: bf16[32,256], index: 3, kind: input, shape index: {}]   ;;  %s5366_s4 = inlined_call_operand.vmem [shape: f32[1,256], index: 4, kind: input, shape index: {}]   ;;  %s5367_s5 = inlined_call_operand.vmem [shape: bf16[2,256,128], index: 5, kind: input, shape index: {}]   ;;  %s5368_s6 = inlined_call_operand.vmem [shape: f32[1,256], index: 6, kind: input, shape index: {}]   ;;  %s5369_s7 = inlined_call_operand.hbm [shape: bf16[256,256], index: 7, kind: input, shape index: {}]   ;;  %s5370_s8 = inlined_call_operand.vmem [shape: f32[1,256], index: 8, kind: input, shape index: {}]   ;;  %s5371_s9 = inlined_call_operand.vmem [shape: bf16[32,32], index: 9, kind: input, shape index: {}]   ;;  %s5372_s10 = inlined_call_operand.vmem [shape: f32[1,32], index: 10, kind: input, shape index: {}]   ;;  %s5373_s11 = inlined_call_operand.vmem [shape: bf16[32,32], index: 11, kind: input, shape index: {}]   ;;  %s5374_s12 = inlined_call_operand.vmem [shape: f32[1,32], index: 12, kind: input, shape index: {}]   ;;  %s5375_s13 = inlined_call_operand.vmem [shape: f32[2,256,32], index: 13, kind: output, shape index: {0}]   ;;  %s5376_s14 = inlined_call_operand.vmem [shape: f32[2,256,32], index: 14, kind: output, shape index: {1}]   ;;  %s5377_s15 = inlined_call_operand.hbm [shape: bf16[2,256,256], index: 15, kind: output, shape index: {2}]  }
   0x1   :  { %5404 = sst [smem:[#allocation28_spill]] %s5362_s0 }
   0x2   :  { %5405 = sst [smem:[#allocation29_spill]] %s5363_s1 }
   0x3   :  { %5406 = sst [smem:[#allocation30_spill]] %s5364_s2 }
   0x4   :  { %5407 = sst [smem:[#allocation31_spill]] %s5365_s3 }
   0x5   :  { %5408 = sst [smem:[#allocation32_spill]] %s5366_s4 }
   0x6   :  { %5409 = sst [smem:[#allocation33_spill]] %s5368_s6 }
   0x7   :  { %5410 = sst [smem:[#allocation34_spill]] %s5369_s7 }
   0x8   :  { %5411 = sst [smem:[#allocation35_spill]] %s5370_s8 }
   0x9   :  { %5412 = sst [smem:[#allocation36_spill]] %s5371_s9 }
   0xa   :  { %5413 = sst [smem:[#allocation37_spill]] %s5372_s10 }
   0xb   :  { %5414 = sst [smem:[#allocation38_spill]] %s5373_s11 }
   0xc   :  { %5415 = sst [smem:[#allocation39_spill]] %s5374_s12 }
   0xd   :  { %5416 = sst [smem:[#allocation40_spill]] %s5375_s13 }
   0xe   :  { %5417 = sst [smem:[#allocation41_spill]] %s5376_s14 }
   0xf   :  { %5418 = sst [smem:[#allocation42_spill]] %s5377_s15 }
  0x10   :  { %21 = vsyncpa [#allocation6], 0 }
  0x11   :  { %22 = vsyncpa [#allocation9], 0 }
  0x12   :  { %24 = vsyncpa [#allocation9 + $0x1], 0 }
  0x13   :  { %25 = vsyncpa [#allocation7], 0 }
  0x14   :  { %27 = vsyncpa [#allocation7 + $0x1], 0  ;;  %s4620_s18 = smov 0   ;;  %s4622_s19 = smov 0  }
  0x15   :  { %s4624_s20 = smov 0   ;;  %s4626_s21 = smov 0  }
  0x16   :  { %s4628_s22 = smov 0   ;;  %s4630_s23 = smov 0  }
  0x17   :  { %s4632_s24 = smov 0   ;;  %s4634_s25 = smov 0  }
  0x18   :  { %s4636_s26 = smov 0   ;;  %s4638_s27 = smov 0  }
  0x19   :  { %s4640_s28 = smov 0   ;;  %s4642_s29 = smov 0  }
  0x1a   :  { %s4644_s30 = smov 0  }
  0x1b LB: > { %5419 = sst [smem:[#allocation14_spill]] %s4479_s18  ;;  %s3350_s16 = sadd.s32 4294967295, %s4527_s30   ;;  %s4527_s30 = sphi %s4644_s30, %s33_s30   ;;  %s4523_s29 = sphi %s4642_s29, %s5481_s29   ;;  %s4519_s28 = sphi %s4640_s28, %s5480_s28   ;;  %s4515_s27 = sphi %s4638_s27, %s5479_s27   ;;  %s4511_s26 = sphi %s4636_s26, %s5478_s26   ;;  %s4507_s25 = sphi %s4634_s25, %s5477_s25   ;;  %s4503_s24 = sphi %s4632_s24, %s5476_s24   ;;  %s4499_s23 = sphi %s4630_s23, %s5475_s23   ;;  %s4495_s22 = sphi %s4628_s22, %s5474_s22   ;;  %s4491_s21 = sphi %s4626_s21, %s5473_s21   ;;  %s4487_s20 = sphi %s4624_s20, %s5485_s20   ;;  %s4483_s19 = sphi %s4622_s19, %s5484_s19   ;;  %s4479_s18 = sphi %s4620_s18, %s5483_s18  }
  0x1c   : > { %5420 = sst [smem:[#allocation15_spill]] %s4495_s22  ;;  %p228_p0 = scmp.ne.s32.totalorder %s4499_s23, %s4495_s22 }
  0x1d   : > { %5421 = sst [smem:[#allocation16_spill]] %s4499_s23  ;;  %p229_p1 = scmp.eq.s32.totalorder %s4527_s30, 0 }
  0x1e   : > { %5422 = sst [smem:[#allocation17_spill]] %s4515_s27  ;;  %p234_p2 = scmp.ne.s32.totalorder %s4495_s22, %s4491_s21 }
  0x1f   : > { %5423 = sst [smem:[#allocation18_spill]] %s4519_s28  ;;  %s3351_s17 = sadd.s32 4294967294, %s4527_s30  }
  0x20   : > { %5424 = sst [smem:[#allocation19_spill]] %s4523_s29  ;;  %p4689_p3 = scmp.eq.s32.totalorder %s3350_s16, 0 }
  0x21   : > { %5425 = sst [smem:[#allocation20_spill]] %s4527_s30  ;;  %p4693_p4 = por %p229_p1, %p228_p0 }
  0x22   : > { %s5426_s15 = scalar_select %p4689_p3, 1, 0 }
  0x23   : > { %p422_p5 = scmp.ne.s32.totalorder %s4487_s20, %s4483_s19  ;;  %p4701_p6 = por %p4689_p3, %p234_p2 }
  0x24   : > { %p423_p7 = scmp.eq.s32.totalorder %s3350_s16, 7  ;;  %p428_p8 = scmp.ne.s32.totalorder %s4483_s19, %s4479_s18 }
  0x25   : > { %s5428_s10 = scalar_select %p4701_p6, 1, 0 }
  0x26   : > { %p429_p9 = scmp.eq.s32.totalorder %s3351_s17, 7  ;;  %p4707_p10 = por %p423_p7, %p422_p5 }
  0x27   : > { %p3352_p11 = scmp.ge.s32.totalorder %s4527_s30, 1  ;;  %p436_p13 = scmp.lt.s32.totalorder %s4527_s30, 9 }
  0x28   : > { %s5429_s21 = scalar_select %p4707_p10, 1, 0 }
  0x29   : > { %p4712_p12 = por %p429_p9, %p428_p8  ;;  %p4717_p0 = pnand %p3352_p11, %p436_p13 }
  0x2a   : > { %5430 = sst [smem:[#allocation21_spill]] %s5429_s21  ;;  %s4529_s8 = smov [#allocation5]  }
  0x2b   : > { %s5431_s11 = scalar_select %p4712_p12, 1, 0 }
  0x2c   : > { %s5433_s9 = scalar_select %p4717_p0, 1, 0 }
  0x2d   : > { %5432 = sst [smem:[#allocation22_spill]] %s5431_s11  ;;  %s460_s4 = sshll.u32 %s4529_s8, 4  ;;  %s461_s4 = int_to_ptr.vmem [resolvable:$true] %s460_s4 }
  0x2e   : > { %p3922_p1 = pneg %p4717_p0  ;;  %p3935_p2 = scmp.lt.s32.totalorder %s4527_s30, 8 }
  0x2f   : > { %s5436_s2 = sld [smem:[#allocation30_spill]] }
  0x30   : > { %p4726_p5 = pnand %p3922_p1, %p4689_p3  ;;  %p4732_p7 = pnand %p3935_p2, %p4693_p4 }
  0x32   : > { %s5435_s17 = scalar_select %p4732_p7, 1, 0 }
  0x33   : > { %p4329_p9 = pneg %p4726_p5 }
  0x35   : > { %s4327_s21 = scalar_lea.hbm %s5436_s2, 16 }
  0x36   : > { %p4328_p8 = scmp.ne.s32.totalorder %s5436_s2, %s4327_s21  ;;  %p4334_p1 = scmp.lt.u32.totalorder %s4327_s21, %s5436_s2 }
  0x38   : > { %p4330_p11 = pnand %p4329_p9, %p4328_p8 }
  0x3a   : > { %p4331_p13 = pneg %p4330_p11 }
  0x3c   : > { %p4336_p4 = pnand %p4334_p1, %p4331_p13 }
  0x3e   : > { %4339 = shalt.err (!%p4336_p4)
}
  0x3f   : > { %s4340_s12 = scalar_lea.vmem %s461_s4, 16  ;;  %s4347_s11 = scalar_lea.vmem %s461_s4, 32 }
  0x40   : > { %p4341_p2 = scmp.ne.s32.totalorder %s461_s4, %s4340_s12  ;;  %p4348_p6 = scmp.lt.s32.totalorder %s461_s4, %s461_s4 }
  0x41   : > { %p4349_p3 = scmp.lt.s32.totalorder %s4347_s11, %s4340_s12 }
  0x42   : > { %p4343_p12 = pnand %p4341_p2, %p4329_p9 }
  0x43   : > { %p4350_p0 = por %p4349_p3, %p4348_p6 }
  0x44   : > { %p4344_p10 = pneg %p4343_p12 }
  0x46   : > { %p4351_p7 = pnand %p4350_p0, %p4344_p10 }
  0x48   : > { %4354 = shalt.err (!%p4351_p7)
}
  0x49   : > { %3925 = dma.hbm_to_vmem [thread:$0]  (!%p4726_p5), %s5436_s2, 16, %s461_s4, [#allocation6]  }
  0x4a   : > { %s221_s1 = sadd.s32 1, %s4499_s23  ;;  %s45_s30 = sadd.s32 1, %s4515_s27 }
  0x4b   : > { %p46_p3 = scmp.ge.s32.totalorder %s45_s30, 2  ;;  %s48_s21 = sadd.s32 1, %s4519_s28 }
  0x4c   : > { %s52_s16 = sadd.s32 1, %s4523_s29  ;;  %s506_s8 = sand.u32 1, %s4499_s23  }
  0x4d   : > { %s5487_s30 = smov (%p46_p3, %s45_s30), 0  ;;  %s5489_s21 = smov (!%p46_p3, %s48_s21), %s4519_s28 }
  0x4e   : > { %5437 = sst [smem:[#allocation23_spill]] %s5487_s30  ;;  %s218_s12 = ssub.s32 %s4515_s27, %s5487_s30 }
  0x4f   : > { %s3561_s11 = sshll.u32 %s4515_s27, 11  ;;  %p50_p6 = scmp.ge.s32.totalorder %s5489_s21, 2 }
  0x50   : > { %p219_p10 = scmp.eq.s32.totalorder %s218_s12, 0  ;;  %s3355_s3 = sshll.u32 %s506_s8, 7 }
  0x51   : > { %s5491_s21 = smov (%p50_p6, %s5489_s21), 0  ;;  %s5493_s16 = smov (!%p50_p6, %s52_s16), %s4523_s29 }
  0x52   : > { %5438 = sst [smem:[#allocation24_spill]] %s5491_s21  ;;  %p54_p12 = scmp.ge.s32.totalorder %s5493_s16, 2 }
  0x53   : > { %s4767_s4 = scalar_select %p219_p10, %s4499_s23, %s221_s1  }
  0x54   : > { %s5440_s7 = sld [smem:[#allocation34_spill]]  ;;  %s406_s30 = ssub.s32 %s4519_s28, %s5491_s21 }
  0x55   : > { %5439 = sst [smem:[#allocation25_spill]] %s4767_s4  ;;  %s5495_s16 = smov (%p54_p12, %s5493_s16), 0 }
  0x56   : > { %5441 = sst [smem:[#allocation26_spill]] %s5495_s16  ;;  %s510_s27 = scalar_lea.vmem [#allocation8], %s3355_s3 }
  0x57   : > { %s518_s13 = sshll.u32 %s510_s27, 4  ;;  %s405_s6 = ssub.s32 %s4523_s29, %s5495_s16  ;;  %s4780_s13 = int_to_ptr.vmem [resolvable:$true] %s518_s13 }
  0x58   : > { %s407_s1 = sor.u32 %s406_s30, %s405_s6  ;;  %s412_s4 = sadd.s32 1, %s4487_s20 }
  0x59   : > { %s409_s23 = sor.u32 %s407_s1, %s218_s12  ;;  %p5443_p7 = scmp.ne.s32.totalorder %s5435_s17, 0 }
  0x5a   : > { %s4772_s14 = scalar_lea.hbm %s5440_s7, %s3561_s11  ;;  %p4783_p0 = scmp.eq.s32.totalorder %s409_s23, 0 }
  0x5b   : > { %s4787_s11 = scalar_lea.sflag [#allocation9], %s506_s8  ;;  %s4355_s18 = scalar_lea.hbm %s4772_s14, 2048 }
  0x5c   : > { %p4356_p5 = scmp.ne.s32.totalorder %s4772_s14, %s4355_s18  ;;  %p4357_p8 = pneg %p5443_p7 }
  0x5d   : > { %s4360_s30 = scalar_lea.hbm %s5440_s7, 4096  ;;  %p4361_p13 = scmp.lt.u32.totalorder %s4772_s14, %s5440_s7 }
  0x5e   : > { %p4358_p9 = pnand %p4357_p8, %p4356_p5  ;;  %p4362_p1 = scmp.lt.u32.totalorder %s4360_s30, %s4355_s18 }
  0x5f   : > { %p4364_p2 = scmp.lt.u32.totalorder %s4355_s18, %s4772_s14 }
  0x60   : > { %p4359_p11 = pneg %p4358_p9  ;;  %p4363_p4 = por %p4362_p1, %p4361_p13 }
  0x62   : > { %p4365_p3 = por %p4364_p2, %p4363_p4 }
  0x64   : > { %p4366_p6 = pnand %p4365_p3, %p4359_p11 }
  0x66   : > { %4369 = shalt.err (!%p4366_p6)
}
  0x67   : > { %s4370_s23 = scalar_lea.vmem %s4780_s13, 2048  ;;  %s4530_s8 = smov [#allocation8]  }
  0x68   : > { %p4371_p10 = scmp.ne.s32.totalorder %s4780_s13, %s4370_s23  ;;  %s4375_s1 = sshll.u32 %s4530_s8, 4  ;;  %s4376_s1 = int_to_ptr.vmem [resolvable:$false] %s4375_s1 }
  0x69   : > { %s4377_s27 = scalar_lea.vmem %s4376_s1, 4096  ;;  %p4378_p9 = scmp.lt.s32.totalorder %s4780_s13, %s4376_s1 }
  0x6a   : > { %p4373_p12 = pnand %p4371_p10, %p4357_p8  ;;  %p4379_p13 = scmp.lt.s32.totalorder %s4377_s27, %s4370_s23 }
  0x6c   : > { %p4374_p5 = pneg %p4373_p12  ;;  %p4380_p1 = por %p4379_p13, %p4378_p9 }
  0x6e   : > { %p4381_p4 = pnand %p4380_p1, %p4374_p5 }
  0x70   : > { %4384 = shalt.err (!%p4381_p4)
}
  0x71   : > { %s4531_s18 = smov 128   ;;  %s4532_s6 = smov 8  }
  0x72   : > { %3929 = dma.hbm_to_vmem [thread:$0]  (!%p5443_p7), %s4772_s14, 2048, %s4780_s13, %s4787_s11, %s4531_s18, %s4531_s18, %s4532_s6  }
  0x73   : > { %s4820_s30 = scalar_select %p4783_p0, %s4487_s20, %s412_s4  }
  0x74   : > { %p5445_p8 = scmp.ne.s32.totalorder %s5433_s9, 0 }
  0x75   : > { %5444 = sst [smem:[#allocation27_spill]] %s4820_s30  ;;  %p5446_p11 = scmp.ne.s32.totalorder (!%p5445_p8), %s5426_s15, 0 }
  0x76   : > { %530 = sbr.rel (%p5445_p8) target bundleno = 1757 (0x6dd), region = 72 }
  0x7d   : > { %4466 = dma.done.wait (%p5446_p11), [#allocation6], 16  }
  0x7e   : > { %4468 = vsyncadd (%p5446_p11), [#allocation6], 4294967280  ;;  %s536_s3 = sand.u32 1, %s4495_s22   ;;  %p5447_p7 = scmp.ne.s32.totalorder %s5428_s10, 0 }
  0x7f   : > { %s3361_s12 = sshll.u32 %s536_s3, 7  ;;  %s537_s23 = scalar_lea.sflag [#allocation9], %s536_s3 }
  0x80   : > { %s4829_s17 = scalar_lea.vmem [#allocation8], %s3361_s12 }
  0x81   : > { %4470 = dma.done.wait (%p5447_p7), %s537_s23, 2048  }
  0x82   : > { %4472 = vsyncadd (%p5447_p7), %s537_s23, 4294965248  ;;  %s5398_s9 = sand.u32 1, %s4483_s19   ;;  %p618_p0 = scmp.lt.s32.totalorder %s4511_s26, 1 }
  0x83   : > { %s3362_s13 = sshll.u32 %s5398_s9, 6  ;;  %p623_p2 = scmp.lt.s32.totalorder %s4503_s24, 1 }
  0x84   : > { %s3367_s14 = sshll.u32 %s4507_s25, 4  ;;  %s5448_s0 = sld [smem:[#allocation28_spill]] }
  0x85   : > { %s619_s15 = scalar_select %p618_p0, %s4511_s26, 1 }
  0x86   : > { %s4843_s4 = scalar_select %p623_p2, %s4503_s24, 1 }
  0x87   : > { %s3562_s10 = sshll.u32 %s619_s15, 7  ;;  %p635_p3 = scmp.lt.s32.totalorder %s3367_s14, 31 }
  0x88   : > { %s3563_s1 = sshll.u32 %s4843_s4, 7  ;;  %s5449_s23 = sld [smem:[#allocation33_spill]] }
  0x89   : > { %s4854_s6 = scalar_lea.vmem %s5367_s5, %s3563_s1  ;;  %s5497_s14 = smov (!%p635_p3, %s3367_s14), 31 }
  0x8a   : > { %s4848_s8 = scalar_lea.vmem %s5448_s0, %s3562_s10  ;;  %s3368_s7 = sshll.u32 %s619_s15, 5 }
  0x8b   : > { %s638_s16 = sadd.s32 %s3368_s7, %s5497_s14  ;;  %s5450_s22 = sld [smem:[#allocation40_spill]] }
  0x8c   : > { %s3369_s21 = sshll.u32 %s638_s16, 3  ;;  %s5451_s0 = sld [smem:[#allocation41_spill]] }
  0x8d   : > { %s4870_s1 = scalar_lea.vmem [#allocation10], %s3362_s13  ;;  %p3373_p6 = scmp.ne.s32.totalorder %s4503_s24, 0 }
  0x8e   : > { %s630_s9 = scalar_lea.vmem %s5449_s23, %s4843_s4  ;;  %s5452_s15 = sld [smem:[#allocation29_spill]] (!%p3373_p6)  ;;  %vm742_vm0 = vcmask (!%p3373_p6), 261120   ;;  %v4533_v2 = vmov (!%p3373_p6), 0.0   ;;  %v4534_v15 = vmov (!%p3373_p6), 0   ;;  %v3376_v16 = vld [vmem:[#allocation5] ss:$0 sm:$0xff] (!%p3373_p6) }
  0x8f   : > { %657 = sbr.rel (%p3373_p6) target bundleno = 648 (0x288), region = 84  ;;  %s3374_s7 = sshll.u32 (!%p3373_p6), %s4507_s25, 7  ;;  %1125 = vst [vmem:[#allocation3] sm:$0xff] (!%p3373_p6), %v4533_v2  ;;  %1126 = vst [vmem:[#allocation3 + $0x8] sm:$0xff] (!%p3373_p6), %v4533_v2  ;;  %1000 = vmatprep.mubr.bf16.mxu1 (!%p3373_p6), %v4534_v15 }
  0x90   : > { %s659_s29 = sshra.s32 (!%p3373_p6), %s3374_s7, 3  ;;  %1127 = vst [vmem:[#allocation3 + $0x10] sm:$0xff] (!%p3373_p6), %v4533_v2  ;;  %1128 = vst [vmem:[#allocation3 + $0x18] sm:$0xff] (!%p3373_p6), %v4533_v2  ;;  %s5453_s14 = sld [smem:[#allocation31_spill]] (!%p3373_p6) }
  0x91   : > { %s4863_s2 = scalar_lea.vmem %s5450_s22, %s3369_s21  ;;  %1129 = vst [vmem:[#allocation3 + $0x20] sm:$0xff] (!%p3373_p6), %v4533_v2  ;;  %1130 = vst [vmem:[#allocation3 + $0x28] sm:$0xff] (!%p3373_p6), %v4533_v2  ;;  %s5454_s28 = sld [smem:[#allocation32_spill]] (!%p3373_p6) }
  0x92   : > { %s4868_s30 = scalar_lea.vmem %s5451_s0, %s3369_s21  ;;  %s3375_s0 = sshll.u32 (!%p3373_p6), %s659_s29, 2  ;;  %1131 = vst [vmem:[#allocation3 + $0x30] sm:$0xff] (!%p3373_p6), %v4533_v2  ;;  %1132 = vst [vmem:[#allocation3 + $0x38] sm:$0xff] (!%p3373_p6), %v4533_v2 }
  0x93   : > { %s4881_s21 = scalar_lea.vmem (!%p3373_p6), %s4848_s8, %s3375_s0  ;;  %1133 = vst [vmem:[#allocation3 + $0x40] sm:$0xff] (!%p3373_p6), %v4533_v2  ;;  %1134 = vst [vmem:[#allocation3 + $0x48] sm:$0xff] (!%p3373_p6), %v4533_v2 }
  0x94   : > { %v4051_v0 = vld [vmem:[%s5452_s15] sm:$0xff] (!%p3373_p6)   ;;  %v4052_v1 = vld [vmem:[%s5452_s15 + $0x8] sm:$0xff] (!%p3373_p6)   ;;  %1135 = vst [vmem:[#allocation3 + $0x50] sm:$0xff] (!%p3373_p6), %v4533_v2  ;;  %1136 = vst [vmem:[#allocation3 + $0x58] sm:$0xff] (!%p3373_p6), %v4533_v2 }
  0x95   : > { %3802 = vmatprep.subr.bf16.mxu0 (!%p3373_p6), %v4051_v0  ;;  %1137 = vst [vmem:[#allocation3 + $0x60] sm:$0xff] (!%p3373_p6), %v4533_v2  ;;  %1138 = vst [vmem:[#allocation3 + $0x68] sm:$0xff] (!%p3373_p6), %v4533_v2  ;;  %v4053_v3 = vld [vmem:[%s4881_s21] sm:$0xff] (!%p3373_p6)   ;;  %v4054_v4 = vld [vmem:[%s4881_s21 + $0x8] sm:$0xff] (!%p3373_p6)  }
  0x96   : > { %3803 = vmatpush3.bf16.msra.mxu0 %v4051_v0  ;;  %1139 = vst [vmem:[#allocation3 + $0x70] sm:$0xff] %v4533_v2  ;;  %1140 = vst [vmem:[#allocation3 + $0x78] sm:$0xff] %v4533_v2  ;;  %3806 = vmatprep.mubr.msk.bf16.mxu0 %vm742_vm0, %v4053_v3  ;;  %v4055_v5 = vld [vmem:[%s4881_s21 + $0x10] sm:$0xff]   ;;  %v4056_v6 = vld [vmem:[%s4881_s21 + $0x18] sm:$0xff]  }
  0x97   : > { %1141 = vst [vmem:[#allocation3 + $0x80] sm:$0xff] %v4533_v2  ;;  %1142 = vst [vmem:[#allocation3 + $0x88] sm:$0xff] %v4533_v2  ;;  %3804 = vmatprep.subr.bf16.mxu0 %v4052_v1  ;;  %v4057_v7 = vld [vmem:[%s4881_s21 + $0x20] sm:$0xff]   ;;  %v4058_v8 = vld [vmem:[%s4881_s21 + $0x28] sm:$0xff]  }
  0x98   : > { %1143 = vst [vmem:[#allocation3 + $0x90] sm:$0xff] %v4533_v2  ;;  %1144 = vst [vmem:[#allocation3 + $0x98] sm:$0xff] %v4533_v2  ;;  %v4059_v9 = vld [vmem:[%s4881_s21 + $0x30] sm:$0xff]   ;;  %v4060_v10 = vld [vmem:[%s4881_s21 + $0x38] sm:$0xff]  }
  0x99   : > { %1145 = vst [vmem:[#allocation3 + $0xa0] sm:$0xff] %v4533_v2  ;;  %1146 = vst [vmem:[#allocation3 + $0xa8] sm:$0xff] %v4533_v2  ;;  %v4063_v11 = vld [vmem:[%s5453_s14 + $0x4] ss:$8 sps:$4 sm:$0xff]   ;;  %v4061_v12 = vld [vmem:[%s5453_s14] ss:$8 sps:$4 sm:$0xff]  }
  0x9a   : > { %1147 = vst [vmem:[#allocation3 + $0xb0] sm:$0xff] %v4533_v2  ;;  %1148 = vst [vmem:[#allocation3 + $0xb8] sm:$0xff] %v4533_v2  ;;  %3805 = vmatpush3.bf16.msra.mxu0 %v4052_v1  ;;  %3894 = vmatprep.subr.bf16.mxu1 %v4063_v11  ;;  %v4066_v13 = vld [vmem:[%s5453_s14 + $0x14] ss:$8 sps:$4 sm:$0xff]   ;;  %v4064_v14 = vld [vmem:[%s5453_s14 + $0x10] ss:$8 sps:$4 sm:$0xff]  }
  0x9b   : > { %1149 = vst [vmem:[#allocation3 + $0xc0] sm:$0xff] %v4533_v2  ;;  %1150 = vst [vmem:[#allocation3 + $0xc8] sm:$0xff] %v4533_v2  ;;  %948 = vmatprep.subr.bf16.mxu0 %v4063_v11  ;;  %3896 = vmatpush1.bf16.msra.mxu1 %v4061_v12 }
  0x9c   : > { %1151 = vst [vmem:[#allocation3 + $0xd0] sm:$0xff] %v4533_v2  ;;  %1152 = vst [vmem:[#allocation3 + $0xd8] sm:$0xff] %v4533_v2  ;;  %3895 = vmatprep.subr.bf16.mxu1 %v4066_v13 }
  0x9d   : > { %1153 = vst [vmem:[#allocation3 + $0xe0] sm:$0xff] %v4533_v2  ;;  %1154 = vst [vmem:[#allocation3 + $0xe8] sm:$0xff] %v4533_v2  ;;  %3807 = vmatmul.mubr.msk.bf16.vlgmr.msra.gmra.mrb[0].mxu0 %vm742_vm0, %v4054_v4 }
  0x9e   : > { %1155 = vst [vmem:[#allocation3 + $0xf0] sm:$0xff] %v4533_v2  ;;  %1156 = vst [vmem:[#allocation3 + $0xf8] sm:$0xff] %v4533_v2  ;;  %3810 = vmatprep.mubr.msk.bf16.mxu0 %vm742_vm0, %v4055_v5  ;;  %949 = vmatpush1.bf16.msra.mxu0 %v4061_v12  ;;  %v892_v12 = vld [vmem:[%s5454_s28] sm:$0x3] }
  0x9f   : > { %1157 = vst.msk [vmem:[#allocation4] sm:$0xff] %vm742_vm0, %v4533_v2  ;;  %1158 = vst.msk [vmem:[#allocation4 + $0x8] sm:$0xff] %vm742_vm0, %v4533_v2  ;;  %950 = vmatprep.subr.bf16.mxu0 %v4066_v13  ;;  %3897 = vmatpush1.bf16.msra.mxu1 %v4064_v14 }
  0xa0   : > { %1159 = vst.msk [vmem:[#allocation4 + $0x10] sm:$0xff] %vm742_vm0, %v4533_v2  ;;  %1160 = vst.msk [vmem:[#allocation4 + $0x18] sm:$0xff] %vm742_vm0, %v4533_v2 }
  0xa1   : > { %1161 = vst.msk [vmem:[#allocation4 + $0x20] sm:$0xff] %vm742_vm0, %v4533_v2  ;;  %1162 = vst.msk [vmem:[#allocation4 + $0x28] sm:$0xff] %vm742_vm0, %v4533_v2 }
  0xa2   : > { %1163 = vst.msk [vmem:[#allocation4 + $0x30] sm:$0xff] %vm742_vm0, %v4533_v2  ;;  %1164 = vst.msk [vmem:[#allocation4 + $0x38] sm:$0xff] %vm742_vm0, %v4533_v2  ;;  %951 = vmatpush1.bf16.msra.mxu0 %v4064_v14 }
  0xa3   : > { %1165 = vst.msk [vmem:[#allocation4 + $0x40] sm:$0xff] %vm742_vm0, %v4533_v2  ;;  %1166 = vst.msk [vmem:[#allocation4 + $0x48] sm:$0xff] %vm742_vm0, %v4533_v2 }
  0xa4   : > { %1167 = vst.msk [vmem:[#allocation4 + $0x50] sm:$0xff] %vm742_vm0, %v4533_v2  ;;  %1168 = vst.msk [vmem:[#allocation4 + $0x58] sm:$0xff] %vm742_vm0, %v4533_v2 }
  0xa5   : > { %1169 = vst.msk [vmem:[#allocation4 + $0x60] sm:$0xff] %vm742_vm0, %v4533_v2  ;;  %1170 = vst.msk [vmem:[#allocation4 + $0x68] sm:$0xff] %vm742_vm0, %v4533_v2  ;;  %3811 = vmatmul.mubr.msk.bf16.gmra.mrb[4].mxu0 %vm742_vm0, %v4056_v6 }
  0xa6   : > { %1171 = vst.msk [vmem:[#allocation4 + $0x70] sm:$0xff] %vm742_vm0, %v4533_v2  ;;  %1172 = vst.msk [vmem:[#allocation4 + $0x78] sm:$0xff] %vm742_vm0, %v4533_v2  ;;  %3814 = vmatprep.mubr.msk.bf16.mxu0 %vm742_vm0, %v4057_v7 }
  0xad   : > { %3815 = vmatmul.mubr.msk.bf16.gmra.mrb[8].mxu0 %vm742_vm0, %v4058_v8 }
  0xae   : > { %3818 = vmatprep.mubr.msk.bf16.mxu0 %vm742_vm0, %v4059_v9  ;;  %v894_v9 = vlaneseq }
  0xb5   : > { %3819 = vmatmul.mubr.msk.bf16.gmra.mrb[12].mxu0 %vm742_vm0, %v4060_v10  ;;  %v895_v10 = vshrl.u32 %v894_v9, 7 }
  0xb6   : > { %980 = vmatprep.mubr.bf16.mxu0 %v4534_v15 }
  0xb7   : > { %v896_v11 = vsub.s32 0, %v895_v10  ;;  %v900_v13 = vsub.s32 1, %v895_v10 }
  0xb9   : > { %v4946_v14 = vrot.slane %v892_v12, %v896_v11 }
 0x170   : > { %v3808_v17 = vpop.f32.mrb[0].mxu0 }
 0x171   : > { %v810_v18 = vadd.f32 %v3808_v17, %v3376_v16  ;;  %v801_v19 = vpop.f32.mrb[1].mxu0 }
 0x172   : > { %v802_v20 = vadd.f32 %v3376_v16, %v801_v19  ;;  %v3809_v21 = vpop.f32.mrb[2].mxu0 }
 0x173   : > { %v813_v22 = vadd.f32 %v3809_v21, %v3376_v16  ;;  %v804_v23 = vpop.f32.mrb[3].mxu0  ;;  %v866_v25 = vmax.f32 %v810_v18, 0.0 }
 0x174   : > { %v805_v24 = vadd.f32 %v3376_v16, %v804_v23  ;;  %v864_v27 = vmax.f32 %v802_v20, 0.0 }
 0x175   : > { %v867_v26 = vmax.f32 %v813_v22, 0.0 }
 0x176   : > { %v865_v28 = vmax.f32 %v805_v24, 0.0 }
 0x177   : > { %v881_v29 = vpack.c.bf16 %v867_v26, %v866_v25 }
 0x178   : > { %v880_v30 = vpack.c.bf16 %v865_v28, %v864_v27  ;;  %v3812_v31 = vpop.f32.mrb[4].mxu0 }
 0x179   : > { %v826_v32 = vadd.f32 %v3812_v31, %v3376_v16  ;;  %v817_v33 = vpop.f32.mrb[5].mxu0 }
 0x17a   : > { %v818_v34 = vadd.f32 %v3376_v16, %v817_v33  ;;  %v3813_v35 = vpop.f32.mrb[6].mxu0  ;;  %3399 = vmatmul.mubr.msk.bf16.vlgmr.msra.gmra.mrb[16].mxu0 %vm742_vm0, %v880_v30 }
 0x17b   : > { %v829_v36 = vadd.f32 %v3813_v35, %v3376_v16  ;;  %v820_v37 = vpop.f32.mrb[7].mxu0  ;;  %990 = vmatprep.mubr.bf16.mxu0 %v4534_v15  ;;  %v870_v39 = vmax.f32 %v826_v32, 0.0 }
 0x17c   : > { %v821_v38 = vadd.f32 %v3376_v16, %v820_v37  ;;  %v868_v41 = vmax.f32 %v818_v34, 0.0 }
 0x17d   : > { %v871_v40 = vmax.f32 %v829_v36, 0.0 }
 0x17e   : > { %v869_v42 = vmax.f32 %v821_v38, 0.0 }
 0x17f   : > { %v883_v43 = vpack.c.bf16 %v871_v40, %v870_v39 }
 0x180   : > { %v882_v44 = vpack.c.bf16 %v869_v42, %v868_v41  ;;  %v3816_v45 = vpop.f32.mrb[8].mxu0 }
 0x181   : > { %v842_v46 = vadd.f32 %v3816_v45, %v3376_v16  ;;  %v833_v47 = vpop.f32.mrb[9].mxu0 }
 0x182   : > { %3400 = vmatmul.mubr.msk.bf16.gmra.mrb[20].mxu0 %vm742_vm0, %v881_v29  ;;  %3401 = vmatmul.mubr.msk.bf16.vlgmr.msra.gmra.mrb[0].mxu1 %vm742_vm0, %v882_v44  ;;  %v834_v48 = vadd.f32 %v3376_v16, %v833_v47  ;;  %v3817_v49 = vpop.f32.mrb[10].mxu0 }
 0x183   : > { %v874_v50 = vmax.f32 %v842_v46, 0.0  ;;  %v845_v51 = vadd.f32 %v3817_v49, %v3376_v16  ;;  %v836_v52 = vpop.f32.mrb[11].mxu0  ;;  %1010 = vmatprep.mubr.bf16.mxu1 %v4534_v15 }
 0x184   : > { %v872_v53 = vmax.f32 %v834_v48, 0.0  ;;  %v837_v54 = vadd.f32 %v3376_v16, %v836_v52 }
 0x185   : > { %v875_v55 = vmax.f32 %v845_v51, 0.0 }
 0x186   : > { %v873_v56 = vmax.f32 %v837_v54, 0.0 }
 0x187   : > { %v885_v57 = vpack.c.bf16 %v875_v55, %v874_v50 }
 0x188   : > { %v884_v58 = vpack.c.bf16 %v873_v56, %v872_v53  ;;  %v3820_v59 = vpop.f32.mrb[12].mxu0 }
 0x189   : > { %v858_v60 = vadd.f32 %v3820_v59, %v3376_v16  ;;  %v849_v61 = vpop.f32.mrb[13].mxu0 }
 0x18a   : > { %3402 = vmatmul.mubr.msk.bf16.gmra.mrb[4].mxu1 %vm742_vm0, %v883_v43  ;;  %v850_v62 = vadd.f32 %v3376_v16, %v849_v61  ;;  %v3821_v63 = vpop.f32.mrb[14].mxu0 }
 0x18b   : > { %1020 = vmatprep.mubr.bf16.mxu1 %v4534_v15  ;;  %v878_v0 = vmax.f32 %v858_v60, 0.0  ;;  %v861_v1 = vadd.f32 %v3821_v63, %v3376_v16  ;;  %v852_v2 = vpop.f32.mrb[15].mxu0 }
 0x18c   : > { %v876_v3 = vmax.f32 %v850_v62, 0.0  ;;  %v853_v4 = vadd.f32 %v3376_v16, %v852_v2  ;;  %v4948_v16 = vrot.slane %v892_v12, %v900_v13 }
 0x18d   : > { %v879_v5 = vmax.f32 %v861_v1, 0.0 }
 0x18e   : > { %v877_v6 = vmax.f32 %v853_v4, 0.0 }
 0x18f   : > { %v887_v7 = vpack.c.bf16 %v879_v5, %v878_v0 }
 0x190   : > { %v886_v8 = vpack.c.bf16 %v877_v6, %v876_v3 }
 0x192   : > { %3403 = vmatmul.mubr.msk.bf16.gmra.mrb[8].mxu1 %vm742_vm0, %v884_v58 }
 0x193   : > { %1030 = vmatprep.mubr.bf16.mxu1 %v4534_v15 }
 0x19a   : > { %3404 = vmatmul.mubr.msk.bf16.gmra.mrb[12].mxu1 %vm742_vm0, %v885_v57 }
 0x19b   : > { %1040 = vmatprep.mubr.bf16.mxu1 %v4534_v15 }
 0x1a2   : > { %3405 = vmatmul.mubr.msk.bf16.gmra.mrb[16].mxu1 %vm742_vm0, %v886_v8 }
 0x1a3   : > { %1050 = vmatprep.mubr.bf16.mxu1 %v4534_v15 }
 0x1aa   : > { %3406 = vmatmul.mubr.msk.bf16.gmra.mrb[20].mxu1 %vm742_vm0, %v887_v7 }
 0x24d   : > { %v982_v17 = vpop.f32.mrb[16].mxu0 }
 0x24e   : > { %v983_v18 = vadd.f32 %v982_v17, %v4946_v14  ;;  %v984_v19 = vpop.f32.mrb[17].mxu0 }
 0x24f   : > { %v985_v15 = vadd.f32 %v984_v19, %v4948_v16  ;;  %v986_v20 = vpop.f32.mrb[18].mxu0 }
 0x250   : > { %v987_v21 = vadd.f32 %v986_v20, %v4946_v14  ;;  %v988_v22 = vpop.f32.mrb[19].mxu0  ;;  %v1061_v24 = vmax.f32 %v983_v18, 0.0 }
 0x251   : > { %v989_v23 = vadd.f32 %v988_v22, %v4948_v16  ;;  %v1062_v26 = vmax.f32 %v985_v15, 0.0 }
 0x252   : > { %v1063_v25 = vmax.f32 %v987_v21, 0.0 }
 0x253   : > { %v1064_v27 = vmax.f32 %v989_v23, 0.0 }
 0x254   : > { %v1093_v28 = vpack.c.bf16 %v1063_v25, %v1061_v24 }
 0x255   : > { %v1094_v29 = vpack.c.bf16 %v1064_v27, %v1062_v26  ;;  %v992_v30 = vpop.f32.mrb[20].mxu0  ;;  %v1002_v31 = vpop.f32.mrb[0].mxu1 }
 0x256   : > { %1109 = vst [vmem:[#allocation2] sm:$0xff] %v1093_v28  ;;  %v993_v32 = vadd.f32 %v992_v30, %v4946_v14  ;;  %v1003_v33 = vadd.f32 %v1002_v31, %v4946_v14  ;;  %v994_v34 = vpop.f32.mrb[21].mxu0  ;;  %v1004_v35 = vpop.f32.mrb[1].mxu1 }
 0x257   : > { %1110 = vst [vmem:[#allocation2 + $0x8] sm:$0xff] %v1094_v29  ;;  %v995_v36 = vadd.f32 %v994_v34, %v4948_v16  ;;  %v1005_v37 = vadd.f32 %v1004_v35, %v4948_v16  ;;  %v996_v38 = vpop.f32.mrb[22].mxu0  ;;  %v1006_v39 = vpop.f32.mrb[2].mxu1 }
 0x258   : > { %v997_v40 = vadd.f32 %v996_v38, %v4946_v14  ;;  %v1007_v41 = vadd.f32 %v1006_v39, %v4946_v14  ;;  %v998_v42 = vpop.f32.mrb[23].mxu0  ;;  %v1008_v43 = vpop.f32.mrb[3].mxu1  ;;  %v1065_v46 = vmax.f32 %v993_v32, 0.0  ;;  %v1069_v47 = vmax.f32 %v1003_v33, 0.0 }
 0x259   : > { %v999_v44 = vadd.f32 %v998_v42, %v4948_v16  ;;  %v1009_v45 = vadd.f32 %v1008_v43, %v4948_v16  ;;  %v1066_v50 = vmax.f32 %v995_v36, 0.0  ;;  %v1070_v51 = vmax.f32 %v1005_v37, 0.0 }
 0x25a   : > { %v1067_v48 = vmax.f32 %v997_v40, 0.0  ;;  %v1071_v49 = vmax.f32 %v1007_v41, 0.0 }
 0x25b   : > { %v1068_v52 = vmax.f32 %v999_v44, 0.0  ;;  %v1072_v53 = vmax.f32 %v1009_v45, 0.0 }
 0x25c   : > { %v1095_v54 = vpack.c.bf16 %v1067_v48, %v1065_v46  ;;  %v1097_v55 = vpack.c.bf16 %v1071_v49, %v1069_v47 }
 0x25d   : > { %v1096_v56 = vpack.c.bf16 %v1068_v52, %v1066_v50  ;;  %v1098_v57 = vpack.c.bf16 %v1072_v53, %v1070_v51  ;;  %v1012_v58 = vpop.f32.mrb[4].mxu1 }
 0x25e   : > { %1111 = vst [vmem:[#allocation2 + $0x10] sm:$0xff] %v1095_v54  ;;  %1113 = vst [vmem:[#allocation2 + $0x20] sm:$0xff] %v1097_v55  ;;  %v1013_v59 = vadd.f32 %v1012_v58, %v4946_v14  ;;  %v1014_v60 = vpop.f32.mrb[5].mxu1 }
 0x25f   : > { %1112 = vst [vmem:[#allocation2 + $0x18] sm:$0xff] %v1096_v56  ;;  %1114 = vst [vmem:[#allocation2 + $0x28] sm:$0xff] %v1098_v57  ;;  %v1015_v61 = vadd.f32 %v1014_v60, %v4948_v16  ;;  %v1016_v62 = vpop.f32.mrb[6].mxu1 }
 0x260   : > { %v1017_v63 = vadd.f32 %v1016_v62, %v4946_v14  ;;  %v1018_v0 = vpop.f32.mrb[7].mxu1  ;;  %v1073_v2 = vmax.f32 %v1013_v59, 0.0 }
 0x261   : > { %v1019_v1 = vadd.f32 %v1018_v0, %v4948_v16  ;;  %v1074_v4 = vmax.f32 %v1015_v61, 0.0 }
 0x262   : > { %v1075_v3 = vmax.f32 %v1017_v63, 0.0 }
 0x263   : > { %v1076_v5 = vmax.f32 %v1019_v1, 0.0 }
 0x264   : > { %v1099_v6 = vpack.c.bf16 %v1075_v3, %v1073_v2 }
 0x265   : > { %v1100_v7 = vpack.c.bf16 %v1076_v5, %v1074_v4  ;;  %v1022_v8 = vpop.f32.mrb[8].mxu1 }
 0x266   : > { %1115 = vst [vmem:[#allocation2 + $0x30] sm:$0xff] %v1099_v6  ;;  %v1023_v9 = vadd.f32 %v1022_v8, %v4946_v14  ;;  %v1024_v10 = vpop.f32.mrb[9].mxu1 }
 0x267   : > { %1116 = vst [vmem:[#allocation2 + $0x38] sm:$0xff] %v1100_v7  ;;  %v1025_v11 = vadd.f32 %v1024_v10, %v4948_v16  ;;  %v1026_v12 = vpop.f32.mrb[10].mxu1 }
 0x268   : > { %v1027_v13 = vadd.f32 %v1026_v12, %v4946_v14  ;;  %v1028_v17 = vpop.f32.mrb[11].mxu1  ;;  %v1077_v19 = vmax.f32 %v1023_v9, 0.0 }
 0x269   : > { %v1029_v18 = vadd.f32 %v1028_v17, %v4948_v16  ;;  %v1078_v20 = vmax.f32 %v1025_v11, 0.0 }
 0x26a   : > { %v1079_v15 = vmax.f32 %v1027_v13, 0.0 }
 0x26b   : > { %v1080_v21 = vmax.f32 %v1029_v18, 0.0 }
 0x26c   : > { %v1101_v22 = vpack.c.bf16 %v1079_v15, %v1077_v19 }
 0x26d   : > { %v1102_v23 = vpack.c.bf16 %v1080_v21, %v1078_v20  ;;  %v1032_v24 = vpop.f32.mrb[12].mxu1 }
 0x26e   : > { %1117 = vst [vmem:[#allocation2 + $0x40] sm:$0xff] %v1101_v22  ;;  %v1033_v25 = vadd.f32 %v1032_v24, %v4946_v14  ;;  %v1034_v26 = vpop.f32.mrb[13].mxu1 }
 0x26f   : > { %1118 = vst [vmem:[#allocation2 + $0x48] sm:$0xff] %v1102_v23  ;;  %v1035_v27 = vadd.f32 %v1034_v26, %v4948_v16  ;;  %v1036_v28 = vpop.f32.mrb[14].mxu1 }
 0x270   : > { %v1037_v29 = vadd.f32 %v1036_v28, %v4946_v14  ;;  %v1038_v30 = vpop.f32.mrb[15].mxu1  ;;  %v1081_v32 = vmax.f32 %v1033_v25, 0.0 }
 0x271   : > { %v1039_v31 = vadd.f32 %v1038_v30, %v4948_v16  ;;  %v1082_v34 = vmax.f32 %v1035_v27, 0.0 }
 0x272   : > { %v1083_v33 = vmax.f32 %v1037_v29, 0.0 }
 0x273   : > { %v1084_v35 = vmax.f32 %v1039_v31, 0.0 }
 0x274   : > { %v1103_v36 = vpack.c.bf16 %v1083_v33, %v1081_v32 }
 0x275   : > { %v1104_v37 = vpack.c.bf16 %v1084_v35, %v1082_v34  ;;  %v1042_v38 = vpop.f32.mrb[16].mxu1 }
 0x276   : > { %1119 = vst [vmem:[#allocation2 + $0x50] sm:$0xff] %v1103_v36  ;;  %v1043_v39 = vadd.f32 %v1042_v38, %v4946_v14  ;;  %v1044_v40 = vpop.f32.mrb[17].mxu1 }
 0x277   : > { %1120 = vst [vmem:[#allocation2 + $0x58] sm:$0xff] %v1104_v37  ;;  %v1045_v41 = vadd.f32 %v1044_v40, %v4948_v16  ;;  %v1046_v42 = vpop.f32.mrb[18].mxu1 }
 0x278   : > { %v1047_v43 = vadd.f32 %v1046_v42, %v4946_v14  ;;  %v1048_v44 = vpop.f32.mrb[19].mxu1  ;;  %v1085_v46 = vmax.f32 %v1043_v39, 0.0 }
 0x279   : > { %v1049_v45 = vadd.f32 %v1048_v44, %v4948_v16  ;;  %v1086_v48 = vmax.f32 %v1045_v41, 0.0 }
 0x27a   : > { %v1087_v47 = vmax.f32 %v1047_v43, 0.0 }
 0x27b   : > { %v1088_v49 = vmax.f32 %v1049_v45, 0.0 }
 0x27c   : > { %v1105_v50 = vpack.c.bf16 %v1087_v47, %v1085_v46 }
 0x27d   : > { %v1106_v51 = vpack.c.bf16 %v1088_v49, %v1086_v48  ;;  %v1052_v52 = vpop.f32.mrb[20].mxu1 }
 0x27e   : > { %1121 = vst [vmem:[#allocation2 + $0x60] sm:$0xff] %v1105_v50  ;;  %v1053_v53 = vadd.f32 %v1052_v52, %v4946_v14  ;;  %v1054_v54 = vpop.f32.mrb[21].mxu1 }
 0x27f   : > { %1122 = vst [vmem:[#allocation2 + $0x68] sm:$0xff] %v1106_v51  ;;  %v1055_v55 = vadd.f32 %v1054_v54, %v4948_v16  ;;  %v1056_v56 = vpop.f32.mrb[22].mxu1 }
 0x280   : > { %v1057_v57 = vadd.f32 %v1056_v56, %v4946_v14  ;;  %v1058_v58 = vpop.f32.mrb[23].mxu1  ;;  %v1089_v60 = vmax.f32 %v1053_v53, 0.0 }
 0x281   : > { %v1059_v59 = vadd.f32 %v1058_v58, %v4948_v16  ;;  %v1090_v62 = vmax.f32 %v1055_v55, 0.0 }
 0x282   : > { %v1091_v61 = vmax.f32 %v1057_v57, 0.0 }
 0x283   : > { %v1092_v63 = vmax.f32 %v1059_v59, 0.0 }
 0x284   : > { %v1107_v0 = vpack.c.bf16 %v1091_v61, %v1089_v60 }
 0x285   : > { %v1108_v1 = vpack.c.bf16 %v1092_v63, %v1090_v62 }
 0x286   : > { %1123 = vst [vmem:[#allocation2 + $0x70] sm:$0xff] %v1107_v0 }
 0x287   : > { %1124 = vst [vmem:[#allocation2 + $0x78] sm:$0xff] %v1108_v1 }
 0x288 PF: > { %v4067_v14 = vld [vmem:[%s4854_s6 + $0x40] sm:$0xff]   ;;  %v4069_v2 = vld [vmem:[%s4854_s6 + $0x48] sm:$0xff]   ;;  %v4071_v4 = vld [vmem:[%s4854_s6 + $0x50] sm:$0xff]   ;;  %v4535_v50 = vmov 0   ;;  %vm2108_vm1 = vcmask 261120   ;;  %p3482_p10 = scmp.ne.s32.totalorder %s4503_s24, 1 }
 0x289   : > { %v4068_v16 = vld [vmem:[%s4854_s6] sm:$0xff]   ;;  %3638 = vmatprep.subr.bf16.mxu0 %v4067_v14  ;;  %v4070_v3 = vld [vmem:[%s4854_s6 + $0x8] sm:$0xff]   ;;  %v4072_v5 = vld [vmem:[%s4854_s6 + $0x10] sm:$0xff]   ;;  %1765 = vmatprep.mubr.bf16.mxu1 %v4535_v50  ;;  %s5456_s13 = sld [smem:[#allocation35_spill]] (!%p3482_p10)  ;;  %s5457_s12 = sld [smem:[#allocation36_spill]] (!%p3482_p10) }
 0x28a   : > { %3639 = vmatpush3.bf16.msra.mxu0 %v4068_v16  ;;  %v4073_v6 = vld [vmem:[%s4854_s6 + $0x58] sm:$0xff]   ;;  %v4075_v8 = vld [vmem:[%s4854_s6 + $0x60] sm:$0xff]   ;;  %v4077_v10 = vld [vmem:[%s4854_s6 + $0x68] sm:$0xff]   ;;  %s5458_s18 = sld [smem:[#allocation38_spill]] (!%p3482_p10)  ;;  %s5461_s16 = sld [smem:[#allocation39_spill]] (!%p3482_p10) }
 0x28b   : > { %3640 = vmatprep.subr.bf16.mxu0 %v4069_v2  ;;  %v4074_v7 = vld [vmem:[%s4854_s6 + $0x18] sm:$0xff]   ;;  %v4076_v9 = vld [vmem:[%s4854_s6 + $0x20] sm:$0xff]   ;;  %v1222_v11 = vld [vmem:[#allocation2 + $0x8] sm:$0xff] }
 0x28c   : > { %1372 = vmatprep.mubr.bf16.mxu0 %v1222_v11  ;;  %v4078_v12 = vld [vmem:[%s4854_s6 + $0x28] sm:$0xff]   ;;  %v4079_v13 = vld [vmem:[%s4854_s6 + $0x70] sm:$0xff]   ;;  %v4081_v20 = vld [vmem:[%s4854_s6 + $0x78] sm:$0xff]  }
 0x28d   : > { %v4083_v17 = vld [vmem:[%s4829_s17 + $0x4] ss:$8 sps:$4 sm:$0xff]   ;;  %v4085_v18 = vld [vmem:[%s4829_s17] ss:$8 sps:$4 sm:$0xff]   ;;  %v4086_v15 = vld [vmem:[%s4829_s17 + $0x14] ss:$8 sps:$4 sm:$0xff]  }
 0x28e   : > { %3641 = vmatpush3.bf16.msra.mxu0 %v4070_v3  ;;  %v4080_v19 = vld [vmem:[%s4854_s6 + $0x30] sm:$0xff]   ;;  %1733 = vmatprep.subr.bf16.mxu1 %v4083_v17  ;;  %v4082_v23 = vld [vmem:[%s4854_s6 + $0x38] sm:$0xff]   ;;  %v4091_v24 = vld [vmem:[%s4829_s17 + $0x20] ss:$8 sps:$4 sm:$0xff]   ;;  %s3472_s6 = sshll.u32 %s4503_s24, 7 }
 0x28f   : > { %3642 = vmatprep.subr.bf16.mxu0 %v4071_v4  ;;  %1734 = vmatpush1.bf16.msra.mxu1 %v4085_v18  ;;  %v4088_v21 = vld [vmem:[%s4829_s17 + $0x10] ss:$8 sps:$4 sm:$0xff]   ;;  %v4089_v22 = vld [vmem:[%s4829_s17 + $0x24] ss:$8 sps:$4 sm:$0xff]   ;;  %v4092_v25 = vld [vmem:[%s4829_s17 + $0x34] ss:$8 sps:$4 sm:$0xff]  }
 0x290   : > { %1735 = vmatprep.subr.bf16.mxu1 %v4086_v15  ;;  %v1221_v26 = vld [vmem:[#allocation2] sm:$0xff]  ;;  %v1224_v27 = vld [vmem:[#allocation2 + $0x18] sm:$0xff]  ;;  %v1223_v32 = vld [vmem:[#allocation2 + $0x10] sm:$0xff]  ;;  %s1911_s22 = sshra.s32 %s3472_s6, 3  ;;  %s5459_s7 = smov (!%p3482_p10), %s5458_s18 }
 0x291   : > { %v4094_v28 = vld [vmem:[%s4829_s17 + $0x30] ss:$8 sps:$4 sm:$0xff]   ;;  %v4095_v29 = vld [vmem:[%s4829_s17 + $0x44] ss:$8 sps:$4 sm:$0xff]   ;;  %v4097_v30 = vld [vmem:[%s4829_s17 + $0x40] ss:$8 sps:$4 sm:$0xff]  }
 0x292   : > { %3643 = vmatpush3.bf16.msra.mxu0 %v4072_v5  ;;  %v4098_v31 = vld [vmem:[%s4829_s17 + $0x54] ss:$8 sps:$4 sm:$0xff]   ;;  %v1226_v33 = vld [vmem:[#allocation2 + $0x28] sm:$0xff]  ;;  %v4100_v34 = vld [vmem:[%s4829_s17 + $0x50] ss:$8 sps:$4 sm:$0xff]   ;;  %s3473_s29 = sshll.u32 %s1911_s22, 2 }
 0x293   : > { %3644 = vmatprep.subr.bf16.mxu0 %v4073_v6  ;;  %1736 = vmatpush1.bf16.msra.mxu1 %v4088_v21  ;;  %v1225_v35 = vld [vmem:[#allocation2 + $0x20] sm:$0xff]  ;;  %v1228_v36 = vld [vmem:[#allocation2 + $0x38] sm:$0xff]  ;;  %v1227_v37 = vld [vmem:[#allocation2 + $0x30] sm:$0xff]  ;;  %s1914_s0 = scalar_lea.vmem %s4848_s8, %s3473_s29 }
 0x294   : > { %1737 = vmatprep.subr.bf16.mxu1 %v4089_v22  ;;  %v1230_v38 = vld [vmem:[#allocation2 + $0x48] sm:$0xff]  ;;  %v1229_v39 = vld [vmem:[#allocation2 + $0x40] sm:$0xff]  ;;  %v1232_v40 = vld [vmem:[#allocation2 + $0x58] sm:$0xff] }
 0x295   : > { %v1231_v41 = vld [vmem:[#allocation2 + $0x50] sm:$0xff]  ;;  %v1234_v42 = vld [vmem:[#allocation2 + $0x68] sm:$0xff]  ;;  %v1233_v43 = vld [vmem:[#allocation2 + $0x60] sm:$0xff] }
 0x296   : > { %3645 = vmatpush3.bf16.msra.mxu0 %v4074_v7  ;;  %v1236_v44 = vld [vmem:[#allocation2 + $0x78] sm:$0xff]  ;;  %v1235_v45 = vld [vmem:[#allocation2 + $0x70] sm:$0xff]  ;;  %v4103_v47 = vld [vmem:[%s4829_s17 + $0x60] ss:$8 sps:$4 sm:$0xff]  }
 0x297   : > { %3646 = vmatprep.subr.bf16.mxu0 %v4075_v8  ;;  %1738 = vmatpush1.bf16.msra.mxu1 %v4091_v24  ;;  %v4101_v46 = vld [vmem:[%s4829_s17 + $0x64] ss:$8 sps:$4 sm:$0xff]   ;;  %v4104_v48 = vld [vmem:[%s4829_s17 + $0x74] ss:$8 sps:$4 sm:$0xff]   ;;  %v4106_v49 = vld [vmem:[%s4829_s17 + $0x70] ss:$8 sps:$4 sm:$0xff]  }
 0x298   : > { %1739 = vmatprep.subr.bf16.mxu1 %v4092_v25  ;;  %v4107_v51 = vld [vmem:[%s1914_s0] sm:$0xff]   ;;  %v4108_v52 = vld [vmem:[%s1914_s0 + $0x8] sm:$0xff]   ;;  %v4109_v53 = vld [vmem:[%s1914_s0 + $0x10] sm:$0xff]  }
 0x299   : > { %v5017_v54 = vld [vmem:[%s1914_s0 + $0x18] sm:$0xff]   ;;  %v5021_v55 = vld [vmem:[%s1914_s0 + $0x20] sm:$0xff]   ;;  %v5025_v56 = vld [vmem:[%s1914_s0 + $0x28] sm:$0xff]  }
 0x29a   : > { %3647 = vmatpush3.bf16.msra.mxu0 %v4076_v9  ;;  %v5029_v57 = vld [vmem:[%s1914_s0 + $0x30] sm:$0xff]   ;;  %v5033_v58 = vld [vmem:[%s1914_s0 + $0x38] sm:$0xff]   ;;  %v5042_v60 = vld [vmem:[%s630_s9] ss:$0 sm:$0xff]  ;;  %s5460_s0 = sld [smem:[#allocation37_spill]] (!%p3482_p10) }
 0x29b   : > { %3648 = vmatprep.subr.bf16.mxu0 %v4077_v10  ;;  %1740 = vmatpush1.bf16.msra.mxu1 %v4094_v28 }
 0x29c   : > { %1741 = vmatprep.subr.bf16.mxu1 %v4095_v29 }
 0x29e   : > { %3649 = vmatpush3.bf16.msra.mxu0 %v4078_v12 }
 0x29f   : > { %3650 = vmatprep.subr.bf16.mxu0 %v4079_v13  ;;  %1742 = vmatpush1.bf16.msra.mxu1 %v4097_v30 }
 0x2a0   : > { %1743 = vmatprep.subr.bf16.mxu1 %v4098_v31 }
 0x2a2   : > { %3651 = vmatpush3.bf16.msra.mxu0 %v4080_v19 }
 0x2a3   : > { %3652 = vmatprep.subr.bf16.mxu0 %v4081_v20  ;;  %1744 = vmatpush1.bf16.msra.mxu1 %v4100_v34 }
 0x2a4   : > { %1745 = vmatprep.subr.bf16.mxu1 %v4101_v46 }
 0x2a6   : > { %3653 = vmatpush3.bf16.msra.mxu0 %v4082_v23 }
 0x2a7   : > { %1746 = vmatpush1.bf16.msra.mxu1 %v4103_v47  ;;  %3822 = vmatprep.subr.bf16.mxu0 %v4107_v51 }
 0x2a8   : > { %1747 = vmatprep.subr.bf16.mxu1 %v4104_v48 }
 0x2a9   : > { %1373 = vmatmul.mubr.bf16.vlgmr.msra.gmra.mrb[0].mxu0 %v1221_v26 }
 0x2aa   : > { %1380 = vmatprep.mubr.bf16.mxu0 %v1224_v27  ;;  %3823 = vmatpush3.bf16.msra.mxu0 %v4107_v51 }
 0x2ab   : > { %1748 = vmatpush1.bf16.msra.mxu1 %v4106_v49  ;;  %3824 = vmatprep.subr.bf16.mxu0 %v4108_v52 }
 0x2ac   : > { %3898 = vmatprep.subr.bf16.mxu1 %v4107_v51 }
 0x2ae   : > { %3825 = vmatpush3.bf16.msra.mxu0 %v4108_v52 }
 0x2af   : > { %3826 = vmatprep.subr.bf16.mxu0 %v4109_v53 }
 0x2b1   : > { %1381 = vmatmul.mubr.bf16.gmra.mrb[4].mxu0 %v1223_v32 }
 0x2b2   : > { %1388 = vmatprep.mubr.bf16.mxu0 %v1226_v33  ;;  %3827 = vmatpush3.bf16.msra.mxu0 %v4109_v53 }
 0x2b3   : > { %3828 = vmatprep.subr.bf16.mxu0 %v5017_v54 }
 0x2b6   : > { %3829 = vmatpush3.bf16.msra.mxu0 %v5017_v54 }
 0x2b7   : > { %3830 = vmatprep.subr.bf16.mxu0 %v5021_v55 }
 0x2b9   : > { %1389 = vmatmul.mubr.bf16.gmra.mrb[8].mxu0 %v1225_v35 }
 0x2ba   : > { %1396 = vmatprep.mubr.bf16.mxu0 %v1228_v36  ;;  %3831 = vmatpush3.bf16.msra.mxu0 %v5021_v55 }
 0x2bb   : > { %3832 = vmatprep.subr.bf16.mxu0 %v5025_v56 }
 0x2be   : > { %3833 = vmatpush3.bf16.msra.mxu0 %v5025_v56 }
 0x2bf   : > { %3834 = vmatprep.subr.bf16.mxu0 %v5029_v57 }
 0x2c1   : > { %1397 = vmatmul.mubr.bf16.gmra.mrb[12].mxu0 %v1227_v37 }
 0x2c2   : > { %1404 = vmatprep.mubr.bf16.mxu0 %v1230_v38  ;;  %3835 = vmatpush3.bf16.msra.mxu0 %v5029_v57 }
 0x2c3   : > { %3836 = vmatprep.subr.bf16.mxu0 %v5033_v58 }
 0x2c6   : > { %3837 = vmatpush3.bf16.msra.mxu0 %v5033_v58 }
 0x2c9   : > { %1405 = vmatmul.mubr.bf16.gmra.mrb[16].mxu0 %v1229_v39 }
 0x2ca   : > { %1412 = vmatprep.mubr.bf16.mxu0 %v1232_v40 }
 0x2d1   : > { %1413 = vmatmul.mubr.bf16.gmra.mrb[20].mxu0 %v1231_v41 }
 0x2d2   : > { %1420 = vmatprep.mubr.bf16.mxu0 %v1234_v42 }
 0x2d9   : > { %1421 = vmatmul.mubr.bf16.gmra.mrb[24].mxu0 %v1233_v43 }
 0x2da   : > { %1428 = vmatprep.mubr.bf16.mxu0 %v1236_v44 }
 0x2e1   : > { %1429 = vmatmul.mubr.bf16.gmra.mrb[28].mxu0 %v1235_v45 }
 0x37c   : > { %v3654_v59 = vpop.f32.mrb[0].mxu0 }
 0x37d   : > { %v3655_v61 = vpop.f32.mrb[1].mxu0 }
 0x37e   : > { %v3656_v62 = vadd.f32 %v3655_v61, %v3654_v59  ;;  %v3657_v63 = vpop.f32.mrb[2].mxu0 }
 0x37f   : > { %v3658_v0 = vpop.f32.mrb[3].mxu0 }
 0x380   : > { %v1375_v1 = vadd.f32 %v3656_v62, %v5042_v60  ;;  %v3659_v14 = vadd.f32 %v3658_v0, %v3657_v63 }
 0x382   : > { %v3424_v16 = vmul.f32 -1.442695, %v1375_v1  ;;  %v1378_v2 = vadd.f32 %v3659_v14, %v5042_v60 }
 0x384   : > { %4115 = vpow2.f32 %v3424_v16  ;;  %v3425_v3 = vmul.f32 -1.442695, %v1378_v2  ;;  %v3660_v4 = vpop.f32.mrb[4].mxu0  ;;  %v1645_v5 = vpack.c.bf16 %v1378_v2, %v1375_v1 }
 0x385   : > { %v3661_v6 = vpop.f32.mrb[5].mxu0 }
 0x386   : > { %4117 = vpow2.f32 %v3425_v3  ;;  %v3662_v7 = vadd.f32 %v3661_v6, %v3660_v4  ;;  %v3663_v8 = vpop.f32.mrb[6].mxu0  ;;  %1766 = vmatmul.mubr.bf16.vlgmr.msra.gmra.mrb[0].mxu1 %v1645_v5 }
 0x387   : > { %v3664_v9 = vpop.f32.mrb[7].mxu0  ;;  %1775 = vmatprep.mubr.bf16.mxu1 %v4535_v50  ;;  %3906 = vmatpush3.bf16.msra.mxu1 %v4107_v51 }
 0x388   : > { %v1383_v10 = vadd.f32 %v3662_v7, %v5042_v60  ;;  %v3665_v11 = vadd.f32 %v3664_v9, %v3663_v8  ;;  %3899 = vmatprep.subr.bf16.mxu1 %v4108_v52 }
 0x38a   : > { %v3426_v12 = vmul.f32 -1.442695, %v1383_v10  ;;  %v1386_v13 = vadd.f32 %v3665_v11, %v5042_v60 }
 0x38b   : > { %3907 = vmatpush3.bf16.msra.mxu1 %v4108_v52 }
 0x38c   : > { %4119 = vpow2.f32 %v3426_v12  ;;  %v3427_v17 = vmul.f32 -1.442695, %v1386_v13  ;;  %v3666_v18 = vpop.f32.mrb[8].mxu0  ;;  %v1646_v19 = vpack.c.bf16 %v1386_v13, %v1383_v10  ;;  %3900 = vmatprep.subr.bf16.mxu1 %v4109_v53 }
 0x38d   : > { %v3667_v15 = vpop.f32.mrb[9].mxu0 }
 0x38e   : > { %v4116_v20 = vpop.eup %4115  ;;  %4121 = vpow2.f32 %v3427_v17  ;;  %v3668_v21 = vadd.f32 %v3667_v15, %v3666_v18  ;;  %v3669_v22 = vpop.f32.mrb[10].mxu0  ;;  %1776 = vmatmul.mubr.bf16.gmra.mrb[4].mxu1 %v1646_v19 }
 0x38f   : > { %v1485_v23 = vadd.f32 1.0, %v4116_v20  ;;  %v3670_v24 = vpop.f32.mrb[11].mxu0  ;;  %1785 = vmatprep.mubr.bf16.mxu1 %v4535_v50  ;;  %3908 = vmatpush3.bf16.msra.mxu1 %v4109_v53 }
 0x390   : > { %v4118_v25 = vpop.eup %4117  ;;  %v1391_v26 = vadd.f32 %v3668_v21, %v5042_v60  ;;  %v3671_v27 = vadd.f32 %v3670_v24, %v3669_v22  ;;  %3901 = vmatprep.subr.bf16.mxu1 %v5017_v54 }
 0x391   : > { %v1486_v28 = vadd.f32 1.0, %v4118_v25  ;;  %4123 = vrcp.f32 %v1485_v23 }
 0x392   : > { %v3428_v29 = vmul.f32 -1.442695, %v1391_v26  ;;  %v1394_v30 = vadd.f32 %v3671_v27, %v5042_v60 }
 0x393   : > { %4125 = vrcp.f32 %v1486_v28  ;;  %3909 = vmatpush3.bf16.msra.mxu1 %v5017_v54 }
 0x394   : > { %4127 = vpow2.f32 %v3428_v29  ;;  %v3429_v31 = vmul.f32 -1.442695, %v1394_v30  ;;  %v3672_v32 = vpop.f32.mrb[12].mxu0  ;;  %v1647_v33 = vpack.c.bf16 %v1394_v30, %v1391_v26  ;;  %3902 = vmatprep.subr.bf16.mxu1 %v5021_v55 }
 0x395   : > { %v3673_v34 = vpop.f32.mrb[13].mxu0 }
 0x396   : > { %v4120_v35 = vpop.eup %4119  ;;  %4129 = vpow2.f32 %v3429_v31  ;;  %v3674_v36 = vadd.f32 %v3673_v34, %v3672_v32  ;;  %v3675_v37 = vpop.f32.mrb[14].mxu0  ;;  %1786 = vmatmul.mubr.bf16.gmra.mrb[8].mxu1 %v1647_v33 }
 0x397   : > { %v1487_v38 = vadd.f32 1.0, %v4120_v35  ;;  %v3676_v39 = vpop.f32.mrb[15].mxu0  ;;  %1795 = vmatprep.mubr.bf16.mxu1 %v4535_v50  ;;  %3910 = vmatpush3.bf16.msra.mxu1 %v5021_v55 }
 0x398   : > { %v4122_v40 = vpop.eup %4121  ;;  %v1399_v41 = vadd.f32 %v3674_v36, %v5042_v60  ;;  %v3677_v42 = vadd.f32 %v3676_v39, %v3675_v37  ;;  %3903 = vmatprep.subr.bf16.mxu1 %v5025_v56 }
 0x399   : > { %v1488_v43 = vadd.f32 1.0, %v4122_v40  ;;  %4131 = vrcp.f32 %v1487_v38 }
 0x39a   : > { %v3430_v44 = vmul.f32 -1.442695, %v1399_v41  ;;  %v1402_v45 = vadd.f32 %v3677_v42, %v5042_v60 }
 0x39b   : > { %4133 = vrcp.f32 %v1488_v43  ;;  %3911 = vmatpush3.bf16.msra.mxu1 %v5025_v56  ;;  %v4124_v46 = vpop.eup %4123 }
 0x39c   : > { %4135 = vpow2.f32 %v3430_v44  ;;  %v3431_v47 = vmul.f32 -1.442695, %v1402_v45  ;;  %v3678_v48 = vpop.f32.mrb[16].mxu0  ;;  %v1648_v49 = vpack.c.bf16 %v1402_v45, %v1399_v41  ;;  %3904 = vmatprep.subr.bf16.mxu1 %v5029_v57 }
 0x39d   : > { %v4126_v51 = vpop.eup %4125  ;;  %v3679_v52 = vpop.f32.mrb[17].mxu0 }
 0x39e   : > { %v4128_v53 = vpop.eup %4127  ;;  %4137 = vpow2.f32 %v3431_v47  ;;  %v3680_v54 = vadd.f32 %v3679_v52, %v3678_v48  ;;  %v3681_v55 = vpop.f32.mrb[18].mxu0  ;;  %1796 = vmatmul.mubr.bf16.gmra.mrb[12].mxu1 %v1648_v49  ;;  %v1533_v59 = vpack.c.bf16 %v4126_v51, %v4124_v46 }
 0x39f   : > { %v1489_v61 = vadd.f32 1.0, %v4128_v53  ;;  %v3682_v62 = vpop.f32.mrb[19].mxu0  ;;  %1805 = vmatprep.mubr.bf16.mxu1 %v4535_v50  ;;  %3912 = vmatpush3.bf16.msra.mxu1 %v5029_v57 }
 0x3a0   : > { %v4130_v56 = vpop.eup %4129  ;;  %v1407_v63 = vadd.f32 %v3680_v54, %v5042_v60  ;;  %v3683_v0 = vadd.f32 %v3682_v62, %v3681_v55  ;;  %3585 = vst [vmem:[%s4870_s1] sm:$0xff] %v1533_v59   ;;  %3838 = vmatprep.mubr.bf16.mxu0 %v1533_v59  ;;  %3905 = vmatprep.subr.bf16.mxu1 %v5033_v58 }
 0x3a1   : > { %v1490_v1 = vadd.f32 1.0, %v4130_v56  ;;  %4139 = vrcp.f32 %v1489_v61 }
 0x3a2   : > { %v3432_v14 = vmul.f32 -1.442695, %v1407_v63  ;;  %v1410_v16 = vadd.f32 %v3683_v0, %v5042_v60 }
 0x3a3   : > { %4141 = vrcp.f32 %v1490_v1  ;;  %3913 = vmatpush3.bf16.msra.mxu1 %v5033_v58  ;;  %v4132_v2 = vpop.eup %4131 }
 0x3a4   : > { %4143 = vpow2.f32 %v3432_v14  ;;  %v3433_v3 = vmul.f32 -1.442695, %v1410_v16  ;;  %v3684_v57 = vpop.f32.mrb[20].mxu0  ;;  %v1649_v4 = vpack.c.bf16 %v1410_v16, %v1407_v63 }
 0x3a5   : > { %v4134_v5 = vpop.eup %4133  ;;  %v3685_v6 = vpop.f32.mrb[21].mxu0 }
 0x3a6   : > { %v4136_v7 = vpop.eup %4135  ;;  %4145 = vpow2.f32 %v3433_v3  ;;  %v3686_v8 = vadd.f32 %v3685_v6, %v3684_v57  ;;  %v3687_v9 = vpop.f32.mrb[22].mxu0  ;;  %1806 = vmatmul.mubr.bf16.gmra.mrb[16].mxu1 %v1649_v4  ;;  %v1534_v10 = vpack.c.bf16 %v4134_v5, %v4132_v2 }
 0x3a7   : > { %v1491_v11 = vadd.f32 1.0, %v4136_v7  ;;  %v3688_v12 = vpop.f32.mrb[23].mxu0  ;;  %1815 = vmatprep.mubr.bf16.mxu1 %v4535_v50 }
 0x3a8   : > { %v4138_v13 = vpop.eup %4137  ;;  %v1415_v58 = vadd.f32 %v3686_v8, %v5042_v60  ;;  %v3689_v17 = vadd.f32 %v3688_v12, %v3687_v9  ;;  %3621 = vst [vmem:[%s4870_s1 + $0x8] sm:$0xff] %v1534_v10   ;;  %3839 = vmatmul.mubr.bf16.vlgmr.msra.gmra.mrb[32].mxu0 %v1534_v10 }
 0x3a9   : > { %v1492_v18 = vadd.f32 1.0, %v4138_v13  ;;  %4147 = vrcp.f32 %v1491_v11  ;;  %v1613_v13 = vld [vmem:[#allocation3] sm:$0xff] }
 0x3aa   : > { %v3434_v19 = vmul.f32 -1.442695, %v1415_v58  ;;  %v1418_v15 = vadd.f32 %v3689_v17, %v5042_v60 }
 0x3ab   : > { %4149 = vrcp.f32 %v1492_v18  ;;  %v4140_v20 = vpop.eup %4139  ;;  %v1615_v18 = vld [vmem:[#allocation3 + $0x10] sm:$0xff] }
 0x3ac   : > { %4151 = vpow2.f32 %v3434_v19  ;;  %v3435_v21 = vmul.f32 -1.442695, %v1418_v15  ;;  %v3690_v22 = vpop.f32.mrb[24].mxu0  ;;  %v1650_v23 = vpack.c.bf16 %v1418_v15, %v1415_v58  ;;  %v1614_v58 = vld [vmem:[#allocation3 + $0x8] sm:$0xff] }
 0x3ad   : > { %v4142_v24 = vpop.eup %4141  ;;  %v3691_v25 = vpop.f32.mrb[25].mxu0 }
 0x3ae   : > { %v4144_v26 = vpop.eup %4143  ;;  %4153 = vpow2.f32 %v3435_v21  ;;  %v3692_v27 = vadd.f32 %v3691_v25, %v3690_v22  ;;  %v3693_v28 = vpop.f32.mrb[26].mxu0  ;;  %1816 = vmatmul.mubr.bf16.gmra.mrb[20].mxu1 %v1650_v23  ;;  %v1535_v29 = vpack.c.bf16 %v4142_v24, %v4140_v20  ;;  %v1616_v20 = vld [vmem:[#allocation3 + $0x18] sm:$0xff] }
 0x3af   : > { %v1493_v30 = vadd.f32 1.0, %v4144_v26  ;;  %v3694_v31 = vpop.f32.mrb[27].mxu0  ;;  %1825 = vmatprep.mubr.bf16.mxu1 %v4535_v50  ;;  %v1617_v26 = vld [vmem:[#allocation3 + $0x20] sm:$0xff] }
 0x3b0   : > { %v4146_v32 = vpop.eup %4145  ;;  %v1423_v33 = vadd.f32 %v3692_v27, %v5042_v60  ;;  %v3695_v34 = vadd.f32 %v3694_v31, %v3693_v28  ;;  %3622 = vst [vmem:[%s4870_s1 + $0x10] sm:$0xff] %v1535_v29   ;;  %3842 = vmatprep.mubr.bf16.mxu0 %v1535_v29  ;;  %v1618_v27 = vld [vmem:[#allocation3 + $0x28] sm:$0xff]  ;;  %v1619_v29 = vld [vmem:[#allocation3 + $0x30] sm:$0xff] }
 0x3b1   : > { %v1494_v35 = vadd.f32 1.0, %v4146_v32  ;;  %4155 = vrcp.f32 %v1493_v30  ;;  %v1620_v32 = vld [vmem:[#allocation3 + $0x38] sm:$0xff] }
 0x3b2   : > { %v3436_v36 = vmul.f32 -1.442695, %v1423_v33  ;;  %v1426_v37 = vadd.f32 %v3695_v34, %v5042_v60 }
 0x3b3   : > { %4157 = vrcp.f32 %v1494_v35  ;;  %v4148_v38 = vpop.eup %4147 }
 0x3b4   : > { %4159 = vpow2.f32 %v3436_v36  ;;  %v3437_v39 = vmul.f32 -1.442695, %v1426_v37  ;;  %v3696_v40 = vpop.f32.mrb[28].mxu0  ;;  %v1651_v41 = vpack.c.bf16 %v1426_v37, %v1423_v33 }
 0x3b5   : > { %v4150_v42 = vpop.eup %4149  ;;  %v3697_v43 = vpop.f32.mrb[29].mxu0 }
 0x3b6   : > { %v4152_v44 = vpop.eup %4151  ;;  %4161 = vpow2.f32 %v3437_v39  ;;  %v3698_v45 = vadd.f32 %v3697_v43, %v3696_v40  ;;  %v3699_v46 = vpop.f32.mrb[30].mxu0  ;;  %1826 = vmatmul.mubr.bf16.gmra.mrb[24].mxu1 %v1651_v41  ;;  %v1536_v47 = vpack.c.bf16 %v4150_v42, %v4148_v38  ;;  %v1621_v38 = vld [vmem:[#allocation3 + $0x40] sm:$0xff]  ;;  %v1622_v39 = vld [vmem:[#allocation3 + $0x48] sm:$0xff]  ;;  %v1623_v41 = vld [vmem:[#allocation3 + $0x50] sm:$0xff] }
 0x3b7   : > { %v1495_v48 = vadd.f32 1.0, %v4152_v44  ;;  %v3700_v49 = vpop.f32.mrb[31].mxu0  ;;  %1835 = vmatprep.mubr.bf16.mxu1 %v4535_v50  ;;  %v1624_v44 = vld [vmem:[#allocation3 + $0x58] sm:$0xff] }
 0x3b8   : > { %v4154_v51 = vpop.eup %4153  ;;  %v1431_v52 = vadd.f32 %v3698_v45, %v5042_v60  ;;  %v3701_v53 = vadd.f32 %v3700_v49, %v3699_v46  ;;  %3623 = vst [vmem:[%s4870_s1 + $0x18] sm:$0xff] %v1536_v47   ;;  %3843 = vmatmul.mubr.bf16.gmra.mrb[36].mxu0 %v1536_v47 }
 0x3b9   : > { %v1496_v54 = vadd.f32 1.0, %v4154_v51  ;;  %4163 = vrcp.f32 %v1495_v48  ;;  %v1625_v51 = vld [vmem:[#allocation3 + $0x60] sm:$0xff] }
 0x3ba   : > { %v3438_v55 = vmul.f32 -1.442695, %v1431_v52  ;;  %v1434_v59 = vadd.f32 %v3701_v53, %v5042_v60 }
 0x3bb   : > { %4165 = vrcp.f32 %v1496_v54  ;;  %v4156_v61 = vpop.eup %4155  ;;  %v1627_v54 = vld [vmem:[#allocation3 + $0x70] sm:$0xff] }
 0x3bc   : > { %4167 = vpow2.f32 %v3438_v55  ;;  %v3439_v62 = vmul.f32 -1.442695, %v1434_v59  ;;  %v1652_v56 = vpack.c.bf16 %v1434_v59, %v1431_v52  ;;  %v1626_v52 = vld [vmem:[#allocation3 + $0x68] sm:$0xff] }
 0x3bd   : > { %v4158_v63 = vpop.eup %4157 }
 0x3be   : > { %v4160_v0 = vpop.eup %4159  ;;  %4169 = vpow2.f32 %v3439_v62  ;;  %1836 = vmatmul.mubr.bf16.gmra.mrb[28].mxu1 %v1652_v56  ;;  %v1537_v50 = vpack.c.bf16 %v4158_v63, %v4156_v61  ;;  %v1628_v61 = vld [vmem:[#allocation3 + $0x78] sm:$0xff] }
 0x3bf   : > { %v1497_v1 = vadd.f32 1.0, %v4160_v0 }
 0x3c0   : > { %v4162_v14 = vpop.eup %4161  ;;  %3624 = vst [vmem:[%s4870_s1 + $0x20] sm:$0xff] %v1537_v50   ;;  %3846 = vmatprep.mubr.bf16.mxu1 %v1537_v50 }
 0x3c1   : > { %v1498_v16 = vadd.f32 1.0, %v4162_v14  ;;  %4171 = vrcp.f32 %v1497_v1  ;;  %v1629_v1 = vld [vmem:[#allocation3 + $0x80] sm:$0xff]  ;;  %v1630_v14 = vld [vmem:[#allocation3 + $0x88] sm:$0xff] }
 0x3c3   : > { %4173 = vrcp.f32 %v1498_v16  ;;  %v4164_v60 = vpop.eup %4163 }
 0x3c5   : > { %v4166_v2 = vpop.eup %4165 }
 0x3c6   : > { %v4168_v3 = vpop.eup %4167  ;;  %v1538_v57 = vpack.c.bf16 %v4166_v2, %v4164_v60  ;;  %v1631_v60 = vld [vmem:[#allocation3 + $0x90] sm:$0xff] }
 0x3c7   : > { %v1499_v4 = vadd.f32 1.0, %v4168_v3  ;;  %v1933_v2 = vld [vmem:[#allocation4 + $0x10] sm:$0xff] }
 0x3c8   : > { %v4170_v5 = vpop.eup %4169  ;;  %3625 = vst [vmem:[%s4870_s1 + $0x28] sm:$0xff] %v1538_v57   ;;  %3847 = vmatmul.mubr.bf16.vlgmr.msra.gmra.mrb[32].mxu1 %v1538_v57 }
 0x3c9   : > { %v1500_v6 = vadd.f32 1.0, %v4170_v5  ;;  %4175 = vrcp.f32 %v1499_v4  ;;  %v1632_v4 = vld [vmem:[#allocation3 + $0x98] sm:$0xff]  ;;  %v1931_v5 = vld [vmem:[#allocation4] sm:$0xff] }
 0x3cb   : > { %4177 = vrcp.f32 %v1500_v6  ;;  %v4172_v7 = vpop.eup %4171 }
 0x3cd   : > { %v4174_v8 = vpop.eup %4173 }
 0x3ce   : > { %v1539_v9 = vpack.c.bf16 %v4174_v8, %v4172_v7 }
 0x3d0   : > { %3626 = vst [vmem:[%s4870_s1 + $0x30] sm:$0xff] %v1539_v9   ;;  %3850 = vmatprep.mubr.bf16.mxu1 %v1539_v9  ;;  %v1934_v9 = vld [vmem:[#allocation4 + $0x18] sm:$0xff] }
 0x3d3   : > { %v4176_v10 = vpop.eup %4175 }
 0x3d5   : > { %v4178_v11 = vpop.eup %4177 }
 0x3d6   : > { %v1540_v12 = vpack.c.bf16 %v4178_v11, %v4176_v10 }
 0x3d8   : > { %3627 = vst [vmem:[%s4870_s1 + $0x38] sm:$0xff] %v1540_v12   ;;  %3851 = vmatmul.mubr.bf16.gmra.mrb[36].mxu1 %v1540_v12 }
 0x459   : > { %v1767_v17 = vpop.f32.mrb[0].mxu1 }
 0x45a   : > { %v1846_v19 = vadd.f32 %v1767_v17, %v1613_v13  ;;  %v1769_v15 = vpop.f32.mrb[1].mxu1 }
 0x45b   : > { %v1847_v21 = vadd.f32 %v1769_v15, %v1614_v58  ;;  %v1771_v22 = vpop.f32.mrb[2].mxu1  ;;  %v1932_v58 = vld [vmem:[#allocation4 + $0x8] sm:$0xff] }
 0x45c   : > { %1878 = vst [vmem:[#allocation3] sm:$0xff] %v1846_v19  ;;  %v1848_v23 = vadd.f32 %v1771_v22, %v1615_v18  ;;  %v1773_v24 = vpop.f32.mrb[3].mxu1  ;;  %v1633_v22 = vld [vmem:[#allocation3 + $0xa0] sm:$0xff] }
 0x45d   : > { %1879 = vst [vmem:[#allocation3 + $0x8] sm:$0xff] %v1847_v21  ;;  %v1849_v25 = vadd.f32 %v1773_v24, %v1616_v20 }
 0x45e   : > { %1880 = vst [vmem:[#allocation3 + $0x10] sm:$0xff] %v1848_v23  ;;  %v1634_v23 = vld [vmem:[#allocation3 + $0xa8] sm:$0xff] }
 0x45f   : > { %1881 = vst [vmem:[#allocation3 + $0x18] sm:$0xff] %v1849_v25  ;;  %v1635_v25 = vld [vmem:[#allocation3 + $0xb0] sm:$0xff] }
 0x461   : > { %v1777_v28 = vpop.f32.mrb[4].mxu1 }
 0x462   : > { %v1850_v30 = vadd.f32 %v1777_v28, %v1617_v26  ;;  %v1779_v31 = vpop.f32.mrb[5].mxu1  ;;  %v1636_v28 = vld [vmem:[#allocation3 + $0xb8] sm:$0xff] }
 0x463   : > { %v1851_v33 = vadd.f32 %v1779_v31, %v1618_v27  ;;  %v1781_v34 = vpop.f32.mrb[6].mxu1 }
 0x464   : > { %1882 = vst [vmem:[#allocation3 + $0x20] sm:$0xff] %v1850_v30  ;;  %v1852_v35 = vadd.f32 %v1781_v34, %v1619_v29  ;;  %v1783_v36 = vpop.f32.mrb[7].mxu1  ;;  %v1637_v34 = vld [vmem:[#allocation3 + $0xc0] sm:$0xff] }
 0x465   : > { %1883 = vst [vmem:[#allocation3 + $0x28] sm:$0xff] %v1851_v33  ;;  %v1853_v37 = vadd.f32 %v1783_v36, %v1620_v32 }
 0x466   : > { %1884 = vst [vmem:[#allocation3 + $0x30] sm:$0xff] %v1852_v35  ;;  %v1638_v35 = vld [vmem:[#allocation3 + $0xc8] sm:$0xff] }
 0x467   : > { %1885 = vst [vmem:[#allocation3 + $0x38] sm:$0xff] %v1853_v37  ;;  %v1639_v37 = vld [vmem:[#allocation3 + $0xd0] sm:$0xff] }
 0x469   : > { %v1787_v40 = vpop.f32.mrb[8].mxu1 }
 0x46a   : > { %v1854_v42 = vadd.f32 %v1787_v40, %v1621_v38  ;;  %v1789_v43 = vpop.f32.mrb[9].mxu1  ;;  %v1937_v38 = vld [vmem:[#allocation4 + $0x30] sm:$0xff] }
 0x46b   : > { %v1855_v45 = vadd.f32 %v1789_v43, %v1622_v39  ;;  %v1791_v46 = vpop.f32.mrb[10].mxu1 }
 0x46c   : > { %1886 = vst [vmem:[#allocation3 + $0x40] sm:$0xff] %v1854_v42  ;;  %v1856_v47 = vadd.f32 %v1791_v46, %v1623_v41  ;;  %v1793_v48 = vpop.f32.mrb[11].mxu1  ;;  %v1640_v41 = vld [vmem:[#allocation3 + $0xd8] sm:$0xff]  ;;  %v1935_v42 = vld [vmem:[#allocation4 + $0x20] sm:$0xff] }
 0x46d   : > { %1887 = vst [vmem:[#allocation3 + $0x48] sm:$0xff] %v1855_v45  ;;  %v1857_v49 = vadd.f32 %v1793_v48, %v1624_v44  ;;  %v1938_v46 = vld [vmem:[#allocation4 + $0x38] sm:$0xff] }
 0x46e   : > { %1888 = vst [vmem:[#allocation3 + $0x50] sm:$0xff] %v1856_v47 }
 0x46f   : > { %1889 = vst [vmem:[#allocation3 + $0x58] sm:$0xff] %v1857_v49 }
 0x471   : > { %v1797_v53 = vpop.f32.mrb[12].mxu1 }
 0x472   : > { %v1858_v55 = vadd.f32 %v1797_v53, %v1625_v51  ;;  %v1799_v59 = vpop.f32.mrb[13].mxu1 }
 0x473   : > { %v1859_v62 = vadd.f32 %v1799_v59, %v1626_v52  ;;  %v1801_v56 = vpop.f32.mrb[14].mxu1  ;;  %v1936_v52 = vld [vmem:[#allocation4 + $0x28] sm:$0xff] }
 0x474   : > { %1890 = vst [vmem:[#allocation3 + $0x60] sm:$0xff] %v1858_v55  ;;  %v1860_v63 = vadd.f32 %v1801_v56, %v1627_v54  ;;  %v1803_v0 = vpop.f32.mrb[15].mxu1  ;;  %v1641_v56 = vld [vmem:[#allocation3 + $0xe0] sm:$0xff] }
 0x475   : > { %1891 = vst [vmem:[#allocation3 + $0x68] sm:$0xff] %v1859_v62  ;;  %v1861_v50 = vadd.f32 %v1803_v0, %v1628_v61 }
 0x476   : > { %1892 = vst [vmem:[#allocation3 + $0x70] sm:$0xff] %v1860_v63  ;;  %v1642_v63 = vld [vmem:[#allocation3 + $0xe8] sm:$0xff] }
 0x477   : > { %1893 = vst [vmem:[#allocation3 + $0x78] sm:$0xff] %v1861_v50  ;;  %v1643_v50 = vld [vmem:[#allocation3 + $0xf0] sm:$0xff] }
 0x479   : > { %v1807_v16 = vpop.f32.mrb[16].mxu1 }
 0x47a   : > { %v1862_v3 = vadd.f32 %v1807_v16, %v1629_v1  ;;  %v1809_v57 = vpop.f32.mrb[17].mxu1  ;;  %v1644_v16 = vld [vmem:[#allocation3 + $0xf8] sm:$0xff] }
 0x47b   : > { %v1863_v6 = vadd.f32 %v1809_v57, %v1630_v14  ;;  %v1811_v7 = vpop.f32.mrb[18].mxu1  ;;  %v3840_v8 = vpop.f32.mrb[32].mxu0 }
 0x47c   : > { %1894 = vst [vmem:[#allocation3 + $0x80] sm:$0xff] %v1862_v3  ;;  %v1864_v10 = vadd.f32 %v1811_v7, %v1631_v60  ;;  %v2094_v11 = vadd.f32 %v3840_v8, %v1933_v2  ;;  %v1813_v12 = vpop.f32.mrb[19].mxu1  ;;  %v2029_v13 = vpop.f32.mrb[33].mxu0  ;;  %v1942_v8 = vld [vmem:[#allocation4 + $0x58] sm:$0xff] }
 0x47d   : > { %1895 = vst [vmem:[#allocation3 + $0x88] sm:$0xff] %v1863_v6  ;;  %v1865_v17 = vadd.f32 %v1813_v12, %v1632_v4  ;;  %v2092_v18 = vadd.f32 %v2029_v13, %v1931_v5  ;;  %v3841_v19 = vpop.f32.mrb[34].mxu0  ;;  %v1941_v5 = vld [vmem:[#allocation4 + $0x50] sm:$0xff]  ;;  %v1939_v6 = vld [vmem:[#allocation4 + $0x40] sm:$0xff] }
 0x47e   : > { %1896 = vst [vmem:[#allocation3 + $0x90] sm:$0xff] %v1864_v10  ;;  %2111 = vst.msk [vmem:[#allocation4 + $0x10] sm:$0xff] %vm2108_vm1, %v2094_v11  ;;  %v2095_v15 = vadd.f32 %v3841_v19, %v1934_v9  ;;  %v2032_v20 = vpop.f32.mrb[35].mxu0  ;;  %v1940_v11 = vld [vmem:[#allocation4 + $0x48] sm:$0xff]  ;;  %v1945_v19 = vld [vmem:[#allocation4 + $0x70] sm:$0xff] }
 0x47f   : > { %1897 = vst [vmem:[#allocation3 + $0x98] sm:$0xff] %v1865_v17  ;;  %2109 = vst.msk [vmem:[#allocation4] sm:$0xff] %vm2108_vm1, %v2092_v18  ;;  %v2093_v21 = vadd.f32 %v2032_v20, %v1932_v58 }
 0x480   : > { %2112 = vst.msk [vmem:[#allocation4 + $0x18] sm:$0xff] %vm2108_vm1, %v2095_v15  ;;  %v1943_v15 = vld [vmem:[#allocation4 + $0x60] sm:$0xff] }
 0x481   : > { %2110 = vst.msk [vmem:[#allocation4 + $0x8] sm:$0xff] %vm2108_vm1, %v2093_v21  ;;  %v1817_v24 = vpop.f32.mrb[20].mxu1  ;;  %v1946_v21 = vld [vmem:[#allocation4 + $0x78] sm:$0xff] }
 0x482   : > { %v1866_v26 = vadd.f32 %v1817_v24, %v1633_v22  ;;  %v1819_v27 = vpop.f32.mrb[21].mxu1  ;;  %v1944_v24 = vld [vmem:[#allocation4 + $0x68] sm:$0xff] }
 0x483   : > { %v1867_v29 = vadd.f32 %v1819_v27, %v1634_v23  ;;  %v1821_v30 = vpop.f32.mrb[22].mxu1 }
 0x484   : > { %1898 = vst [vmem:[#allocation3 + $0xa0] sm:$0xff] %v1866_v26  ;;  %v1868_v31 = vadd.f32 %v1821_v30, %v1635_v25  ;;  %v1823_v32 = vpop.f32.mrb[23].mxu1  ;;  %v4179_v30 = vld [vmem:[%s4848_s8 + $0x40] sm:$0xff] (!%p3482_p10)  }
 0x485   : > { %1899 = vst [vmem:[#allocation3 + $0xa8] sm:$0xff] %v1867_v29  ;;  %v1869_v33 = vadd.f32 %v1823_v32, %v1636_v28  ;;  %3718 = vmatprep.subr.bf16.mxu0 (!%p3482_p10), %v4179_v30  ;;  %v4181_v32 = vld [vmem:[%s4848_s8 + $0x48] sm:$0xff] (!%p3482_p10)  }
 0x486   : > { %1900 = vst [vmem:[#allocation3 + $0xb0] sm:$0xff] %v1868_v31  ;;  %v4180_v31 = vld [vmem:[%s4848_s8] sm:$0xff] (!%p3482_p10)  }
 0x487   : > { %1901 = vst [vmem:[#allocation3 + $0xb8] sm:$0xff] %v1869_v33  ;;  %3719 = vmatpush3.bf16.msra.mxu0 (!%p3482_p10), %v4180_v31  ;;  %v4182_v33 = vld [vmem:[%s4848_s8 + $0x8] sm:$0xff] (!%p3482_p10)  }
 0x488   : > { %3720 = vmatprep.subr.bf16.mxu0 (!%p3482_p10), %v4181_v32 }
 0x489   : > { %v1827_v36 = vpop.f32.mrb[24].mxu1 }
 0x48a   : > { %v1870_v39 = vadd.f32 %v1827_v36, %v1637_v34  ;;  %v1829_v40 = vpop.f32.mrb[25].mxu1  ;;  %v4183_v34 = vld [vmem:[%s4848_s8 + $0x50] sm:$0xff] (!%p3482_p10)  }
 0x48b   : > { %v1871_v43 = vadd.f32 %v1829_v40, %v1638_v35  ;;  %v1831_v44 = vpop.f32.mrb[26].mxu1  ;;  %v3844_v45 = vpop.f32.mrb[36].mxu0  ;;  %v2163_v35 = vlaneseq (!%p3482_p10)  ;;  %3721 = vmatpush3.bf16.msra.mxu0 (!%p3482_p10), %v4182_v33  ;;  %v4184_v36 = vld [vmem:[%s4848_s8 + $0x10] sm:$0xff] (!%p3482_p10)   ;;  %v4187_v40 = vld [vmem:[%s4848_s8 + $0x60] sm:$0xff] (!%p3482_p10)  }
 0x48c   : > { %1902 = vst [vmem:[#allocation3 + $0xc0] sm:$0xff] %v1870_v39  ;;  %v1872_v47 = vadd.f32 %v1831_v44, %v1639_v37  ;;  %v2098_v48 = vadd.f32 %v3844_v45, %v1937_v38  ;;  %v1833_v49 = vpop.f32.mrb[27].mxu1  ;;  %v2045_v51 = vpop.f32.mrb[37].mxu0  ;;  %3722 = vmatprep.subr.bf16.mxu0 (!%p3482_p10), %v4183_v34  ;;  %v4185_v37 = vld [vmem:[%s4848_s8 + $0x58] sm:$0xff] (!%p3482_p10)   ;;  %v4189_v44 = vld [vmem:[%s4848_s8 + $0x68] sm:$0xff] (!%p3482_p10)  }
 0x48d   : > { %1903 = vst [vmem:[#allocation3 + $0xc8] sm:$0xff] %v1871_v43  ;;  %v1873_v53 = vadd.f32 %v1833_v49, %v1640_v41  ;;  %v2096_v54 = vadd.f32 %v2045_v51, %v1935_v42  ;;  %v3845_v55 = vpop.f32.mrb[38].mxu0  ;;  %v2164_v38 = vshrl.u32 (!%p3482_p10), %v2163_v35, 7  ;;  %v4186_v39 = vld [vmem:[%s4848_s8 + $0x18] sm:$0xff] (!%p3482_p10)   ;;  %v4188_v43 = vld [vmem:[%s4848_s8 + $0x20] sm:$0xff] (!%p3482_p10)   ;;  %v2130_v45 = vld [vmem:[#allocation3 + $0x8] sm:$0xff] (!%p3482_p10) }
 0x48e   : > { %1904 = vst [vmem:[#allocation3 + $0xd0] sm:$0xff] %v1872_v47  ;;  %2115 = vst.msk [vmem:[#allocation4 + $0x30] sm:$0xff] %vm2108_vm1, %v2098_v48  ;;  %v2099_v59 = vadd.f32 %v3845_v55, %v1938_v46  ;;  %v2048_v61 = vpop.f32.mrb[39].mxu0  ;;  %v2132_v46 = vld [vmem:[#allocation3 + $0x18] sm:$0xff] (!%p3482_p10)  ;;  %v2161_v47 = vld [vmem:[%s5456_s13] sm:$0x3] (!%p3482_p10) }
 0x48f   : > { %1905 = vst [vmem:[#allocation3 + $0xd8] sm:$0xff] %v1873_v53  ;;  %2113 = vst.msk [vmem:[#allocation4 + $0x20] sm:$0xff] %vm2108_vm1, %v2096_v54  ;;  %v2097_v62 = vadd.f32 %v2048_v61, %v1936_v52  ;;  %3723 = vmatpush3.bf16.msra.mxu0 (!%p3482_p10), %v4184_v36  ;;  %v2165_v41 = vsub.s32 (!%p3482_p10), 0, %v2164_v38  ;;  %v2169_v42 = vsub.s32 (!%p3482_p10), 1, %v2164_v38  ;;  %v2129_v51 = vld [vmem:[#allocation3] sm:$0xff] (!%p3482_p10)  ;;  %v2131_v52 = vld [vmem:[#allocation3 + $0x10] sm:$0xff] (!%p3482_p10) }
 0x490   : > { %2116 = vst.msk [vmem:[#allocation4 + $0x38] sm:$0xff] %vm2108_vm1, %v2099_v59  ;;  %3724 = vmatprep.subr.bf16.mxu0 (!%p3482_p10), %v4185_v37  ;;  %v2134_v53 = vld [vmem:[#allocation3 + $0x28] sm:$0xff] (!%p3482_p10)  ;;  %v2136_v54 = vld [vmem:[#allocation3 + $0x38] sm:$0xff] (!%p3482_p10)  ;;  %v2133_v55 = vld [vmem:[#allocation3 + $0x20] sm:$0xff] (!%p3482_p10) }
 0x491   : > { %2114 = vst.msk [vmem:[#allocation4 + $0x28] sm:$0xff] %vm2108_vm1, %v2097_v62  ;;  %v1837_v0 = vpop.f32.mrb[28].mxu1  ;;  %v5116_v48 = vrot.slane (!%p3482_p10), %v2161_v47, %v2165_v41  ;;  %v5118_v49 = vrot.slane (!%p3482_p10), %v2161_v47, %v2169_v42  ;;  %v2135_v59 = vld [vmem:[#allocation3 + $0x30] sm:$0xff] (!%p3482_p10)  ;;  %v4190_v61 = vld [vmem:[%s4848_s8 + $0x28] sm:$0xff] (!%p3482_p10)   ;;  %v2144_v38 = vld [vmem:[#allocation3 + $0x78] sm:$0xff] (!%p3482_p10) }
 0x492   : > { %v1874_v1 = vadd.f32 %v1837_v0, %v1641_v56  ;;  %v1839_v14 = vpop.f32.mrb[29].mxu1  ;;  %v2141_v41 = vld [vmem:[#allocation3 + $0x60] sm:$0xff] (!%p3482_p10)  ;;  %v2143_v47 = vld [vmem:[#allocation3 + $0x70] sm:$0xff] (!%p3482_p10) }
 0x493   : > { %v1875_v60 = vadd.f32 %v1839_v14, %v1642_v63  ;;  %v1841_v2 = vpop.f32.mrb[30].mxu1  ;;  %3725 = vmatpush3.bf16.msra.mxu0 (!%p3482_p10), %v4186_v39  ;;  %v2174_v62 = vadd.f32 (!%p3482_p10), %v5118_v49, %v2130_v45  ;;  %v2176_v56 = vadd.f32 (!%p3482_p10), %v5118_v49, %v2132_v46  ;;  %v2173_v63 = vadd.f32 (!%p3482_p10), %v5116_v48, %v2129_v51  ;;  %v4195_v42 = vld [vmem:[%s5457_s12] sm:$0xff] (!%p3482_p10)  }
 0x494   : > { %1906 = vst [vmem:[#allocation3 + $0xe0] sm:$0xff] %v1874_v1  ;;  %v1876_v3 = vadd.f32 %v1841_v2, %v1643_v50  ;;  %v1843_v57 = vpop.f32.mrb[31].mxu1  ;;  %3726 = vmatprep.subr.bf16.mxu0 (!%p3482_p10), %v4187_v40  ;;  %v2175_v0 = vadd.f32 (!%p3482_p10), %v5116_v48, %v2131_v52  ;;  %v4191_v50 = vld [vmem:[%s4848_s8 + $0x70] sm:$0xff] (!%p3482_p10)   ;;  %v2178_v1 = vadd.f32 (!%p3482_p10), %v5118_v49, %v2134_v53  ;;  %v2138_v2 = vld [vmem:[#allocation3 + $0x48] sm:$0xff] (!%p3482_p10) }
 0x495   : > { %1907 = vst [vmem:[#allocation3 + $0xe8] sm:$0xff] %v1875_v60  ;;  %v1877_v4 = vadd.f32 %v1843_v57, %v1644_v16  ;;  %v2180_v14 = vadd.f32 (!%p3482_p10), %v5118_v49, %v2136_v54  ;;  %v2177_v16 = vadd.f32 (!%p3482_p10), %v5116_v48, %v2133_v55  ;;  %v2179_v60 = vadd.f32 (!%p3482_p10), %v5116_v48, %v2135_v59 }
 0x496   : > { %1908 = vst [vmem:[#allocation3 + $0xf0] sm:$0xff] %v1876_v3  ;;  %v2206_v3 = vsub.f32 (!%p3482_p10), 0.0, %v2174_v62  ;;  %v2208_v57 = vsub.f32 (!%p3482_p10), 0.0, %v2176_v56  ;;  %3854 = vmatprep.subr.bf16.mxu1 (!%p3482_p10), %v4195_v42  ;;  %v2185_v51 = vadd.f32 (!%p3482_p10), %v5116_v48, %v2141_v41 }
 0x497   : > { %1909 = vst [vmem:[#allocation3 + $0xf8] sm:$0xff] %v1877_v4  ;;  %3727 = vmatpush3.bf16.msra.mxu0 (!%p3482_p10), %v4188_v43  ;;  %v2205_v4 = vsub.f32 (!%p3482_p10), 0.0, %v2173_v63  ;;  %v4196_v43 = vld [vmem:[%s5457_s12 + $0x8] sm:$0xff] (!%p3482_p10)   ;;  %3855 = vmatpush3.bf16.msra.mxu1 (!%p3482_p10), %v4195_v42  ;;  %v2187_v63 = vadd.f32 (!%p3482_p10), %v5116_v48, %v2143_v47  ;;  %v2686_v42 = vld [vmem:[#allocation4] sm:$0xff] (!%p3482_p10)  ;;  %v2156_v47 = vld [vmem:[#allocation3 + $0xd8] sm:$0xff] (!%p3482_p10) }
 0x498   : > { %3728 = vmatprep.subr.bf16.mxu0 (!%p3482_p10), %v4189_v44  ;;  %v2188_v44 = vadd.f32 (!%p3482_p10), %v5118_v49, %v2144_v38  ;;  %3856 = vmatprep.subr.bf16.mxu1 (!%p3482_p10), %v4196_v43 }
 0x49a   : > { %v2220_v59 = vsub.f32 (!%p3482_p10), 0.0, %v2188_v44 }
 0x49b   : > { %v3848_v7 = vpop.f32.mrb[32].mxu1  ;;  %3729 = vmatpush3.bf16.msra.mxu0 (!%p3482_p10), %v4190_v61  ;;  %v2146_v61 = vld [vmem:[#allocation3 + $0x88] sm:$0xff] (!%p3482_p10)  ;;  %3857 = vmatpush3.bf16.msra.mxu1 (!%p3482_p10), %v4196_v43 }
 0x49c   : > { %v2102_v9 = vadd.f32 %v3848_v7, %v1941_v5  ;;  %v2061_v10 = vpop.f32.mrb[33].mxu1  ;;  %v2207_v5 = vsub.f32 (!%p3482_p10), 0.0, %v2175_v0  ;;  %v4192_v7 = vld [vmem:[%s4848_s8 + $0x30] sm:$0xff] (!%p3482_p10)   ;;  %3730 = vmatprep.subr.bf16.mxu0 (!%p3482_p10), %v4191_v50  ;;  %v2148_v0 = vld [vmem:[#allocation3 + $0x98] sm:$0xff] (!%p3482_p10)  ;;  %v2145_v50 = vld [vmem:[#allocation3 + $0x80] sm:$0xff] (!%p3482_p10) }
 0x49d   : > { %v2100_v12 = vadd.f32 %v2061_v10, %v1939_v6  ;;  %v3849_v13 = vpop.f32.mrb[34].mxu1  ;;  %v2140_v6 = vld [vmem:[#allocation3 + $0x58] sm:$0xff] (!%p3482_p10)  ;;  %v2209_v10 = vsub.f32 (!%p3482_p10), 0.0, %v2177_v16  ;;  %v2217_v16 = vsub.f32 (!%p3482_p10), 0.0, %v2185_v51 }
 0x49e   : > { %2119 = vst.msk [vmem:[#allocation4 + $0x50] sm:$0xff] %vm2108_vm1, %v2102_v9  ;;  %v2103_v58 = vadd.f32 %v3849_v13, %v1942_v8  ;;  %v2064_v17 = vpop.f32.mrb[35].mxu1  ;;  %v2210_v8 = vsub.f32 (!%p3482_p10), 0.0, %v2178_v1  ;;  %v2212_v9 = vsub.f32 (!%p3482_p10), 0.0, %v2180_v14  ;;  %v3484_v13 = vmul.f32 (!%p3482_p10), -1.442695, %v2206_v3 }
 0x49f   : > { %2117 = vst.msk [vmem:[#allocation4 + $0x40] sm:$0xff] %vm2108_vm1, %v2100_v12  ;;  %v2101_v18 = vadd.f32 %v2064_v17, %v1940_v11  ;;  %v2137_v11 = vld [vmem:[#allocation3 + $0x40] sm:$0xff] (!%p3482_p10)  ;;  %v2139_v12 = vld [vmem:[#allocation3 + $0x50] sm:$0xff] (!%p3482_p10)  ;;  %v3483_v17 = vmul.f32 (!%p3482_p10), -1.442695, %v2205_v4  ;;  %3731 = vmatpush3.bf16.msra.mxu0 (!%p3482_p10), %v4192_v7  ;;  %v2190_v3 = vadd.f32 (!%p3482_p10), %v5118_v49, %v2146_v61  ;;  %v2192_v7 = vadd.f32 (!%p3482_p10), %v5118_v49, %v2148_v0 }
 0x4a0   : > { %2120 = vst.msk [vmem:[#allocation4 + $0x58] sm:$0xff] %vm2108_vm1, %v2103_v58  ;;  %v3486_v58 = vmul.f32 (!%p3482_p10), -1.442695, %v2208_v57  ;;  %4199 = vpow2.f32 (!%p3482_p10), %v3484_v13  ;;  %v3487_v30 = vmul.f32 (!%p3482_p10), -1.442695, %v2209_v10  ;;  %v2147_v57 = vld [vmem:[#allocation3 + $0x90] sm:$0xff] (!%p3482_p10) }
 0x4a1   : > { %2118 = vst.msk [vmem:[#allocation4 + $0x48] sm:$0xff] %vm2108_vm1, %v2101_v18  ;;  %v2182_v18 = vadd.f32 (!%p3482_p10), %v5118_v49, %v2138_v2  ;;  %v2152_v13 = vld [vmem:[#allocation3 + $0xb8] sm:$0xff] (!%p3482_p10) }
 0x4a2   : > { %4201 = vpow2.f32 (!%p3482_p10), %v3486_v58 }
 0x4a3   : > { %4203 = vpow2.f32 (!%p3482_p10), %v3483_v17 }
 0x4aa   : > { %v4200_v46 = vpop.eup (!%p3482_p10), %4199 }
 0x4ab   : > { %v3852_v20 = vpop.f32.mrb[36].mxu1  ;;  %2128 = sbr.rel (%p3482_p10) target bundleno = 1725 (0x6bd), region = 88  ;;  %v2334_v53 = vadd.f32 (!%p3482_p10), 1.0, %v4200_v46 }
 0x4ac   : > { %v2106_v22 = vadd.f32 %v3852_v20, %v1945_v19  ;;  %v2077_v23 = vpop.f32.mrb[37].mxu1  ;;  %v4193_v19 = vld [vmem:[%s4848_s8 + $0x78] sm:$0xff] (!%p3482_p10)   ;;  %v2211_v20 = vsub.f32 (!%p3482_p10), 0.0, %v2179_v60  ;;  %v4202_v52 = vpop.eup (!%p3482_p10), %4201 }
 0x4ad   : > { %v2104_v25 = vadd.f32 %v2077_v23, %v1943_v15  ;;  %v3853_v26 = vpop.f32.mrb[38].mxu1  ;;  %v3485_v15 = vmul.f32 (!%p3482_p10), -1.442695, %v2207_v5  ;;  %v3488_v23 = vmul.f32 (!%p3482_p10), -1.442695, %v2210_v8  ;;  %3732 = vmatprep.subr.bf16.mxu0 (!%p3482_p10), %v4193_v19  ;;  %v4204_v54 = vpop.eup (!%p3482_p10), %4203  ;;  %v2336_v55 = vadd.f32 (!%p3482_p10), 1.0, %v4202_v52 }
 0x4ae   : > { %2123 = vst.msk [vmem:[#allocation4 + $0x70] sm:$0xff] %vm2108_vm1, %v2106_v22  ;;  %v2107_v27 = vadd.f32 %v3853_v26, %v1946_v21  ;;  %v2080_v28 = vpop.f32.mrb[39].mxu1  ;;  %v2184_v21 = vadd.f32 (!%p3482_p10), %v5118_v49, %v2140_v6  ;;  %v2142_v22 = vld [vmem:[#allocation3 + $0x68] sm:$0xff] (!%p3482_p10)  ;;  %v3489_v32 = vmul.f32 (!%p3482_p10), -1.442695, %v2211_v20  ;;  %v2333_v56 = vadd.f32 (!%p3482_p10), 1.0, %v4204_v54 }
 0x4af   : > { %2121 = vst.msk [vmem:[#allocation4 + $0x60] sm:$0xff] %vm2108_vm1, %v2104_v25  ;;  %v2105_v29 = vadd.f32 %v2080_v28, %v1944_v24  ;;  %v3490_v24 = vmul.f32 (!%p3482_p10), -1.442695, %v2212_v9  ;;  %v2214_v25 = vsub.f32 (!%p3482_p10), 0.0, %v2182_v18  ;;  %v2183_v28 = vadd.f32 (!%p3482_p10), %v5116_v48, %v2139_v12  ;;  %v2150_v8 = vld [vmem:[#allocation3 + $0xa8] sm:$0xff] (!%p3482_p10) }
 0x4b0   : > { %2124 = vst.msk [vmem:[#allocation4 + $0x78] sm:$0xff] %vm2108_vm1, %v2107_v27  ;;  %v2216_v26 = vsub.f32 (!%p3482_p10), 0.0, %v2184_v21  ;;  %v2181_v27 = vadd.f32 (!%p3482_p10), %v5116_v48, %v2137_v11  ;;  %v2186_v31 = vadd.f32 (!%p3482_p10), %v5118_v49, %v2142_v22  ;;  %4205 = vpow2.f32 (!%p3482_p10), %v3485_v15 }
 0x4b1   : > { %2122 = vst.msk [vmem:[#allocation4 + $0x68] sm:$0xff] %vm2108_vm1, %v2105_v29  ;;  %v4194_v29 = vld [vmem:[%s4848_s8 + $0x38] sm:$0xff] (!%p3482_p10)   ;;  %v2215_v34 = vsub.f32 (!%p3482_p10), 0.0, %v2183_v28  ;;  %4207 = vpow2.f32 (!%p3482_p10), %v3488_v23  ;;  %v3492_v35 = vmul.f32 (!%p3482_p10), -1.442695, %v2214_v25  ;;  %v2219_v11 = vsub.f32 (!%p3482_p10), 0.0, %v2187_v63 }
 0x4b2   : > { %v2213_v33 = vsub.f32 0.0, %v2181_v27  ;;  %v2218_v36 = vsub.f32 0.0, %v2186_v31  ;;  %4209 = vpow2.f32 %v3490_v24  ;;  %v3494_v37 = vmul.f32 -1.442695, %v2216_v26  ;;  %3733 = vmatpush3.bf16.msra.mxu0 %v4194_v29  ;;  %v2149_v23 = vld [vmem:[#allocation3 + $0xa0] sm:$0xff]  ;;  %v2688_v63 = vld [vmem:[#allocation4 + $0x10] sm:$0xff] }
 0x4b3   : > { %4211 = vpow2.f32 %v3487_v30  ;;  %v3493_v40 = vmul.f32 -1.442695, %v2215_v34  ;;  %v3498_v6 = vmul.f32 -1.442695, %v2220_v59  ;;  %v2189_v12 = vadd.f32 %v5116_v48, %v2145_v50 }
 0x4b4   : > { %v3491_v39 = vmul.f32 -1.442695, %v2213_v33  ;;  %4213 = vpow2.f32 %v3489_v32  ;;  %v3496_v45 = vmul.f32 -1.442695, %v2218_v36  ;;  %v3495_v18 = vmul.f32 -1.442695, %v2217_v16 }
 0x4b5   : > { %4215 = vpow2.f32 %v3492_v35  ;;  %v2191_v19 = vadd.f32 %v5116_v48, %v2147_v57  ;;  %v2222_v21 = vsub.f32 0.0, %v2190_v3  ;;  %v2194_v22 = vadd.f32 %v5118_v49, %v2150_v8  ;;  %v2151_v32 = vld [vmem:[#allocation3 + $0xb0] sm:$0xff]  ;;  %v2689_v16 = vld [vmem:[#allocation4 + $0x18] sm:$0xff] }
 0x4b6   : > { %4217 = vpow2.f32 %v3494_v37  ;;  %v2224_v26 = vsub.f32 0.0, %v2192_v7  ;;  %v2196_v27 = vadd.f32 %v5118_v49, %v2152_v13  ;;  %v3497_v30 = vmul.f32 -1.442695, %v2219_v11  ;;  %v2154_v37 = vld [vmem:[#allocation3 + $0xc8] sm:$0xff] }
 0x4b7   : > { %4219 = vpow2.f32 %v3491_v39  ;;  %v2221_v31 = vsub.f32 0.0, %v2189_v12  ;;  %v2223_v35 = vsub.f32 0.0, %v2191_v19  ;;  %v2193_v36 = vadd.f32 %v5116_v48, %v2149_v23 }
 0x4b8   : > { %4221 = vpow2.f32 %v3493_v40  ;;  %v3500_v40 = vmul.f32 -1.442695, %v2222_v21  ;;  %v2226_v41 = vsub.f32 0.0, %v2194_v22  ;;  %v3502_v44 = vmul.f32 -1.442695, %v2224_v26 }
 0x4b9   : > { %4223 = vpow2.f32 %v3496_v45  ;;  %v2228_v45 = vsub.f32 0.0, %v2196_v27  ;;  %v2195_v46 = vadd.f32 %v5116_v48, %v2151_v32  ;;  %v2198_v54 = vadd.f32 %v5118_v49, %v2154_v37 }
 0x4ba   : > { %v4206_v62 = vpop.eup %4205  ;;  %4225 = vrcp.f32 %v2334_v53  ;;  %v3499_v53 = vmul.f32 -1.442695, %v2221_v31  ;;  %v3501_v61 = vmul.f32 -1.442695, %v2223_v35  ;;  %v2705_v13 = vmul.f32 0.0051020407, %v2689_v16 }
 0x4bb   : > { %v4208_v1 = vpop.eup %4207  ;;  %4227 = vrcp.f32 %v2336_v55  ;;  %v2335_v14 = vadd.f32 1.0, %v4206_v62  ;;  %v2687_v55 = vld [vmem:[#allocation4 + $0x8] sm:$0xff]  ;;  %v2225_v62 = vsub.f32 0.0, %v2193_v36  ;;  %v3506_v3 = vmul.f32 -1.442695, %v2228_v45  ;;  %v2153_v36 = vld [vmem:[#allocation3 + $0xc0] sm:$0xff] }
 0x4bc   : > { %v4210_v60 = vpop.eup %4209  ;;  %4229 = vrcp.f32 %v2333_v56  ;;  %v2338_v2 = vadd.f32 1.0, %v4208_v1  ;;  %v2702_v56 = vmul.f32 0.0051020407, %v2686_v42  ;;  %v3504_v1 = vmul.f32 -1.442695, %v2226_v41  ;;  %v2158_v45 = vld [vmem:[#allocation3 + $0xe8] sm:$0xff] }
 0x4bd   : > { %v4212_v4 = vpop.eup %4211  ;;  %4231 = vrcp.f32 %v2335_v14  ;;  %v2340_v5 = vadd.f32 1.0, %v4210_v60  ;;  %v2200_v14 = vadd.f32 %v5118_v49, %v2156_v47  ;;  %v2690_v60 = vld [vmem:[#allocation4 + $0x20] sm:$0xff]  ;;  %v2227_v57 = vsub.f32 0.0, %v2195_v46 }
 0x4be   : > { %v4214_v9 = vpop.eup %4213  ;;  %4233 = vrcp.f32 %v2338_v2  ;;  %v2337_v10 = vadd.f32 1.0, %v4212_v4  ;;  %v2703_v4 = vmul.f32 0.0051020407, %v2687_v55  ;;  %v2230_v8 = vsub.f32 0.0, %v2198_v54 }
 0x4bf   : > { %v4216_v58 = vpop.eup %4215  ;;  %4235 = vrcp.f32 %v2340_v5  ;;  %v2339_v17 = vadd.f32 1.0, %v4214_v9  ;;  %v2691_v5 = vld [vmem:[#allocation4 + $0x28] sm:$0xff]  ;;  %v2704_v9 = vmul.f32 0.0051020407, %v2688_v63  ;;  %v3503_v11 = vmul.f32 -1.442695, %v2225_v62 }
 0x4c0   : > { %v4218_v15 = vpop.eup %4217  ;;  %4237 = vrcp.f32 %v2337_v10  ;;  %v2342_v20 = vadd.f32 1.0, %v4216_v58  ;;  %v2718_v12 = vpack.c.bf16 %v2703_v4, %v2702_v56  ;;  %v2692_v58 = vld [vmem:[#allocation4 + $0x30] sm:$0xff]  ;;  %v2706_v19 = vmul.f32 0.0051020407, %v2690_v60 }
 0x4c1   : > { %v4220_v24 = vpop.eup %4219  ;;  %4239 = vrcp.f32 %v2339_v17  ;;  %v2344_v25 = vadd.f32 1.0, %v4218_v15  ;;  %v2707_v15 = vmul.f32 0.0051020407, %v2691_v5  ;;  %v3505_v22 = vmul.f32 -1.442695, %v2227_v57  ;;  %v2159_v63 = vld [vmem:[#allocation3 + $0xf0] sm:$0xff] }
 0x4c2   : > { %v4222_v28 = vpop.eup %4221  ;;  %4241 = vrcp.f32 %v2342_v20  ;;  %v2341_v29 = vadd.f32 1.0, %v4220_v24  ;;  %v2693_v20 = vld [vmem:[#allocation4 + $0x38] sm:$0xff]  ;;  %3858 = vmatprep.mubr.msk.bf16.mxu1 %vm2108_vm1, %v2718_v12  ;;  %v2719_v23 = vpack.c.bf16 %v2705_v13, %v2704_v9  ;;  %v3508_v26 = vmul.f32 -1.442695, %v2230_v8 }
 0x4c3   : > { %v4224_v33 = vpop.eup %4223  ;;  %4243 = vrcp.f32 %v2344_v25  ;;  %v2343_v34 = vadd.f32 1.0, %v4222_v28  ;;  %v2720_v27 = vpack.c.bf16 %v2707_v15, %v2706_v19  ;;  %v2709_v31 = vmul.f32 0.0051020407, %v2693_v20 }
 0x4c4   : > { %v4226_v38 = vpop.eup %4225  ;;  %4245 = vrcp.f32 %v2341_v29  ;;  %v2346_v39 = vadd.f32 1.0, %v4224_v33  ;;  %3859 = vmatmul.mubr.msk.bf16.vlgmr.msra.gmra.mrb[0].mxu1 %vm2108_vm1, %v2719_v23  ;;  %v2202_v56 = vadd.f32 %v5118_v49, %v2158_v45  ;;  %v2203_v5 = vadd.f32 %v5116_v48, %v2159_v63 }
 0x4c5   : > { %v4228_v43 = vpop.eup %4227  ;;  %4247 = vrcp.f32 %v2343_v34  ;;  %3862 = vmatprep.mubr.msk.bf16.mxu1 %vm2108_vm1, %v2720_v27 }
 0x4c6   : > { %v4230_v51 = vpop.eup %4229  ;;  %v2430_v52 = vpack.c.bf16 %v4228_v43, %v4226_v38  ;;  %4249 = vpow2.f32 %v3498_v6  ;;  %v2234_v8 = vsub.f32 0.0, %v2202_v56  ;;  %v2235_v15 = vsub.f32 0.0, %v2203_v5  ;;  %v2697_v5 = vld [vmem:[#allocation4 + $0x58] sm:$0xff] }
 0x4c7   : > { %v4232_v59 = vpop.eup %4231  ;;  %4251 = vrcp.f32 %v2346_v39 }
 0x4c8   : > { %v4234_v0 = vpop.eup %4233  ;;  %2605 = vmatprep.mubr.bf16.mxu0 %v2430_v52  ;;  %v2429_v50 = vpack.c.bf16 %v4232_v59, %v4230_v51  ;;  %4253 = vpow2.f32 %v3495_v18  ;;  %v2232_v18 = vsub.f32 0.0, %v2200_v14  ;;  %v2160_v51 = vld [vmem:[#allocation3 + $0xf8] sm:$0xff]  ;;  %v2157_v59 = vld [vmem:[#allocation3 + $0xe0] sm:$0xff] }
 0x4c9   : > { %v4236_v2 = vpop.eup %4235  ;;  %4255 = vpow2.f32 %v3497_v30  ;;  %v2708_v30 = vmul.f32 0.0051020407, %v2692_v58  ;;  %v2204_v14 = vadd.f32 %v5118_v49, %v2160_v51 }
 0x4ca   : > { %v4238_v6 = vpop.eup %4237  ;;  %2606 = vmatmul.mubr.bf16.vlgmr.msra.gmra.mrb[0].mxu0 %v2429_v50  ;;  %v2432_v7 = vpack.c.bf16 %v4236_v2, %v4234_v0  ;;  %4257 = vpow2.f32 %v3500_v40  ;;  %v3510_v33 = vmul.f32 -1.442695, %v2232_v18  ;;  %v2155_v40 = vld [vmem:[#allocation3 + $0xd0] sm:$0xff]  ;;  %v2201_v2 = vadd.f32 %v5116_v48, %v2157_v59 }
 0x4cb   : > { %v4240_v10 = vpop.eup %4239  ;;  %4259 = vpow2.f32 %v3502_v44  ;;  %v2721_v41 = vpack.c.bf16 %v2709_v31, %v2708_v30  ;;  %v2197_v44 = vadd.f32 %v5116_v48, %v2153_v36  ;;  %v2199_v55 = vadd.f32 %v5116_v48, %v2155_v40 }
 0x4cc   : > { %v4242_v17 = vpop.eup %4241  ;;  %2613 = vmatprep.mubr.bf16.mxu0 %v2432_v7  ;;  %4261 = vpow2.f32 %v3499_v53  ;;  %v2431_v25 = vpack.c.bf16 %v4240_v10, %v4238_v6  ;;  %v2233_v58 = vsub.f32 0.0, %v2201_v2  ;;  %v2695_v2 = vld [vmem:[#allocation4 + $0x48] sm:$0xff] }
 0x4cd   : > { %v4244_v21 = vpop.eup %4243  ;;  %4263 = vpow2.f32 %v3501_v61  ;;  %3863 = vmatmul.mubr.msk.bf16.gmra.mrb[4].mxu1 %vm2108_vm1, %v2721_v41  ;;  %v2231_v4 = vsub.f32 0.0, %v2199_v55 }
 0x4ce   : > { %v4246_v24 = vpop.eup %4245  ;;  %4265 = vpow2.f32 %v3504_v1  ;;  %v2434_v29 = vpack.c.bf16 %v4244_v21, %v4242_v17  ;;  %v2229_v1 = vsub.f32 0.0, %v2197_v44  ;;  %v3512_v21 = vmul.f32 -1.442695, %v2234_v8 }
 0x4cf   : > { %v4248_v28 = vpop.eup %4247  ;;  %4267 = vpow2.f32 %v3506_v3  ;;  %v3509_v19 = vmul.f32 -1.442695, %v2231_v4  ;;  %v2696_v4 = vld [vmem:[#allocation4 + $0x50] sm:$0xff] }
 0x4d0   : > { %v4250_v32 = vpop.eup %4249  ;;  %4269 = vpow2.f32 %v3503_v11  ;;  %v2433_v53 = vpack.c.bf16 %v4248_v28, %v4246_v24  ;;  %v3507_v49 = vmul.f32 -1.442695, %v2229_v1  ;;  %v2236_v11 = vsub.f32 0.0, %v2204_v14 }
 0x4d1   : > { %v5160_v34 = vpop.eup %4251  ;;  %v2348_v35 = vadd.f32 1.0, %v4250_v32  ;;  %4271 = vpow2.f32 %v3505_v22  ;;  %v3513_v28 = vmul.f32 -1.442695, %v2235_v15 }
 0x4d2   : > { %v4254_v37 = vpop.eup %4253  ;;  %2614 = vmatmul.mubr.bf16.gmra.mrb[4].mxu0 %v2431_v25  ;;  %4273 = vpow2.f32 %v3508_v26  ;;  %v3514_v23 = vmul.f32 -1.442695, %v2236_v11  ;;  %v3511_v26 = vmul.f32 -1.442695, %v2233_v58  ;;  %v2701_v58 = vld [vmem:[#allocation4 + $0x78] sm:$0xff] }
 0x4d3   : > { %v4256_v38 = vpop.eup %4255  ;;  %2621 = vmatprep.mubr.bf16.mxu0 %v2434_v29  ;;  %4275 = vrcp.f32 %v2348_v35  ;;  %v2345_v39 = vadd.f32 1.0, %v4254_v37 }
 0x4d4   : > { %v4258_v42 = vpop.eup %4257  ;;  %v2347_v43 = vadd.f32 1.0, %v4256_v38  ;;  %4277 = vpow2.f32 %v3510_v33 }
 0x4d5   : > { %v4260_v46 = vpop.eup %4259  ;;  %4279 = vrcp.f32 %v2345_v39  ;;  %v2350_v47 = vadd.f32 1.0, %v4258_v42 }
 0x4d6   : > { %v4262_v52 = vpop.eup %4261  ;;  %4281 = vrcp.f32 %v2347_v43  ;;  %v2352_v54 = vadd.f32 1.0, %v4260_v46 }
 0x4d7   : > { %v4264_v61 = vpop.eup %4263  ;;  %4283 = vrcp.f32 %v2350_v47  ;;  %v2349_v62 = vadd.f32 1.0, %v4262_v52 }
 0x4d8   : > { %v4266_v0 = vpop.eup %4265  ;;  %4285 = vrcp.f32 %v2352_v54  ;;  %v2351_v50 = vadd.f32 1.0, %v4264_v61 }
 0x4d9   : > { %v4268_v16 = vpop.eup %4267  ;;  %4287 = vrcp.f32 %v2349_v62  ;;  %v2354_v60 = vadd.f32 1.0, %v4266_v0 }
 0x4da   : > { %v4270_v3 = vpop.eup %4269  ;;  %2622 = vmatmul.mubr.bf16.gmra.mrb[8].mxu0 %v2433_v53  ;;  %4289 = vrcp.f32 %v2351_v50  ;;  %v2356_v57 = vadd.f32 1.0, %v4268_v16 }
 0x4db   : > { %v4272_v6 = vpop.eup %4271  ;;  %4291 = vrcp.f32 %v2354_v60  ;;  %v2353_v7 = vadd.f32 1.0, %v4270_v3  ;;  %v2694_v60 = vld [vmem:[#allocation4 + $0x40] sm:$0xff] }
 0x4dc   : > { %v4274_v9 = vpop.eup %4273  ;;  %4293 = vrcp.f32 %v2356_v57  ;;  %v2355_v10 = vadd.f32 1.0, %v4272_v6  ;;  %v2710_v3 = vmul.f32 0.0051020407, %v2694_v60  ;;  %v2711_v57 = vmul.f32 0.0051020407, %v2695_v2 }
 0x4dd   : > { %v4276_v12 = vpop.eup %4275  ;;  %4295 = vrcp.f32 %v2353_v7  ;;  %v2358_v13 = vadd.f32 1.0, %v4274_v9  ;;  %v2712_v6 = vmul.f32 0.0051020407, %v2696_v4  ;;  %v2713_v7 = vmul.f32 0.0051020407, %v2697_v5 }
 0x4de   : > { %v4278_v17 = vpop.eup %4277  ;;  %v2436_v18 = vpack.c.bf16 %v4276_v12, %v5160_v34  ;;  %4297 = vrcp.f32 %v2355_v10  ;;  %v2722_v8 = vpack.c.bf16 %v2711_v57, %v2710_v3  ;;  %v2698_v10 = vld [vmem:[#allocation4 + $0x60] sm:$0xff] }
 0x4df   : > { %v4280_v48 = vpop.eup %4279  ;;  %v2360_v20 = vadd.f32 1.0, %v4278_v17  ;;  %4299 = vrcp.f32 %v2358_v13  ;;  %v2723_v9 = vpack.c.bf16 %v2713_v7, %v2712_v6  ;;  %v2714_v11 = vmul.f32 0.0051020407, %v2698_v10  ;;  %v2700_v13 = vld [vmem:[#allocation4 + $0x70] sm:$0xff] }
 0x4e0   : > { %v4282_v22 = vpop.eup %4281  ;;  %2629 = vmatprep.mubr.bf16.mxu0 %v2436_v18  ;;  %4301 = vpow2.f32 %v3507_v49  ;;  %3866 = vmatprep.mubr.msk.bf16.mxu1 %vm2108_vm1, %v2722_v8  ;;  %v2699_v49 = vld [vmem:[#allocation4 + $0x68] sm:$0xff]  ;;  %v2716_v17 = vmul.f32 0.0051020407, %v2700_v13  ;;  %v2717_v18 = vmul.f32 0.0051020407, %v2701_v58 }
 0x4e1   : > { %v4284_v24 = vpop.eup %4283  ;;  %v2435_v25 = vpack.c.bf16 %v4282_v22, %v4280_v48  ;;  %4303 = vrcp.f32 %v2360_v20  ;;  %3867 = vmatmul.mubr.msk.bf16.gmra.mrb[8].mxu1 %vm2108_vm1, %v2723_v9  ;;  %v2715_v12 = vmul.f32 0.0051020407, %v2699_v49  ;;  %v4197_v48 = vld [vmem:[%s5458_s18] sm:$0xff]   ;;  %v4198_v20 = vld [vmem:[%s5459_s7 + $0x8] sm:$0xff]  }
 0x4e2   : > { %v4286_v27 = vpop.eup %4285  ;;  %4305 = vpow2.f32 %v3509_v19  ;;  %v2725_v15 = vpack.c.bf16 %v2717_v18, %v2716_v17  ;;  %3874 = vmatprep.subr.bf16.mxu1 %v4197_v48 }
 0x4e3   : > { %v4288_v29 = vpop.eup %4287  ;;  %2630 = vmatmul.mubr.bf16.gmra.mrb[12].mxu0 %v2435_v25  ;;  %v2438_v30 = vpack.c.bf16 %v4286_v27, %v4284_v24  ;;  %4307 = vpow2.f32 %v3512_v21  ;;  %v2724_v19 = vpack.c.bf16 %v2715_v12, %v2714_v11  ;;  %3875 = vmatpush3.bf16.msra.mxu1 %v4197_v48 }
 0x4e4   : > { %v4290_v31 = vpop.eup %4289  ;;  %4309 = vpow2.f32 %v3514_v23  ;;  %3876 = vmatprep.subr.bf16.mxu1 %v4198_v20 }
 0x4e5   : > { %v4292_v32 = vpop.eup %4291  ;;  %2637 = vmatprep.mubr.bf16.mxu0 %v2438_v30  ;;  %4311 = vpow2.f32 %v3511_v26  ;;  %v2437_v35 = vpack.c.bf16 %v4290_v31, %v4288_v29  ;;  %3870 = vmatprep.mubr.msk.bf16.mxu1 %vm2108_vm1, %v2724_v19  ;;  %v5183_v26 = vld [vmem:[%s5460_s0] ss:$0 sm:$0xff] }
 0x4e6   : > { %v4294_v33 = vpop.eup %4293  ;;  %4313 = vpow2.f32 %v3513_v28 }
 0x4e7   : > { %v4296_v34 = vpop.eup %4295  ;;  %v2440_v37 = vpack.c.bf16 %v4294_v33, %v4292_v32  ;;  %3877 = vmatpush3.bf16.msra.mxu1 %v4198_v20 }
 0x4e8   : > { %v4298_v36 = vpop.eup %4297 }
 0x4e9   : > { %v4300_v38 = vpop.eup %4299  ;;  %v2439_v51 = vpack.c.bf16 %v4298_v36, %v4296_v34  ;;  %3871 = vmatmul.mubr.msk.bf16.gmra.mrb[12].mxu1 %vm2108_vm1, %v2725_v15 }
 0x4ea   : > { %v4302_v39 = vpop.eup %4301 }
 0x4eb   : > { %v4304_v40 = vpop.eup %4303  ;;  %2638 = vmatmul.mubr.bf16.gmra.mrb[16].mxu0 %v2437_v35  ;;  %v2357_v41 = vadd.f32 1.0, %v4302_v39 }
 0x4ec   : > { %v4306_v42 = vpop.eup %4305  ;;  %2645 = vmatprep.mubr.bf16.mxu0 %v2440_v37  ;;  %v2442_v54 = vpack.c.bf16 %v4304_v40, %v4300_v38 }
 0x4ed   : > { %v4308_v43 = vpop.eup %4307  ;;  %v2359_v44 = vadd.f32 1.0, %v4306_v42  ;;  %4315 = vrcp.f32 %v2357_v41 }
 0x4ee   : > { %v4310_v45 = vpop.eup %4309  ;;  %v2362_v46 = vadd.f32 1.0, %v4308_v43 }
 0x4ef   : > { %v4312_v47 = vpop.eup %4311  ;;  %4317 = vrcp.f32 %v2359_v44  ;;  %v2364_v52 = vadd.f32 1.0, %v4310_v45 }
 0x4f0   : > { %v4314_v53 = vpop.eup %4313  ;;  %4319 = vrcp.f32 %v2362_v46  ;;  %v2361_v55 = vadd.f32 1.0, %v4312_v47 }
 0x4f1   : > { %4321 = vrcp.f32 %v2364_v52  ;;  %v2363_v59 = vadd.f32 1.0, %v4314_v53 }
 0x4f2   : > { %4323 = vrcp.f32 %v2361_v55 }
 0x4f3   : > { %2646 = vmatmul.mubr.bf16.gmra.mrb[20].mxu0 %v2439_v51  ;;  %4325 = vrcp.f32 %v2363_v59 }
 0x4f4   : > { %2653 = vmatprep.mubr.bf16.mxu0 %v2442_v54 }
 0x4f7   : > { %v4316_v61 = vpop.eup %4315 }
 0x4f9   : > { %v4318_v62 = vpop.eup %4317 }
 0x4fa   : > { %v4320_v56 = vpop.eup %4319  ;;  %v2441_v63 = vpack.c.bf16 %v4318_v62, %v4316_v61 }
 0x4fb   : > { %v4322_v0 = vpop.eup %4321 }
 0x4fc   : > { %v4324_v50 = vpop.eup %4323  ;;  %2654 = vmatmul.mubr.bf16.gmra.mrb[24].mxu0 %v2441_v63  ;;  %v2444_v1 = vpack.c.bf16 %v4322_v0, %v4320_v56 }
 0x4fd   : > { %v4326_v14 = vpop.eup %4325 }
 0x4fe   : > { %2661 = vmatprep.mubr.bf16.mxu0 %v2444_v1  ;;  %v2443_v16 = vpack.c.bf16 %v4326_v14, %v4324_v50 }
 0x504   : > { %2662 = vmatmul.mubr.bf16.gmra.mrb[28].mxu0 %v2443_v16 }
 0x597   : > { %v3860_v28 = vpop.f32.mrb[0].mxu1 }
 0x598   : > { %v2816_v31 = vadd.f32 %v3860_v28, %v5183_v26  ;;  %v2807_v32 = vpop.f32.mrb[1].mxu1 }
 0x599   : > { %v2808_v33 = vadd.f32 %v5183_v26, %v2807_v32  ;;  %v3861_v34 = vpop.f32.mrb[2].mxu1 }
 0x59a   : > { %v3024_v37 = vmax.f32 %v2816_v31, 0.0  ;;  %v2819_v38 = vadd.f32 %v3861_v34, %v5183_v26  ;;  %v2810_v39 = vpop.f32.mrb[3].mxu1 }
 0x59b   : > { %v3022_v41 = vmax.f32 %v2808_v33, 0.0  ;;  %v2811_v42 = vadd.f32 %v5183_v26, %v2810_v39 }
 0x59c   : > { %3040 = vst.msk [vmem:[%s4863_s2 + $0x10] sm:$0xff] %vm2108_vm1, %v3024_v37  ;;  %v3025_v45 = vmax.f32 %v2819_v38, 0.0 }
 0x59d   : > { %v3734_v21 = vpop.f32.mrb[0].mxu0  ;;  %3038 = vst.msk [vmem:[%s4863_s2] sm:$0xff] %vm2108_vm1, %v3022_v41  ;;  %v3023_v47 = vmax.f32 %v2811_v42, 0.0 }
 0x59e   : > { %v3735_v22 = vpop.f32.mrb[1].mxu0  ;;  %3041 = vst.msk [vmem:[%s4863_s2 + $0x18] sm:$0xff] %vm2108_vm1, %v3025_v45 }
 0x59f   : > { %v3736_v23 = vadd.f32 %v3735_v22, %v3734_v21  ;;  %v3737_v24 = vpop.f32.mrb[2].mxu0  ;;  %3039 = vst.msk [vmem:[%s4863_s2 + $0x8] sm:$0xff] %vm2108_vm1, %v3023_v47 }
 0x5a0   : > { %v3738_v25 = vpop.f32.mrb[3].mxu0  ;;  %v3864_v52 = vpop.f32.mrb[4].mxu1 }
 0x5a1   : > { %v3739_v27 = vadd.f32 %v3738_v25, %v3737_v24  ;;  %v2670_v29 = vmul.f32 0.0051020407, %v3736_v23  ;;  %v2832_v55 = vadd.f32 %v3864_v52, %v5183_v26  ;;  %v2823_v59 = vpop.f32.mrb[5].mxu1 }
 0x5a2   : > { %v2824_v61 = vadd.f32 %v5183_v26, %v2823_v59  ;;  %v3865_v62 = vpop.f32.mrb[6].mxu1 }
 0x5a3   : > { %v2671_v30 = vmul.f32 0.0051020407, %v3739_v27  ;;  %v3028_v0 = vmax.f32 %v2832_v55, 0.0  ;;  %v2835_v50 = vadd.f32 %v3865_v62, %v5183_v26  ;;  %v2826_v1 = vpop.f32.mrb[7].mxu1 }
 0x5a4   : > { %v3026_v16 = vmax.f32 %v2824_v61, 0.0  ;;  %v2827_v60 = vadd.f32 %v5183_v26, %v2826_v1 }
 0x5a5   : > { %v2870_v35 = vpack.c.bf16 %v2671_v30, %v2670_v29  ;;  %v3740_v36 = vpop.f32.mrb[4].mxu0  ;;  %3044 = vst.msk [vmem:[%s4863_s2 + $0x30] sm:$0xff] %vm2108_vm1, %v3028_v0  ;;  %v3029_v57 = vmax.f32 %v2835_v50, 0.0 }
 0x5a6   : > { %v3741_v40 = vpop.f32.mrb[5].mxu0  ;;  %3042 = vst.msk [vmem:[%s4863_s2 + $0x20] sm:$0xff] %vm2108_vm1, %v3026_v16  ;;  %v3027_v5 = vmax.f32 %v2827_v60, 0.0 }
 0x5a7   : > { %v3742_v43 = vadd.f32 %v3741_v40, %v3740_v36  ;;  %v3743_v44 = vpop.f32.mrb[6].mxu0  ;;  %3878 = vmatprep.mubr.msk.bf16.mxu1 %vm2108_vm1, %v2870_v35  ;;  %3045 = vst.msk [vmem:[%s4863_s2 + $0x38] sm:$0xff] %vm2108_vm1, %v3029_v57 }
 0x5a8   : > { %v3744_v46 = vpop.f32.mrb[7].mxu0  ;;  %3043 = vst.msk [vmem:[%s4863_s2 + $0x28] sm:$0xff] %vm2108_vm1, %v3027_v5 }
 0x5a9   : > { %v3745_v51 = vadd.f32 %v3744_v46, %v3743_v44  ;;  %v2672_v53 = vmul.f32 0.0051020407, %v3742_v43 }
 0x5ab   : > { %v2673_v54 = vmul.f32 0.0051020407, %v3745_v51 }
 0x5ad   : > { %v2871_v56 = vpack.c.bf16 %v2673_v54, %v2672_v53  ;;  %v3746_v63 = vpop.f32.mrb[8].mxu0 }
 0x5ae   : > { %v3747_v14 = vpop.f32.mrb[9].mxu0 }
 0x5af   : > { %v3748_v2 = vadd.f32 %v3747_v14, %v3746_v63  ;;  %v3749_v3 = vpop.f32.mrb[10].mxu0  ;;  %3879 = vmatmul.mubr.msk.bf16.vlgmr.msra.gmra.mrb[16].mxu1 %vm2108_vm1, %v2871_v56 }
 0x5b0   : > { %v3750_v4 = vpop.f32.mrb[11].mxu0 }
 0x5b1   : > { %v3751_v6 = vadd.f32 %v3750_v4, %v3749_v3  ;;  %v2674_v7 = vmul.f32 0.0051020407, %v3748_v2 }
 0x5b3   : > { %v2675_v8 = vmul.f32 0.0051020407, %v3751_v6 }
 0x5b4   : > { %v3868_v62 = vpop.f32.mrb[8].mxu1 }
 0x5b5   : > { %v2872_v9 = vpack.c.bf16 %v2675_v8, %v2674_v7  ;;  %v2848_v56 = vadd.f32 %v3868_v62, %v5183_v26  ;;  %v2839_v63 = vpop.f32.mrb[9].mxu1 }
 0x5b6   : > { %v3752_v10 = vpop.f32.mrb[12].mxu0  ;;  %v2840_v0 = vadd.f32 %v5183_v26, %v2839_v63  ;;  %v3869_v50 = vpop.f32.mrb[10].mxu1 }
 0x5b7   : > { %v3753_v49 = vpop.f32.mrb[13].mxu0  ;;  %3882 = vmatprep.mubr.msk.bf16.mxu1 %vm2108_vm1, %v2872_v9  ;;  %v3032_v1 = vmax.f32 %v2848_v56, 0.0  ;;  %v2851_v14 = vadd.f32 %v3869_v50, %v5183_v26  ;;  %v2842_v16 = vpop.f32.mrb[11].mxu1 }
 0x5b8   : > { %v3754_v11 = vadd.f32 %v3753_v49, %v3752_v10  ;;  %v3755_v12 = vpop.f32.mrb[14].mxu0  ;;  %v3030_v60 = vmax.f32 %v2840_v0, 0.0  ;;  %v2843_v2 = vadd.f32 %v5183_v26, %v2842_v16 }
 0x5b9   : > { %v3756_v13 = vpop.f32.mrb[15].mxu0  ;;  %3048 = vst.msk [vmem:[%s4863_s2 + $0x50] sm:$0xff] %vm2108_vm1, %v3032_v1  ;;  %v3033_v3 = vmax.f32 %v2851_v14, 0.0 }
 0x5ba   : > { %v3757_v58 = vadd.f32 %v3756_v13, %v3755_v12  ;;  %v2676_v17 = vmul.f32 0.0051020407, %v3754_v11  ;;  %3046 = vst.msk [vmem:[%s4863_s2 + $0x40] sm:$0xff] %vm2108_vm1, %v3030_v60  ;;  %v3031_v57 = vmax.f32 %v2843_v2, 0.0 }
 0x5bb   : > { %3049 = vst.msk [vmem:[%s4863_s2 + $0x58] sm:$0xff] %vm2108_vm1, %v3033_v3 }
 0x5bc   : > { %v2677_v18 = vmul.f32 0.0051020407, %v3757_v58  ;;  %3047 = vst.msk [vmem:[%s4863_s2 + $0x48] sm:$0xff] %vm2108_vm1, %v3031_v57  ;;  %v3872_v4 = vpop.f32.mrb[12].mxu1 }
 0x5bd   : > { %v2864_v5 = vadd.f32 %v3872_v4, %v5183_v26  ;;  %v2855_v6 = vpop.f32.mrb[13].mxu1 }
 0x5be   : > { %v2873_v19 = vpack.c.bf16 %v2677_v18, %v2676_v17  ;;  %v3758_v15 = vpop.f32.mrb[16].mxu0  ;;  %v2856_v7 = vadd.f32 %v5183_v26, %v2855_v6  ;;  %v3873_v8 = vpop.f32.mrb[14].mxu1  ;;  %v3542_v17 = vld [vmem:[%s5461_s16] ss:$0 sm:$0xff] }
 0x5bf   : > { %v3759_v48 = vpop.f32.mrb[17].mxu0  ;;  %v3036_v9 = vmax.f32 %v2864_v5, 0.0  ;;  %v2867_v10 = vadd.f32 %v3873_v8, %v5183_v26  ;;  %v2858_v49 = vpop.f32.mrb[15].mxu1 }
 0x5c0   : > { %v3760_v20 = vadd.f32 %v3759_v48, %v3758_v15  ;;  %v3761_v21 = vpop.f32.mrb[18].mxu0  ;;  %3883 = vmatmul.mubr.msk.bf16.gmra.mrb[20].mxu1 %vm2108_vm1, %v2873_v19  ;;  %v3034_v11 = vmax.f32 %v2856_v7, 0.0  ;;  %v2859_v12 = vadd.f32 %v5183_v26, %v2858_v49 }
 0x5c1   : > { %v3762_v22 = vpop.f32.mrb[19].mxu0  ;;  %3052 = vst.msk [vmem:[%s4863_s2 + $0x70] sm:$0xff] %vm2108_vm1, %v3036_v9  ;;  %v3037_v13 = vmax.f32 %v2867_v10, 0.0 }
 0x5c2   : > { %v3763_v23 = vadd.f32 %v3762_v22, %v3761_v21  ;;  %v2678_v24 = vmul.f32 0.0051020407, %v3760_v20  ;;  %3050 = vst.msk [vmem:[%s4863_s2 + $0x60] sm:$0xff] %vm2108_vm1, %v3034_v11  ;;  %v3035_v58 = vmax.f32 %v2859_v12, 0.0 }
 0x5c3   : > { %3053 = vst.msk [vmem:[%s4863_s2 + $0x78] sm:$0xff] %vm2108_vm1, %v3037_v13 }
 0x5c4   : > { %v2679_v25 = vmul.f32 0.0051020407, %v3763_v23  ;;  %3051 = vst.msk [vmem:[%s4863_s2 + $0x68] sm:$0xff] %vm2108_vm1, %v3035_v58 }
 0x5c6   : > { %v2874_v27 = vpack.c.bf16 %v2679_v25, %v2678_v24  ;;  %v3764_v28 = vpop.f32.mrb[20].mxu0 }
 0x5c7   : > { %v3765_v29 = vpop.f32.mrb[21].mxu0 }
 0x5c8   : > { %v3766_v30 = vadd.f32 %v3765_v29, %v3764_v28  ;;  %v3767_v31 = vpop.f32.mrb[22].mxu0  ;;  %3886 = vmatprep.mubr.msk.bf16.mxu1 %vm2108_vm1, %v2874_v27 }
 0x5c9   : > { %v3768_v32 = vpop.f32.mrb[23].mxu0 }
 0x5ca   : > { %v3769_v33 = vadd.f32 %v3768_v32, %v3767_v31  ;;  %v2680_v34 = vmul.f32 0.0051020407, %v3766_v30 }
 0x5cc   : > { %v2681_v35 = vmul.f32 0.0051020407, %v3769_v33 }
 0x5ce   : > { %v2875_v36 = vpack.c.bf16 %v2681_v35, %v2680_v34 }
 0x5cf   : > { %v3770_v37 = vpop.f32.mrb[24].mxu0 }
 0x5d0   : > { %v3771_v38 = vpop.f32.mrb[25].mxu0  ;;  %3887 = vmatmul.mubr.msk.bf16.gmra.mrb[24].mxu1 %vm2108_vm1, %v2875_v36 }
 0x5d1   : > { %v3772_v39 = vadd.f32 %v3771_v38, %v3770_v37  ;;  %v3773_v40 = vpop.f32.mrb[26].mxu0 }
 0x5d2   : > { %v3774_v41 = vpop.f32.mrb[27].mxu0 }
 0x5d3   : > { %v3775_v42 = vadd.f32 %v3774_v41, %v3773_v40  ;;  %v2682_v43 = vmul.f32 0.0051020407, %v3772_v39 }
 0x5d5   : > { %v2683_v44 = vmul.f32 0.0051020407, %v3775_v42 }
 0x5d7   : > { %v2876_v45 = vpack.c.bf16 %v2683_v44, %v2682_v43  ;;  %v3776_v46 = vpop.f32.mrb[28].mxu0 }
 0x5d8   : > { %v3777_v47 = vpop.f32.mrb[29].mxu0 }
 0x5d9   : > { %v3778_v51 = vadd.f32 %v3777_v47, %v3776_v46  ;;  %v3779_v52 = vpop.f32.mrb[30].mxu0  ;;  %3890 = vmatprep.mubr.msk.bf16.mxu1 %vm2108_vm1, %v2876_v45 }
 0x5da   : > { %v3780_v53 = vpop.f32.mrb[31].mxu0 }
 0x5db   : > { %v3781_v54 = vadd.f32 %v3780_v53, %v3779_v52  ;;  %v2684_v55 = vmul.f32 0.0051020407, %v3778_v51 }
 0x5dd   : > { %v2685_v59 = vmul.f32 0.0051020407, %v3781_v54 }
 0x5df   : > { %v2877_v61 = vpack.c.bf16 %v2685_v59, %v2684_v55 }
 0x5e1   : > { %3891 = vmatmul.mubr.msk.bf16.gmra.mrb[28].mxu1 %vm2108_vm1, %v2877_v61 }
 0x682   : > { %v3880_v18 = vpop.f32.mrb[16].mxu1 }
 0x683   : > { %v2968_v26 = vadd.f32 %v3880_v18, %v3542_v17  ;;  %v2959_v19 = vpop.f32.mrb[17].mxu1 }
 0x684   : > { %v2960_v15 = vadd.f32 %v3542_v17, %v2959_v19  ;;  %v3881_v48 = vpop.f32.mrb[18].mxu1 }
 0x685   : > { %v3056_v20 = vmax.f32 %v2968_v26, 0.0  ;;  %v2971_v21 = vadd.f32 %v3881_v48, %v3542_v17  ;;  %v2962_v22 = vpop.f32.mrb[19].mxu1 }
 0x686   : > { %v3054_v23 = vmax.f32 %v2960_v15, 0.0  ;;  %v2963_v24 = vadd.f32 %v3542_v17, %v2962_v22 }
 0x687   : > { %3072 = vst.msk [vmem:[%s4868_s30 + $0x10] sm:$0xff] %vm2108_vm1, %v3056_v20  ;;  %v3057_v25 = vmax.f32 %v2971_v21, 0.0 }
 0x688   : > { %3070 = vst.msk [vmem:[%s4868_s30] sm:$0xff] %vm2108_vm1, %v3054_v23  ;;  %v3055_v27 = vmax.f32 %v2963_v24, 0.0 }
 0x689   : > { %3073 = vst.msk [vmem:[%s4868_s30 + $0x18] sm:$0xff] %vm2108_vm1, %v3057_v25 }
 0x68a   : > { %3071 = vst.msk [vmem:[%s4868_s30 + $0x8] sm:$0xff] %vm2108_vm1, %v3055_v27 }
 0x693   : > { %v3884_v28 = vpop.f32.mrb[20].mxu1 }
 0x694   : > { %v2984_v29 = vadd.f32 %v3884_v28, %v3542_v17  ;;  %v2975_v30 = vpop.f32.mrb[21].mxu1 }
 0x695   : > { %v2976_v31 = vadd.f32 %v3542_v17, %v2975_v30  ;;  %v3885_v32 = vpop.f32.mrb[22].mxu1 }
 0x696   : > { %v3060_v33 = vmax.f32 %v2984_v29, 0.0  ;;  %v2987_v34 = vadd.f32 %v3885_v32, %v3542_v17  ;;  %v2978_v35 = vpop.f32.mrb[23].mxu1 }
 0x697   : > { %v3058_v36 = vmax.f32 %v2976_v31, 0.0  ;;  %v2979_v37 = vadd.f32 %v3542_v17, %v2978_v35 }
 0x698   : > { %3076 = vst.msk [vmem:[%s4868_s30 + $0x30] sm:$0xff] %vm2108_vm1, %v3060_v33  ;;  %v3061_v38 = vmax.f32 %v2987_v34, 0.0 }
 0x699   : > { %3074 = vst.msk [vmem:[%s4868_s30 + $0x20] sm:$0xff] %vm2108_vm1, %v3058_v36  ;;  %v3059_v39 = vmax.f32 %v2979_v37, 0.0 }
 0x69a   : > { %3077 = vst.msk [vmem:[%s4868_s30 + $0x38] sm:$0xff] %vm2108_vm1, %v3061_v38 }
 0x69b   : > { %3075 = vst.msk [vmem:[%s4868_s30 + $0x28] sm:$0xff] %vm2108_vm1, %v3059_v39 }
 0x6a3   : > { %v3888_v40 = vpop.f32.mrb[24].mxu1 }
 0x6a4   : > { %v3000_v41 = vadd.f32 %v3888_v40, %v3542_v17  ;;  %v2991_v42 = vpop.f32.mrb[25].mxu1 }
 0x6a5   : > { %v2992_v43 = vadd.f32 %v3542_v17, %v2991_v42  ;;  %v3889_v44 = vpop.f32.mrb[26].mxu1 }
 0x6a6   : > { %v3064_v45 = vmax.f32 %v3000_v41, 0.0  ;;  %v3003_v46 = vadd.f32 %v3889_v44, %v3542_v17  ;;  %v2994_v47 = vpop.f32.mrb[27].mxu1 }
 0x6a7   : > { %v3062_v51 = vmax.f32 %v2992_v43, 0.0  ;;  %v2995_v52 = vadd.f32 %v3542_v17, %v2994_v47 }
 0x6a8   : > { %3080 = vst.msk [vmem:[%s4868_s30 + $0x50] sm:$0xff] %vm2108_vm1, %v3064_v45  ;;  %v3065_v53 = vmax.f32 %v3003_v46, 0.0 }
 0x6a9   : > { %3078 = vst.msk [vmem:[%s4868_s30 + $0x40] sm:$0xff] %vm2108_vm1, %v3062_v51  ;;  %v3063_v54 = vmax.f32 %v2995_v52, 0.0 }
 0x6aa   : > { %3081 = vst.msk [vmem:[%s4868_s30 + $0x58] sm:$0xff] %vm2108_vm1, %v3065_v53 }
 0x6ab   : > { %3079 = vst.msk [vmem:[%s4868_s30 + $0x48] sm:$0xff] %vm2108_vm1, %v3063_v54 }
 0x6b4   : > { %v3892_v55 = vpop.f32.mrb[28].mxu1 }
 0x6b5   : > { %v3016_v59 = vadd.f32 %v3892_v55, %v3542_v17  ;;  %v3007_v61 = vpop.f32.mrb[29].mxu1 }
 0x6b6   : > { %v3008_v62 = vadd.f32 %v3542_v17, %v3007_v61  ;;  %v3893_v56 = vpop.f32.mrb[30].mxu1 }
 0x6b7   : > { %v3068_v63 = vmax.f32 %v3016_v59, 0.0  ;;  %v3019_v0 = vadd.f32 %v3893_v56, %v3542_v17  ;;  %v3010_v50 = vpop.f32.mrb[31].mxu1 }
 0x6b8   : > { %v3066_v1 = vmax.f32 %v3008_v62, 0.0  ;;  %v3011_v14 = vadd.f32 %v3542_v17, %v3010_v50 }
 0x6b9   : > { %3084 = vst.msk [vmem:[%s4868_s30 + $0x70] sm:$0xff] %vm2108_vm1, %v3068_v63  ;;  %v3069_v16 = vmax.f32 %v3019_v0, 0.0 }
 0x6ba   : > { %3082 = vst.msk [vmem:[%s4868_s30 + $0x60] sm:$0xff] %vm2108_vm1, %v3066_v1  ;;  %v3067_v60 = vmax.f32 %v3011_v14, 0.0 }
 0x6bb   : > { %3085 = vst.msk [vmem:[%s4868_s30 + $0x78] sm:$0xff] %vm2108_vm1, %v3069_v16 }
 0x6bc   : > { %3083 = vst.msk [vmem:[%s4868_s30 + $0x68] sm:$0xff] %vm2108_vm1, %v3067_v60 }
 0x6bd PF: > { %s5462_s2 = sld [smem:[#allocation21_spill]]  ;;  %s3580_s9 = sshll.u32 %s4507_s25, 5 }
 0x6be   : > { %s3125_s4 = sadd.s32 %s4503_s24, %s3580_s9  ;;  %s3556_s13 = sshll.u32 %s4511_s26, 6 }
 0x6bf   : > { %s3127_s8 = sadd.s32 %s3556_s13, %s3125_s4  ;;  %s3130_s3 = sshll.u32 %s4870_s1, 4  ;;  %s5280_s3 = int_to_ptr.vmem [resolvable:$true] %s3130_s3 }
 0x6c0   : > { %s3557_s23 = sshll.u32 %s3127_s8, 6  ;;  %s5463_s27 = sld [smem:[#allocation42_spill]] }
 0x6c1   : > { %s5465_s18 = sand.u32 1, %s4483_s19   ;;  %s4385_s22 = scalar_lea.vmem %s5280_s3, 1024 }
 0x6c2   : > { %s5289_s28 = scalar_lea.sflag [#allocation7], %s5465_s18  ;;  %p4386_p12 = scmp.ne.s32.totalorder %s5280_s3, %s4385_s22 }
 0x6c3   : > { %p5466_p5 = scmp.ne.s32.totalorder %s5462_s2, 0  ;;  %s4536_s24 = smov [#allocation10]  }
 0x6c4   : > { %s4389_s25 = sshll.u32 %s4536_s24, 4  ;;  %s4390_s25 = int_to_ptr.vmem [resolvable:$false] %s4389_s25 }
 0x6c5   : > { %p4387_p9 = pnand %p4386_p12, %p5466_p5  ;;  %s4391_s26 = scalar_lea.vmem %s4390_s25, 2048 }
 0x6c6   : > { %s5464_s6 = smov %s5463_s27  ;;  %s5285_s30 = scalar_lea.hbm %s5463_s27, %s3557_s23 }
 0x6c7   : > { %p4388_p13 = pneg %p4387_p9  ;;  %p4392_p1 = scmp.lt.s32.totalorder %s5280_s3, %s4390_s25 }
 0x6c8   : > { %p4393_p4 = scmp.lt.s32.totalorder %s4391_s26, %s4385_s22 }
 0x6ca   : > { %p4394_p8 = por %p4393_p4, %p4392_p1 }
 0x6cc   : > { %p4395_p11 = pnand %p4394_p8, %p4388_p13 }
 0x6ce   : > { %4398 = shalt.err (!%p4395_p11)
}
 0x6cf   : > { %s4399_s1 = scalar_lea.hbm %s5285_s30, 1024  ;;  %s4403_s17 = scalar_lea.hbm %s5464_s6, 8192 }
 0x6d0   : > { %p4400_p7 = scmp.ne.s32.totalorder %s5285_s30, %s4399_s1  ;;  %p4404_p3 = scmp.lt.u32.totalorder %s5285_s30, %s5464_s6 }
 0x6d1   : > { %p4405_p6 = scmp.lt.u32.totalorder %s4403_s17, %s4399_s1  ;;  %p4407_p12 = scmp.lt.u32.totalorder %s4399_s1, %s5285_s30 }
 0x6d2   : > { %p4401_p0 = pnand %p4400_p7, %p5466_p5 }
 0x6d3   : > { %p4406_p10 = por %p4405_p6, %p4404_p3 }
 0x6d4   : > { %p4402_p2 = pneg %p4401_p0 }
 0x6d5   : > { %p4408_p9 = por %p4407_p12, %p4406_p10 }
 0x6d7   : > { %p4409_p13 = pnand %p4408_p9, %p4402_p2 }
 0x6d9   : > { %4412 = shalt.err (!%p4409_p13)
}
 0x6da   : > { %s4537_s9 = smov 64   ;;  %s4538_s4 = smov 128  }
 0x6db   : > { %s4539_s13 = smov 4  }
 0x6dc   : > { %3920 = dma.vmem_to_hbm [thread:$0]  (%p5466_p5), %s5280_s3, 1024, %s5285_s30, %s5289_s28, %s4537_s9, %s4538_s4, %s4539_s13  }
 0x6dd PF: > { %s5467_s8 = sld [smem:[#allocation20_spill]]  ;;  %s5468_s23 = sld [smem:[#allocation14_spill]] }
 0x6de   : > { %s5469_s10 = sld [smem:[#allocation22_spill]] }
 0x6e3   : > { %p3937_p1 = scmp.ge.s32.totalorder %s5467_s8, 2  ;;  %s3169_s11 = sand.u32 1, %s5468_s23  }
 0x6e4   : > { %p5470_p4 = scmp.ne.s32.totalorder %s5469_s10, 0  ;;  %s3170_s27 = scalar_lea.sflag [#allocation7], %s3169_s11 }
 0x6e6   : > { %p3931_p8 = pnand %p3937_p1, %p5470_p4 }
 0x6e8   : > { %4474 = dma.done.wait (!%p3931_p8), %s3170_s27, 1024  }
 0x6e9   : > { %4476 = vsyncadd (!%p3931_p8), %s3170_s27, 4294966272  ;;  %s33_s30 = sadd.s32 1, %s5467_s8   ;;  %s5472_s2 = sld [smem:[#allocation27_spill]] }
 0x6ea   : > { %p5318_p11 = scmp.ge.s32.totalorder %s33_s30, 10   ;;  %s5473_s21 = sld [smem:[#allocation15_spill]] }
 0x6eb   : > { %s5474_s22 = sld [smem:[#allocation16_spill]]  ;;  %s5475_s23 = sld [smem:[#allocation25_spill]] }
 0x6ec   : > { %s5476_s24 = sld [smem:[#allocation17_spill]]  ;;  %s5477_s25 = sld [smem:[#allocation18_spill]] }
 0x6ed   : > { %s5478_s26 = sld [smem:[#allocation19_spill]]  ;;  %s5479_s27 = sld [smem:[#allocation23_spill]] }
 0x6ee   : > { %s5480_s28 = sld [smem:[#allocation24_spill]]  ;;  %s5481_s29 = sld [smem:[#allocation26_spill]] }
 0x6ef   : > { %s5483_s18 = smov %s4483_s19  ;;  %s5484_s19 = smov %s4487_s20 }
 0x6f0   : > { %s5485_s20 = smov %s5472_s2  ;;  %32 = sbr.rel (!%p5318_p11) target bundleno = 27 (0x1b), region = 165 }
 0x6f7   :  { %3175 = vsyncpa [#allocation6], 1 }
 0x6f8   :  { %3177 = vsyncpa [#allocation6 + $0x1], 1 }
 0x6f9   :  { %3178 = vsyncpa [#allocation9], 1 }
 0x6fa   :  { %3180 = vsyncpa [#allocation9 + $0x1], 1 }
 0x6fb   :  { %3181 = vsyncpa [#allocation7], 1 }
 0x6fc   :  { %3183 = vsyncpa [#allocation7 + $0x1], 1 }

// kernel: tpu_custom_call.1
= control target key start
LH: loop header
LB: loop body
LE: loop exit
PB: predicated region body
PF: predicated region fallthrough
CT: control target
= control target key end

     0   :  { %s5359_s0 = inlined_call_operand.vmem [shape: bf16[2,256,32], index: 0, kind: input, shape index: {}]   ;;  %s5360_s1 = inlined_call_operand.vmem [shape: bf16[32,32], index: 1, kind: input, shape index: {}]   ;;  %s5361_s2 = inlined_call_operand.hbm [shape: f32[1,32], index: 2, kind: input, shape index: {}]   ;;  %s5362_s3 = inlined_call_operand.vmem [shape: bf16[32,256], index: 3, kind: input, shape index: {}]   ;;  %s5363_s4 = inlined_call_operand.vmem [shape: f32[1,256], index: 4, kind: input, shape index: {}]   ;;  %s5364_s5 = inlined_call_operand.vmem [shape: bf16[2,256,128], index: 5, kind: input, shape index: {}]   ;;  %s5365_s6 = inlined_call_operand.vmem [shape: f32[1,256], index: 6, kind: input, shape index: {}]   ;;  %s5366_s7 = inlined_call_operand.hbm [shape: bf16[256,256], index: 7, kind: input, shape index: {}]   ;;  %s5367_s8 = inlined_call_operand.vmem [shape: f32[1,256], index: 8, kind: input, shape index: {}]   ;;  %s5368_s9 = inlined_call_operand.vmem [shape: bf16[32,32], index: 9, kind: input, shape index: {}]   ;;  %s5369_s10 = inlined_call_operand.vmem [shape: f32[1,32], index: 10, kind: input, shape index: {}]   ;;  %s5370_s11 = inlined_call_operand.vmem [shape: bf16[32,32], index: 11, kind: input, shape index: {}]   ;;  %s5371_s12 = inlined_call_operand.vmem [shape: f32[1,32], index: 12, kind: input, shape index: {}]   ;;  %s5372_s13 = inlined_call_operand.vmem [shape: f32[2,256,32], index: 13, kind: output, shape index: {0}]   ;;  %s5373_s14 = inlined_call_operand.vmem [shape: f32[2,256,32], index: 14, kind: output, shape index: {1}]   ;;  %s5374_s15 = inlined_call_operand.hbm [shape: bf16[2,256,256], index: 15, kind: output, shape index: {2}]  }
   0x1   :  { %5401 = sst [smem:[#allocation28_spill]] %s5359_s0 }
   0x2   :  { %5402 = sst [smem:[#allocation29_spill]] %s5360_s1 }
   0x3   :  { %5403 = sst [smem:[#allocation30_spill]] %s5361_s2 }
   0x4   :  { %5404 = sst [smem:[#allocation31_spill]] %s5362_s3 }
   0x5   :  { %5405 = sst [smem:[#allocation32_spill]] %s5363_s4 }
   0x6   :  { %5406 = sst [smem:[#allocation33_spill]] %s5365_s6 }
   0x7   :  { %5407 = sst [smem:[#allocation34_spill]] %s5366_s7 }
   0x8   :  { %5408 = sst [smem:[#allocation35_spill]] %s5367_s8 }
   0x9   :  { %5409 = sst [smem:[#allocation36_spill]] %s5368_s9 }
   0xa   :  { %5410 = sst [smem:[#allocation37_spill]] %s5369_s10 }
   0xb   :  { %5411 = sst [smem:[#allocation38_spill]] %s5370_s11 }
   0xc   :  { %5412 = sst [smem:[#allocation39_spill]] %s5371_s12 }
   0xd   :  { %5413 = sst [smem:[#allocation40_spill]] %s5372_s13 }
   0xe   :  { %5414 = sst [smem:[#allocation41_spill]] %s5373_s14 }
   0xf   :  { %5415 = sst [smem:[#allocation42_spill]] %s5374_s15 }
  0x10   :  { %21 = vsyncpa [#allocation6], 0 }
  0x11   :  { %22 = vsyncpa [#allocation9], 0 }
  0x12   :  { %24 = vsyncpa [#allocation9 + $0x1], 0 }
  0x13   :  { %25 = vsyncpa [#allocation7], 0 }
  0x14   :  { %27 = vsyncpa [#allocation7 + $0x1], 0  ;;  %s4617_s18 = smov 0   ;;  %s4619_s19 = smov 0  }
  0x15   :  { %s4621_s20 = smov 0   ;;  %s4623_s21 = smov 0  }
  0x16   :  { %s4625_s22 = smov 0   ;;  %s4627_s23 = smov 0  }
  0x17   :  { %s4629_s24 = smov 0   ;;  %s4631_s25 = smov 0  }
  0x18   :  { %s4633_s26 = smov 0   ;;  %s4635_s27 = smov 0  }
  0x19   :  { %s4637_s28 = smov 0   ;;  %s4639_s29 = smov 0  }
  0x1a   :  { %s4641_s30 = smov 0  }
  0x1b LB: > { %5416 = sst [smem:[#allocation14_spill]] %s4476_s18  ;;  %s3347_s16 = sadd.s32 4294967295, %s4524_s30   ;;  %s4524_s30 = sphi %s4641_s30, %s33_s30   ;;  %s4520_s29 = sphi %s4639_s29, %s5478_s29   ;;  %s4516_s28 = sphi %s4637_s28, %s5477_s28   ;;  %s4512_s27 = sphi %s4635_s27, %s5476_s27   ;;  %s4508_s26 = sphi %s4633_s26, %s5475_s26   ;;  %s4504_s25 = sphi %s4631_s25, %s5474_s25   ;;  %s4500_s24 = sphi %s4629_s24, %s5473_s24   ;;  %s4496_s23 = sphi %s4627_s23, %s5472_s23   ;;  %s4492_s22 = sphi %s4625_s22, %s5471_s22   ;;  %s4488_s21 = sphi %s4623_s21, %s5470_s21   ;;  %s4484_s20 = sphi %s4621_s20, %s5482_s20   ;;  %s4480_s19 = sphi %s4619_s19, %s5481_s19   ;;  %s4476_s18 = sphi %s4617_s18, %s5480_s18  }
  0x1c   : > { %5417 = sst [smem:[#allocation15_spill]] %s4492_s22  ;;  %p228_p0 = scmp.ne.s32.totalorder %s4496_s23, %s4492_s22 }
  0x1d   : > { %5418 = sst [smem:[#allocation16_spill]] %s4496_s23  ;;  %p229_p1 = scmp.eq.s32.totalorder %s4524_s30, 0 }
  0x1e   : > { %5419 = sst [smem:[#allocation17_spill]] %s4512_s27  ;;  %p234_p2 = scmp.ne.s32.totalorder %s4492_s22, %s4488_s21 }
  0x1f   : > { %5420 = sst [smem:[#allocation18_spill]] %s4516_s28  ;;  %s3348_s17 = sadd.s32 4294967294, %s4524_s30  }
  0x20   : > { %5421 = sst [smem:[#allocation19_spill]] %s4520_s29  ;;  %p4686_p3 = scmp.eq.s32.totalorder %s3347_s16, 0 }
  0x21   : > { %5422 = sst [smem:[#allocation20_spill]] %s4524_s30  ;;  %p4690_p4 = por %p229_p1, %p228_p0 }
  0x22   : > { %s5423_s15 = scalar_select %p4686_p3, 1, 0 }
  0x23   : > { %p422_p5 = scmp.ne.s32.totalorder %s4484_s20, %s4480_s19  ;;  %p4698_p6 = por %p4686_p3, %p234_p2 }
  0x24   : > { %p423_p7 = scmp.eq.s32.totalorder %s3347_s16, 7  ;;  %p428_p8 = scmp.ne.s32.totalorder %s4480_s19, %s4476_s18 }
  0x25   : > { %s5425_s10 = scalar_select %p4698_p6, 1, 0 }
  0x26   : > { %p429_p9 = scmp.eq.s32.totalorder %s3348_s17, 7  ;;  %p4704_p10 = por %p423_p7, %p422_p5 }
  0x27   : > { %p3349_p11 = scmp.ge.s32.totalorder %s4524_s30, 1  ;;  %p436_p13 = scmp.lt.s32.totalorder %s4524_s30, 9 }
  0x28   : > { %s5426_s21 = scalar_select %p4704_p10, 1, 0 }
  0x29   : > { %p4709_p12 = por %p429_p9, %p428_p8  ;;  %p4714_p0 = pnand %p3349_p11, %p436_p13 }
  0x2a   : > { %5427 = sst [smem:[#allocation21_spill]] %s5426_s21  ;;  %s4526_s8 = smov [#allocation5]  }
  0x2b   : > { %s5428_s11 = scalar_select %p4709_p12, 1, 0 }
  0x2c   : > { %s5430_s9 = scalar_select %p4714_p0, 1, 0 }
  0x2d   : > { %5429 = sst [smem:[#allocation22_spill]] %s5428_s11  ;;  %s452_s4 = sshll.u32 %s4526_s8, 4  ;;  %s453_s4 = int_to_ptr.vmem [resolvable:$true] %s452_s4 }
  0x2e   : > { %p3919_p1 = pneg %p4714_p0  ;;  %p3932_p2 = scmp.lt.s32.totalorder %s4524_s30, 8 }
  0x2f   : > { %s5433_s2 = sld [smem:[#allocation30_spill]] }
  0x30   : > { %p4723_p5 = pnand %p3919_p1, %p4686_p3  ;;  %p4729_p7 = pnand %p3932_p2, %p4690_p4 }
  0x32   : > { %s5432_s17 = scalar_select %p4729_p7, 1, 0 }
  0x33   : > { %p4326_p9 = pneg %p4723_p5 }
  0x35   : > { %s4324_s21 = scalar_lea.hbm %s5433_s2, 16 }
  0x36   : > { %p4325_p8 = scmp.ne.s32.totalorder %s5433_s2, %s4324_s21  ;;  %p4331_p1 = scmp.lt.u32.totalorder %s4324_s21, %s5433_s2 }
  0x38   : > { %p4327_p11 = pnand %p4326_p9, %p4325_p8 }
  0x3a   : > { %p4328_p13 = pneg %p4327_p11 }
  0x3c   : > { %p4333_p4 = pnand %p4331_p1, %p4328_p13 }
  0x3e   : > { %4336 = shalt.err (!%p4333_p4)
}
  0x3f   : > { %s4337_s12 = scalar_lea.vmem %s453_s4, 16  ;;  %s4344_s11 = scalar_lea.vmem %s453_s4, 32 }
  0x40   : > { %p4338_p2 = scmp.ne.s32.totalorder %s453_s4, %s4337_s12  ;;  %p4345_p6 = scmp.lt.s32.totalorder %s453_s4, %s453_s4 }
  0x41   : > { %p4346_p3 = scmp.lt.s32.totalorder %s4344_s11, %s4337_s12 }
  0x42   : > { %p4340_p12 = pnand %p4338_p2, %p4326_p9 }
  0x43   : > { %p4347_p0 = por %p4346_p3, %p4345_p6 }
  0x44   : > { %p4341_p10 = pneg %p4340_p12 }
  0x46   : > { %p4348_p7 = pnand %p4347_p0, %p4341_p10 }
  0x48   : > { %4351 = shalt.err (!%p4348_p7)
}
  0x49   : > { %3922 = dma.hbm_to_vmem [thread:$0]  (!%p4723_p5), %s5433_s2, 16, %s453_s4, [#allocation6]  }
  0x4a   : > { %s221_s1 = sadd.s32 1, %s4496_s23  ;;  %s45_s30 = sadd.s32 1, %s4512_s27 }
  0x4b   : > { %p46_p3 = scmp.ge.s32.totalorder %s45_s30, 2  ;;  %s48_s21 = sadd.s32 1, %s4516_s28 }
  0x4c   : > { %s52_s16 = sadd.s32 1, %s4520_s29  ;;  %s506_s8 = sand.u32 1, %s4496_s23  }
  0x4d   : > { %s5484_s30 = smov (%p46_p3, %s45_s30), 0  ;;  %s5486_s21 = smov (!%p46_p3, %s48_s21), %s4516_s28 }
  0x4e   : > { %5434 = sst [smem:[#allocation23_spill]] %s5484_s30  ;;  %s218_s12 = ssub.s32 %s4512_s27, %s5484_s30 }
  0x4f   : > { %s3558_s11 = sshll.u32 %s4512_s27, 11  ;;  %p50_p6 = scmp.ge.s32.totalorder %s5486_s21, 2 }
  0x50   : > { %p219_p10 = scmp.eq.s32.totalorder %s218_s12, 0  ;;  %s3352_s3 = sshll.u32 %s506_s8, 7 }
  0x51   : > { %s5488_s21 = smov (%p50_p6, %s5486_s21), 0  ;;  %s5490_s16 = smov (!%p50_p6, %s52_s16), %s4520_s29 }
  0x52   : > { %5435 = sst [smem:[#allocation24_spill]] %s5488_s21  ;;  %p54_p12 = scmp.ge.s32.totalorder %s5490_s16, 2 }
  0x53   : > { %s4764_s4 = scalar_select %p219_p10, %s4496_s23, %s221_s1  }
  0x54   : > { %s5437_s7 = sld [smem:[#allocation34_spill]]  ;;  %s406_s30 = ssub.s32 %s4516_s28, %s5488_s21 }
  0x55   : > { %5436 = sst [smem:[#allocation25_spill]] %s4764_s4  ;;  %s5492_s16 = smov (%p54_p12, %s5490_s16), 0 }
  0x56   : > { %5438 = sst [smem:[#allocation26_spill]] %s5492_s16  ;;  %s510_s27 = scalar_lea.vmem [#allocation8], %s3352_s3 }
  0x57   : > { %s518_s13 = sshll.u32 %s510_s27, 4  ;;  %s405_s6 = ssub.s32 %s4520_s29, %s5492_s16  ;;  %s4777_s13 = int_to_ptr.vmem [resolvable:$true] %s518_s13 }
  0x58   : > { %s407_s1 = sor.u32 %s406_s30, %s405_s6  ;;  %s412_s4 = sadd.s32 1, %s4484_s20 }
  0x59   : > { %s409_s23 = sor.u32 %s407_s1, %s218_s12  ;;  %p5440_p7 = scmp.ne.s32.totalorder %s5432_s17, 0 }
  0x5a   : > { %s4769_s14 = scalar_lea.hbm %s5437_s7, %s3558_s11  ;;  %p4780_p0 = scmp.eq.s32.totalorder %s409_s23, 0 }
  0x5b   : > { %s4784_s11 = scalar_lea.sflag [#allocation9], %s506_s8  ;;  %s4352_s18 = scalar_lea.hbm %s4769_s14, 2048 }
  0x5c   : > { %p4353_p5 = scmp.ne.s32.totalorder %s4769_s14, %s4352_s18  ;;  %p4354_p8 = pneg %p5440_p7 }
  0x5d   : > { %s4357_s30 = scalar_lea.hbm %s5437_s7, 4096  ;;  %p4358_p13 = scmp.lt.u32.totalorder %s4769_s14, %s5437_s7 }
  0x5e   : > { %p4355_p9 = pnand %p4354_p8, %p4353_p5  ;;  %p4359_p1 = scmp.lt.u32.totalorder %s4357_s30, %s4352_s18 }
  0x5f   : > { %p4361_p2 = scmp.lt.u32.totalorder %s4352_s18, %s4769_s14 }
  0x60   : > { %p4356_p11 = pneg %p4355_p9  ;;  %p4360_p4 = por %p4359_p1, %p4358_p13 }
  0x62   : > { %p4362_p3 = por %p4361_p2, %p4360_p4 }
  0x64   : > { %p4363_p6 = pnand %p4362_p3, %p4356_p11 }
  0x66   : > { %4366 = shalt.err (!%p4363_p6)
}
  0x67   : > { %s4367_s23 = scalar_lea.vmem %s4777_s13, 2048  ;;  %s4527_s8 = smov [#allocation8]  }
  0x68   : > { %p4368_p10 = scmp.ne.s32.totalorder %s4777_s13, %s4367_s23  ;;  %s4372_s1 = sshll.u32 %s4527_s8, 4  ;;  %s4373_s1 = int_to_ptr.vmem [resolvable:$false] %s4372_s1 }
  0x69   : > { %s4374_s27 = scalar_lea.vmem %s4373_s1, 4096  ;;  %p4375_p9 = scmp.lt.s32.totalorder %s4777_s13, %s4373_s1 }
  0x6a   : > { %p4370_p12 = pnand %p4368_p10, %p4354_p8  ;;  %p4376_p13 = scmp.lt.s32.totalorder %s4374_s27, %s4367_s23 }
  0x6c   : > { %p4371_p5 = pneg %p4370_p12  ;;  %p4377_p1 = por %p4376_p13, %p4375_p9 }
  0x6e   : > { %p4378_p4 = pnand %p4377_p1, %p4371_p5 }
  0x70   : > { %4381 = shalt.err (!%p4378_p4)
}
  0x71   : > { %s4528_s18 = smov 128   ;;  %s4529_s6 = smov 8  }
  0x72   : > { %3926 = dma.hbm_to_vmem [thread:$0]  (!%p5440_p7), %s4769_s14, 2048, %s4777_s13, %s4784_s11, %s4528_s18, %s4528_s18, %s4529_s6  }
  0x73   : > { %s4817_s30 = scalar_select %p4780_p0, %s4484_s20, %s412_s4  }
  0x74   : > { %p5442_p8 = scmp.ne.s32.totalorder %s5430_s9, 0 }
  0x75   : > { %5441 = sst [smem:[#allocation27_spill]] %s4817_s30  ;;  %p5443_p11 = scmp.ne.s32.totalorder (!%p5442_p8), %s5423_s15, 0 }
  0x76   : > { %530 = sbr.rel (%p5442_p8) target bundleno = 1757 (0x6dd), region = 72 }
  0x7d   : > { %4463 = dma.done.wait (%p5443_p11), [#allocation6], 16  }
  0x7e   : > { %4465 = vsyncadd (%p5443_p11), [#allocation6], 4294967280  ;;  %s536_s3 = sand.u32 1, %s4492_s22   ;;  %p5444_p7 = scmp.ne.s32.totalorder %s5425_s10, 0 }
  0x7f   : > { %s3358_s12 = sshll.u32 %s536_s3, 7  ;;  %s537_s23 = scalar_lea.sflag [#allocation9], %s536_s3 }
  0x80   : > { %s4826_s17 = scalar_lea.vmem [#allocation8], %s3358_s12 }
  0x81   : > { %4467 = dma.done.wait (%p5444_p7), %s537_s23, 2048  }
  0x82   : > { %4469 = vsyncadd (%p5444_p7), %s537_s23, 4294965248  ;;  %s5395_s9 = sand.u32 1, %s4480_s19   ;;  %p618_p0 = scmp.lt.s32.totalorder %s4508_s26, 1 }
  0x83   : > { %s3359_s13 = sshll.u32 %s5395_s9, 6  ;;  %p623_p2 = scmp.lt.s32.totalorder %s4500_s24, 1 }
  0x84   : > { %s3364_s14 = sshll.u32 %s4504_s25, 4  ;;  %s5445_s0 = sld [smem:[#allocation28_spill]] }
  0x85   : > { %s619_s15 = scalar_select %p618_p0, %s4508_s26, 1 }
  0x86   : > { %s4840_s4 = scalar_select %p623_p2, %s4500_s24, 1 }
  0x87   : > { %s3559_s10 = sshll.u32 %s619_s15, 7  ;;  %p635_p3 = scmp.lt.s32.totalorder %s3364_s14, 31 }
  0x88   : > { %s3560_s1 = sshll.u32 %s4840_s4, 7  ;;  %s5446_s23 = sld [smem:[#allocation33_spill]] }
  0x89   : > { %s4851_s6 = scalar_lea.vmem %s5364_s5, %s3560_s1  ;;  %s5494_s14 = smov (!%p635_p3, %s3364_s14), 31 }
  0x8a   : > { %s4845_s8 = scalar_lea.vmem %s5445_s0, %s3559_s10  ;;  %s3365_s7 = sshll.u32 %s619_s15, 5 }
  0x8b   : > { %s638_s16 = sadd.s32 %s3365_s7, %s5494_s14  ;;  %s5447_s22 = sld [smem:[#allocation40_spill]] }
  0x8c   : > { %s3366_s21 = sshll.u32 %s638_s16, 3  ;;  %s5448_s0 = sld [smem:[#allocation41_spill]] }
  0x8d   : > { %s4867_s1 = scalar_lea.vmem [#allocation10], %s3359_s13  ;;  %p3370_p6 = scmp.ne.s32.totalorder %s4500_s24, 0 }
  0x8e   : > { %s630_s9 = scalar_lea.vmem %s5446_s23, %s4840_s4  ;;  %s5449_s15 = sld [smem:[#allocation29_spill]] (!%p3370_p6)  ;;  %vm742_vm0 = vcmask (!%p3370_p6), 261120   ;;  %v4530_v2 = vmov (!%p3370_p6), 0.0   ;;  %v4531_v15 = vmov (!%p3370_p6), 0   ;;  %v3373_v16 = vld [vmem:[#allocation5] ss:$0 sm:$0xff] (!%p3370_p6) }
  0x8f   : > { %657 = sbr.rel (%p3370_p6) target bundleno = 648 (0x288), region = 84  ;;  %s3371_s7 = sshll.u32 (!%p3370_p6), %s4504_s25, 7  ;;  %1125 = vst [vmem:[#allocation3] sm:$0xff] (!%p3370_p6), %v4530_v2  ;;  %1126 = vst [vmem:[#allocation3 + $0x8] sm:$0xff] (!%p3370_p6), %v4530_v2  ;;  %1000 = vmatprep.mubr.bf16.mxu1 (!%p3370_p6), %v4531_v15 }
  0x90   : > { %s659_s29 = sshra.s32 (!%p3370_p6), %s3371_s7, 3  ;;  %1127 = vst [vmem:[#allocation3 + $0x10] sm:$0xff] (!%p3370_p6), %v4530_v2  ;;  %1128 = vst [vmem:[#allocation3 + $0x18] sm:$0xff] (!%p3370_p6), %v4530_v2  ;;  %s5450_s14 = sld [smem:[#allocation31_spill]] (!%p3370_p6) }
  0x91   : > { %s4860_s2 = scalar_lea.vmem %s5447_s22, %s3366_s21  ;;  %1129 = vst [vmem:[#allocation3 + $0x20] sm:$0xff] (!%p3370_p6), %v4530_v2  ;;  %1130 = vst [vmem:[#allocation3 + $0x28] sm:$0xff] (!%p3370_p6), %v4530_v2  ;;  %s5451_s28 = sld [smem:[#allocation32_spill]] (!%p3370_p6) }
  0x92   : > { %s4865_s30 = scalar_lea.vmem %s5448_s0, %s3366_s21  ;;  %s3372_s0 = sshll.u32 (!%p3370_p6), %s659_s29, 2  ;;  %1131 = vst [vmem:[#allocation3 + $0x30] sm:$0xff] (!%p3370_p6), %v4530_v2  ;;  %1132 = vst [vmem:[#allocation3 + $0x38] sm:$0xff] (!%p3370_p6), %v4530_v2 }
  0x93   : > { %s4878_s21 = scalar_lea.vmem (!%p3370_p6), %s4845_s8, %s3372_s0  ;;  %1133 = vst [vmem:[#allocation3 + $0x40] sm:$0xff] (!%p3370_p6), %v4530_v2  ;;  %1134 = vst [vmem:[#allocation3 + $0x48] sm:$0xff] (!%p3370_p6), %v4530_v2 }
  0x94   : > { %v4048_v0 = vld [vmem:[%s5449_s15] sm:$0xff] (!%p3370_p6)   ;;  %v4049_v1 = vld [vmem:[%s5449_s15 + $0x8] sm:$0xff] (!%p3370_p6)   ;;  %1135 = vst [vmem:[#allocation3 + $0x50] sm:$0xff] (!%p3370_p6), %v4530_v2  ;;  %1136 = vst [vmem:[#allocation3 + $0x58] sm:$0xff] (!%p3370_p6), %v4530_v2 }
  0x95   : > { %3799 = vmatprep.subr.bf16.mxu0 (!%p3370_p6), %v4048_v0  ;;  %1137 = vst [vmem:[#allocation3 + $0x60] sm:$0xff] (!%p3370_p6), %v4530_v2  ;;  %1138 = vst [vmem:[#allocation3 + $0x68] sm:$0xff] (!%p3370_p6), %v4530_v2  ;;  %v4050_v3 = vld [vmem:[%s4878_s21] sm:$0xff] (!%p3370_p6)   ;;  %v4051_v4 = vld [vmem:[%s4878_s21 + $0x8] sm:$0xff] (!%p3370_p6)  }
  0x96   : > { %3800 = vmatpush3.bf16.msra.mxu0 %v4048_v0  ;;  %1139 = vst [vmem:[#allocation3 + $0x70] sm:$0xff] %v4530_v2  ;;  %1140 = vst [vmem:[#allocation3 + $0x78] sm:$0xff] %v4530_v2  ;;  %3803 = vmatprep.mubr.msk.bf16.mxu0 %vm742_vm0, %v4050_v3  ;;  %v4052_v5 = vld [vmem:[%s4878_s21 + $0x10] sm:$0xff]   ;;  %v4053_v6 = vld [vmem:[%s4878_s21 + $0x18] sm:$0xff]  }
  0x97   : > { %1141 = vst [vmem:[#allocation3 + $0x80] sm:$0xff] %v4530_v2  ;;  %1142 = vst [vmem:[#allocation3 + $0x88] sm:$0xff] %v4530_v2  ;;  %3801 = vmatprep.subr.bf16.mxu0 %v4049_v1  ;;  %v4054_v7 = vld [vmem:[%s4878_s21 + $0x20] sm:$0xff]   ;;  %v4055_v8 = vld [vmem:[%s4878_s21 + $0x28] sm:$0xff]  }
  0x98   : > { %1143 = vst [vmem:[#allocation3 + $0x90] sm:$0xff] %v4530_v2  ;;  %1144 = vst [vmem:[#allocation3 + $0x98] sm:$0xff] %v4530_v2  ;;  %v4056_v9 = vld [vmem:[%s4878_s21 + $0x30] sm:$0xff]   ;;  %v4057_v10 = vld [vmem:[%s4878_s21 + $0x38] sm:$0xff]  }
  0x99   : > { %1145 = vst [vmem:[#allocation3 + $0xa0] sm:$0xff] %v4530_v2  ;;  %1146 = vst [vmem:[#allocation3 + $0xa8] sm:$0xff] %v4530_v2  ;;  %v4060_v11 = vld [vmem:[%s5450_s14 + $0x4] ss:$8 sps:$4 sm:$0xff]   ;;  %v4058_v12 = vld [vmem:[%s5450_s14] ss:$8 sps:$4 sm:$0xff]  }
  0x9a   : > { %1147 = vst [vmem:[#allocation3 + $0xb0] sm:$0xff] %v4530_v2  ;;  %1148 = vst [vmem:[#allocation3 + $0xb8] sm:$0xff] %v4530_v2  ;;  %3802 = vmatpush3.bf16.msra.mxu0 %v4049_v1  ;;  %3891 = vmatprep.subr.bf16.mxu1 %v4060_v11  ;;  %v4063_v13 = vld [vmem:[%s5450_s14 + $0x14] ss:$8 sps:$4 sm:$0xff]   ;;  %v4061_v14 = vld [vmem:[%s5450_s14 + $0x10] ss:$8 sps:$4 sm:$0xff]  }
  0x9b   : > { %1149 = vst [vmem:[#allocation3 + $0xc0] sm:$0xff] %v4530_v2  ;;  %1150 = vst [vmem:[#allocation3 + $0xc8] sm:$0xff] %v4530_v2  ;;  %948 = vmatprep.subr.bf16.mxu0 %v4060_v11  ;;  %3893 = vmatpush1.bf16.msra.mxu1 %v4058_v12 }
  0x9c   : > { %1151 = vst [vmem:[#allocation3 + $0xd0] sm:$0xff] %v4530_v2  ;;  %1152 = vst [vmem:[#allocation3 + $0xd8] sm:$0xff] %v4530_v2  ;;  %3892 = vmatprep.subr.bf16.mxu1 %v4063_v13 }
  0x9d   : > { %1153 = vst [vmem:[#allocation3 + $0xe0] sm:$0xff] %v4530_v2  ;;  %1154 = vst [vmem:[#allocation3 + $0xe8] sm:$0xff] %v4530_v2  ;;  %3804 = vmatmul.mubr.msk.bf16.vlgmr.msra.gmra.mrb[0].mxu0 %vm742_vm0, %v4051_v4 }
  0x9e   : > { %1155 = vst [vmem:[#allocation3 + $0xf0] sm:$0xff] %v4530_v2  ;;  %1156 = vst [vmem:[#allocation3 + $0xf8] sm:$0xff] %v4530_v2  ;;  %3807 = vmatprep.mubr.msk.bf16.mxu0 %vm742_vm0, %v4052_v5  ;;  %949 = vmatpush1.bf16.msra.mxu0 %v4058_v12  ;;  %v892_v12 = vld [vmem:[%s5451_s28] sm:$0x3] }
  0x9f   : > { %1157 = vst.msk [vmem:[#allocation4] sm:$0xff] %vm742_vm0, %v4530_v2  ;;  %1158 = vst.msk [vmem:[#allocation4 + $0x8] sm:$0xff] %vm742_vm0, %v4530_v2  ;;  %950 = vmatprep.subr.bf16.mxu0 %v4063_v13  ;;  %3894 = vmatpush1.bf16.msra.mxu1 %v4061_v14 }
  0xa0   : > { %1159 = vst.msk [vmem:[#allocation4 + $0x10] sm:$0xff] %vm742_vm0, %v4530_v2  ;;  %1160 = vst.msk [vmem:[#allocation4 + $0x18] sm:$0xff] %vm742_vm0, %v4530_v2 }
  0xa1   : > { %1161 = vst.msk [vmem:[#allocation4 + $0x20] sm:$0xff] %vm742_vm0, %v4530_v2  ;;  %1162 = vst.msk [vmem:[#allocation4 + $0x28] sm:$0xff] %vm742_vm0, %v4530_v2 }
  0xa2   : > { %1163 = vst.msk [vmem:[#allocation4 + $0x30] sm:$0xff] %vm742_vm0, %v4530_v2  ;;  %1164 = vst.msk [vmem:[#allocation4 + $0x38] sm:$0xff] %vm742_vm0, %v4530_v2  ;;  %951 = vmatpush1.bf16.msra.mxu0 %v4061_v14 }
  0xa3   : > { %1165 = vst.msk [vmem:[#allocation4 + $0x40] sm:$0xff] %vm742_vm0, %v4530_v2  ;;  %1166 = vst.msk [vmem:[#allocation4 + $0x48] sm:$0xff] %vm742_vm0, %v4530_v2 }
  0xa4   : > { %1167 = vst.msk [vmem:[#allocation4 + $0x50] sm:$0xff] %vm742_vm0, %v4530_v2  ;;  %1168 = vst.msk [vmem:[#allocation4 + $0x58] sm:$0xff] %vm742_vm0, %v4530_v2 }
  0xa5   : > { %1169 = vst.msk [vmem:[#allocation4 + $0x60] sm:$0xff] %vm742_vm0, %v4530_v2  ;;  %1170 = vst.msk [vmem:[#allocation4 + $0x68] sm:$0xff] %vm742_vm0, %v4530_v2  ;;  %3808 = vmatmul.mubr.msk.bf16.gmra.mrb[4].mxu0 %vm742_vm0, %v4053_v6 }
  0xa6   : > { %1171 = vst.msk [vmem:[#allocation4 + $0x70] sm:$0xff] %vm742_vm0, %v4530_v2  ;;  %1172 = vst.msk [vmem:[#allocation4 + $0x78] sm:$0xff] %vm742_vm0, %v4530_v2  ;;  %3811 = vmatprep.mubr.msk.bf16.mxu0 %vm742_vm0, %v4054_v7 }
  0xad   : > { %3812 = vmatmul.mubr.msk.bf16.gmra.mrb[8].mxu0 %vm742_vm0, %v4055_v8 }
  0xae   : > { %3815 = vmatprep.mubr.msk.bf16.mxu0 %vm742_vm0, %v4056_v9  ;;  %v894_v9 = vlaneseq }
  0xb5   : > { %3816 = vmatmul.mubr.msk.bf16.gmra.mrb[12].mxu0 %vm742_vm0, %v4057_v10  ;;  %v895_v10 = vshrl.u32 %v894_v9, 7 }
  0xb6   : > { %980 = vmatprep.mubr.bf16.mxu0 %v4531_v15 }
  0xb7   : > { %v896_v11 = vsub.s32 0, %v895_v10  ;;  %v900_v13 = vsub.s32 1, %v895_v10 }
  0xb9   : > { %v4943_v14 = vrot.slane %v892_v12, %v896_v11 }
 0x170   : > { %v3805_v17 = vpop.f32.mrb[0].mxu0 }
 0x171   : > { %v810_v18 = vadd.f32 %v3805_v17, %v3373_v16  ;;  %v801_v19 = vpop.f32.mrb[1].mxu0 }
 0x172   : > { %v802_v20 = vadd.f32 %v3373_v16, %v801_v19  ;;  %v3806_v21 = vpop.f32.mrb[2].mxu0 }
 0x173   : > { %v813_v22 = vadd.f32 %v3806_v21, %v3373_v16  ;;  %v804_v23 = vpop.f32.mrb[3].mxu0  ;;  %v866_v25 = vmax.f32 %v810_v18, 0.0 }
 0x174   : > { %v805_v24 = vadd.f32 %v3373_v16, %v804_v23  ;;  %v864_v27 = vmax.f32 %v802_v20, 0.0 }
 0x175   : > { %v867_v26 = vmax.f32 %v813_v22, 0.0 }
 0x176   : > { %v865_v28 = vmax.f32 %v805_v24, 0.0 }
 0x177   : > { %v881_v29 = vpack.c.bf16 %v867_v26, %v866_v25 }
 0x178   : > { %v880_v30 = vpack.c.bf16 %v865_v28, %v864_v27  ;;  %v3809_v31 = vpop.f32.mrb[4].mxu0 }
 0x179   : > { %v826_v32 = vadd.f32 %v3809_v31, %v3373_v16  ;;  %v817_v33 = vpop.f32.mrb[5].mxu0 }
 0x17a   : > { %v818_v34 = vadd.f32 %v3373_v16, %v817_v33  ;;  %v3810_v35 = vpop.f32.mrb[6].mxu0  ;;  %3396 = vmatmul.mubr.msk.bf16.vlgmr.msra.gmra.mrb[16].mxu0 %vm742_vm0, %v880_v30 }
 0x17b   : > { %v829_v36 = vadd.f32 %v3810_v35, %v3373_v16  ;;  %v820_v37 = vpop.f32.mrb[7].mxu0  ;;  %990 = vmatprep.mubr.bf16.mxu0 %v4531_v15  ;;  %v870_v39 = vmax.f32 %v826_v32, 0.0 }
 0x17c   : > { %v821_v38 = vadd.f32 %v3373_v16, %v820_v37  ;;  %v868_v41 = vmax.f32 %v818_v34, 0.0 }
 0x17d   : > { %v871_v40 = vmax.f32 %v829_v36, 0.0 }
 0x17e   : > { %v869_v42 = vmax.f32 %v821_v38, 0.0 }
 0x17f   : > { %v883_v43 = vpack.c.bf16 %v871_v40, %v870_v39 }
 0x180   : > { %v882_v44 = vpack.c.bf16 %v869_v42, %v868_v41  ;;  %v3813_v45 = vpop.f32.mrb[8].mxu0 }
 0x181   : > { %v842_v46 = vadd.f32 %v3813_v45, %v3373_v16  ;;  %v833_v47 = vpop.f32.mrb[9].mxu0 }
 0x182   : > { %3397 = vmatmul.mubr.msk.bf16.gmra.mrb[20].mxu0 %vm742_vm0, %v881_v29  ;;  %3398 = vmatmul.mubr.msk.bf16.vlgmr.msra.gmra.mrb[0].mxu1 %vm742_vm0, %v882_v44  ;;  %v834_v48 = vadd.f32 %v3373_v16, %v833_v47  ;;  %v3814_v49 = vpop.f32.mrb[10].mxu0 }
 0x183   : > { %v874_v50 = vmax.f32 %v842_v46, 0.0  ;;  %v845_v51 = vadd.f32 %v3814_v49, %v3373_v16  ;;  %v836_v52 = vpop.f32.mrb[11].mxu0  ;;  %1010 = vmatprep.mubr.bf16.mxu1 %v4531_v15 }
 0x184   : > { %v872_v53 = vmax.f32 %v834_v48, 0.0  ;;  %v837_v54 = vadd.f32 %v3373_v16, %v836_v52 }
 0x185   : > { %v875_v55 = vmax.f32 %v845_v51, 0.0 }
 0x186   : > { %v873_v56 = vmax.f32 %v837_v54, 0.0 }
 0x187   : > { %v885_v57 = vpack.c.bf16 %v875_v55, %v874_v50 }
 0x188   : > { %v884_v58 = vpack.c.bf16 %v873_v56, %v872_v53  ;;  %v3817_v59 = vpop.f32.mrb[12].mxu0 }
 0x189   : > { %v858_v60 = vadd.f32 %v3817_v59, %v3373_v16  ;;  %v849_v61 = vpop.f32.mrb[13].mxu0 }
 0x18a   : > { %3399 = vmatmul.mubr.msk.bf16.gmra.mrb[4].mxu1 %vm742_vm0, %v883_v43  ;;  %v850_v62 = vadd.f32 %v3373_v16, %v849_v61  ;;  %v3818_v63 = vpop.f32.mrb[14].mxu0 }
 0x18b   : > { %1020 = vmatprep.mubr.bf16.mxu1 %v4531_v15  ;;  %v878_v0 = vmax.f32 %v858_v60, 0.0  ;;  %v861_v1 = vadd.f32 %v3818_v63, %v3373_v16  ;;  %v852_v2 = vpop.f32.mrb[15].mxu0 }
 0x18c   : > { %v876_v3 = vmax.f32 %v850_v62, 0.0  ;;  %v853_v4 = vadd.f32 %v3373_v16, %v852_v2  ;;  %v4945_v16 = vrot.slane %v892_v12, %v900_v13 }
 0x18d   : > { %v879_v5 = vmax.f32 %v861_v1, 0.0 }
 0x18e   : > { %v877_v6 = vmax.f32 %v853_v4, 0.0 }
 0x18f   : > { %v887_v7 = vpack.c.bf16 %v879_v5, %v878_v0 }
 0x190   : > { %v886_v8 = vpack.c.bf16 %v877_v6, %v876_v3 }
 0x192   : > { %3400 = vmatmul.mubr.msk.bf16.gmra.mrb[8].mxu1 %vm742_vm0, %v884_v58 }
 0x193   : > { %1030 = vmatprep.mubr.bf16.mxu1 %v4531_v15 }
 0x19a   : > { %3401 = vmatmul.mubr.msk.bf16.gmra.mrb[12].mxu1 %vm742_vm0, %v885_v57 }
 0x19b   : > { %1040 = vmatprep.mubr.bf16.mxu1 %v4531_v15 }
 0x1a2   : > { %3402 = vmatmul.mubr.msk.bf16.gmra.mrb[16].mxu1 %vm742_vm0, %v886_v8 }
 0x1a3   : > { %1050 = vmatprep.mubr.bf16.mxu1 %v4531_v15 }
 0x1aa   : > { %3403 = vmatmul.mubr.msk.bf16.gmra.mrb[20].mxu1 %vm742_vm0, %v887_v7 }
 0x24d   : > { %v982_v17 = vpop.f32.mrb[16].mxu0 }
 0x24e   : > { %v983_v18 = vadd.f32 %v982_v17, %v4943_v14  ;;  %v984_v19 = vpop.f32.mrb[17].mxu0 }
 0x24f   : > { %v985_v15 = vadd.f32 %v984_v19, %v4945_v16  ;;  %v986_v20 = vpop.f32.mrb[18].mxu0 }
 0x250   : > { %v987_v21 = vadd.f32 %v986_v20, %v4943_v14  ;;  %v988_v22 = vpop.f32.mrb[19].mxu0  ;;  %v1061_v24 = vmax.f32 %v983_v18, 0.0 }
 0x251   : > { %v989_v23 = vadd.f32 %v988_v22, %v4945_v16  ;;  %v1062_v26 = vmax.f32 %v985_v15, 0.0 }
 0x252   : > { %v1063_v25 = vmax.f32 %v987_v21, 0.0 }
 0x253   : > { %v1064_v27 = vmax.f32 %v989_v23, 0.0 }
 0x254   : > { %v1093_v28 = vpack.c.bf16 %v1063_v25, %v1061_v24 }
 0x255   : > { %v1094_v29 = vpack.c.bf16 %v1064_v27, %v1062_v26  ;;  %v992_v30 = vpop.f32.mrb[20].mxu0  ;;  %v1002_v31 = vpop.f32.mrb[0].mxu1 }
 0x256   : > { %1109 = vst [vmem:[#allocation2] sm:$0xff] %v1093_v28  ;;  %v993_v32 = vadd.f32 %v992_v30, %v4943_v14  ;;  %v1003_v33 = vadd.f32 %v1002_v31, %v4943_v14  ;;  %v994_v34 = vpop.f32.mrb[21].mxu0  ;;  %v1004_v35 = vpop.f32.mrb[1].mxu1 }
 0x257   : > { %1110 = vst [vmem:[#allocation2 + $0x8] sm:$0xff] %v1094_v29  ;;  %v995_v36 = vadd.f32 %v994_v34, %v4945_v16  ;;  %v1005_v37 = vadd.f32 %v1004_v35, %v4945_v16  ;;  %v996_v38 = vpop.f32.mrb[22].mxu0  ;;  %v1006_v39 = vpop.f32.mrb[2].mxu1 }
 0x258   : > { %v997_v40 = vadd.f32 %v996_v38, %v4943_v14  ;;  %v1007_v41 = vadd.f32 %v1006_v39, %v4943_v14  ;;  %v998_v42 = vpop.f32.mrb[23].mxu0  ;;  %v1008_v43 = vpop.f32.mrb[3].mxu1  ;;  %v1065_v46 = vmax.f32 %v993_v32, 0.0  ;;  %v1069_v47 = vmax.f32 %v1003_v33, 0.0 }
 0x259   : > { %v999_v44 = vadd.f32 %v998_v42, %v4945_v16  ;;  %v1009_v45 = vadd.f32 %v1008_v43, %v4945_v16  ;;  %v1066_v50 = vmax.f32 %v995_v36, 0.0  ;;  %v1070_v51 = vmax.f32 %v1005_v37, 0.0 }
 0x25a   : > { %v1067_v48 = vmax.f32 %v997_v40, 0.0  ;;  %v1071_v49 = vmax.f32 %v1007_v41, 0.0 }
 0x25b   : > { %v1068_v52 = vmax.f32 %v999_v44, 0.0  ;;  %v1072_v53 = vmax.f32 %v1009_v45, 0.0 }
 0x25c   : > { %v1095_v54 = vpack.c.bf16 %v1067_v48, %v1065_v46  ;;  %v1097_v55 = vpack.c.bf16 %v1071_v49, %v1069_v47 }
 0x25d   : > { %v1096_v56 = vpack.c.bf16 %v1068_v52, %v1066_v50  ;;  %v1098_v57 = vpack.c.bf16 %v1072_v53, %v1070_v51  ;;  %v1012_v58 = vpop.f32.mrb[4].mxu1 }
 0x25e   : > { %1111 = vst [vmem:[#allocation2 + $0x10] sm:$0xff] %v1095_v54  ;;  %1113 = vst [vmem:[#allocation2 + $0x20] sm:$0xff] %v1097_v55  ;;  %v1013_v59 = vadd.f32 %v1012_v58, %v4943_v14  ;;  %v1014_v60 = vpop.f32.mrb[5].mxu1 }
 0x25f   : > { %1112 = vst [vmem:[#allocation2 + $0x18] sm:$0xff] %v1096_v56  ;;  %1114 = vst [vmem:[#allocation2 + $0x28] sm:$0xff] %v1098_v57  ;;  %v1015_v61 = vadd.f32 %v1014_v60, %v4945_v16  ;;  %v1016_v62 = vpop.f32.mrb[6].mxu1 }
 0x260   : > { %v1017_v63 = vadd.f32 %v1016_v62, %v4943_v14  ;;  %v1018_v0 = vpop.f32.mrb[7].mxu1  ;;  %v1073_v2 = vmax.f32 %v1013_v59, 0.0 }
 0x261   : > { %v1019_v1 = vadd.f32 %v1018_v0, %v4945_v16  ;;  %v1074_v4 = vmax.f32 %v1015_v61, 0.0 }
 0x262   : > { %v1075_v3 = vmax.f32 %v1017_v63, 0.0 }
 0x263   : > { %v1076_v5 = vmax.f32 %v1019_v1, 0.0 }
 0x264   : > { %v1099_v6 = vpack.c.bf16 %v1075_v3, %v1073_v2 }
 0x265   : > { %v1100_v7 = vpack.c.bf16 %v1076_v5, %v1074_v4  ;;  %v1022_v8 = vpop.f32.mrb[8].mxu1 }
 0x266   : > { %1115 = vst [vmem:[#allocation2 + $0x30] sm:$0xff] %v1099_v6  ;;  %v1023_v9 = vadd.f32 %v1022_v8, %v4943_v14  ;;  %v1024_v10 = vpop.f32.mrb[9].mxu1 }
 0x267   : > { %1116 = vst [vmem:[#allocation2 + $0x38] sm:$0xff] %v1100_v7  ;;  %v1025_v11 = vadd.f32 %v1024_v10, %v4945_v16  ;;  %v1026_v12 = vpop.f32.mrb[10].mxu1 }
 0x268   : > { %v1027_v13 = vadd.f32 %v1026_v12, %v4943_v14  ;;  %v1028_v17 = vpop.f32.mrb[11].mxu1  ;;  %v1077_v19 = vmax.f32 %v1023_v9, 0.0 }
 0x269   : > { %v1029_v18 = vadd.f32 %v1028_v17, %v4945_v16  ;;  %v1078_v20 = vmax.f32 %v1025_v11, 0.0 }
 0x26a   : > { %v1079_v15 = vmax.f32 %v1027_v13, 0.0 }
 0x26b   : > { %v1080_v21 = vmax.f32 %v1029_v18, 0.0 }
 0x26c   : > { %v1101_v22 = vpack.c.bf16 %v1079_v15, %v1077_v19 }
 0x26d   : > { %v1102_v23 = vpack.c.bf16 %v1080_v21, %v1078_v20  ;;  %v1032_v24 = vpop.f32.mrb[12].mxu1 }
 0x26e   : > { %1117 = vst [vmem:[#allocation2 + $0x40] sm:$0xff] %v1101_v22  ;;  %v1033_v25 = vadd.f32 %v1032_v24, %v4943_v14  ;;  %v1034_v26 = vpop.f32.mrb[13].mxu1 }
 0x26f   : > { %1118 = vst [vmem:[#allocation2 + $0x48] sm:$0xff] %v1102_v23  ;;  %v1035_v27 = vadd.f32 %v1034_v26, %v4945_v16  ;;  %v1036_v28 = vpop.f32.mrb[14].mxu1 }
 0x270   : > { %v1037_v29 = vadd.f32 %v1036_v28, %v4943_v14  ;;  %v1038_v30 = vpop.f32.mrb[15].mxu1  ;;  %v1081_v32 = vmax.f32 %v1033_v25, 0.0 }
 0x271   : > { %v1039_v31 = vadd.f32 %v1038_v30, %v4945_v16  ;;  %v1082_v34 = vmax.f32 %v1035_v27, 0.0 }
 0x272   : > { %v1083_v33 = vmax.f32 %v1037_v29, 0.0 }
 0x273   : > { %v1084_v35 = vmax.f32 %v1039_v31, 0.0 }
 0x274   : > { %v1103_v36 = vpack.c.bf16 %v1083_v33, %v1081_v32 }
 0x275   : > { %v1104_v37 = vpack.c.bf16 %v1084_v35, %v1082_v34  ;;  %v1042_v38 = vpop.f32.mrb[16].mxu1 }
 0x276   : > { %1119 = vst [vmem:[#allocation2 + $0x50] sm:$0xff] %v1103_v36  ;;  %v1043_v39 = vadd.f32 %v1042_v38, %v4943_v14  ;;  %v1044_v40 = vpop.f32.mrb[17].mxu1 }
 0x277   : > { %1120 = vst [vmem:[#allocation2 + $0x58] sm:$0xff] %v1104_v37  ;;  %v1045_v41 = vadd.f32 %v1044_v40, %v4945_v16  ;;  %v1046_v42 = vpop.f32.mrb[18].mxu1 }
 0x278   : > { %v1047_v43 = vadd.f32 %v1046_v42, %v4943_v14  ;;  %v1048_v44 = vpop.f32.mrb[19].mxu1  ;;  %v1085_v46 = vmax.f32 %v1043_v39, 0.0 }
 0x279   : > { %v1049_v45 = vadd.f32 %v1048_v44, %v4945_v16  ;;  %v1086_v48 = vmax.f32 %v1045_v41, 0.0 }
 0x27a   : > { %v1087_v47 = vmax.f32 %v1047_v43, 0.0 }
 0x27b   : > { %v1088_v49 = vmax.f32 %v1049_v45, 0.0 }
 0x27c   : > { %v1105_v50 = vpack.c.bf16 %v1087_v47, %v1085_v46 }
 0x27d   : > { %v1106_v51 = vpack.c.bf16 %v1088_v49, %v1086_v48  ;;  %v1052_v52 = vpop.f32.mrb[20].mxu1 }
 0x27e   : > { %1121 = vst [vmem:[#allocation2 + $0x60] sm:$0xff] %v1105_v50  ;;  %v1053_v53 = vadd.f32 %v1052_v52, %v4943_v14  ;;  %v1054_v54 = vpop.f32.mrb[21].mxu1 }
 0x27f   : > { %1122 = vst [vmem:[#allocation2 + $0x68] sm:$0xff] %v1106_v51  ;;  %v1055_v55 = vadd.f32 %v1054_v54, %v4945_v16  ;;  %v1056_v56 = vpop.f32.mrb[22].mxu1 }
 0x280   : > { %v1057_v57 = vadd.f32 %v1056_v56, %v4943_v14  ;;  %v1058_v58 = vpop.f32.mrb[23].mxu1  ;;  %v1089_v60 = vmax.f32 %v1053_v53, 0.0 }
 0x281   : > { %v1059_v59 = vadd.f32 %v1058_v58, %v4945_v16  ;;  %v1090_v62 = vmax.f32 %v1055_v55, 0.0 }
 0x282   : > { %v1091_v61 = vmax.f32 %v1057_v57, 0.0 }
 0x283   : > { %v1092_v63 = vmax.f32 %v1059_v59, 0.0 }
 0x284   : > { %v1107_v0 = vpack.c.bf16 %v1091_v61, %v1089_v60 }
 0x285   : > { %v1108_v1 = vpack.c.bf16 %v1092_v63, %v1090_v62 }
 0x286   : > { %1123 = vst [vmem:[#allocation2 + $0x70] sm:$0xff] %v1107_v0 }
 0x287   : > { %1124 = vst [vmem:[#allocation2 + $0x78] sm:$0xff] %v1108_v1 }
 0x288 PF: > { %v4064_v14 = vld [vmem:[%s4851_s6 + $0x40] sm:$0xff]   ;;  %v4066_v2 = vld [vmem:[%s4851_s6 + $0x48] sm:$0xff]   ;;  %v4068_v4 = vld [vmem:[%s4851_s6 + $0x50] sm:$0xff]   ;;  %v4532_v50 = vmov 0   ;;  %vm2108_vm1 = vcmask 261120   ;;  %p3479_p10 = scmp.ne.s32.totalorder %s4500_s24, 1 }
 0x289   : > { %v4065_v16 = vld [vmem:[%s4851_s6] sm:$0xff]   ;;  %3635 = vmatprep.subr.bf16.mxu0 %v4064_v14  ;;  %v4067_v3 = vld [vmem:[%s4851_s6 + $0x8] sm:$0xff]   ;;  %v4069_v5 = vld [vmem:[%s4851_s6 + $0x10] sm:$0xff]   ;;  %1765 = vmatprep.mubr.bf16.mxu1 %v4532_v50  ;;  %s5453_s13 = sld [smem:[#allocation35_spill]] (!%p3479_p10)  ;;  %s5454_s12 = sld [smem:[#allocation36_spill]] (!%p3479_p10) }
 0x28a   : > { %3636 = vmatpush3.bf16.msra.mxu0 %v4065_v16  ;;  %v4070_v6 = vld [vmem:[%s4851_s6 + $0x58] sm:$0xff]   ;;  %v4072_v8 = vld [vmem:[%s4851_s6 + $0x60] sm:$0xff]   ;;  %v4074_v10 = vld [vmem:[%s4851_s6 + $0x68] sm:$0xff]   ;;  %s5455_s18 = sld [smem:[#allocation38_spill]] (!%p3479_p10)  ;;  %s5458_s16 = sld [smem:[#allocation39_spill]] (!%p3479_p10) }
 0x28b   : > { %3637 = vmatprep.subr.bf16.mxu0 %v4066_v2  ;;  %v4071_v7 = vld [vmem:[%s4851_s6 + $0x18] sm:$0xff]   ;;  %v4073_v9 = vld [vmem:[%s4851_s6 + $0x20] sm:$0xff]   ;;  %v1222_v11 = vld [vmem:[#allocation2 + $0x8] sm:$0xff] }
 0x28c   : > { %1372 = vmatprep.mubr.bf16.mxu0 %v1222_v11  ;;  %v4075_v12 = vld [vmem:[%s4851_s6 + $0x28] sm:$0xff]   ;;  %v4076_v13 = vld [vmem:[%s4851_s6 + $0x70] sm:$0xff]   ;;  %v4078_v20 = vld [vmem:[%s4851_s6 + $0x78] sm:$0xff]  }
 0x28d   : > { %v4080_v17 = vld [vmem:[%s4826_s17 + $0x4] ss:$8 sps:$4 sm:$0xff]   ;;  %v4082_v18 = vld [vmem:[%s4826_s17] ss:$8 sps:$4 sm:$0xff]   ;;  %v4083_v15 = vld [vmem:[%s4826_s17 + $0x14] ss:$8 sps:$4 sm:$0xff]  }
 0x28e   : > { %3638 = vmatpush3.bf16.msra.mxu0 %v4067_v3  ;;  %v4077_v19 = vld [vmem:[%s4851_s6 + $0x30] sm:$0xff]   ;;  %1733 = vmatprep.subr.bf16.mxu1 %v4080_v17  ;;  %v4079_v23 = vld [vmem:[%s4851_s6 + $0x38] sm:$0xff]   ;;  %v4088_v24 = vld [vmem:[%s4826_s17 + $0x20] ss:$8 sps:$4 sm:$0xff]   ;;  %s3469_s6 = sshll.u32 %s4500_s24, 7 }
 0x28f   : > { %3639 = vmatprep.subr.bf16.mxu0 %v4068_v4  ;;  %1734 = vmatpush1.bf16.msra.mxu1 %v4082_v18  ;;  %v4085_v21 = vld [vmem:[%s4826_s17 + $0x10] ss:$8 sps:$4 sm:$0xff]   ;;  %v4086_v22 = vld [vmem:[%s4826_s17 + $0x24] ss:$8 sps:$4 sm:$0xff]   ;;  %v4089_v25 = vld [vmem:[%s4826_s17 + $0x34] ss:$8 sps:$4 sm:$0xff]  }
 0x290   : > { %1735 = vmatprep.subr.bf16.mxu1 %v4083_v15  ;;  %v1221_v26 = vld [vmem:[#allocation2] sm:$0xff]  ;;  %v1224_v27 = vld [vmem:[#allocation2 + $0x18] sm:$0xff]  ;;  %v1223_v32 = vld [vmem:[#allocation2 + $0x10] sm:$0xff]  ;;  %s1911_s22 = sshra.s32 %s3469_s6, 3  ;;  %s5456_s7 = smov (!%p3479_p10), %s5455_s18 }
 0x291   : > { %v4091_v28 = vld [vmem:[%s4826_s17 + $0x30] ss:$8 sps:$4 sm:$0xff]   ;;  %v4092_v29 = vld [vmem:[%s4826_s17 + $0x44] ss:$8 sps:$4 sm:$0xff]   ;;  %v4094_v30 = vld [vmem:[%s4826_s17 + $0x40] ss:$8 sps:$4 sm:$0xff]  }
 0x292   : > { %3640 = vmatpush3.bf16.msra.mxu0 %v4069_v5  ;;  %v4095_v31 = vld [vmem:[%s4826_s17 + $0x54] ss:$8 sps:$4 sm:$0xff]   ;;  %v1226_v33 = vld [vmem:[#allocation2 + $0x28] sm:$0xff]  ;;  %v4097_v34 = vld [vmem:[%s4826_s17 + $0x50] ss:$8 sps:$4 sm:$0xff]   ;;  %s3470_s29 = sshll.u32 %s1911_s22, 2 }
 0x293   : > { %3641 = vmatprep.subr.bf16.mxu0 %v4070_v6  ;;  %1736 = vmatpush1.bf16.msra.mxu1 %v4085_v21  ;;  %v1225_v35 = vld [vmem:[#allocation2 + $0x20] sm:$0xff]  ;;  %v1228_v36 = vld [vmem:[#allocation2 + $0x38] sm:$0xff]  ;;  %v1227_v37 = vld [vmem:[#allocation2 + $0x30] sm:$0xff]  ;;  %s1914_s0 = scalar_lea.vmem %s4845_s8, %s3470_s29 }
 0x294   : > { %1737 = vmatprep.subr.bf16.mxu1 %v4086_v22  ;;  %v1230_v38 = vld [vmem:[#allocation2 + $0x48] sm:$0xff]  ;;  %v1229_v39 = vld [vmem:[#allocation2 + $0x40] sm:$0xff]  ;;  %v1232_v40 = vld [vmem:[#allocation2 + $0x58] sm:$0xff] }
 0x295   : > { %v1231_v41 = vld [vmem:[#allocation2 + $0x50] sm:$0xff]  ;;  %v1234_v42 = vld [vmem:[#allocation2 + $0x68] sm:$0xff]  ;;  %v1233_v43 = vld [vmem:[#allocation2 + $0x60] sm:$0xff] }
 0x296   : > { %3642 = vmatpush3.bf16.msra.mxu0 %v4071_v7  ;;  %v1236_v44 = vld [vmem:[#allocation2 + $0x78] sm:$0xff]  ;;  %v1235_v45 = vld [vmem:[#allocation2 + $0x70] sm:$0xff]  ;;  %v4100_v47 = vld [vmem:[%s4826_s17 + $0x60] ss:$8 sps:$4 sm:$0xff]  }
 0x297   : > { %3643 = vmatprep.subr.bf16.mxu0 %v4072_v8  ;;  %1738 = vmatpush1.bf16.msra.mxu1 %v4088_v24  ;;  %v4098_v46 = vld [vmem:[%s4826_s17 + $0x64] ss:$8 sps:$4 sm:$0xff]   ;;  %v4101_v48 = vld [vmem:[%s4826_s17 + $0x74] ss:$8 sps:$4 sm:$0xff]   ;;  %v4103_v49 = vld [vmem:[%s4826_s17 + $0x70] ss:$8 sps:$4 sm:$0xff]  }
 0x298   : > { %1739 = vmatprep.subr.bf16.mxu1 %v4089_v25  ;;  %v4104_v51 = vld [vmem:[%s1914_s0] sm:$0xff]   ;;  %v4105_v52 = vld [vmem:[%s1914_s0 + $0x8] sm:$0xff]   ;;  %v4106_v53 = vld [vmem:[%s1914_s0 + $0x10] sm:$0xff]  }
 0x299   : > { %v5014_v54 = vld [vmem:[%s1914_s0 + $0x18] sm:$0xff]   ;;  %v5018_v55 = vld [vmem:[%s1914_s0 + $0x20] sm:$0xff]   ;;  %v5022_v56 = vld [vmem:[%s1914_s0 + $0x28] sm:$0xff]  }
 0x29a   : > { %3644 = vmatpush3.bf16.msra.mxu0 %v4073_v9  ;;  %v5026_v57 = vld [vmem:[%s1914_s0 + $0x30] sm:$0xff]   ;;  %v5030_v58 = vld [vmem:[%s1914_s0 + $0x38] sm:$0xff]   ;;  %v5039_v60 = vld [vmem:[%s630_s9] ss:$0 sm:$0xff]  ;;  %s5457_s0 = sld [smem:[#allocation37_spill]] (!%p3479_p10) }
 0x29b   : > { %3645 = vmatprep.subr.bf16.mxu0 %v4074_v10  ;;  %1740 = vmatpush1.bf16.msra.mxu1 %v4091_v28 }
 0x29c   : > { %1741 = vmatprep.subr.bf16.mxu1 %v4092_v29 }
 0x29e   : > { %3646 = vmatpush3.bf16.msra.mxu0 %v4075_v12 }
 0x29f   : > { %3647 = vmatprep.subr.bf16.mxu0 %v4076_v13  ;;  %1742 = vmatpush1.bf16.msra.mxu1 %v4094_v30 }
 0x2a0   : > { %1743 = vmatprep.subr.bf16.mxu1 %v4095_v31 }
 0x2a2   : > { %3648 = vmatpush3.bf16.msra.mxu0 %v4077_v19 }
 0x2a3   : > { %3649 = vmatprep.subr.bf16.mxu0 %v4078_v20  ;;  %1744 = vmatpush1.bf16.msra.mxu1 %v4097_v34 }
 0x2a4   : > { %1745 = vmatprep.subr.bf16.mxu1 %v4098_v46 }
 0x2a6   : > { %3650 = vmatpush3.bf16.msra.mxu0 %v4079_v23 }
 0x2a7   : > { %1746 = vmatpush1.bf16.msra.mxu1 %v4100_v47  ;;  %3819 = vmatprep.subr.bf16.mxu0 %v4104_v51 }
 0x2a8   : > { %1747 = vmatprep.subr.bf16.mxu1 %v4101_v48 }
 0x2a9   : > { %1373 = vmatmul.mubr.bf16.vlgmr.msra.gmra.mrb[0].mxu0 %v1221_v26 }
 0x2aa   : > { %1380 = vmatprep.mubr.bf16.mxu0 %v1224_v27  ;;  %3820 = vmatpush3.bf16.msra.mxu0 %v4104_v51 }
 0x2ab   : > { %1748 = vmatpush1.bf16.msra.mxu1 %v4103_v49  ;;  %3821 = vmatprep.subr.bf16.mxu0 %v4105_v52 }
 0x2ac   : > { %3895 = vmatprep.subr.bf16.mxu1 %v4104_v51 }
 0x2ae   : > { %3822 = vmatpush3.bf16.msra.mxu0 %v4105_v52 }
 0x2af   : > { %3823 = vmatprep.subr.bf16.mxu0 %v4106_v53 }
 0x2b1   : > { %1381 = vmatmul.mubr.bf16.gmra.mrb[4].mxu0 %v1223_v32 }
 0x2b2   : > { %1388 = vmatprep.mubr.bf16.mxu0 %v1226_v33  ;;  %3824 = vmatpush3.bf16.msra.mxu0 %v4106_v53 }
 0x2b3   : > { %3825 = vmatprep.subr.bf16.mxu0 %v5014_v54 }
 0x2b6   : > { %3826 = vmatpush3.bf16.msra.mxu0 %v5014_v54 }
 0x2b7   : > { %3827 = vmatprep.subr.bf16.mxu0 %v5018_v55 }
 0x2b9   : > { %1389 = vmatmul.mubr.bf16.gmra.mrb[8].mxu0 %v1225_v35 }
 0x2ba   : > { %1396 = vmatprep.mubr.bf16.mxu0 %v1228_v36  ;;  %3828 = vmatpush3.bf16.msra.mxu0 %v5018_v55 }
 0x2bb   : > { %3829 = vmatprep.subr.bf16.mxu0 %v5022_v56 }
 0x2be   : > { %3830 = vmatpush3.bf16.msra.mxu0 %v5022_v56 }
 0x2bf   : > { %3831 = vmatprep.subr.bf16.mxu0 %v5026_v57 }
 0x2c1   : > { %1397 = vmatmul.mubr.bf16.gmra.mrb[12].mxu0 %v1227_v37 }
 0x2c2   : > { %1404 = vmatprep.mubr.bf16.mxu0 %v1230_v38  ;;  %3832 = vmatpush3.bf16.msra.mxu0 %v5026_v57 }
 0x2c3   : > { %3833 = vmatprep.subr.bf16.mxu0 %v5030_v58 }
 0x2c6   : > { %3834 = vmatpush3.bf16.msra.mxu0 %v5030_v58 }
 0x2c9   : > { %1405 = vmatmul.mubr.bf16.gmra.mrb[16].mxu0 %v1229_v39 }
 0x2ca   : > { %1412 = vmatprep.mubr.bf16.mxu0 %v1232_v40 }
 0x2d1   : > { %1413 = vmatmul.mubr.bf16.gmra.mrb[20].mxu0 %v1231_v41 }
 0x2d2   : > { %1420 = vmatprep.mubr.bf16.mxu0 %v1234_v42 }
 0x2d9   : > { %1421 = vmatmul.mubr.bf16.gmra.mrb[24].mxu0 %v1233_v43 }
 0x2da   : > { %1428 = vmatprep.mubr.bf16.mxu0 %v1236_v44 }
 0x2e1   : > { %1429 = vmatmul.mubr.bf16.gmra.mrb[28].mxu0 %v1235_v45 }
 0x37c   : > { %v3651_v59 = vpop.f32.mrb[0].mxu0 }
 0x37d   : > { %v3652_v61 = vpop.f32.mrb[1].mxu0 }
 0x37e   : > { %v3653_v62 = vadd.f32 %v3652_v61, %v3651_v59  ;;  %v3654_v63 = vpop.f32.mrb[2].mxu0 }
 0x37f   : > { %v3655_v0 = vpop.f32.mrb[3].mxu0 }
 0x380   : > { %v1375_v1 = vadd.f32 %v3653_v62, %v5039_v60  ;;  %v3656_v14 = vadd.f32 %v3655_v0, %v3654_v63 }
 0x382   : > { %v3421_v16 = vmul.f32 -1.442695, %v1375_v1  ;;  %v1378_v2 = vadd.f32 %v3656_v14, %v5039_v60 }
 0x384   : > { %4112 = vpow2.f32 %v3421_v16  ;;  %v3422_v3 = vmul.f32 -1.442695, %v1378_v2  ;;  %v3657_v4 = vpop.f32.mrb[4].mxu0  ;;  %v1645_v5 = vpack.c.bf16 %v1378_v2, %v1375_v1 }
 0x385   : > { %v3658_v6 = vpop.f32.mrb[5].mxu0 }
 0x386   : > { %4114 = vpow2.f32 %v3422_v3  ;;  %v3659_v7 = vadd.f32 %v3658_v6, %v3657_v4  ;;  %v3660_v8 = vpop.f32.mrb[6].mxu0  ;;  %1766 = vmatmul.mubr.bf16.vlgmr.msra.gmra.mrb[0].mxu1 %v1645_v5 }
 0x387   : > { %v3661_v9 = vpop.f32.mrb[7].mxu0  ;;  %1775 = vmatprep.mubr.bf16.mxu1 %v4532_v50  ;;  %3903 = vmatpush3.bf16.msra.mxu1 %v4104_v51 }
 0x388   : > { %v1383_v10 = vadd.f32 %v3659_v7, %v5039_v60  ;;  %v3662_v11 = vadd.f32 %v3661_v9, %v3660_v8  ;;  %3896 = vmatprep.subr.bf16.mxu1 %v4105_v52 }
 0x38a   : > { %v3423_v12 = vmul.f32 -1.442695, %v1383_v10  ;;  %v1386_v13 = vadd.f32 %v3662_v11, %v5039_v60 }
 0x38b   : > { %3904 = vmatpush3.bf16.msra.mxu1 %v4105_v52 }
 0x38c   : > { %4116 = vpow2.f32 %v3423_v12  ;;  %v3424_v17 = vmul.f32 -1.442695, %v1386_v13  ;;  %v3663_v18 = vpop.f32.mrb[8].mxu0  ;;  %v1646_v19 = vpack.c.bf16 %v1386_v13, %v1383_v10  ;;  %3897 = vmatprep.subr.bf16.mxu1 %v4106_v53 }
 0x38d   : > { %v3664_v15 = vpop.f32.mrb[9].mxu0 }
 0x38e   : > { %v4113_v20 = vpop.eup %4112  ;;  %4118 = vpow2.f32 %v3424_v17  ;;  %v3665_v21 = vadd.f32 %v3664_v15, %v3663_v18  ;;  %v3666_v22 = vpop.f32.mrb[10].mxu0  ;;  %1776 = vmatmul.mubr.bf16.gmra.mrb[4].mxu1 %v1646_v19 }
 0x38f   : > { %v1485_v23 = vadd.f32 1.0, %v4113_v20  ;;  %v3667_v24 = vpop.f32.mrb[11].mxu0  ;;  %1785 = vmatprep.mubr.bf16.mxu1 %v4532_v50  ;;  %3905 = vmatpush3.bf16.msra.mxu1 %v4106_v53 }
 0x390   : > { %v4115_v25 = vpop.eup %4114  ;;  %v1391_v26 = vadd.f32 %v3665_v21, %v5039_v60  ;;  %v3668_v27 = vadd.f32 %v3667_v24, %v3666_v22  ;;  %3898 = vmatprep.subr.bf16.mxu1 %v5014_v54 }
 0x391   : > { %v1486_v28 = vadd.f32 1.0, %v4115_v25  ;;  %4120 = vrcp.f32 %v1485_v23 }
 0x392   : > { %v3425_v29 = vmul.f32 -1.442695, %v1391_v26  ;;  %v1394_v30 = vadd.f32 %v3668_v27, %v5039_v60 }
 0x393   : > { %4122 = vrcp.f32 %v1486_v28  ;;  %3906 = vmatpush3.bf16.msra.mxu1 %v5014_v54 }
 0x394   : > { %4124 = vpow2.f32 %v3425_v29  ;;  %v3426_v31 = vmul.f32 -1.442695, %v1394_v30  ;;  %v3669_v32 = vpop.f32.mrb[12].mxu0  ;;  %v1647_v33 = vpack.c.bf16 %v1394_v30, %v1391_v26  ;;  %3899 = vmatprep.subr.bf16.mxu1 %v5018_v55 }
 0x395   : > { %v3670_v34 = vpop.f32.mrb[13].mxu0 }
 0x396   : > { %v4117_v35 = vpop.eup %4116  ;;  %4126 = vpow2.f32 %v3426_v31  ;;  %v3671_v36 = vadd.f32 %v3670_v34, %v3669_v32  ;;  %v3672_v37 = vpop.f32.mrb[14].mxu0  ;;  %1786 = vmatmul.mubr.bf16.gmra.mrb[8].mxu1 %v1647_v33 }
 0x397   : > { %v1487_v38 = vadd.f32 1.0, %v4117_v35  ;;  %v3673_v39 = vpop.f32.mrb[15].mxu0  ;;  %1795 = vmatprep.mubr.bf16.mxu1 %v4532_v50  ;;  %3907 = vmatpush3.bf16.msra.mxu1 %v5018_v55 }
 0x398   : > { %v4119_v40 = vpop.eup %4118  ;;  %v1399_v41 = vadd.f32 %v3671_v36, %v5039_v60  ;;  %v3674_v42 = vadd.f32 %v3673_v39, %v3672_v37  ;;  %3900 = vmatprep.subr.bf16.mxu1 %v5022_v56 }
 0x399   : > { %v1488_v43 = vadd.f32 1.0, %v4119_v40  ;;  %4128 = vrcp.f32 %v1487_v38 }
 0x39a   : > { %v3427_v44 = vmul.f32 -1.442695, %v1399_v41  ;;  %v1402_v45 = vadd.f32 %v3674_v42, %v5039_v60 }
 0x39b   : > { %4130 = vrcp.f32 %v1488_v43  ;;  %3908 = vmatpush3.bf16.msra.mxu1 %v5022_v56  ;;  %v4121_v46 = vpop.eup %4120 }
 0x39c   : > { %4132 = vpow2.f32 %v3427_v44  ;;  %v3428_v47 = vmul.f32 -1.442695, %v1402_v45  ;;  %v3675_v48 = vpop.f32.mrb[16].mxu0  ;;  %v1648_v49 = vpack.c.bf16 %v1402_v45, %v1399_v41  ;;  %3901 = vmatprep.subr.bf16.mxu1 %v5026_v57 }
 0x39d   : > { %v4123_v51 = vpop.eup %4122  ;;  %v3676_v52 = vpop.f32.mrb[17].mxu0 }
 0x39e   : > { %v4125_v53 = vpop.eup %4124  ;;  %4134 = vpow2.f32 %v3428_v47  ;;  %v3677_v54 = vadd.f32 %v3676_v52, %v3675_v48  ;;  %v3678_v55 = vpop.f32.mrb[18].mxu0  ;;  %1796 = vmatmul.mubr.bf16.gmra.mrb[12].mxu1 %v1648_v49  ;;  %v1533_v59 = vpack.c.bf16 %v4123_v51, %v4121_v46 }
 0x39f   : > { %v1489_v61 = vadd.f32 1.0, %v4125_v53  ;;  %v3679_v62 = vpop.f32.mrb[19].mxu0  ;;  %1805 = vmatprep.mubr.bf16.mxu1 %v4532_v50  ;;  %3909 = vmatpush3.bf16.msra.mxu1 %v5026_v57 }
 0x3a0   : > { %v4127_v56 = vpop.eup %4126  ;;  %v1407_v63 = vadd.f32 %v3677_v54, %v5039_v60  ;;  %v3680_v0 = vadd.f32 %v3679_v62, %v3678_v55  ;;  %3582 = vst [vmem:[%s4867_s1] sm:$0xff] %v1533_v59   ;;  %3835 = vmatprep.mubr.bf16.mxu0 %v1533_v59  ;;  %3902 = vmatprep.subr.bf16.mxu1 %v5030_v58 }
 0x3a1   : > { %v1490_v1 = vadd.f32 1.0, %v4127_v56  ;;  %4136 = vrcp.f32 %v1489_v61 }
 0x3a2   : > { %v3429_v14 = vmul.f32 -1.442695, %v1407_v63  ;;  %v1410_v16 = vadd.f32 %v3680_v0, %v5039_v60 }
 0x3a3   : > { %4138 = vrcp.f32 %v1490_v1  ;;  %3910 = vmatpush3.bf16.msra.mxu1 %v5030_v58  ;;  %v4129_v2 = vpop.eup %4128 }
 0x3a4   : > { %4140 = vpow2.f32 %v3429_v14  ;;  %v3430_v3 = vmul.f32 -1.442695, %v1410_v16  ;;  %v3681_v57 = vpop.f32.mrb[20].mxu0  ;;  %v1649_v4 = vpack.c.bf16 %v1410_v16, %v1407_v63 }
 0x3a5   : > { %v4131_v5 = vpop.eup %4130  ;;  %v3682_v6 = vpop.f32.mrb[21].mxu0 }
 0x3a6   : > { %v4133_v7 = vpop.eup %4132  ;;  %4142 = vpow2.f32 %v3430_v3  ;;  %v3683_v8 = vadd.f32 %v3682_v6, %v3681_v57  ;;  %v3684_v9 = vpop.f32.mrb[22].mxu0  ;;  %1806 = vmatmul.mubr.bf16.gmra.mrb[16].mxu1 %v1649_v4  ;;  %v1534_v10 = vpack.c.bf16 %v4131_v5, %v4129_v2 }
 0x3a7   : > { %v1491_v11 = vadd.f32 1.0, %v4133_v7  ;;  %v3685_v12 = vpop.f32.mrb[23].mxu0  ;;  %1815 = vmatprep.mubr.bf16.mxu1 %v4532_v50 }
 0x3a8   : > { %v4135_v13 = vpop.eup %4134  ;;  %v1415_v58 = vadd.f32 %v3683_v8, %v5039_v60  ;;  %v3686_v17 = vadd.f32 %v3685_v12, %v3684_v9  ;;  %3618 = vst [vmem:[%s4867_s1 + $0x8] sm:$0xff] %v1534_v10   ;;  %3836 = vmatmul.mubr.bf16.vlgmr.msra.gmra.mrb[32].mxu0 %v1534_v10 }
 0x3a9   : > { %v1492_v18 = vadd.f32 1.0, %v4135_v13  ;;  %4144 = vrcp.f32 %v1491_v11  ;;  %v1613_v13 = vld [vmem:[#allocation3] sm:$0xff] }
 0x3aa   : > { %v3431_v19 = vmul.f32 -1.442695, %v1415_v58  ;;  %v1418_v15 = vadd.f32 %v3686_v17, %v5039_v60 }
 0x3ab   : > { %4146 = vrcp.f32 %v1492_v18  ;;  %v4137_v20 = vpop.eup %4136  ;;  %v1615_v18 = vld [vmem:[#allocation3 + $0x10] sm:$0xff] }
 0x3ac   : > { %4148 = vpow2.f32 %v3431_v19  ;;  %v3432_v21 = vmul.f32 -1.442695, %v1418_v15  ;;  %v3687_v22 = vpop.f32.mrb[24].mxu0  ;;  %v1650_v23 = vpack.c.bf16 %v1418_v15, %v1415_v58  ;;  %v1614_v58 = vld [vmem:[#allocation3 + $0x8] sm:$0xff] }
 0x3ad   : > { %v4139_v24 = vpop.eup %4138  ;;  %v3688_v25 = vpop.f32.mrb[25].mxu0 }
 0x3ae   : > { %v4141_v26 = vpop.eup %4140  ;;  %4150 = vpow2.f32 %v3432_v21  ;;  %v3689_v27 = vadd.f32 %v3688_v25, %v3687_v22  ;;  %v3690_v28 = vpop.f32.mrb[26].mxu0  ;;  %1816 = vmatmul.mubr.bf16.gmra.mrb[20].mxu1 %v1650_v23  ;;  %v1535_v29 = vpack.c.bf16 %v4139_v24, %v4137_v20  ;;  %v1616_v20 = vld [vmem:[#allocation3 + $0x18] sm:$0xff] }
 0x3af   : > { %v1493_v30 = vadd.f32 1.0, %v4141_v26  ;;  %v3691_v31 = vpop.f32.mrb[27].mxu0  ;;  %1825 = vmatprep.mubr.bf16.mxu1 %v4532_v50  ;;  %v1617_v26 = vld [vmem:[#allocation3 + $0x20] sm:$0xff] }
 0x3b0   : > { %v4143_v32 = vpop.eup %4142  ;;  %v1423_v33 = vadd.f32 %v3689_v27, %v5039_v60  ;;  %v3692_v34 = vadd.f32 %v3691_v31, %v3690_v28  ;;  %3619 = vst [vmem:[%s4867_s1 + $0x10] sm:$0xff] %v1535_v29   ;;  %3839 = vmatprep.mubr.bf16.mxu0 %v1535_v29  ;;  %v1618_v27 = vld [vmem:[#allocation3 + $0x28] sm:$0xff]  ;;  %v1619_v29 = vld [vmem:[#allocation3 + $0x30] sm:$0xff] }
 0x3b1   : > { %v1494_v35 = vadd.f32 1.0, %v4143_v32  ;;  %4152 = vrcp.f32 %v1493_v30  ;;  %v1620_v32 = vld [vmem:[#allocation3 + $0x38] sm:$0xff] }
 0x3b2   : > { %v3433_v36 = vmul.f32 -1.442695, %v1423_v33  ;;  %v1426_v37 = vadd.f32 %v3692_v34, %v5039_v60 }
 0x3b3   : > { %4154 = vrcp.f32 %v1494_v35  ;;  %v4145_v38 = vpop.eup %4144 }
 0x3b4   : > { %4156 = vpow2.f32 %v3433_v36  ;;  %v3434_v39 = vmul.f32 -1.442695, %v1426_v37  ;;  %v3693_v40 = vpop.f32.mrb[28].mxu0  ;;  %v1651_v41 = vpack.c.bf16 %v1426_v37, %v1423_v33 }
 0x3b5   : > { %v4147_v42 = vpop.eup %4146  ;;  %v3694_v43 = vpop.f32.mrb[29].mxu0 }
 0x3b6   : > { %v4149_v44 = vpop.eup %4148  ;;  %4158 = vpow2.f32 %v3434_v39  ;;  %v3695_v45 = vadd.f32 %v3694_v43, %v3693_v40  ;;  %v3696_v46 = vpop.f32.mrb[30].mxu0  ;;  %1826 = vmatmul.mubr.bf16.gmra.mrb[24].mxu1 %v1651_v41  ;;  %v1536_v47 = vpack.c.bf16 %v4147_v42, %v4145_v38  ;;  %v1621_v38 = vld [vmem:[#allocation3 + $0x40] sm:$0xff]  ;;  %v1622_v39 = vld [vmem:[#allocation3 + $0x48] sm:$0xff]  ;;  %v1623_v41 = vld [vmem:[#allocation3 + $0x50] sm:$0xff] }
 0x3b7   : > { %v1495_v48 = vadd.f32 1.0, %v4149_v44  ;;  %v3697_v49 = vpop.f32.mrb[31].mxu0  ;;  %1835 = vmatprep.mubr.bf16.mxu1 %v4532_v50  ;;  %v1624_v44 = vld [vmem:[#allocation3 + $0x58] sm:$0xff] }
 0x3b8   : > { %v4151_v51 = vpop.eup %4150  ;;  %v1431_v52 = vadd.f32 %v3695_v45, %v5039_v60  ;;  %v3698_v53 = vadd.f32 %v3697_v49, %v3696_v46  ;;  %3620 = vst [vmem:[%s4867_s1 + $0x18] sm:$0xff] %v1536_v47   ;;  %3840 = vmatmul.mubr.bf16.gmra.mrb[36].mxu0 %v1536_v47 }
 0x3b9   : > { %v1496_v54 = vadd.f32 1.0, %v4151_v51  ;;  %4160 = vrcp.f32 %v1495_v48  ;;  %v1625_v51 = vld [vmem:[#allocation3 + $0x60] sm:$0xff] }
 0x3ba   : > { %v3435_v55 = vmul.f32 -1.442695, %v1431_v52  ;;  %v1434_v59 = vadd.f32 %v3698_v53, %v5039_v60 }
 0x3bb   : > { %4162 = vrcp.f32 %v1496_v54  ;;  %v4153_v61 = vpop.eup %4152  ;;  %v1627_v54 = vld [vmem:[#allocation3 + $0x70] sm:$0xff] }
 0x3bc   : > { %4164 = vpow2.f32 %v3435_v55  ;;  %v3436_v62 = vmul.f32 -1.442695, %v1434_v59  ;;  %v1652_v56 = vpack.c.bf16 %v1434_v59, %v1431_v52  ;;  %v1626_v52 = vld [vmem:[#allocation3 + $0x68] sm:$0xff] }
 0x3bd   : > { %v4155_v63 = vpop.eup %4154 }
 0x3be   : > { %v4157_v0 = vpop.eup %4156  ;;  %4166 = vpow2.f32 %v3436_v62  ;;  %1836 = vmatmul.mubr.bf16.gmra.mrb[28].mxu1 %v1652_v56  ;;  %v1537_v50 = vpack.c.bf16 %v4155_v63, %v4153_v61  ;;  %v1628_v61 = vld [vmem:[#allocation3 + $0x78] sm:$0xff] }
 0x3bf   : > { %v1497_v1 = vadd.f32 1.0, %v4157_v0 }
 0x3c0   : > { %v4159_v14 = vpop.eup %4158  ;;  %3621 = vst [vmem:[%s4867_s1 + $0x20] sm:$0xff] %v1537_v50   ;;  %3843 = vmatprep.mubr.bf16.mxu1 %v1537_v50 }
 0x3c1   : > { %v1498_v16 = vadd.f32 1.0, %v4159_v14  ;;  %4168 = vrcp.f32 %v1497_v1  ;;  %v1629_v1 = vld [vmem:[#allocation3 + $0x80] sm:$0xff]  ;;  %v1630_v14 = vld [vmem:[#allocation3 + $0x88] sm:$0xff] }
 0x3c3   : > { %4170 = vrcp.f32 %v1498_v16  ;;  %v4161_v60 = vpop.eup %4160 }
 0x3c5   : > { %v4163_v2 = vpop.eup %4162 }
 0x3c6   : > { %v4165_v3 = vpop.eup %4164  ;;  %v1538_v57 = vpack.c.bf16 %v4163_v2, %v4161_v60  ;;  %v1631_v60 = vld [vmem:[#allocation3 + $0x90] sm:$0xff] }
 0x3c7   : > { %v1499_v4 = vadd.f32 1.0, %v4165_v3  ;;  %v1933_v2 = vld [vmem:[#allocation4 + $0x10] sm:$0xff] }
 0x3c8   : > { %v4167_v5 = vpop.eup %4166  ;;  %3622 = vst [vmem:[%s4867_s1 + $0x28] sm:$0xff] %v1538_v57   ;;  %3844 = vmatmul.mubr.bf16.vlgmr.msra.gmra.mrb[32].mxu1 %v1538_v57 }
 0x3c9   : > { %v1500_v6 = vadd.f32 1.0, %v4167_v5  ;;  %4172 = vrcp.f32 %v1499_v4  ;;  %v1632_v4 = vld [vmem:[#allocation3 + $0x98] sm:$0xff]  ;;  %v1931_v5 = vld [vmem:[#allocation4] sm:$0xff] }
 0x3cb   : > { %4174 = vrcp.f32 %v1500_v6  ;;  %v4169_v7 = vpop.eup %4168 }
 0x3cd   : > { %v4171_v8 = vpop.eup %4170 }
 0x3ce   : > { %v1539_v9 = vpack.c.bf16 %v4171_v8, %v4169_v7 }
 0x3d0   : > { %3623 = vst [vmem:[%s4867_s1 + $0x30] sm:$0xff] %v1539_v9   ;;  %3847 = vmatprep.mubr.bf16.mxu1 %v1539_v9  ;;  %v1934_v9 = vld [vmem:[#allocation4 + $0x18] sm:$0xff] }
 0x3d3   : > { %v4173_v10 = vpop.eup %4172 }
 0x3d5   : > { %v4175_v11 = vpop.eup %4174 }
 0x3d6   : > { %v1540_v12 = vpack.c.bf16 %v4175_v11, %v4173_v10 }
 0x3d8   : > { %3624 = vst [vmem:[%s4867_s1 + $0x38] sm:$0xff] %v1540_v12   ;;  %3848 = vmatmul.mubr.bf16.gmra.mrb[36].mxu1 %v1540_v12 }
 0x459   : > { %v1767_v17 = vpop.f32.mrb[0].mxu1 }
 0x45a   : > { %v1846_v19 = vadd.f32 %v1767_v17, %v1613_v13  ;;  %v1769_v15 = vpop.f32.mrb[1].mxu1 }
 0x45b   : > { %v1847_v21 = vadd.f32 %v1769_v15, %v1614_v58  ;;  %v1771_v22 = vpop.f32.mrb[2].mxu1  ;;  %v1932_v58 = vld [vmem:[#allocation4 + $0x8] sm:$0xff] }
 0x45c   : > { %1878 = vst [vmem:[#allocation3] sm:$0xff] %v1846_v19  ;;  %v1848_v23 = vadd.f32 %v1771_v22, %v1615_v18  ;;  %v1773_v24 = vpop.f32.mrb[3].mxu1  ;;  %v1633_v22 = vld [vmem:[#allocation3 + $0xa0] sm:$0xff] }
 0x45d   : > { %1879 = vst [vmem:[#allocation3 + $0x8] sm:$0xff] %v1847_v21  ;;  %v1849_v25 = vadd.f32 %v1773_v24, %v1616_v20 }
 0x45e   : > { %1880 = vst [vmem:[#allocation3 + $0x10] sm:$0xff] %v1848_v23  ;;  %v1634_v23 = vld [vmem:[#allocation3 + $0xa8] sm:$0xff] }
 0x45f   : > { %1881 = vst [vmem:[#allocation3 + $0x18] sm:$0xff] %v1849_v25  ;;  %v1635_v25 = vld [vmem:[#allocation3 + $0xb0] sm:$0xff] }
 0x461   : > { %v1777_v28 = vpop.f32.mrb[4].mxu1 }
 0x462   : > { %v1850_v30 = vadd.f32 %v1777_v28, %v1617_v26  ;;  %v1779_v31 = vpop.f32.mrb[5].mxu1  ;;  %v1636_v28 = vld [vmem:[#allocation3 + $0xb8] sm:$0xff] }
 0x463   : > { %v1851_v33 = vadd.f32 %v1779_v31, %v1618_v27  ;;  %v1781_v34 = vpop.f32.mrb[6].mxu1 }
 0x464   : > { %1882 = vst [vmem:[#allocation3 + $0x20] sm:$0xff] %v1850_v30  ;;  %v1852_v35 = vadd.f32 %v1781_v34, %v1619_v29  ;;  %v1783_v36 = vpop.f32.mrb[7].mxu1  ;;  %v1637_v34 = vld [vmem:[#allocation3 + $0xc0] sm:$0xff] }
 0x465   : > { %1883 = vst [vmem:[#allocation3 + $0x28] sm:$0xff] %v1851_v33  ;;  %v1853_v37 = vadd.f32 %v1783_v36, %v1620_v32 }
 0x466   : > { %1884 = vst [vmem:[#allocation3 + $0x30] sm:$0xff] %v1852_v35  ;;  %v1638_v35 = vld [vmem:[#allocation3 + $0xc8] sm:$0xff] }
 0x467   : > { %1885 = vst [vmem:[#allocation3 + $0x38] sm:$0xff] %v1853_v37  ;;  %v1639_v37 = vld [vmem:[#allocation3 + $0xd0] sm:$0xff] }
 0x469   : > { %v1787_v40 = vpop.f32.mrb[8].mxu1 }
 0x46a   : > { %v1854_v42 = vadd.f32 %v1787_v40, %v1621_v38  ;;  %v1789_v43 = vpop.f32.mrb[9].mxu1  ;;  %v1937_v38 = vld [vmem:[#allocation4 + $0x30] sm:$0xff] }
 0x46b   : > { %v1855_v45 = vadd.f32 %v1789_v43, %v1622_v39  ;;  %v1791_v46 = vpop.f32.mrb[10].mxu1 }
 0x46c   : > { %1886 = vst [vmem:[#allocation3 + $0x40] sm:$0xff] %v1854_v42  ;;  %v1856_v47 = vadd.f32 %v1791_v46, %v1623_v41  ;;  %v1793_v48 = vpop.f32.mrb[11].mxu1  ;;  %v1640_v41 = vld [vmem:[#allocation3 + $0xd8] sm:$0xff]  ;;  %v1935_v42 = vld [vmem:[#allocation4 + $0x20] sm:$0xff] }
 0x46d   : > { %1887 = vst [vmem:[#allocation3 + $0x48] sm:$0xff] %v1855_v45  ;;  %v1857_v49 = vadd.f32 %v1793_v48, %v1624_v44  ;;  %v1938_v46 = vld [vmem:[#allocation4 + $0x38] sm:$0xff] }
 0x46e   : > { %1888 = vst [vmem:[#allocation3 + $0x50] sm:$0xff] %v1856_v47 }
 0x46f   : > { %1889 = vst [vmem:[#allocation3 + $0x58] sm:$0xff] %v1857_v49 }
 0x471   : > { %v1797_v53 = vpop.f32.mrb[12].mxu1 }
 0x472   : > { %v1858_v55 = vadd.f32 %v1797_v53, %v1625_v51  ;;  %v1799_v59 = vpop.f32.mrb[13].mxu1 }
 0x473   : > { %v1859_v62 = vadd.f32 %v1799_v59, %v1626_v52  ;;  %v1801_v56 = vpop.f32.mrb[14].mxu1  ;;  %v1936_v52 = vld [vmem:[#allocation4 + $0x28] sm:$0xff] }
 0x474   : > { %1890 = vst [vmem:[#allocation3 + $0x60] sm:$0xff] %v1858_v55  ;;  %v1860_v63 = vadd.f32 %v1801_v56, %v1627_v54  ;;  %v1803_v0 = vpop.f32.mrb[15].mxu1  ;;  %v1641_v56 = vld [vmem:[#allocation3 + $0xe0] sm:$0xff] }
 0x475   : > { %1891 = vst [vmem:[#allocation3 + $0x68] sm:$0xff] %v1859_v62  ;;  %v1861_v50 = vadd.f32 %v1803_v0, %v1628_v61 }
 0x476   : > { %1892 = vst [vmem:[#allocation3 + $0x70] sm:$0xff] %v1860_v63  ;;  %v1642_v63 = vld [vmem:[#allocation3 + $0xe8] sm:$0xff] }
 0x477   : > { %1893 = vst [vmem:[#allocation3 + $0x78] sm:$0xff] %v1861_v50  ;;  %v1643_v50 = vld [vmem:[#allocation3 + $0xf0] sm:$0xff] }
 0x479   : > { %v1807_v16 = vpop.f32.mrb[16].mxu1 }
 0x47a   : > { %v1862_v3 = vadd.f32 %v1807_v16, %v1629_v1  ;;  %v1809_v57 = vpop.f32.mrb[17].mxu1  ;;  %v1644_v16 = vld [vmem:[#allocation3 + $0xf8] sm:$0xff] }
 0x47b   : > { %v1863_v6 = vadd.f32 %v1809_v57, %v1630_v14  ;;  %v1811_v7 = vpop.f32.mrb[18].mxu1  ;;  %v3837_v8 = vpop.f32.mrb[32].mxu0 }
 0x47c   : > { %1894 = vst [vmem:[#allocation3 + $0x80] sm:$0xff] %v1862_v3  ;;  %v1864_v10 = vadd.f32 %v1811_v7, %v1631_v60  ;;  %v2094_v11 = vadd.f32 %v3837_v8, %v1933_v2  ;;  %v1813_v12 = vpop.f32.mrb[19].mxu1  ;;  %v2029_v13 = vpop.f32.mrb[33].mxu0  ;;  %v1942_v8 = vld [vmem:[#allocation4 + $0x58] sm:$0xff] }
 0x47d   : > { %1895 = vst [vmem:[#allocation3 + $0x88] sm:$0xff] %v1863_v6  ;;  %v1865_v17 = vadd.f32 %v1813_v12, %v1632_v4  ;;  %v2092_v18 = vadd.f32 %v2029_v13, %v1931_v5  ;;  %v3838_v19 = vpop.f32.mrb[34].mxu0  ;;  %v1941_v5 = vld [vmem:[#allocation4 + $0x50] sm:$0xff]  ;;  %v1939_v6 = vld [vmem:[#allocation4 + $0x40] sm:$0xff] }
 0x47e   : > { %1896 = vst [vmem:[#allocation3 + $0x90] sm:$0xff] %v1864_v10  ;;  %2111 = vst.msk [vmem:[#allocation4 + $0x10] sm:$0xff] %vm2108_vm1, %v2094_v11  ;;  %v2095_v15 = vadd.f32 %v3838_v19, %v1934_v9  ;;  %v2032_v20 = vpop.f32.mrb[35].mxu0  ;;  %v1940_v11 = vld [vmem:[#allocation4 + $0x48] sm:$0xff]  ;;  %v1945_v19 = vld [vmem:[#allocation4 + $0x70] sm:$0xff] }
 0x47f   : > { %1897 = vst [vmem:[#allocation3 + $0x98] sm:$0xff] %v1865_v17  ;;  %2109 = vst.msk [vmem:[#allocation4] sm:$0xff] %vm2108_vm1, %v2092_v18  ;;  %v2093_v21 = vadd.f32 %v2032_v20, %v1932_v58 }
 0x480   : > { %2112 = vst.msk [vmem:[#allocation4 + $0x18] sm:$0xff] %vm2108_vm1, %v2095_v15  ;;  %v1943_v15 = vld [vmem:[#allocation4 + $0x60] sm:$0xff] }
 0x481   : > { %2110 = vst.msk [vmem:[#allocation4 + $0x8] sm:$0xff] %vm2108_vm1, %v2093_v21  ;;  %v1817_v24 = vpop.f32.mrb[20].mxu1  ;;  %v1946_v21 = vld [vmem:[#allocation4 + $0x78] sm:$0xff] }
 0x482   : > { %v1866_v26 = vadd.f32 %v1817_v24, %v1633_v22  ;;  %v1819_v27 = vpop.f32.mrb[21].mxu1  ;;  %v1944_v24 = vld [vmem:[#allocation4 + $0x68] sm:$0xff] }
 0x483   : > { %v1867_v29 = vadd.f32 %v1819_v27, %v1634_v23  ;;  %v1821_v30 = vpop.f32.mrb[22].mxu1 }
 0x484   : > { %1898 = vst [vmem:[#allocation3 + $0xa0] sm:$0xff] %v1866_v26  ;;  %v1868_v31 = vadd.f32 %v1821_v30, %v1635_v25  ;;  %v1823_v32 = vpop.f32.mrb[23].mxu1  ;;  %v4176_v30 = vld [vmem:[%s4845_s8 + $0x40] sm:$0xff] (!%p3479_p10)  }
 0x485   : > { %1899 = vst [vmem:[#allocation3 + $0xa8] sm:$0xff] %v1867_v29  ;;  %v1869_v33 = vadd.f32 %v1823_v32, %v1636_v28  ;;  %3715 = vmatprep.subr.bf16.mxu0 (!%p3479_p10), %v4176_v30  ;;  %v4178_v32 = vld [vmem:[%s4845_s8 + $0x48] sm:$0xff] (!%p3479_p10)  }
 0x486   : > { %1900 = vst [vmem:[#allocation3 + $0xb0] sm:$0xff] %v1868_v31  ;;  %v4177_v31 = vld [vmem:[%s4845_s8] sm:$0xff] (!%p3479_p10)  }
 0x487   : > { %1901 = vst [vmem:[#allocation3 + $0xb8] sm:$0xff] %v1869_v33  ;;  %3716 = vmatpush3.bf16.msra.mxu0 (!%p3479_p10), %v4177_v31  ;;  %v4179_v33 = vld [vmem:[%s4845_s8 + $0x8] sm:$0xff] (!%p3479_p10)  }
 0x488   : > { %3717 = vmatprep.subr.bf16.mxu0 (!%p3479_p10), %v4178_v32 }
 0x489   : > { %v1827_v36 = vpop.f32.mrb[24].mxu1 }
 0x48a   : > { %v1870_v39 = vadd.f32 %v1827_v36, %v1637_v34  ;;  %v1829_v40 = vpop.f32.mrb[25].mxu1  ;;  %v4180_v34 = vld [vmem:[%s4845_s8 + $0x50] sm:$0xff] (!%p3479_p10)  }
 0x48b   : > { %v1871_v43 = vadd.f32 %v1829_v40, %v1638_v35  ;;  %v1831_v44 = vpop.f32.mrb[26].mxu1  ;;  %v3841_v45 = vpop.f32.mrb[36].mxu0  ;;  %v2163_v35 = vlaneseq (!%p3479_p10)  ;;  %3718 = vmatpush3.bf16.msra.mxu0 (!%p3479_p10), %v4179_v33  ;;  %v4181_v36 = vld [vmem:[%s4845_s8 + $0x10] sm:$0xff] (!%p3479_p10)   ;;  %v4184_v40 = vld [vmem:[%s4845_s8 + $0x60] sm:$0xff] (!%p3479_p10)  }
 0x48c   : > { %1902 = vst [vmem:[#allocation3 + $0xc0] sm:$0xff] %v1870_v39  ;;  %v1872_v47 = vadd.f32 %v1831_v44, %v1639_v37  ;;  %v2098_v48 = vadd.f32 %v3841_v45, %v1937_v38  ;;  %v1833_v49 = vpop.f32.mrb[27].mxu1  ;;  %v2045_v51 = vpop.f32.mrb[37].mxu0  ;;  %3719 = vmatprep.subr.bf16.mxu0 (!%p3479_p10), %v4180_v34  ;;  %v4182_v37 = vld [vmem:[%s4845_s8 + $0x58] sm:$0xff] (!%p3479_p10)   ;;  %v4186_v44 = vld [vmem:[%s4845_s8 + $0x68] sm:$0xff] (!%p3479_p10)  }
 0x48d   : > { %1903 = vst [vmem:[#allocation3 + $0xc8] sm:$0xff] %v1871_v43  ;;  %v1873_v53 = vadd.f32 %v1833_v49, %v1640_v41  ;;  %v2096_v54 = vadd.f32 %v2045_v51, %v1935_v42  ;;  %v3842_v55 = vpop.f32.mrb[38].mxu0  ;;  %v2164_v38 = vshrl.u32 (!%p3479_p10), %v2163_v35, 7  ;;  %v4183_v39 = vld [vmem:[%s4845_s8 + $0x18] sm:$0xff] (!%p3479_p10)   ;;  %v4185_v43 = vld [vmem:[%s4845_s8 + $0x20] sm:$0xff] (!%p3479_p10)   ;;  %v2130_v45 = vld [vmem:[#allocation3 + $0x8] sm:$0xff] (!%p3479_p10) }
 0x48e   : > { %1904 = vst [vmem:[#allocation3 + $0xd0] sm:$0xff] %v1872_v47  ;;  %2115 = vst.msk [vmem:[#allocation4 + $0x30] sm:$0xff] %vm2108_vm1, %v2098_v48  ;;  %v2099_v59 = vadd.f32 %v3842_v55, %v1938_v46  ;;  %v2048_v61 = vpop.f32.mrb[39].mxu0  ;;  %v2132_v46 = vld [vmem:[#allocation3 + $0x18] sm:$0xff] (!%p3479_p10)  ;;  %v2161_v47 = vld [vmem:[%s5453_s13] sm:$0x3] (!%p3479_p10) }
 0x48f   : > { %1905 = vst [vmem:[#allocation3 + $0xd8] sm:$0xff] %v1873_v53  ;;  %2113 = vst.msk [vmem:[#allocation4 + $0x20] sm:$0xff] %vm2108_vm1, %v2096_v54  ;;  %v2097_v62 = vadd.f32 %v2048_v61, %v1936_v52  ;;  %3720 = vmatpush3.bf16.msra.mxu0 (!%p3479_p10), %v4181_v36  ;;  %v2165_v41 = vsub.s32 (!%p3479_p10), 0, %v2164_v38  ;;  %v2169_v42 = vsub.s32 (!%p3479_p10), 1, %v2164_v38  ;;  %v2129_v51 = vld [vmem:[#allocation3] sm:$0xff] (!%p3479_p10)  ;;  %v2131_v52 = vld [vmem:[#allocation3 + $0x10] sm:$0xff] (!%p3479_p10) }
 0x490   : > { %2116 = vst.msk [vmem:[#allocation4 + $0x38] sm:$0xff] %vm2108_vm1, %v2099_v59  ;;  %3721 = vmatprep.subr.bf16.mxu0 (!%p3479_p10), %v4182_v37  ;;  %v2134_v53 = vld [vmem:[#allocation3 + $0x28] sm:$0xff] (!%p3479_p10)  ;;  %v2136_v54 = vld [vmem:[#allocation3 + $0x38] sm:$0xff] (!%p3479_p10)  ;;  %v2133_v55 = vld [vmem:[#allocation3 + $0x20] sm:$0xff] (!%p3479_p10) }
 0x491   : > { %2114 = vst.msk [vmem:[#allocation4 + $0x28] sm:$0xff] %vm2108_vm1, %v2097_v62  ;;  %v1837_v0 = vpop.f32.mrb[28].mxu1  ;;  %v5113_v48 = vrot.slane (!%p3479_p10), %v2161_v47, %v2165_v41  ;;  %v5115_v49 = vrot.slane (!%p3479_p10), %v2161_v47, %v2169_v42  ;;  %v2135_v59 = vld [vmem:[#allocation3 + $0x30] sm:$0xff] (!%p3479_p10)  ;;  %v4187_v61 = vld [vmem:[%s4845_s8 + $0x28] sm:$0xff] (!%p3479_p10)   ;;  %v2144_v38 = vld [vmem:[#allocation3 + $0x78] sm:$0xff] (!%p3479_p10) }
 0x492   : > { %v1874_v1 = vadd.f32 %v1837_v0, %v1641_v56  ;;  %v1839_v14 = vpop.f32.mrb[29].mxu1  ;;  %v2141_v41 = vld [vmem:[#allocation3 + $0x60] sm:$0xff] (!%p3479_p10)  ;;  %v2143_v47 = vld [vmem:[#allocation3 + $0x70] sm:$0xff] (!%p3479_p10) }
 0x493   : > { %v1875_v60 = vadd.f32 %v1839_v14, %v1642_v63  ;;  %v1841_v2 = vpop.f32.mrb[30].mxu1  ;;  %3722 = vmatpush3.bf16.msra.mxu0 (!%p3479_p10), %v4183_v39  ;;  %v2174_v62 = vadd.f32 (!%p3479_p10), %v5115_v49, %v2130_v45  ;;  %v2176_v56 = vadd.f32 (!%p3479_p10), %v5115_v49, %v2132_v46  ;;  %v2173_v63 = vadd.f32 (!%p3479_p10), %v5113_v48, %v2129_v51  ;;  %v4192_v42 = vld [vmem:[%s5454_s12] sm:$0xff] (!%p3479_p10)  }
 0x494   : > { %1906 = vst [vmem:[#allocation3 + $0xe0] sm:$0xff] %v1874_v1  ;;  %v1876_v3 = vadd.f32 %v1841_v2, %v1643_v50  ;;  %v1843_v57 = vpop.f32.mrb[31].mxu1  ;;  %3723 = vmatprep.subr.bf16.mxu0 (!%p3479_p10), %v4184_v40  ;;  %v2175_v0 = vadd.f32 (!%p3479_p10), %v5113_v48, %v2131_v52  ;;  %v4188_v50 = vld [vmem:[%s4845_s8 + $0x70] sm:$0xff] (!%p3479_p10)   ;;  %v2178_v1 = vadd.f32 (!%p3479_p10), %v5115_v49, %v2134_v53  ;;  %v2138_v2 = vld [vmem:[#allocation3 + $0x48] sm:$0xff] (!%p3479_p10) }
 0x495   : > { %1907 = vst [vmem:[#allocation3 + $0xe8] sm:$0xff] %v1875_v60  ;;  %v1877_v4 = vadd.f32 %v1843_v57, %v1644_v16  ;;  %v2180_v14 = vadd.f32 (!%p3479_p10), %v5115_v49, %v2136_v54  ;;  %v2177_v16 = vadd.f32 (!%p3479_p10), %v5113_v48, %v2133_v55  ;;  %v2179_v60 = vadd.f32 (!%p3479_p10), %v5113_v48, %v2135_v59 }
 0x496   : > { %1908 = vst [vmem:[#allocation3 + $0xf0] sm:$0xff] %v1876_v3  ;;  %v2206_v3 = vsub.f32 (!%p3479_p10), 0.0, %v2174_v62  ;;  %v2208_v57 = vsub.f32 (!%p3479_p10), 0.0, %v2176_v56  ;;  %3851 = vmatprep.subr.bf16.mxu1 (!%p3479_p10), %v4192_v42  ;;  %v2185_v51 = vadd.f32 (!%p3479_p10), %v5113_v48, %v2141_v41 }
 0x497   : > { %1909 = vst [vmem:[#allocation3 + $0xf8] sm:$0xff] %v1877_v4  ;;  %3724 = vmatpush3.bf16.msra.mxu0 (!%p3479_p10), %v4185_v43  ;;  %v2205_v4 = vsub.f32 (!%p3479_p10), 0.0, %v2173_v63  ;;  %v4193_v43 = vld [vmem:[%s5454_s12 + $0x8] sm:$0xff] (!%p3479_p10)   ;;  %3852 = vmatpush3.bf16.msra.mxu1 (!%p3479_p10), %v4192_v42  ;;  %v2187_v63 = vadd.f32 (!%p3479_p10), %v5113_v48, %v2143_v47  ;;  %v2686_v42 = vld [vmem:[#allocation4] sm:$0xff] (!%p3479_p10)  ;;  %v2156_v47 = vld [vmem:[#allocation3 + $0xd8] sm:$0xff] (!%p3479_p10) }
 0x498   : > { %3725 = vmatprep.subr.bf16.mxu0 (!%p3479_p10), %v4186_v44  ;;  %v2188_v44 = vadd.f32 (!%p3479_p10), %v5115_v49, %v2144_v38  ;;  %3853 = vmatprep.subr.bf16.mxu1 (!%p3479_p10), %v4193_v43 }
 0x49a   : > { %v2220_v59 = vsub.f32 (!%p3479_p10), 0.0, %v2188_v44 }
 0x49b   : > { %v3845_v7 = vpop.f32.mrb[32].mxu1  ;;  %3726 = vmatpush3.bf16.msra.mxu0 (!%p3479_p10), %v4187_v61  ;;  %v2146_v61 = vld [vmem:[#allocation3 + $0x88] sm:$0xff] (!%p3479_p10)  ;;  %3854 = vmatpush3.bf16.msra.mxu1 (!%p3479_p10), %v4193_v43 }
 0x49c   : > { %v2102_v9 = vadd.f32 %v3845_v7, %v1941_v5  ;;  %v2061_v10 = vpop.f32.mrb[33].mxu1  ;;  %v2207_v5 = vsub.f32 (!%p3479_p10), 0.0, %v2175_v0  ;;  %v4189_v7 = vld [vmem:[%s4845_s8 + $0x30] sm:$0xff] (!%p3479_p10)   ;;  %3727 = vmatprep.subr.bf16.mxu0 (!%p3479_p10), %v4188_v50  ;;  %v2148_v0 = vld [vmem:[#allocation3 + $0x98] sm:$0xff] (!%p3479_p10)  ;;  %v2145_v50 = vld [vmem:[#allocation3 + $0x80] sm:$0xff] (!%p3479_p10) }
 0x49d   : > { %v2100_v12 = vadd.f32 %v2061_v10, %v1939_v6  ;;  %v3846_v13 = vpop.f32.mrb[34].mxu1  ;;  %v2140_v6 = vld [vmem:[#allocation3 + $0x58] sm:$0xff] (!%p3479_p10)  ;;  %v2209_v10 = vsub.f32 (!%p3479_p10), 0.0, %v2177_v16  ;;  %v2217_v16 = vsub.f32 (!%p3479_p10), 0.0, %v2185_v51 }
 0x49e   : > { %2119 = vst.msk [vmem:[#allocation4 + $0x50] sm:$0xff] %vm2108_vm1, %v2102_v9  ;;  %v2103_v58 = vadd.f32 %v3846_v13, %v1942_v8  ;;  %v2064_v17 = vpop.f32.mrb[35].mxu1  ;;  %v2210_v8 = vsub.f32 (!%p3479_p10), 0.0, %v2178_v1  ;;  %v2212_v9 = vsub.f32 (!%p3479_p10), 0.0, %v2180_v14  ;;  %v3481_v13 = vmul.f32 (!%p3479_p10), -1.442695, %v2206_v3 }
 0x49f   : > { %2117 = vst.msk [vmem:[#allocation4 + $0x40] sm:$0xff] %vm2108_vm1, %v2100_v12  ;;  %v2101_v18 = vadd.f32 %v2064_v17, %v1940_v11  ;;  %v2137_v11 = vld [vmem:[#allocation3 + $0x40] sm:$0xff] (!%p3479_p10)  ;;  %v2139_v12 = vld [vmem:[#allocation3 + $0x50] sm:$0xff] (!%p3479_p10)  ;;  %v3480_v17 = vmul.f32 (!%p3479_p10), -1.442695, %v2205_v4  ;;  %3728 = vmatpush3.bf16.msra.mxu0 (!%p3479_p10), %v4189_v7  ;;  %v2190_v3 = vadd.f32 (!%p3479_p10), %v5115_v49, %v2146_v61  ;;  %v2192_v7 = vadd.f32 (!%p3479_p10), %v5115_v49, %v2148_v0 }
 0x4a0   : > { %2120 = vst.msk [vmem:[#allocation4 + $0x58] sm:$0xff] %vm2108_vm1, %v2103_v58  ;;  %v3483_v58 = vmul.f32 (!%p3479_p10), -1.442695, %v2208_v57  ;;  %4196 = vpow2.f32 (!%p3479_p10), %v3481_v13  ;;  %v3484_v30 = vmul.f32 (!%p3479_p10), -1.442695, %v2209_v10  ;;  %v2147_v57 = vld [vmem:[#allocation3 + $0x90] sm:$0xff] (!%p3479_p10) }
 0x4a1   : > { %2118 = vst.msk [vmem:[#allocation4 + $0x48] sm:$0xff] %vm2108_vm1, %v2101_v18  ;;  %v2182_v18 = vadd.f32 (!%p3479_p10), %v5115_v49, %v2138_v2  ;;  %v2152_v13 = vld [vmem:[#allocation3 + $0xb8] sm:$0xff] (!%p3479_p10) }
 0x4a2   : > { %4198 = vpow2.f32 (!%p3479_p10), %v3483_v58 }
 0x4a3   : > { %4200 = vpow2.f32 (!%p3479_p10), %v3480_v17 }
 0x4aa   : > { %v4197_v46 = vpop.eup (!%p3479_p10), %4196 }
 0x4ab   : > { %v3849_v20 = vpop.f32.mrb[36].mxu1  ;;  %2128 = sbr.rel (%p3479_p10) target bundleno = 1725 (0x6bd), region = 88  ;;  %v2334_v53 = vadd.f32 (!%p3479_p10), 1.0, %v4197_v46 }
 0x4ac   : > { %v2106_v22 = vadd.f32 %v3849_v20, %v1945_v19  ;;  %v2077_v23 = vpop.f32.mrb[37].mxu1  ;;  %v4190_v19 = vld [vmem:[%s4845_s8 + $0x78] sm:$0xff] (!%p3479_p10)   ;;  %v2211_v20 = vsub.f32 (!%p3479_p10), 0.0, %v2179_v60  ;;  %v4199_v52 = vpop.eup (!%p3479_p10), %4198 }
 0x4ad   : > { %v2104_v25 = vadd.f32 %v2077_v23, %v1943_v15  ;;  %v3850_v26 = vpop.f32.mrb[38].mxu1  ;;  %v3482_v15 = vmul.f32 (!%p3479_p10), -1.442695, %v2207_v5  ;;  %v3485_v23 = vmul.f32 (!%p3479_p10), -1.442695, %v2210_v8  ;;  %3729 = vmatprep.subr.bf16.mxu0 (!%p3479_p10), %v4190_v19  ;;  %v4201_v54 = vpop.eup (!%p3479_p10), %4200  ;;  %v2336_v55 = vadd.f32 (!%p3479_p10), 1.0, %v4199_v52 }
 0x4ae   : > { %2123 = vst.msk [vmem:[#allocation4 + $0x70] sm:$0xff] %vm2108_vm1, %v2106_v22  ;;  %v2107_v27 = vadd.f32 %v3850_v26, %v1946_v21  ;;  %v2080_v28 = vpop.f32.mrb[39].mxu1  ;;  %v2184_v21 = vadd.f32 (!%p3479_p10), %v5115_v49, %v2140_v6  ;;  %v2142_v22 = vld [vmem:[#allocation3 + $0x68] sm:$0xff] (!%p3479_p10)  ;;  %v3486_v32 = vmul.f32 (!%p3479_p10), -1.442695, %v2211_v20  ;;  %v2333_v56 = vadd.f32 (!%p3479_p10), 1.0, %v4201_v54 }
 0x4af   : > { %2121 = vst.msk [vmem:[#allocation4 + $0x60] sm:$0xff] %vm2108_vm1, %v2104_v25  ;;  %v2105_v29 = vadd.f32 %v2080_v28, %v1944_v24  ;;  %v3487_v24 = vmul.f32 (!%p3479_p10), -1.442695, %v2212_v9  ;;  %v2214_v25 = vsub.f32 (!%p3479_p10), 0.0, %v2182_v18  ;;  %v2183_v28 = vadd.f32 (!%p3479_p10), %v5113_v48, %v2139_v12  ;;  %v2150_v8 = vld [vmem:[#allocation3 + $0xa8] sm:$0xff] (!%p3479_p10) }
 0x4b0   : > { %2124 = vst.msk [vmem:[#allocation4 + $0x78] sm:$0xff] %vm2108_vm1, %v2107_v27  ;;  %v2216_v26 = vsub.f32 (!%p3479_p10), 0.0, %v2184_v21  ;;  %v2181_v27 = vadd.f32 (!%p3479_p10), %v5113_v48, %v2137_v11  ;;  %v2186_v31 = vadd.f32 (!%p3479_p10), %v5115_v49, %v2142_v22  ;;  %4202 = vpow2.f32 (!%p3479_p10), %v3482_v15 }
 0x4b1   : > { %2122 = vst.msk [vmem:[#allocation4 + $0x68] sm:$0xff] %vm2108_vm1, %v2105_v29  ;;  %v4191_v29 = vld [vmem:[%s4845_s8 + $0x38] sm:$0xff] (!%p3479_p10)   ;;  %v2215_v34 = vsub.f32 (!%p3479_p10), 0.0, %v2183_v28  ;;  %4204 = vpow2.f32 (!%p3479_p10), %v3485_v23  ;;  %v3489_v35 = vmul.f32 (!%p3479_p10), -1.442695, %v2214_v25  ;;  %v2219_v11 = vsub.f32 (!%p3479_p10), 0.0, %v2187_v63 }
 0x4b2   : > { %v2213_v33 = vsub.f32 0.0, %v2181_v27  ;;  %v2218_v36 = vsub.f32 0.0, %v2186_v31  ;;  %4206 = vpow2.f32 %v3487_v24  ;;  %v3491_v37 = vmul.f32 -1.442695, %v2216_v26  ;;  %3730 = vmatpush3.bf16.msra.mxu0 %v4191_v29  ;;  %v2149_v23 = vld [vmem:[#allocation3 + $0xa0] sm:$0xff]  ;;  %v2688_v63 = vld [vmem:[#allocation4 + $0x10] sm:$0xff] }
 0x4b3   : > { %4208 = vpow2.f32 %v3484_v30  ;;  %v3490_v40 = vmul.f32 -1.442695, %v2215_v34  ;;  %v3495_v6 = vmul.f32 -1.442695, %v2220_v59  ;;  %v2189_v12 = vadd.f32 %v5113_v48, %v2145_v50 }
 0x4b4   : > { %v3488_v39 = vmul.f32 -1.442695, %v2213_v33  ;;  %4210 = vpow2.f32 %v3486_v32  ;;  %v3493_v45 = vmul.f32 -1.442695, %v2218_v36  ;;  %v3492_v18 = vmul.f32 -1.442695, %v2217_v16 }
 0x4b5   : > { %4212 = vpow2.f32 %v3489_v35  ;;  %v2191_v19 = vadd.f32 %v5113_v48, %v2147_v57  ;;  %v2222_v21 = vsub.f32 0.0, %v2190_v3  ;;  %v2194_v22 = vadd.f32 %v5115_v49, %v2150_v8  ;;  %v2151_v32 = vld [vmem:[#allocation3 + $0xb0] sm:$0xff]  ;;  %v2689_v16 = vld [vmem:[#allocation4 + $0x18] sm:$0xff] }
 0x4b6   : > { %4214 = vpow2.f32 %v3491_v37  ;;  %v2224_v26 = vsub.f32 0.0, %v2192_v7  ;;  %v2196_v27 = vadd.f32 %v5115_v49, %v2152_v13  ;;  %v3494_v30 = vmul.f32 -1.442695, %v2219_v11  ;;  %v2154_v37 = vld [vmem:[#allocation3 + $0xc8] sm:$0xff] }
 0x4b7   : > { %4216 = vpow2.f32 %v3488_v39  ;;  %v2221_v31 = vsub.f32 0.0, %v2189_v12  ;;  %v2223_v35 = vsub.f32 0.0, %v2191_v19  ;;  %v2193_v36 = vadd.f32 %v5113_v48, %v2149_v23 }
 0x4b8   : > { %4218 = vpow2.f32 %v3490_v40  ;;  %v3497_v40 = vmul.f32 -1.442695, %v2222_v21  ;;  %v2226_v41 = vsub.f32 0.0, %v2194_v22  ;;  %v3499_v44 = vmul.f32 -1.442695, %v2224_v26 }
 0x4b9   : > { %4220 = vpow2.f32 %v3493_v45  ;;  %v2228_v45 = vsub.f32 0.0, %v2196_v27  ;;  %v2195_v46 = vadd.f32 %v5113_v48, %v2151_v32  ;;  %v2198_v54 = vadd.f32 %v5115_v49, %v2154_v37 }
 0x4ba   : > { %v4203_v62 = vpop.eup %4202  ;;  %4222 = vrcp.f32 %v2334_v53  ;;  %v3496_v53 = vmul.f32 -1.442695, %v2221_v31  ;;  %v3498_v61 = vmul.f32 -1.442695, %v2223_v35  ;;  %v2705_v13 = vmul.f32 0.0051020407, %v2689_v16 }
 0x4bb   : > { %v4205_v1 = vpop.eup %4204  ;;  %4224 = vrcp.f32 %v2336_v55  ;;  %v2335_v14 = vadd.f32 1.0, %v4203_v62  ;;  %v2687_v55 = vld [vmem:[#allocation4 + $0x8] sm:$0xff]  ;;  %v2225_v62 = vsub.f32 0.0, %v2193_v36  ;;  %v3503_v3 = vmul.f32 -1.442695, %v2228_v45  ;;  %v2153_v36 = vld [vmem:[#allocation3 + $0xc0] sm:$0xff] }
 0x4bc   : > { %v4207_v60 = vpop.eup %4206  ;;  %4226 = vrcp.f32 %v2333_v56  ;;  %v2338_v2 = vadd.f32 1.0, %v4205_v1  ;;  %v2702_v56 = vmul.f32 0.0051020407, %v2686_v42  ;;  %v3501_v1 = vmul.f32 -1.442695, %v2226_v41  ;;  %v2158_v45 = vld [vmem:[#allocation3 + $0xe8] sm:$0xff] }
 0x4bd   : > { %v4209_v4 = vpop.eup %4208  ;;  %4228 = vrcp.f32 %v2335_v14  ;;  %v2340_v5 = vadd.f32 1.0, %v4207_v60  ;;  %v2200_v14 = vadd.f32 %v5115_v49, %v2156_v47  ;;  %v2690_v60 = vld [vmem:[#allocation4 + $0x20] sm:$0xff]  ;;  %v2227_v57 = vsub.f32 0.0, %v2195_v46 }
 0x4be   : > { %v4211_v9 = vpop.eup %4210  ;;  %4230 = vrcp.f32 %v2338_v2  ;;  %v2337_v10 = vadd.f32 1.0, %v4209_v4  ;;  %v2703_v4 = vmul.f32 0.0051020407, %v2687_v55  ;;  %v2230_v8 = vsub.f32 0.0, %v2198_v54 }
 0x4bf   : > { %v4213_v58 = vpop.eup %4212  ;;  %4232 = vrcp.f32 %v2340_v5  ;;  %v2339_v17 = vadd.f32 1.0, %v4211_v9  ;;  %v2691_v5 = vld [vmem:[#allocation4 + $0x28] sm:$0xff]  ;;  %v2704_v9 = vmul.f32 0.0051020407, %v2688_v63  ;;  %v3500_v11 = vmul.f32 -1.442695, %v2225_v62 }
 0x4c0   : > { %v4215_v15 = vpop.eup %4214  ;;  %4234 = vrcp.f32 %v2337_v10  ;;  %v2342_v20 = vadd.f32 1.0, %v4213_v58  ;;  %v2718_v12 = vpack.c.bf16 %v2703_v4, %v2702_v56  ;;  %v2692_v58 = vld [vmem:[#allocation4 + $0x30] sm:$0xff]  ;;  %v2706_v19 = vmul.f32 0.0051020407, %v2690_v60 }
 0x4c1   : > { %v4217_v24 = vpop.eup %4216  ;;  %4236 = vrcp.f32 %v2339_v17  ;;  %v2344_v25 = vadd.f32 1.0, %v4215_v15  ;;  %v2707_v15 = vmul.f32 0.0051020407, %v2691_v5  ;;  %v3502_v22 = vmul.f32 -1.442695, %v2227_v57  ;;  %v2159_v63 = vld [vmem:[#allocation3 + $0xf0] sm:$0xff] }
 0x4c2   : > { %v4219_v28 = vpop.eup %4218  ;;  %4238 = vrcp.f32 %v2342_v20  ;;  %v2341_v29 = vadd.f32 1.0, %v4217_v24  ;;  %v2693_v20 = vld [vmem:[#allocation4 + $0x38] sm:$0xff]  ;;  %3855 = vmatprep.mubr.msk.bf16.mxu1 %vm2108_vm1, %v2718_v12  ;;  %v2719_v23 = vpack.c.bf16 %v2705_v13, %v2704_v9  ;;  %v3505_v26 = vmul.f32 -1.442695, %v2230_v8 }
 0x4c3   : > { %v4221_v33 = vpop.eup %4220  ;;  %4240 = vrcp.f32 %v2344_v25  ;;  %v2343_v34 = vadd.f32 1.0, %v4219_v28  ;;  %v2720_v27 = vpack.c.bf16 %v2707_v15, %v2706_v19  ;;  %v2709_v31 = vmul.f32 0.0051020407, %v2693_v20 }
 0x4c4   : > { %v4223_v38 = vpop.eup %4222  ;;  %4242 = vrcp.f32 %v2341_v29  ;;  %v2346_v39 = vadd.f32 1.0, %v4221_v33  ;;  %3856 = vmatmul.mubr.msk.bf16.vlgmr.msra.gmra.mrb[0].mxu1 %vm2108_vm1, %v2719_v23  ;;  %v2202_v56 = vadd.f32 %v5115_v49, %v2158_v45  ;;  %v2203_v5 = vadd.f32 %v5113_v48, %v2159_v63 }
 0x4c5   : > { %v4225_v43 = vpop.eup %4224  ;;  %4244 = vrcp.f32 %v2343_v34  ;;  %3859 = vmatprep.mubr.msk.bf16.mxu1 %vm2108_vm1, %v2720_v27 }
 0x4c6   : > { %v4227_v51 = vpop.eup %4226  ;;  %v2430_v52 = vpack.c.bf16 %v4225_v43, %v4223_v38  ;;  %4246 = vpow2.f32 %v3495_v6  ;;  %v2234_v8 = vsub.f32 0.0, %v2202_v56  ;;  %v2235_v15 = vsub.f32 0.0, %v2203_v5  ;;  %v2697_v5 = vld [vmem:[#allocation4 + $0x58] sm:$0xff] }
 0x4c7   : > { %v4229_v59 = vpop.eup %4228  ;;  %4248 = vrcp.f32 %v2346_v39 }
 0x4c8   : > { %v4231_v0 = vpop.eup %4230  ;;  %2605 = vmatprep.mubr.bf16.mxu0 %v2430_v52  ;;  %v2429_v50 = vpack.c.bf16 %v4229_v59, %v4227_v51  ;;  %4250 = vpow2.f32 %v3492_v18  ;;  %v2232_v18 = vsub.f32 0.0, %v2200_v14  ;;  %v2160_v51 = vld [vmem:[#allocation3 + $0xf8] sm:$0xff]  ;;  %v2157_v59 = vld [vmem:[#allocation3 + $0xe0] sm:$0xff] }
 0x4c9   : > { %v4233_v2 = vpop.eup %4232  ;;  %4252 = vpow2.f32 %v3494_v30  ;;  %v2708_v30 = vmul.f32 0.0051020407, %v2692_v58  ;;  %v2204_v14 = vadd.f32 %v5115_v49, %v2160_v51 }
 0x4ca   : > { %v4235_v6 = vpop.eup %4234  ;;  %2606 = vmatmul.mubr.bf16.vlgmr.msra.gmra.mrb[0].mxu0 %v2429_v50  ;;  %v2432_v7 = vpack.c.bf16 %v4233_v2, %v4231_v0  ;;  %4254 = vpow2.f32 %v3497_v40  ;;  %v3507_v33 = vmul.f32 -1.442695, %v2232_v18  ;;  %v2155_v40 = vld [vmem:[#allocation3 + $0xd0] sm:$0xff]  ;;  %v2201_v2 = vadd.f32 %v5113_v48, %v2157_v59 }
 0x4cb   : > { %v4237_v10 = vpop.eup %4236  ;;  %4256 = vpow2.f32 %v3499_v44  ;;  %v2721_v41 = vpack.c.bf16 %v2709_v31, %v2708_v30  ;;  %v2197_v44 = vadd.f32 %v5113_v48, %v2153_v36  ;;  %v2199_v55 = vadd.f32 %v5113_v48, %v2155_v40 }
 0x4cc   : > { %v4239_v17 = vpop.eup %4238  ;;  %2613 = vmatprep.mubr.bf16.mxu0 %v2432_v7  ;;  %4258 = vpow2.f32 %v3496_v53  ;;  %v2431_v25 = vpack.c.bf16 %v4237_v10, %v4235_v6  ;;  %v2233_v58 = vsub.f32 0.0, %v2201_v2  ;;  %v2695_v2 = vld [vmem:[#allocation4 + $0x48] sm:$0xff] }
 0x4cd   : > { %v4241_v21 = vpop.eup %4240  ;;  %4260 = vpow2.f32 %v3498_v61  ;;  %3860 = vmatmul.mubr.msk.bf16.gmra.mrb[4].mxu1 %vm2108_vm1, %v2721_v41  ;;  %v2231_v4 = vsub.f32 0.0, %v2199_v55 }
 0x4ce   : > { %v4243_v24 = vpop.eup %4242  ;;  %4262 = vpow2.f32 %v3501_v1  ;;  %v2434_v29 = vpack.c.bf16 %v4241_v21, %v4239_v17  ;;  %v2229_v1 = vsub.f32 0.0, %v2197_v44  ;;  %v3509_v21 = vmul.f32 -1.442695, %v2234_v8 }
 0x4cf   : > { %v4245_v28 = vpop.eup %4244  ;;  %4264 = vpow2.f32 %v3503_v3  ;;  %v3506_v19 = vmul.f32 -1.442695, %v2231_v4  ;;  %v2696_v4 = vld [vmem:[#allocation4 + $0x50] sm:$0xff] }
 0x4d0   : > { %v4247_v32 = vpop.eup %4246  ;;  %4266 = vpow2.f32 %v3500_v11  ;;  %v2433_v53 = vpack.c.bf16 %v4245_v28, %v4243_v24  ;;  %v3504_v49 = vmul.f32 -1.442695, %v2229_v1  ;;  %v2236_v11 = vsub.f32 0.0, %v2204_v14 }
 0x4d1   : > { %v5157_v34 = vpop.eup %4248  ;;  %v2348_v35 = vadd.f32 1.0, %v4247_v32  ;;  %4268 = vpow2.f32 %v3502_v22  ;;  %v3510_v28 = vmul.f32 -1.442695, %v2235_v15 }
 0x4d2   : > { %v4251_v37 = vpop.eup %4250  ;;  %2614 = vmatmul.mubr.bf16.gmra.mrb[4].mxu0 %v2431_v25  ;;  %4270 = vpow2.f32 %v3505_v26  ;;  %v3511_v23 = vmul.f32 -1.442695, %v2236_v11  ;;  %v3508_v26 = vmul.f32 -1.442695, %v2233_v58  ;;  %v2701_v58 = vld [vmem:[#allocation4 + $0x78] sm:$0xff] }
 0x4d3   : > { %v4253_v38 = vpop.eup %4252  ;;  %2621 = vmatprep.mubr.bf16.mxu0 %v2434_v29  ;;  %4272 = vrcp.f32 %v2348_v35  ;;  %v2345_v39 = vadd.f32 1.0, %v4251_v37 }
 0x4d4   : > { %v4255_v42 = vpop.eup %4254  ;;  %v2347_v43 = vadd.f32 1.0, %v4253_v38  ;;  %4274 = vpow2.f32 %v3507_v33 }
 0x4d5   : > { %v4257_v46 = vpop.eup %4256  ;;  %4276 = vrcp.f32 %v2345_v39  ;;  %v2350_v47 = vadd.f32 1.0, %v4255_v42 }
 0x4d6   : > { %v4259_v52 = vpop.eup %4258  ;;  %4278 = vrcp.f32 %v2347_v43  ;;  %v2352_v54 = vadd.f32 1.0, %v4257_v46 }
 0x4d7   : > { %v4261_v61 = vpop.eup %4260  ;;  %4280 = vrcp.f32 %v2350_v47  ;;  %v2349_v62 = vadd.f32 1.0, %v4259_v52 }
 0x4d8   : > { %v4263_v0 = vpop.eup %4262  ;;  %4282 = vrcp.f32 %v2352_v54  ;;  %v2351_v50 = vadd.f32 1.0, %v4261_v61 }
 0x4d9   : > { %v4265_v16 = vpop.eup %4264  ;;  %4284 = vrcp.f32 %v2349_v62  ;;  %v2354_v60 = vadd.f32 1.0, %v4263_v0 }
 0x4da   : > { %v4267_v3 = vpop.eup %4266  ;;  %2622 = vmatmul.mubr.bf16.gmra.mrb[8].mxu0 %v2433_v53  ;;  %4286 = vrcp.f32 %v2351_v50  ;;  %v2356_v57 = vadd.f32 1.0, %v4265_v16 }
 0x4db   : > { %v4269_v6 = vpop.eup %4268  ;;  %4288 = vrcp.f32 %v2354_v60  ;;  %v2353_v7 = vadd.f32 1.0, %v4267_v3  ;;  %v2694_v60 = vld [vmem:[#allocation4 + $0x40] sm:$0xff] }
 0x4dc   : > { %v4271_v9 = vpop.eup %4270  ;;  %4290 = vrcp.f32 %v2356_v57  ;;  %v2355_v10 = vadd.f32 1.0, %v4269_v6  ;;  %v2710_v3 = vmul.f32 0.0051020407, %v2694_v60  ;;  %v2711_v57 = vmul.f32 0.0051020407, %v2695_v2 }
 0x4dd   : > { %v4273_v12 = vpop.eup %4272  ;;  %4292 = vrcp.f32 %v2353_v7  ;;  %v2358_v13 = vadd.f32 1.0, %v4271_v9  ;;  %v2712_v6 = vmul.f32 0.0051020407, %v2696_v4  ;;  %v2713_v7 = vmul.f32 0.0051020407, %v2697_v5 }
 0x4de   : > { %v4275_v17 = vpop.eup %4274  ;;  %v2436_v18 = vpack.c.bf16 %v4273_v12, %v5157_v34  ;;  %4294 = vrcp.f32 %v2355_v10  ;;  %v2722_v8 = vpack.c.bf16 %v2711_v57, %v2710_v3  ;;  %v2698_v10 = vld [vmem:[#allocation4 + $0x60] sm:$0xff] }
 0x4df   : > { %v4277_v48 = vpop.eup %4276  ;;  %v2360_v20 = vadd.f32 1.0, %v4275_v17  ;;  %4296 = vrcp.f32 %v2358_v13  ;;  %v2723_v9 = vpack.c.bf16 %v2713_v7, %v2712_v6  ;;  %v2714_v11 = vmul.f32 0.0051020407, %v2698_v10  ;;  %v2700_v13 = vld [vmem:[#allocation4 + $0x70] sm:$0xff] }
 0x4e0   : > { %v4279_v22 = vpop.eup %4278  ;;  %2629 = vmatprep.mubr.bf16.mxu0 %v2436_v18  ;;  %4298 = vpow2.f32 %v3504_v49  ;;  %3863 = vmatprep.mubr.msk.bf16.mxu1 %vm2108_vm1, %v2722_v8  ;;  %v2699_v49 = vld [vmem:[#allocation4 + $0x68] sm:$0xff]  ;;  %v2716_v17 = vmul.f32 0.0051020407, %v2700_v13  ;;  %v2717_v18 = vmul.f32 0.0051020407, %v2701_v58 }
 0x4e1   : > { %v4281_v24 = vpop.eup %4280  ;;  %v2435_v25 = vpack.c.bf16 %v4279_v22, %v4277_v48  ;;  %4300 = vrcp.f32 %v2360_v20  ;;  %3864 = vmatmul.mubr.msk.bf16.gmra.mrb[8].mxu1 %vm2108_vm1, %v2723_v9  ;;  %v2715_v12 = vmul.f32 0.0051020407, %v2699_v49  ;;  %v4194_v48 = vld [vmem:[%s5455_s18] sm:$0xff]   ;;  %v4195_v20 = vld [vmem:[%s5456_s7 + $0x8] sm:$0xff]  }
 0x4e2   : > { %v4283_v27 = vpop.eup %4282  ;;  %4302 = vpow2.f32 %v3506_v19  ;;  %v2725_v15 = vpack.c.bf16 %v2717_v18, %v2716_v17  ;;  %3871 = vmatprep.subr.bf16.mxu1 %v4194_v48 }
 0x4e3   : > { %v4285_v29 = vpop.eup %4284  ;;  %2630 = vmatmul.mubr.bf16.gmra.mrb[12].mxu0 %v2435_v25  ;;  %v2438_v30 = vpack.c.bf16 %v4283_v27, %v4281_v24  ;;  %4304 = vpow2.f32 %v3509_v21  ;;  %v2724_v19 = vpack.c.bf16 %v2715_v12, %v2714_v11  ;;  %3872 = vmatpush3.bf16.msra.mxu1 %v4194_v48 }
 0x4e4   : > { %v4287_v31 = vpop.eup %4286  ;;  %4306 = vpow2.f32 %v3511_v23  ;;  %3873 = vmatprep.subr.bf16.mxu1 %v4195_v20 }
 0x4e5   : > { %v4289_v32 = vpop.eup %4288  ;;  %2637 = vmatprep.mubr.bf16.mxu0 %v2438_v30  ;;  %4308 = vpow2.f32 %v3508_v26  ;;  %v2437_v35 = vpack.c.bf16 %v4287_v31, %v4285_v29  ;;  %3867 = vmatprep.mubr.msk.bf16.mxu1 %vm2108_vm1, %v2724_v19  ;;  %v5180_v26 = vld [vmem:[%s5457_s0] ss:$0 sm:$0xff] }
 0x4e6   : > { %v4291_v33 = vpop.eup %4290  ;;  %4310 = vpow2.f32 %v3510_v28 }
 0x4e7   : > { %v4293_v34 = vpop.eup %4292  ;;  %v2440_v37 = vpack.c.bf16 %v4291_v33, %v4289_v32  ;;  %3874 = vmatpush3.bf16.msra.mxu1 %v4195_v20 }
 0x4e8   : > { %v4295_v36 = vpop.eup %4294 }
 0x4e9   : > { %v4297_v38 = vpop.eup %4296  ;;  %v2439_v51 = vpack.c.bf16 %v4295_v36, %v4293_v34  ;;  %3868 = vmatmul.mubr.msk.bf16.gmra.mrb[12].mxu1 %vm2108_vm1, %v2725_v15 }
 0x4ea   : > { %v4299_v39 = vpop.eup %4298 }
 0x4eb   : > { %v4301_v40 = vpop.eup %4300  ;;  %2638 = vmatmul.mubr.bf16.gmra.mrb[16].mxu0 %v2437_v35  ;;  %v2357_v41 = vadd.f32 1.0, %v4299_v39 }
 0x4ec   : > { %v4303_v42 = vpop.eup %4302  ;;  %2645 = vmatprep.mubr.bf16.mxu0 %v2440_v37  ;;  %v2442_v54 = vpack.c.bf16 %v4301_v40, %v4297_v38 }
 0x4ed   : > { %v4305_v43 = vpop.eup %4304  ;;  %v2359_v44 = vadd.f32 1.0, %v4303_v42  ;;  %4312 = vrcp.f32 %v2357_v41 }
 0x4ee   : > { %v4307_v45 = vpop.eup %4306  ;;  %v2362_v46 = vadd.f32 1.0, %v4305_v43 }
 0x4ef   : > { %v4309_v47 = vpop.eup %4308  ;;  %4314 = vrcp.f32 %v2359_v44  ;;  %v2364_v52 = vadd.f32 1.0, %v4307_v45 }
 0x4f0   : > { %v4311_v53 = vpop.eup %4310  ;;  %4316 = vrcp.f32 %v2362_v46  ;;  %v2361_v55 = vadd.f32 1.0, %v4309_v47 }
 0x4f1   : > { %4318 = vrcp.f32 %v2364_v52  ;;  %v2363_v59 = vadd.f32 1.0, %v4311_v53 }
 0x4f2   : > { %4320 = vrcp.f32 %v2361_v55 }
 0x4f3   : > { %2646 = vmatmul.mubr.bf16.gmra.mrb[20].mxu0 %v2439_v51  ;;  %4322 = vrcp.f32 %v2363_v59 }
 0x4f4   : > { %2653 = vmatprep.mubr.bf16.mxu0 %v2442_v54 }
 0x4f7   : > { %v4313_v61 = vpop.eup %4312 }
 0x4f9   : > { %v4315_v62 = vpop.eup %4314 }
 0x4fa   : > { %v4317_v56 = vpop.eup %4316  ;;  %v2441_v63 = vpack.c.bf16 %v4315_v62, %v4313_v61 }
 0x4fb   : > { %v4319_v0 = vpop.eup %4318 }
 0x4fc   : > { %v4321_v50 = vpop.eup %4320  ;;  %2654 = vmatmul.mubr.bf16.gmra.mrb[24].mxu0 %v2441_v63  ;;  %v2444_v1 = vpack.c.bf16 %v4319_v0, %v4317_v56 }
 0x4fd   : > { %v4323_v14 = vpop.eup %4322 }
 0x4fe   : > { %2661 = vmatprep.mubr.bf16.mxu0 %v2444_v1  ;;  %v2443_v16 = vpack.c.bf16 %v4323_v14, %v4321_v50 }
 0x504   : > { %2662 = vmatmul.mubr.bf16.gmra.mrb[28].mxu0 %v2443_v16 }
 0x597   : > { %v3857_v28 = vpop.f32.mrb[0].mxu1 }
 0x598   : > { %v2816_v31 = vadd.f32 %v3857_v28, %v5180_v26  ;;  %v2807_v32 = vpop.f32.mrb[1].mxu1 }
 0x599   : > { %v2808_v33 = vadd.f32 %v5180_v26, %v2807_v32  ;;  %v3858_v34 = vpop.f32.mrb[2].mxu1 }
 0x59a   : > { %v3024_v37 = vmax.f32 %v2816_v31, 0.0  ;;  %v2819_v38 = vadd.f32 %v3858_v34, %v5180_v26  ;;  %v2810_v39 = vpop.f32.mrb[3].mxu1 }
 0x59b   : > { %v3022_v41 = vmax.f32 %v2808_v33, 0.0  ;;  %v2811_v42 = vadd.f32 %v5180_v26, %v2810_v39 }
 0x59c   : > { %3040 = vst.msk [vmem:[%s4860_s2 + $0x10] sm:$0xff] %vm2108_vm1, %v3024_v37  ;;  %v3025_v45 = vmax.f32 %v2819_v38, 0.0 }
 0x59d   : > { %v3731_v21 = vpop.f32.mrb[0].mxu0  ;;  %3038 = vst.msk [vmem:[%s4860_s2] sm:$0xff] %vm2108_vm1, %v3022_v41  ;;  %v3023_v47 = vmax.f32 %v2811_v42, 0.0 }
 0x59e   : > { %v3732_v22 = vpop.f32.mrb[1].mxu0  ;;  %3041 = vst.msk [vmem:[%s4860_s2 + $0x18] sm:$0xff] %vm2108_vm1, %v3025_v45 }
 0x59f   : > { %v3733_v23 = vadd.f32 %v3732_v22, %v3731_v21  ;;  %v3734_v24 = vpop.f32.mrb[2].mxu0  ;;  %3039 = vst.msk [vmem:[%s4860_s2 + $0x8] sm:$0xff] %vm2108_vm1, %v3023_v47 }
 0x5a0   : > { %v3735_v25 = vpop.f32.mrb[3].mxu0  ;;  %v3861_v52 = vpop.f32.mrb[4].mxu1 }
 0x5a1   : > { %v3736_v27 = vadd.f32 %v3735_v25, %v3734_v24  ;;  %v2670_v29 = vmul.f32 0.0051020407, %v3733_v23  ;;  %v2832_v55 = vadd.f32 %v3861_v52, %v5180_v26  ;;  %v2823_v59 = vpop.f32.mrb[5].mxu1 }
 0x5a2   : > { %v2824_v61 = vadd.f32 %v5180_v26, %v2823_v59  ;;  %v3862_v62 = vpop.f32.mrb[6].mxu1 }
 0x5a3   : > { %v2671_v30 = vmul.f32 0.0051020407, %v3736_v27  ;;  %v3028_v0 = vmax.f32 %v2832_v55, 0.0  ;;  %v2835_v50 = vadd.f32 %v3862_v62, %v5180_v26  ;;  %v2826_v1 = vpop.f32.mrb[7].mxu1 }
 0x5a4   : > { %v3026_v16 = vmax.f32 %v2824_v61, 0.0  ;;  %v2827_v60 = vadd.f32 %v5180_v26, %v2826_v1 }
 0x5a5   : > { %v2870_v35 = vpack.c.bf16 %v2671_v30, %v2670_v29  ;;  %v3737_v36 = vpop.f32.mrb[4].mxu0  ;;  %3044 = vst.msk [vmem:[%s4860_s2 + $0x30] sm:$0xff] %vm2108_vm1, %v3028_v0  ;;  %v3029_v57 = vmax.f32 %v2835_v50, 0.0 }
 0x5a6   : > { %v3738_v40 = vpop.f32.mrb[5].mxu0  ;;  %3042 = vst.msk [vmem:[%s4860_s2 + $0x20] sm:$0xff] %vm2108_vm1, %v3026_v16  ;;  %v3027_v5 = vmax.f32 %v2827_v60, 0.0 }
 0x5a7   : > { %v3739_v43 = vadd.f32 %v3738_v40, %v3737_v36  ;;  %v3740_v44 = vpop.f32.mrb[6].mxu0  ;;  %3875 = vmatprep.mubr.msk.bf16.mxu1 %vm2108_vm1, %v2870_v35  ;;  %3045 = vst.msk [vmem:[%s4860_s2 + $0x38] sm:$0xff] %vm2108_vm1, %v3029_v57 }
 0x5a8   : > { %v3741_v46 = vpop.f32.mrb[7].mxu0  ;;  %3043 = vst.msk [vmem:[%s4860_s2 + $0x28] sm:$0xff] %vm2108_vm1, %v3027_v5 }
 0x5a9   : > { %v3742_v51 = vadd.f32 %v3741_v46, %v3740_v44  ;;  %v2672_v53 = vmul.f32 0.0051020407, %v3739_v43 }
 0x5ab   : > { %v2673_v54 = vmul.f32 0.0051020407, %v3742_v51 }
 0x5ad   : > { %v2871_v56 = vpack.c.bf16 %v2673_v54, %v2672_v53  ;;  %v3743_v63 = vpop.f32.mrb[8].mxu0 }
 0x5ae   : > { %v3744_v14 = vpop.f32.mrb[9].mxu0 }
 0x5af   : > { %v3745_v2 = vadd.f32 %v3744_v14, %v3743_v63  ;;  %v3746_v3 = vpop.f32.mrb[10].mxu0  ;;  %3876 = vmatmul.mubr.msk.bf16.vlgmr.msra.gmra.mrb[16].mxu1 %vm2108_vm1, %v2871_v56 }
 0x5b0   : > { %v3747_v4 = vpop.f32.mrb[11].mxu0 }
 0x5b1   : > { %v3748_v6 = vadd.f32 %v3747_v4, %v3746_v3  ;;  %v2674_v7 = vmul.f32 0.0051020407, %v3745_v2 }
 0x5b3   : > { %v2675_v8 = vmul.f32 0.0051020407, %v3748_v6 }
 0x5b4   : > { %v3865_v62 = vpop.f32.mrb[8].mxu1 }
 0x5b5   : > { %v2872_v9 = vpack.c.bf16 %v2675_v8, %v2674_v7  ;;  %v2848_v56 = vadd.f32 %v3865_v62, %v5180_v26  ;;  %v2839_v63 = vpop.f32.mrb[9].mxu1 }
 0x5b6   : > { %v3749_v10 = vpop.f32.mrb[12].mxu0  ;;  %v2840_v0 = vadd.f32 %v5180_v26, %v2839_v63  ;;  %v3866_v50 = vpop.f32.mrb[10].mxu1 }
 0x5b7   : > { %v3750_v49 = vpop.f32.mrb[13].mxu0  ;;  %3879 = vmatprep.mubr.msk.bf16.mxu1 %vm2108_vm1, %v2872_v9  ;;  %v3032_v1 = vmax.f32 %v2848_v56, 0.0  ;;  %v2851_v14 = vadd.f32 %v3866_v50, %v5180_v26  ;;  %v2842_v16 = vpop.f32.mrb[11].mxu1 }
 0x5b8   : > { %v3751_v11 = vadd.f32 %v3750_v49, %v3749_v10  ;;  %v3752_v12 = vpop.f32.mrb[14].mxu0  ;;  %v3030_v60 = vmax.f32 %v2840_v0, 0.0  ;;  %v2843_v2 = vadd.f32 %v5180_v26, %v2842_v16 }
 0x5b9   : > { %v3753_v13 = vpop.f32.mrb[15].mxu0  ;;  %3048 = vst.msk [vmem:[%s4860_s2 + $0x50] sm:$0xff] %vm2108_vm1, %v3032_v1  ;;  %v3033_v3 = vmax.f32 %v2851_v14, 0.0 }
 0x5ba   : > { %v3754_v58 = vadd.f32 %v3753_v13, %v3752_v12  ;;  %v2676_v17 = vmul.f32 0.0051020407, %v3751_v11  ;;  %3046 = vst.msk [vmem:[%s4860_s2 + $0x40] sm:$0xff] %vm2108_vm1, %v3030_v60  ;;  %v3031_v57 = vmax.f32 %v2843_v2, 0.0 }
 0x5bb   : > { %3049 = vst.msk [vmem:[%s4860_s2 + $0x58] sm:$0xff] %vm2108_vm1, %v3033_v3 }
 0x5bc   : > { %v2677_v18 = vmul.f32 0.0051020407, %v3754_v58  ;;  %3047 = vst.msk [vmem:[%s4860_s2 + $0x48] sm:$0xff] %vm2108_vm1, %v3031_v57  ;;  %v3869_v4 = vpop.f32.mrb[12].mxu1 }
 0x5bd   : > { %v2864_v5 = vadd.f32 %v3869_v4, %v5180_v26  ;;  %v2855_v6 = vpop.f32.mrb[13].mxu1 }
 0x5be   : > { %v2873_v19 = vpack.c.bf16 %v2677_v18, %v2676_v17  ;;  %v3755_v15 = vpop.f32.mrb[16].mxu0  ;;  %v2856_v7 = vadd.f32 %v5180_v26, %v2855_v6  ;;  %v3870_v8 = vpop.f32.mrb[14].mxu1  ;;  %v3539_v17 = vld [vmem:[%s5458_s16] ss:$0 sm:$0xff] }
 0x5bf   : > { %v3756_v48 = vpop.f32.mrb[17].mxu0  ;;  %v3036_v9 = vmax.f32 %v2864_v5, 0.0  ;;  %v2867_v10 = vadd.f32 %v3870_v8, %v5180_v26  ;;  %v2858_v49 = vpop.f32.mrb[15].mxu1 }
 0x5c0   : > { %v3757_v20 = vadd.f32 %v3756_v48, %v3755_v15  ;;  %v3758_v21 = vpop.f32.mrb[18].mxu0  ;;  %3880 = vmatmul.mubr.msk.bf16.gmra.mrb[20].mxu1 %vm2108_vm1, %v2873_v19  ;;  %v3034_v11 = vmax.f32 %v2856_v7, 0.0  ;;  %v2859_v12 = vadd.f32 %v5180_v26, %v2858_v49 }
 0x5c1   : > { %v3759_v22 = vpop.f32.mrb[19].mxu0  ;;  %3052 = vst.msk [vmem:[%s4860_s2 + $0x70] sm:$0xff] %vm2108_vm1, %v3036_v9  ;;  %v3037_v13 = vmax.f32 %v2867_v10, 0.0 }
 0x5c2   : > { %v3760_v23 = vadd.f32 %v3759_v22, %v3758_v21  ;;  %v2678_v24 = vmul.f32 0.0051020407, %v3757_v20  ;;  %3050 = vst.msk [vmem:[%s4860_s2 + $0x60] sm:$0xff] %vm2108_vm1, %v3034_v11  ;;  %v3035_v58 = vmax.f32 %v2859_v12, 0.0 }
 0x5c3   : > { %3053 = vst.msk [vmem:[%s4860_s2 + $0x78] sm:$0xff] %vm2108_vm1, %v3037_v13 }
 0x5c4   : > { %v2679_v25 = vmul.f32 0.0051020407, %v3760_v23  ;;  %3051 = vst.msk [vmem:[%s4860_s2 + $0x68] sm:$0xff] %vm2108_vm1, %v3035_v58 }
 0x5c6   : > { %v2874_v27 = vpack.c.bf16 %v2679_v25, %v2678_v24  ;;  %v3761_v28 = vpop.f32.mrb[20].mxu0 }
 0x5c7   : > { %v3762_v29 = vpop.f32.mrb[21].mxu0 }
 0x5c8   : > { %v3763_v30 = vadd.f32 %v3762_v29, %v3761_v28  ;;  %v3764_v31 = vpop.f32.mrb[22].mxu0  ;;  %3883 = vmatprep.mubr.msk.bf16.mxu1 %vm2108_vm1, %v2874_v27 }
 0x5c9   : > { %v3765_v32 = vpop.f32.mrb[23].mxu0 }
 0x5ca   : > { %v3766_v33 = vadd.f32 %v3765_v32, %v3764_v31  ;;  %v2680_v34 = vmul.f32 0.0051020407, %v3763_v30 }
 0x5cc   : > { %v2681_v35 = vmul.f32 0.0051020407, %v3766_v33 }
 0x5ce   : > { %v2875_v36 = vpack.c.bf16 %v2681_v35, %v2680_v34 }
 0x5cf   : > { %v3767_v37 = vpop.f32.mrb[24].mxu0 }
 0x5d0   : > { %v3768_v38 = vpop.f32.mrb[25].mxu0  ;;  %3884 = vmatmul.mubr.msk.bf16.gmra.mrb[24].mxu1 %vm2108_vm1, %v2875_v36 }
 0x5d1   : > { %v3769_v39 = vadd.f32 %v3768_v38, %v3767_v37  ;;  %v3770_v40 = vpop.f32.mrb[26].mxu0 }
 0x5d2   : > { %v3771_v41 = vpop.f32.mrb[27].mxu0 }
 0x5d3   : > { %v3772_v42 = vadd.f32 %v3771_v41, %v3770_v40  ;;  %v2682_v43 = vmul.f32 0.0051020407, %v3769_v39 }
 0x5d5   : > { %v2683_v44 = vmul.f32 0.0051020407, %v3772_v42 }
 0x5d7   : > { %v2876_v45 = vpack.c.bf16 %v2683_v44, %v2682_v43  ;;  %v3773_v46 = vpop.f32.mrb[28].mxu0 }
 0x5d8   : > { %v3774_v47 = vpop.f32.mrb[29].mxu0 }
 0x5d9   : > { %v3775_v51 = vadd.f32 %v3774_v47, %v3773_v46  ;;  %v3776_v52 = vpop.f32.mrb[30].mxu0  ;;  %3887 = vmatprep.mubr.msk.bf16.mxu1 %vm2108_vm1, %v2876_v45 }
 0x5da   : > { %v3777_v53 = vpop.f32.mrb[31].mxu0 }
 0x5db   : > { %v3778_v54 = vadd.f32 %v3777_v53, %v3776_v52  ;;  %v2684_v55 = vmul.f32 0.0051020407, %v3775_v51 }
 0x5dd   : > { %v2685_v59 = vmul.f32 0.0051020407, %v3778_v54 }
 0x5df   : > { %v2877_v61 = vpack.c.bf16 %v2685_v59, %v2684_v55 }
 0x5e1   : > { %3888 = vmatmul.mubr.msk.bf16.gmra.mrb[28].mxu1 %vm2108_vm1, %v2877_v61 }
 0x682   : > { %v3877_v18 = vpop.f32.mrb[16].mxu1 }
 0x683   : > { %v2968_v26 = vadd.f32 %v3877_v18, %v3539_v17  ;;  %v2959_v19 = vpop.f32.mrb[17].mxu1 }
 0x684   : > { %v2960_v15 = vadd.f32 %v3539_v17, %v2959_v19  ;;  %v3878_v48 = vpop.f32.mrb[18].mxu1 }
 0x685   : > { %v3056_v20 = vmax.f32 %v2968_v26, 0.0  ;;  %v2971_v21 = vadd.f32 %v3878_v48, %v3539_v17  ;;  %v2962_v22 = vpop.f32.mrb[19].mxu1 }
 0x686   : > { %v3054_v23 = vmax.f32 %v2960_v15, 0.0  ;;  %v2963_v24 = vadd.f32 %v3539_v17, %v2962_v22 }
 0x687   : > { %3072 = vst.msk [vmem:[%s4865_s30 + $0x10] sm:$0xff] %vm2108_vm1, %v3056_v20  ;;  %v3057_v25 = vmax.f32 %v2971_v21, 0.0 }
 0x688   : > { %3070 = vst.msk [vmem:[%s4865_s30] sm:$0xff] %vm2108_vm1, %v3054_v23  ;;  %v3055_v27 = vmax.f32 %v2963_v24, 0.0 }
 0x689   : > { %3073 = vst.msk [vmem:[%s4865_s30 + $0x18] sm:$0xff] %vm2108_vm1, %v3057_v25 }
 0x68a   : > { %3071 = vst.msk [vmem:[%s4865_s30 + $0x8] sm:$0xff] %vm2108_vm1, %v3055_v27 }
 0x693   : > { %v3881_v28 = vpop.f32.mrb[20].mxu1 }
 0x694   : > { %v2984_v29 = vadd.f32 %v3881_v28, %v3539_v17  ;;  %v2975_v30 = vpop.f32.mrb[21].mxu1 }
 0x695   : > { %v2976_v31 = vadd.f32 %v3539_v17, %v2975_v30  ;;  %v3882_v32 = vpop.f32.mrb[22].mxu1 }
 0x696   : > { %v3060_v33 = vmax.f32 %v2984_v29, 0.0  ;;  %v2987_v34 = vadd.f32 %v3882_v32, %v3539_v17  ;;  %v2978_v35 = vpop.f32.mrb[23].mxu1 }
 0x697   : > { %v3058_v36 = vmax.f32 %v2976_v31, 0.0  ;;  %v2979_v37 = vadd.f32 %v3539_v17, %v2978_v35 }
 0x698   : > { %3076 = vst.msk [vmem:[%s4865_s30 + $0x30] sm:$0xff] %vm2108_vm1, %v3060_v33  ;;  %v3061_v38 = vmax.f32 %v2987_v34, 0.0 }
 0x699   : > { %3074 = vst.msk [vmem:[%s4865_s30 + $0x20] sm:$0xff] %vm2108_vm1, %v3058_v36  ;;  %v3059_v39 = vmax.f32 %v2979_v37, 0.0 }
 0x69a   : > { %3077 = vst.msk [vmem:[%s4865_s30 + $0x38] sm:$0xff] %vm2108_vm1, %v3061_v38 }
 0x69b   : > { %3075 = vst.msk [vmem:[%s4865_s30 + $0x28] sm:$0xff] %vm2108_vm1, %v3059_v39 }
 0x6a3   : > { %v3885_v40 = vpop.f32.mrb[24].mxu1 }
 0x6a4   : > { %v3000_v41 = vadd.f32 %v3885_v40, %v3539_v17  ;;  %v2991_v42 = vpop.f32.mrb[25].mxu1 }
 0x6a5   : > { %v2992_v43 = vadd.f32 %v3539_v17, %v2991_v42  ;;  %v3886_v44 = vpop.f32.mrb[26].mxu1 }
 0x6a6   : > { %v3064_v45 = vmax.f32 %v3000_v41, 0.0  ;;  %v3003_v46 = vadd.f32 %v3886_v44, %v3539_v17  ;;  %v2994_v47 = vpop.f32.mrb[27].mxu1 }
 0x6a7   : > { %v3062_v51 = vmax.f32 %v2992_v43, 0.0  ;;  %v2995_v52 = vadd.f32 %v3539_v17, %v2994_v47 }
 0x6a8   : > { %3080 = vst.msk [vmem:[%s4865_s30 + $0x50] sm:$0xff] %vm2108_vm1, %v3064_v45  ;;  %v3065_v53 = vmax.f32 %v3003_v46, 0.0 }
 0x6a9   : > { %3078 = vst.msk [vmem:[%s4865_s30 + $0x40] sm:$0xff] %vm2108_vm1, %v3062_v51  ;;  %v3063_v54 = vmax.f32 %v2995_v52, 0.0 }
 0x6aa   : > { %3081 = vst.msk [vmem:[%s4865_s30 + $0x58] sm:$0xff] %vm2108_vm1, %v3065_v53 }
 0x6ab   : > { %3079 = vst.msk [vmem:[%s4865_s30 + $0x48] sm:$0xff] %vm2108_vm1, %v3063_v54 }
 0x6b4   : > { %v3889_v55 = vpop.f32.mrb[28].mxu1 }
 0x6b5   : > { %v3016_v59 = vadd.f32 %v3889_v55, %v3539_v17  ;;  %v3007_v61 = vpop.f32.mrb[29].mxu1 }
 0x6b6   : > { %v3008_v62 = vadd.f32 %v3539_v17, %v3007_v61  ;;  %v3890_v56 = vpop.f32.mrb[30].mxu1 }
 0x6b7   : > { %v3068_v63 = vmax.f32 %v3016_v59, 0.0  ;;  %v3019_v0 = vadd.f32 %v3890_v56, %v3539_v17  ;;  %v3010_v50 = vpop.f32.mrb[31].mxu1 }
 0x6b8   : > { %v3066_v1 = vmax.f32 %v3008_v62, 0.0  ;;  %v3011_v14 = vadd.f32 %v3539_v17, %v3010_v50 }
 0x6b9   : > { %3084 = vst.msk [vmem:[%s4865_s30 + $0x70] sm:$0xff] %vm2108_vm1, %v3068_v63  ;;  %v3069_v16 = vmax.f32 %v3019_v0, 0.0 }
 0x6ba   : > { %3082 = vst.msk [vmem:[%s4865_s30 + $0x60] sm:$0xff] %vm2108_vm1, %v3066_v1  ;;  %v3067_v60 = vmax.f32 %v3011_v14, 0.0 }
 0x6bb   : > { %3085 = vst.msk [vmem:[%s4865_s30 + $0x78] sm:$0xff] %vm2108_vm1, %v3069_v16 }
 0x6bc   : > { %3083 = vst.msk [vmem:[%s4865_s30 + $0x68] sm:$0xff] %vm2108_vm1, %v3067_v60 }
 0x6bd PF: > { %s5459_s2 = sld [smem:[#allocation21_spill]]  ;;  %s3577_s9 = sshll.u32 %s4504_s25, 5 }
 0x6be   : > { %s3125_s4 = sadd.s32 %s4500_s24, %s3577_s9  ;;  %s3553_s13 = sshll.u32 %s4508_s26, 6 }
 0x6bf   : > { %s3127_s8 = sadd.s32 %s3553_s13, %s3125_s4  ;;  %s3130_s3 = sshll.u32 %s4867_s1, 4  ;;  %s5277_s3 = int_to_ptr.vmem [resolvable:$true] %s3130_s3 }
 0x6c0   : > { %s3554_s23 = sshll.u32 %s3127_s8, 6  ;;  %s5460_s27 = sld [smem:[#allocation42_spill]] }
 0x6c1   : > { %s5462_s18 = sand.u32 1, %s4480_s19   ;;  %s4382_s22 = scalar_lea.vmem %s5277_s3, 1024 }
 0x6c2   : > { %s5286_s28 = scalar_lea.sflag [#allocation7], %s5462_s18  ;;  %p4383_p12 = scmp.ne.s32.totalorder %s5277_s3, %s4382_s22 }
 0x6c3   : > { %p5463_p5 = scmp.ne.s32.totalorder %s5459_s2, 0  ;;  %s4533_s24 = smov [#allocation10]  }
 0x6c4   : > { %s4386_s25 = sshll.u32 %s4533_s24, 4  ;;  %s4387_s25 = int_to_ptr.vmem [resolvable:$false] %s4386_s25 }
 0x6c5   : > { %p4384_p9 = pnand %p4383_p12, %p5463_p5  ;;  %s4388_s26 = scalar_lea.vmem %s4387_s25, 2048 }
 0x6c6   : > { %s5461_s6 = smov %s5460_s27  ;;  %s5282_s30 = scalar_lea.hbm %s5460_s27, %s3554_s23 }
 0x6c7   : > { %p4385_p13 = pneg %p4384_p9  ;;  %p4389_p1 = scmp.lt.s32.totalorder %s5277_s3, %s4387_s25 }
 0x6c8   : > { %p4390_p4 = scmp.lt.s32.totalorder %s4388_s26, %s4382_s22 }
 0x6ca   : > { %p4391_p8 = por %p4390_p4, %p4389_p1 }
 0x6cc   : > { %p4392_p11 = pnand %p4391_p8, %p4385_p13 }
 0x6ce   : > { %4395 = shalt.err (!%p4392_p11)
}
 0x6cf   : > { %s4396_s1 = scalar_lea.hbm %s5282_s30, 1024  ;;  %s4400_s17 = scalar_lea.hbm %s5461_s6, 8192 }
 0x6d0   : > { %p4397_p7 = scmp.ne.s32.totalorder %s5282_s30, %s4396_s1  ;;  %p4401_p3 = scmp.lt.u32.totalorder %s5282_s30, %s5461_s6 }
 0x6d1   : > { %p4402_p6 = scmp.lt.u32.totalorder %s4400_s17, %s4396_s1  ;;  %p4404_p12 = scmp.lt.u32.totalorder %s4396_s1, %s5282_s30 }
 0x6d2   : > { %p4398_p0 = pnand %p4397_p7, %p5463_p5 }
 0x6d3   : > { %p4403_p10 = por %p4402_p6, %p4401_p3 }
 0x6d4   : > { %p4399_p2 = pneg %p4398_p0 }
 0x6d5   : > { %p4405_p9 = por %p4404_p12, %p4403_p10 }
 0x6d7   : > { %p4406_p13 = pnand %p4405_p9, %p4399_p2 }
 0x6d9   : > { %4409 = shalt.err (!%p4406_p13)
}
 0x6da   : > { %s4534_s9 = smov 64   ;;  %s4535_s4 = smov 128  }
 0x6db   : > { %s4536_s13 = smov 4  }
 0x6dc   : > { %3917 = dma.vmem_to_hbm [thread:$0]  (%p5463_p5), %s5277_s3, 1024, %s5282_s30, %s5286_s28, %s4534_s9, %s4535_s4, %s4536_s13  }
 0x6dd PF: > { %s5464_s8 = sld [smem:[#allocation20_spill]]  ;;  %s5465_s23 = sld [smem:[#allocation14_spill]] }
 0x6de   : > { %s5466_s10 = sld [smem:[#allocation22_spill]] }
 0x6e3   : > { %p3934_p1 = scmp.ge.s32.totalorder %s5464_s8, 2  ;;  %s3169_s11 = sand.u32 1, %s5465_s23  }
 0x6e4   : > { %p5467_p4 = scmp.ne.s32.totalorder %s5466_s10, 0  ;;  %s3170_s27 = scalar_lea.sflag [#allocation7], %s3169_s11 }
 0x6e6   : > { %p3928_p8 = pnand %p3934_p1, %p5467_p4 }
 0x6e8   : > { %4471 = dma.done.wait (!%p3928_p8), %s3170_s27, 1024  }
 0x6e9   : > { %4473 = vsyncadd (!%p3928_p8), %s3170_s27, 4294966272  ;;  %s33_s30 = sadd.s32 1, %s5464_s8   ;;  %s5469_s2 = sld [smem:[#allocation27_spill]] }
 0x6ea   : > { %p5315_p11 = scmp.ge.s32.totalorder %s33_s30, 10   ;;  %s5470_s21 = sld [smem:[#allocation15_spill]] }
 0x6eb   : > { %s5471_s22 = sld [smem:[#allocation16_spill]]  ;;  %s5472_s23 = sld [smem:[#allocation25_spill]] }
 0x6ec   : > { %s5473_s24 = sld [smem:[#allocation17_spill]]  ;;  %s5474_s25 = sld [smem:[#allocation18_spill]] }
 0x6ed   : > { %s5475_s26 = sld [smem:[#allocation19_spill]]  ;;  %s5476_s27 = sld [smem:[#allocation23_spill]] }
 0x6ee   : > { %s5477_s28 = sld [smem:[#allocation24_spill]]  ;;  %s5478_s29 = sld [smem:[#allocation26_spill]] }
 0x6ef   : > { %s5480_s18 = smov %s4480_s19  ;;  %s5481_s19 = smov %s4484_s20 }
 0x6f0   : > { %s5482_s20 = smov %s5469_s2  ;;  %32 = sbr.rel (!%p5315_p11) target bundleno = 27 (0x1b), region = 165 }
 0x6f7   :  { %3175 = vsyncpa [#allocation6], 1 }
 0x6f8   :  { %3177 = vsyncpa [#allocation6 + $0x1], 1 }
 0x6f9   :  { %3178 = vsyncpa [#allocation9], 1 }
 0x6fa   :  { %3180 = vsyncpa [#allocation9 + $0x1], 1 }
 0x6fb   :  { %3181 = vsyncpa [#allocation7], 1 }
 0x6fc   :  { %3183 = vsyncpa [#allocation7 + $0x1], 1 }

</bundles_post_ra>
